<compile_context>
chip_gen: v7x
topology: tpu7x:2x2x1
jax: 0.10.0
libtpu: 0.0.40
codegen_flags: <defaults>
</compile_context>

<pallas_src>
import jax
import jax.numpy as jnp
from jax import lax
from jax.experimental import pallas as pl
from jax.experimental.pallas import tpu as pltpu

# ---- model config (matches the PyTorch module instantiation used here) ----
NUM_LAYERS = 2      # attention_layers
EMBED_DIM = 32      # embed_dim
NUM_HEADS = 4       # num_heads
HEAD_DIM = EMBED_DIM // NUM_HEADS
FF_DIM = 64         # feedforward_dim
SEQ_LEN = 9         # tic-tac-toe board
EPS = 1e-5          # PyTorch LayerNorm default eps

OUT_W = 16          # packed output lanes: [policy(9) | value(1) | pad(6)]
MAX_TB = 128        # max boards per grid step

# packed per-layer vector-parameter rows (shape (NL, 8, 128))
_V_LN1W, _V_LN1B, _V_LN2W, _V_LN2B, _V_BO, _V_B2, _V_B1, _V_BQKV = range(8)
# packed head-parameter rows (shape (16, 128))
_H_WV = 0            # rows 0..8 : value-head weight (9, D)
_H_NORMW = 9
_H_NORMB = 10
_H_WP = 11
_H_SCAL = 12         # col 0 = policy bias, col 1 = value bias


def _round_up(x, m):
    return (x + m - 1) // m * m


def _layernorm(x, w, b):
    mu = jnp.mean(x, axis=-1, keepdims=True)
    var = jnp.mean(jnp.square(x - mu), axis=-1, keepdims=True)
    return (x - mu) * lax.rsqrt(var + EPS) * w + b


def _make_kernel(TB, CH):
    R = TB * SEQ_LEN          # rows in the flattened activation slab
    CHL = CH * SEQ_LEN        # rows per attention chunk
    NCH = TB // CH            # chunks per tile
    scale = 1.0 / float(HEAD_DIM) ** 0.5

    def kernel(oh_ref, wemb_ref, wmat_ref, w2_ref, vec_ref, head_ref,
               mask_ref, posmask_ref, sel_ref, out_ref, attn_ref):
        # ---- fused embedding: one-hot(token)||one-hot(pos) @ [tok_emb; pos_emb]
        x = jnp.dot(oh_ref[...], wemb_ref[...],
                    preferred_element_type=jnp.float32)              # (R, D)
        neg = mask_ref[...]                                          # (CHL, CHL)

        for layer in range(NUM_LAYERS):
            wmat = wmat_ref[layer]                                   # (D, 192)
            vec = vec_ref[layer]                                     # (8, 128)
            ln1w = vec[_V_LN1W:_V_LN1W + 1, :EMBED_DIM]
            ln1b = vec[_V_LN1B:_V_LN1B + 1, :EMBED_DIM]
            ln2w = vec[_V_LN2W:_V_LN2W + 1, :EMBED_DIM]
            ln2b = vec[_V_LN2B:_V_LN2B + 1, :EMBED_DIM]
            bo = vec[_V_BO:_V_BO + 1, :EMBED_DIM]
            b2 = vec[_V_B2:_V_B2 + 1, :EMBED_DIM]
            b1 = vec[_V_B1:_V_B1 + 1, :FF_DIM]
            bqkv = vec[_V_BQKV:_V_BQKV + 1, :3 * EMBED_DIM]
            wqkv = wmat[:, 0:3 * EMBED_DIM]                          # (D, 3D)
            wo = wmat[:, 3 * EMBED_DIM:4 * EMBED_DIM]                # (D, D)
            w1 = wmat[:, 4 * EMBED_DIM:4 * EMBED_DIM + FF_DIM]       # (D, F)
            w2 = w2_ref[layer]                                       # (F, D)

            # ---- pre-norm multi-head self-attention ----
            h = _layernorm(x, ln1w, ln1b)
            qkv = jnp.dot(h, wqkv,
                          preferred_element_type=jnp.float32) + bqkv  # (R, 3D)

            # block-diagonal attention over chunks of CH boards
            for c in range(NCH):
                r0 = c * CHL
                for hh in range(NUM_HEADS):
                    qo = hh * HEAD_DIM
                    ko = EMBED_DIM + hh * HEAD_DIM
                    vo = 2 * EMBED_DIM + hh * HEAD_DIM
                    qc = qkv[r0:r0 + CHL, qo:qo + HEAD_DIM]          # (CHL, Dh)
                    kc = qkv[r0:r0 + CHL, ko:ko + HEAD_DIM]
                    vc = qkv[r0:r0 + CHL, vo:vo + HEAD_DIM]
                    s = lax.dot_general(qc, kc, (((1,), (1,)), ((), ())),
                                        preferred_element_type=jnp.float32)
                    s = s * scale + neg                              # (CHL, CHL)
                    s = s - jnp.max(s, axis=-1, keepdims=True)
                    p = jnp.exp(s)
                    p = p * pl.reciprocal(
                        jnp.sum(p, axis=-1, keepdims=True), approx=True)
                    oc = jnp.dot(p, vc,
                                 preferred_element_type=jnp.float32)  # (CHL, Dh)
                    attn_ref[r0:r0 + CHL, qo:qo + HEAD_DIM] = oc

            o_full = attn_ref[...]                                   # (R, D)
            x = x + jnp.dot(o_full, wo,
                            preferred_element_type=jnp.float32) + bo

            # ---- pre-norm feedforward ----
            h2 = _layernorm(x, ln2w, ln2b)
            f = jnp.dot(h2, w1, preferred_element_type=jnp.float32) + b1
            f = jnp.maximum(f, 0.0)                                   # relu
            x = x + jnp.dot(f, w2, preferred_element_type=jnp.float32) + b2

        # ---- shared trunk epilogue + heads ----
        hd = head_ref[...]                                            # (16, 128)
        wv = hd[_H_WV:_H_WV + SEQ_LEN, :EMBED_DIM]                    # (9, D)
        normw = hd[_H_NORMW:_H_NORMW + 1, :EMBED_DIM]
        normb = hd[_H_NORMB:_H_NORMB + 1, :EMBED_DIM]
        wp = hd[_H_WP:_H_WP + 1, :EMBED_DIM]
        bp = hd[_H_SCAL:_H_SCAL + 1, 0:1]
        bv = hd[_H_SCAL:_H_SCAL + 1, 1:2]

        x = jnp.maximum(x, 0.0)                    # self.activation (relu)
        x = _layernorm(x, normw, normb)            # self.norm

        posmask = posmask_ref[...]                 # (R, 9): row r -> one-hot(r % 9)
        sel = sel_ref[...]                         # (TB, R): board selector

        # policy head: Linear(D, 1) per position, regrouped per board via selector matmul
        polrow = jnp.sum(x * wp, axis=-1, keepdims=True)              # (R, 1)
        pol = jnp.dot(sel, polrow * posmask,
                      preferred_element_type=jnp.float32) + bp        # (TB, 9)

        # value head: Linear(9*D, 1) on the row-major (l, i) flatten
        wv_rep = jnp.dot(posmask, wv,
                         preferred_element_type=jnp.float32)          # (R, D) = wv[r%9]
        valrow = jnp.sum(x * wv_rep, axis=-1, keepdims=True)          # (R, 1)
        val = jnp.sum(jnp.dot(sel, valrow * posmask,
                              preferred_element_type=jnp.float32),
                      axis=-1, keepdims=True) + bv                    # (TB, 1)
        val = jnp.tanh(val)

        # lane-packed output block: [policy | value | zero pad]
        out_ref[...] = jnp.zeros((TB, OUT_W), jnp.float32)
        out_ref[:, 0:SEQ_LEN] = pol
        out_ref[:, SEQ_LEN:SEQ_LEN + 1] = val

    return kernel


def tic_tac_toe_transformer(params, tokens):
    """tokens: (B, 9) int in {0,1,2}. Returns dict(policy=(B,9), value=(B,))."""
    B = tokens.shape[0]
    TB = min(MAX_TB, _round_up(max(B, 1), 8))
    CH = 16 if TB % 16 == 0 else 8          # boards per attention chunk
    B_pad = _round_up(B, TB)
    R = TB * SEQ_LEN
    CHL = CH * SEQ_LEN
    grid = (B_pad // TB,)

    # ---- fused-embedding input: one-hot(token) || one-hot(position) ----
    tok = jnp.asarray(tokens, jnp.int32)
    tok = jnp.pad(tok, ((0, B_pad - B), (0, 0)))
    tok_flat = tok.reshape(B_pad * SEQ_LEN)
    pos_flat = jnp.tile(jnp.arange(SEQ_LEN, dtype=jnp.int32), (B_pad,))
    onehot = jnp.concatenate(
        [jax.nn.one_hot(tok_flat, 3, dtype=jnp.float32),
         jax.nn.one_hot(pos_flat, SEQ_LEN, dtype=jnp.float32)], axis=-1)  # (B_pad*9, 12)

    # ---- consolidated weight slabs ----
    wemb = jnp.concatenate([params["tok_emb"], params["pos_emb"]], axis=0)      # (12, D)
    wmat = jnp.concatenate([params["wqkv_t"], params["wo_t"], params["w1_t"]],
                           axis=-1)                                             # (NL, D, 192)
    w2 = params["w2_t"]                                                         # (NL, F, D)

    vecs = jnp.zeros((NUM_LAYERS, 8, 128), jnp.float32)
    vecs = vecs.at[:, _V_LN1W, :EMBED_DIM].set(params["ln1w"])
    vecs = vecs.at[:, _V_LN1B, :EMBED_DIM].set(params["ln1b"])
    vecs = vecs.at[:, _V_LN2W, :EMBED_DIM].set(params["ln2w"])
    vecs = vecs.at[:, _V_LN2B, :EMBED_DIM].set(params["ln2b"])
    vecs = vecs.at[:, _V_BO, :EMBED_DIM].set(params["bo"])
    vecs = vecs.at[:, _V_B2, :EMBED_DIM].set(params["b2"])
    vecs = vecs.at[:, _V_B1, :FF_DIM].set(params["b1"])
    vecs = vecs.at[:, _V_BQKV, :3 * EMBED_DIM].set(params["bqkv"])

    head = jnp.zeros((16, 128), jnp.float32)
    head = head.at[_H_WV:_H_WV + SEQ_LEN, :EMBED_DIM].set(params["wv"])
    head = head.at[_H_NORMW, :EMBED_DIM].set(params["normw"])
    head = head.at[_H_NORMB, :EMBED_DIM].set(params["normb"])
    head = head.at[_H_WP, :EMBED_DIM].set(params["wp"])
    head = head.at[_H_SCAL, 0].set(params["bp"])
    head = head.at[_H_SCAL, 1].set(params["bv"])

    # ---- constant index patterns (built host-side; no int div/mod in-kernel) ----
    blk = jnp.kron(jnp.eye(CH, dtype=jnp.float32),
                   jnp.ones((SEQ_LEN, SEQ_LEN), jnp.float32))                   # (CHL, CHL)
    mask = jnp.where(blk > 0.5, 0.0, -1e30).astype(jnp.float32)
    posmask = jnp.tile(jnp.eye(SEQ_LEN, dtype=jnp.float32), (TB, 1))            # (R, 9)
    sel = jnp.repeat(jnp.eye(TB, dtype=jnp.float32), SEQ_LEN, axis=1)           # (TB, R)

    kernel = _make_kernel(TB, CH)

    out = pl.pallas_call(
        kernel,
        grid=grid,
        in_specs=[
            pl.BlockSpec((R, 12), lambda b: (b, 0)),                             # onehot
            pl.BlockSpec((12, EMBED_DIM), lambda b: (0, 0)),                     # wemb
            pl.BlockSpec((NUM_LAYERS, EMBED_DIM, 4 * EMBED_DIM + FF_DIM),
                         lambda b: (0, 0, 0)),                                   # wmat
            pl.BlockSpec((NUM_LAYERS, FF_DIM, EMBED_DIM), lambda b: (0, 0, 0)),  # w2
            pl.BlockSpec((NUM_LAYERS, 8, 128), lambda b: (0, 0, 0)),             # vecs
            pl.BlockSpec((16, 128), lambda b: (0, 0)),                           # head
            pl.BlockSpec((CHL, CHL), lambda b: (0, 0)),                          # mask
            pl.BlockSpec((R, SEQ_LEN), lambda b: (0, 0)),                        # posmask
            pl.BlockSpec((TB, R), lambda b: (0, 0)),                             # sel
        ],
        out_specs=pl.BlockSpec((TB, OUT_W), lambda b: (b, 0)),
        out_shape=jax.ShapeDtypeStruct((B_pad, OUT_W), jnp.float32),
        scratch_shapes=[pltpu.VMEM((R, EMBED_DIM), jnp.float32)],
        compiler_params=pltpu.CompilerParams(
            dimension_semantics=("parallel",)),
    )(onehot, wemb, wmat, w2, vecs, head, mask, posmask, sel)

    return {"policy": out[:B, 0:SEQ_LEN], "value": out[:B, SEQ_LEN]}


def init_params(key):
    keys = iter(jax.random.split(key, 24))

    def rnd(shape, s=0.1):
        return (s * jax.random.normal(next(keys), shape)).astype(jnp.float32)

    NL, D, F, L = NUM_LAYERS, EMBED_DIM, FF_DIM, SEQ_LEN
    return {
        "tok_emb": rnd((3, D)),
        "pos_emb": rnd((L, D)),
        # per-layer transformer weights, pre-transposed to (in, out) layout
        "wqkv_t": rnd((NL, D, 3 * D)),   # == in_proj_weight.T
        "bqkv":   rnd((NL, 3 * D)),
        "wo_t":   rnd((NL, D, D)),       # == out_proj.weight.T
        "bo":     rnd((NL, D)),
        "ln1w":   jnp.ones((NL, D), jnp.float32),
        "ln1b":   jnp.zeros((NL, D), jnp.float32),
        "ln2w":   jnp.ones((NL, D), jnp.float32),
        "ln2b":   jnp.zeros((NL, D), jnp.float32),
        "w1_t":   rnd((NL, D, F)),       # == linear1.weight.T
        "b1":     rnd((NL, F)),
        "w2_t":   rnd((NL, F, D)),       # == linear2.weight.T
        "b2":     rnd((NL, D)),
        # final norm + heads
        "normw":  jnp.ones((D,), jnp.float32),
        "normb":  jnp.zeros((D,), jnp.float32),
        "wp":     rnd((D,)),             # policy_head.weight (1, D)
        "bp":     rnd(()),
        "wv":     rnd((L, D)),           # value_head.weight (1, 9*D) as (l, i)
        "bv":     rnd(()),
    }


def reference_forward(params, tokens):
    """Pure-JAX reference mirroring the PyTorch forward (eval mode)."""
    x = params["tok_emb"][tokens] + params["pos_emb"][None]          # (B, 9, D)

    def ln(v, w, b):
        mu = v.mean(-1, keepdims=True)
        var = ((v - mu) ** 2).mean(-1, keepdims=True)
        return (v - mu) / jnp.sqrt(var + EPS) * w + b

    B = x.shape[0]
    for l in range(NUM_LAYERS):
        h = ln(x, params["ln1w"][l], params["ln1b"][l])
        qkv = h @ params["wqkv_t"][l] + params["bqkv"][l]
        q, k, v = jnp.split(qkv, 3, axis=-1)
        qh = q.reshape(B, SEQ_LEN, NUM_HEADS, HEAD_DIM).transpose(0, 2, 1, 3)
        kh = k.reshape(B, SEQ_LEN, NUM_HEADS, HEAD_DIM).transpose(0, 2, 1, 3)
        vh = v.reshape(B, SEQ_LEN, NUM_HEADS, HEAD_DIM).transpose(0, 2, 1, 3)
        s = jnp.einsum("bhqd,bhkd->bhqk", qh, kh) / jnp.sqrt(float(HEAD_DIM))
        p = jax.nn.softmax(s, axis=-1)
        o = jnp.einsum("bhqk,bhkd->bhqd", p, vh)
        o = o.transpose(0, 2, 1, 3).reshape(B, SEQ_LEN, EMBED_DIM)
        x = x + (o @ params["wo_t"][l] + params["bo"][l])
        h2 = ln(x, params["ln2w"][l], params["ln2b"][l])
        f = jnp.maximum(h2 @ params["w1_t"][l] + params["b1"][l], 0.0)
        x = x + (f @ params["w2_t"][l] + params["b2"][l])

    x = jnp.maximum(x, 0.0)
    x = ln(x, params["normw"], params["normb"])
    policy = jnp.sum(x * params["wp"], axis=-1) + params["bp"]
    val = jnp.sum(x * params["wv"][None], axis=(1, 2)) + params["bv"]
    return {"policy": policy, "value": jnp.tanh(val)}


if __name__ == "__main__":
    key = jax.random.PRNGKey(0)
    pkey, tkey = jax.random.split(key)
    params = init_params(pkey)

    # small primary check (batch=2) + a batched check exercising chunking/grid
    for B in (2, 130):
        tokens = jax.random.randint(jax.random.fold_in(tkey, B),
                                    (B, SEQ_LEN), 0, 3, dtype=jnp.int32)
        out = tic_tac_toe_transformer(params, tokens)
        out = jax.tree_util.tree_map(jax.block_until_ready, out)

        assert out["policy"].shape == (B, SEQ_LEN)
        assert out["value"].shape == (B,)

        ref = reference_forward(params, tokens)
        pol_err = float(jnp.max(jnp.abs(out["policy"] - ref["policy"])))
        val_err = float(jnp.max(jnp.abs(out["value"] - ref["value"])))
        assert pol_err < 5e-2 and val_err < 5e-2, (B, pol_err, val_err)

    # TODO(synk): dropout layers are eval-mode no-ops and are intentionally omitted.
    print("KERNEL_OK")
</pallas_src>

<mosaic_0001>
module attributes {stable_mosaic.version = 11 : i64} {
  func.func @kernel(%arg0: i32, %arg1: memref<72x12xf32, #tpu.memory_space<vmem>>, %arg2: memref<12x32xf32, #tpu.memory_space<vmem>>, %arg3: memref<2x32x192xf32, #tpu.memory_space<vmem>>, %arg4: memref<2x64x32xf32, #tpu.memory_space<vmem>>, %arg5: memref<2x8x128xf32, #tpu.memory_space<vmem>>, %arg6: memref<16x128xf32, #tpu.memory_space<vmem>>, %arg7: memref<72x72xf32, #tpu.memory_space<vmem>>, %arg8: memref<72x9xf32, #tpu.memory_space<vmem>>, %arg9: memref<8x72xf32, #tpu.memory_space<vmem>>, %arg10: memref<8x16xf32, #tpu.memory_space<vmem>>, %arg11: memref<72x32xf32, #tpu.memory_space<vmem>>) attributes {dimension_semantics = [#tpu.dimension_semantics<parallel>], iteration_bounds = array<i64: 1>, scalar_prefetch = 0 : i64, scratch_operands = 1 : i64, tpu.core_type = #tpu.core_type<tc>, window_params = [{transform_indices = @transform_0, window_bounds = array<i64: 72, 12>}, {pipeline_mode = #tpu.pipeline_mode<synchronous>, transform_indices = @transform_1, window_bounds = array<i64: 12, 32>}, {pipeline_mode = #tpu.pipeline_mode<synchronous>, transform_indices = @transform_2, window_bounds = array<i64: 2, 32, 192>}, {pipeline_mode = #tpu.pipeline_mode<synchronous>, transform_indices = @transform_3, window_bounds = array<i64: 2, 64, 32>}, {pipeline_mode = #tpu.pipeline_mode<synchronous>, transform_indices = @transform_4, window_bounds = array<i64: 2, 8, 128>}, {pipeline_mode = #tpu.pipeline_mode<synchronous>, transform_indices = @transform_5, window_bounds = array<i64: 16, 128>}, {pipeline_mode = #tpu.pipeline_mode<synchronous>, transform_indices = @transform_6, window_bounds = array<i64: 72, 72>}, {pipeline_mode = #tpu.pipeline_mode<synchronous>, transform_indices = @transform_7, window_bounds = array<i64: 72, 9>}, {pipeline_mode = #tpu.pipeline_mode<synchronous>, transform_indices = @transform_8, window_bounds = array<i64: 8, 72>}, {transform_indices = @transform_9, window_bounds = array<i64: 8, 16>}]} {
    %c0 = arith.constant 0 : index
    %c0_0 = arith.constant 0 : index
    %0 = vector.load %arg1[%c0, %c0_0] : memref<72x12xf32, #tpu.memory_space<vmem>>, vector<72x12xf32>
    %c0_1 = arith.constant 0 : index
    %c0_2 = arith.constant 0 : index
    %1 = vector.load %arg2[%c0_1, %c0_2] : memref<12x32xf32, #tpu.memory_space<vmem>>, vector<12x32xf32>
    %cst = arith.constant dense<0.000000e+00> : vector<72x32xf32>
    %2 = tpu.matmul %0, %1, %cst {dimension_numbers = #tpu.dot_dimension_numbers<[1], [0], [0], [1], [0, 0, 1, 1], [], []>} : vector<72x12xf32>, vector<12x32xf32>, vector<72x32xf32> -> vector<72x32xf32>
    %c0_3 = arith.constant 0 : index
    %c0_4 = arith.constant 0 : index
    %3 = vector.load %arg7[%c0_3, %c0_4] : memref<72x72xf32, #tpu.memory_space<vmem>>, vector<72x72xf32>
    %c0_5 = arith.constant 0 : index
    %c0_6 = arith.constant 0 : index
    %c0_7 = arith.constant 0 : index
    %4 = vector.load %arg3[%c0_5, %c0_6, %c0_7] : memref<2x32x192xf32, #tpu.memory_space<vmem>>, vector<1x32x192xf32>
    %5 = vector.shape_cast %4 : vector<1x32x192xf32> to vector<32x192xf32>
    %c0_8 = arith.constant 0 : index
    %c0_9 = arith.constant 0 : index
    %c0_10 = arith.constant 0 : index
    %6 = vector.load %arg5[%c0_8, %c0_9, %c0_10] : memref<2x8x128xf32, #tpu.memory_space<vmem>>, vector<1x8x128xf32>
    %7 = vector.shape_cast %6 : vector<1x8x128xf32> to vector<8x128xf32>
    %8 = vector.extract_strided_slice %7 {offsets = [0, 0], sizes = [1, 32], strides = [1, 1]} : vector<8x128xf32> to vector<1x32xf32>
    %9 = vector.extract_strided_slice %7 {offsets = [1, 0], sizes = [1, 32], strides = [1, 1]} : vector<8x128xf32> to vector<1x32xf32>
    %10 = vector.extract_strided_slice %7 {offsets = [2, 0], sizes = [1, 32], strides = [1, 1]} : vector<8x128xf32> to vector<1x32xf32>
    %11 = vector.extract_strided_slice %7 {offsets = [3, 0], sizes = [1, 32], strides = [1, 1]} : vector<8x128xf32> to vector<1x32xf32>
    %12 = vector.extract_strided_slice %7 {offsets = [4, 0], sizes = [1, 32], strides = [1, 1]} : vector<8x128xf32> to vector<1x32xf32>
    %13 = vector.extract_strided_slice %7 {offsets = [5, 0], sizes = [1, 32], strides = [1, 1]} : vector<8x128xf32> to vector<1x32xf32>
    %14 = vector.extract_strided_slice %7 {offsets = [6, 0], sizes = [1, 64], strides = [1, 1]} : vector<8x128xf32> to vector<1x64xf32>
    %15 = vector.extract_strided_slice %7 {offsets = [7, 0], sizes = [1, 96], strides = [1, 1]} : vector<8x128xf32> to vector<1x96xf32>
    %16 = vector.extract_strided_slice %5 {offsets = [0, 0], sizes = [32, 96], strides = [1, 1]} : vector<32x192xf32> to vector<32x96xf32>
    %17 = vector.extract_strided_slice %5 {offsets = [0, 96], sizes = [32, 32], strides = [1, 1]} : vector<32x192xf32> to vector<32x32xf32>
    %18 = vector.extract_strided_slice %5 {offsets = [0, 128], sizes = [32, 64], strides = [1, 1]} : vector<32x192xf32> to vector<32x64xf32>
    %c0_11 = arith.constant 0 : index
    %c0_12 = arith.constant 0 : index
    %c0_13 = arith.constant 0 : index
    %19 = vector.load %arg4[%c0_11, %c0_12, %c0_13] : memref<2x64x32xf32, #tpu.memory_space<vmem>>, vector<1x64x32xf32>
    %20 = vector.shape_cast %19 : vector<1x64x32xf32> to vector<64x32xf32>
    %cst_14 = arith.constant dense<0.000000e+00> : vector<72xf32>
    %21 = vector.multi_reduction <add>, %2, %cst_14 [1] : vector<72x32xf32> to vector<72xf32>
    %22 = vector.shape_cast %21 : vector<72xf32> to vector<72x1xf32>
    %cst_15 = arith.constant 3.200000e+01 : f32
    %23 = vector.broadcast %cst_15 : f32 to vector<72x1xf32>
    %24 = arith.divf %22, %23 : vector<72x1xf32>
    %25 = vector.broadcast %24 : vector<72x1xf32> to vector<72x32xf32>
    %26 = arith.subf %2, %25 : vector<72x32xf32>
    %27 = arith.mulf %26, %26 : vector<72x32xf32>
    %cst_16 = arith.constant dense<0.000000e+00> : vector<72xf32>
    %28 = vector.multi_reduction <add>, %27, %cst_16 [1] : vector<72x32xf32> to vector<72xf32>
    %29 = vector.shape_cast %28 : vector<72xf32> to vector<72x1xf32>
    %cst_17 = arith.constant 3.200000e+01 : f32
    %30 = vector.broadcast %cst_17 : f32 to vector<72x1xf32>
    %31 = arith.divf %29, %30 : vector<72x1xf32>
    %32 = vector.broadcast %24 : vector<72x1xf32> to vector<72x32xf32>
    %33 = arith.subf %2, %32 : vector<72x32xf32>
    %cst_18 = arith.constant 9.99999974E-6 : f32
    %34 = vector.broadcast %cst_18 : f32 to vector<72x1xf32>
    %35 = arith.addf %31, %34 : vector<72x1xf32>
    %36 = math.rsqrt %35 : vector<72x1xf32>
    %37 = vector.broadcast %36 : vector<72x1xf32> to vector<72x32xf32>
    %38 = arith.mulf %33, %37 : vector<72x32xf32>
    %39 = vector.broadcast %8 : vector<1x32xf32> to vector<72x32xf32>
    %40 = arith.mulf %38, %39 : vector<72x32xf32>
    %41 = vector.broadcast %9 : vector<1x32xf32> to vector<72x32xf32>
    %42 = arith.addf %40, %41 : vector<72x32xf32>
    %cst_19 = arith.constant dense<0.000000e+00> : vector<72x96xf32>
    %43 = tpu.matmul %42, %16, %cst_19 {dimension_numbers = #tpu.dot_dimension_numbers<[1], [0], [0], [1], [0, 0, 1, 1], [], []>} : vector<72x32xf32>, vector<32x96xf32>, vector<72x96xf32> -> vector<72x96xf32>
    %44 = vector.broadcast %15 : vector<1x96xf32> to vector<72x96xf32>
    %45 = arith.addf %43, %44 : vector<72x96xf32>
    %46 = vector.extract_strided_slice %45 {offsets = [0, 0], sizes = [72, 8], strides = [1, 1]} : vector<72x96xf32> to vector<72x8xf32>
    %47 = vector.extract_strided_slice %45 {offsets = [0, 32], sizes = [72, 8], strides = [1, 1]} : vector<72x96xf32> to vector<72x8xf32>
    %48 = vector.extract_strided_slice %45 {offsets = [0, 64], sizes = [72, 8], strides = [1, 1]} : vector<72x96xf32> to vector<72x8xf32>
    %cst_20 = arith.constant dense<0.000000e+00> : vector<72x72xf32>
    %49 = tpu.matmul %46, %47, %cst_20 {dimension_numbers = #tpu.dot_dimension_numbers<[1], [1], [0], [0], [0, 0, 1, 0], [], []>} : vector<72x8xf32>, vector<72x8xf32>, vector<72x72xf32> -> vector<72x72xf32>
    %cst_21 = arith.constant 0.353553385 : f32
    %50 = vector.broadcast %cst_21 : f32 to vector<72x72xf32>
    %51 = arith.mulf %49, %50 : vector<72x72xf32>
    %52 = arith.addf %51, %3 : vector<72x72xf32>
    %cst_22 = arith.constant dense<0xFF800000> : vector<72xf32>
    %53 = vector.multi_reduction <maximumf>, %52, %cst_22 [1] : vector<72x72xf32> to vector<72xf32>
    %54 = vector.shape_cast %53 : vector<72xf32> to vector<72x1xf32>
    %55 = vector.broadcast %54 : vector<72x1xf32> to vector<72x72xf32>
    %56 = arith.subf %52, %55 : vector<72x72xf32>
    %57 = math.exp %56 : vector<72x72xf32>
    %cst_23 = arith.constant dense<0.000000e+00> : vector<72xf32>
    %58 = vector.multi_reduction <add>, %57, %cst_23 [1] : vector<72x72xf32> to vector<72xf32>
    %59 = vector.shape_cast %58 : vector<72xf32> to vector<72x1xf32>
    %60 = tpu.reciprocal %59 {approx = true} : vector<72x1xf32> -> vector<72x1xf32>
    %61 = vector.broadcast %60 : vector<72x1xf32> to vector<72x72xf32>
    %62 = arith.mulf %57, %61 : vector<72x72xf32>
    %cst_24 = arith.constant dense<0.000000e+00> : vector<72x8xf32>
    %63 = tpu.matmul %62, %48, %cst_24 {dimension_numbers = #tpu.dot_dimension_numbers<[1], [0], [0], [1], [0, 0, 1, 1], [], []>} : vector<72x72xf32>, vector<72x8xf32>, vector<72x8xf32> -> vector<72x8xf32>
    %c0_25 = arith.constant 0 : index
    %c0_26 = arith.constant 0 : index
    %64 = vector.load %arg11[%c0_25, %c0_26] : memref<72x32xf32, #tpu.memory_space<vmem>>, vector<72x8xf32>
    tpu.vector_store %arg11[%c0_25, %c0_26], %63 {strides = array<i32>} : memref<72x32xf32, #tpu.memory_space<vmem>>, vector<72x8xf32>,
    %65 = vector.extract_strided_slice %45 {offsets = [0, 8], sizes = [72, 8], strides = [1, 1]} : vector<72x96xf32> to vector<72x8xf32>
    %66 = vector.extract_strided_slice %45 {offsets = [0, 40], sizes = [72, 8], strides = [1, 1]} : vector<72x96xf32> to vector<72x8xf32>
    %67 = vector.extract_strided_slice %45 {offsets = [0, 72], sizes = [72, 8], strides = [1, 1]} : vector<72x96xf32> to vector<72x8xf32>
    %cst_27 = arith.constant dense<0.000000e+00> : vector<72x72xf32>
    %68 = tpu.matmul %65, %66, %cst_27 {dimension_numbers = #tpu.dot_dimension_numbers<[1], [1], [0], [0], [0, 0, 1, 0], [], []>} : vector<72x8xf32>, vector<72x8xf32>, vector<72x72xf32> -> vector<72x72xf32>
    %cst_28 = arith.constant 0.353553385 : f32
    %69 = vector.broadcast %cst_28 : f32 to vector<72x72xf32>
    %70 = arith.mulf %68, %69 : vector<72x72xf32>
    %71 = arith.addf %70, %3 : vector<72x72xf32>
    %cst_29 = arith.constant dense<0xFF800000> : vector<72xf32>
    %72 = vector.multi_reduction <maximumf>, %71, %cst_29 [1] : vector<72x72xf32> to vector<72xf32>
    %73 = vector.shape_cast %72 : vector<72xf32> to vector<72x1xf32>
    %74 = vector.broadcast %73 : vector<72x1xf32> to vector<72x72xf32>
    %75 = arith.subf %71, %74 : vector<72x72xf32>
    %76 = math.exp %75 : vector<72x72xf32>
    %cst_30 = arith.constant dense<0.000000e+00> : vector<72xf32>
    %77 = vector.multi_reduction <add>, %76, %cst_30 [1] : vector<72x72xf32> to vector<72xf32>
    %78 = vector.shape_cast %77 : vector<72xf32> to vector<72x1xf32>
    %79 = tpu.reciprocal %78 {approx = true} : vector<72x1xf32> -> vector<72x1xf32>
    %80 = vector.broadcast %79 : vector<72x1xf32> to vector<72x72xf32>
    %81 = arith.mulf %76, %80 : vector<72x72xf32>
    %cst_31 = arith.constant dense<0.000000e+00> : vector<72x8xf32>
    %82 = tpu.matmul %81, %67, %cst_31 {dimension_numbers = #tpu.dot_dimension_numbers<[1], [0], [0], [1], [0, 0, 1, 1], [], []>} : vector<72x72xf32>, vector<72x8xf32>, vector<72x8xf32> -> vector<72x8xf32>
    %c0_32 = arith.constant 0 : index
    %c8 = arith.constant 8 : index
    %83 = vector.load %arg11[%c0_32, %c8] : memref<72x32xf32, #tpu.memory_space<vmem>>, vector<72x8xf32>
    tpu.vector_store %arg11[%c0_32, %c8], %82 {strides = array<i32>} : memref<72x32xf32, #tpu.memory_space<vmem>>, vector<72x8xf32>,
    %84 = vector.extract_strided_slice %45 {offsets = [0, 16], sizes = [72, 8], strides = [1, 1]} : vector<72x96xf32> to vector<72x8xf32>
    %85 = vector.extract_strided_slice %45 {offsets = [0, 48], sizes = [72, 8], strides = [1, 1]} : vector<72x96xf32> to vector<72x8xf32>
    %86 = vector.extract_strided_slice %45 {offsets = [0, 80], sizes = [72, 8], strides = [1, 1]} : vector<72x96xf32> to vector<72x8xf32>
    %cst_33 = arith.constant dense<0.000000e+00> : vector<72x72xf32>
    %87 = tpu.matmul %84, %85, %cst_33 {dimension_numbers = #tpu.dot_dimension_numbers<[1], [1], [0], [0], [0, 0, 1, 0], [], []>} : vector<72x8xf32>, vector<72x8xf32>, vector<72x72xf32> -> vector<72x72xf32>
    %cst_34 = arith.constant 0.353553385 : f32
    %88 = vector.broadcast %cst_34 : f32 to vector<72x72xf32>
    %89 = arith.mulf %87, %88 : vector<72x72xf32>
    %90 = arith.addf %89, %3 : vector<72x72xf32>
    %cst_35 = arith.constant dense<0xFF800000> : vector<72xf32>
    %91 = vector.multi_reduction <maximumf>, %90, %cst_35 [1] : vector<72x72xf32> to vector<72xf32>
    %92 = vector.shape_cast %91 : vector<72xf32> to vector<72x1xf32>
    %93 = vector.broadcast %92 : vector<72x1xf32> to vector<72x72xf32>
    %94 = arith.subf %90, %93 : vector<72x72xf32>
    %95 = math.exp %94 : vector<72x72xf32>
    %cst_36 = arith.constant dense<0.000000e+00> : vector<72xf32>
    %96 = vector.multi_reduction <add>, %95, %cst_36 [1] : vector<72x72xf32> to vector<72xf32>
    %97 = vector.shape_cast %96 : vector<72xf32> to vector<72x1xf32>
    %98 = tpu.reciprocal %97 {approx = true} : vector<72x1xf32> -> vector<72x1xf32>
    %99 = vector.broadcast %98 : vector<72x1xf32> to vector<72x72xf32>
    %100 = arith.mulf %95, %99 : vector<72x72xf32>
    %cst_37 = arith.constant dense<0.000000e+00> : vector<72x8xf32>
    %101 = tpu.matmul %100, %86, %cst_37 {dimension_numbers = #tpu.dot_dimension_numbers<[1], [0], [0], [1], [0, 0, 1, 1], [], []>} : vector<72x72xf32>, vector<72x8xf32>, vector<72x8xf32> -> vector<72x8xf32>
    %c0_38 = arith.constant 0 : index
    %c16 = arith.constant 16 : index
    %102 = vector.load %arg11[%c0_38, %c16] : memref<72x32xf32, #tpu.memory_space<vmem>>, vector<72x8xf32>
    tpu.vector_store %arg11[%c0_38, %c16], %101 {strides = array<i32>} : memref<72x32xf32, #tpu.memory_space<vmem>>, vector<72x8xf32>,
    %103 = vector.extract_strided_slice %45 {offsets = [0, 24], sizes = [72, 8], strides = [1, 1]} : vector<72x96xf32> to vector<72x8xf32>
    %104 = vector.extract_strided_slice %45 {offsets = [0, 56], sizes = [72, 8], strides = [1, 1]} : vector<72x96xf32> to vector<72x8xf32>
    %105 = vector.extract_strided_slice %45 {offsets = [0, 88], sizes = [72, 8], strides = [1, 1]} : vector<72x96xf32> to vector<72x8xf32>
    %cst_39 = arith.constant dense<0.000000e+00> : vector<72x72xf32>
    %106 = tpu.matmul %103, %104, %cst_39 {dimension_numbers = #tpu.dot_dimension_numbers<[1], [1], [0], [0], [0, 0, 1, 0], [], []>} : vector<72x8xf32>, vector<72x8xf32>, vector<72x72xf32> -> vector<72x72xf32>
    %cst_40 = arith.constant 0.353553385 : f32
    %107 = vector.broadcast %cst_40 : f32 to vector<72x72xf32>
    %108 = arith.mulf %106, %107 : vector<72x72xf32>
    %109 = arith.addf %108, %3 : vector<72x72xf32>
    %cst_41 = arith.constant dense<0xFF800000> : vector<72xf32>
    %110 = vector.multi_reduction <maximumf>, %109, %cst_41 [1] : vector<72x72xf32> to vector<72xf32>
    %111 = vector.shape_cast %110 : vector<72xf32> to vector<72x1xf32>
    %112 = vector.broadcast %111 : vector<72x1xf32> to vector<72x72xf32>
    %113 = arith.subf %109, %112 : vector<72x72xf32>
    %114 = math.exp %113 : vector<72x72xf32>
    %cst_42 = arith.constant dense<0.000000e+00> : vector<72xf32>
    %115 = vector.multi_reduction <add>, %114, %cst_42 [1] : vector<72x72xf32> to vector<72xf32>
    %116 = vector.shape_cast %115 : vector<72xf32> to vector<72x1xf32>
    %117 = tpu.reciprocal %116 {approx = true} : vector<72x1xf32> -> vector<72x1xf32>
    %118 = vector.broadcast %117 : vector<72x1xf32> to vector<72x72xf32>
    %119 = arith.mulf %114, %118 : vector<72x72xf32>
    %cst_43 = arith.constant dense<0.000000e+00> : vector<72x8xf32>
    %120 = tpu.matmul %119, %105, %cst_43 {dimension_numbers = #tpu.dot_dimension_numbers<[1], [0], [0], [1], [0, 0, 1, 1], [], []>} : vector<72x72xf32>, vector<72x8xf32>, vector<72x8xf32> -> vector<72x8xf32>
    %c0_44 = arith.constant 0 : index
    %c24 = arith.constant 24 : index
    %121 = vector.load %arg11[%c0_44, %c24] : memref<72x32xf32, #tpu.memory_space<vmem>>, vector<72x8xf32>
    tpu.vector_store %arg11[%c0_44, %c24], %120 {strides = array<i32>} : memref<72x32xf32, #tpu.memory_space<vmem>>, vector<72x8xf32>,
    %c0_45 = arith.constant 0 : index
    %c0_46 = arith.constant 0 : index
    %122 = vector.load %arg11[%c0_45, %c0_46] : memref<72x32xf32, #tpu.memory_space<vmem>>, vector<72x32xf32>
    %cst_47 = arith.constant dense<0.000000e+00> : vector<72x32xf32>
    %123 = tpu.matmul %122, %17, %cst_47 {dimension_numbers = #tpu.dot_dimension_numbers<[1], [0], [0], [1], [0, 0, 1, 1], [], []>} : vector<72x32xf32>, vector<32x32xf32>, vector<72x32xf32> -> vector<72x32xf32>
    %124 = arith.addf %2, %123 : vector<72x32xf32>
    %125 = vector.broadcast %12 : vector<1x32xf32> to vector<72x32xf32>
    %126 = arith.addf %124, %125 : vector<72x32xf32>
    %cst_48 = arith.constant dense<0.000000e+00> : vector<72xf32>
    %127 = vector.multi_reduction <add>, %126, %cst_48 [1] : vector<72x32xf32> to vector<72xf32>
    %128 = vector.shape_cast %127 : vector<72xf32> to vector<72x1xf32>
    %cst_49 = arith.constant 3.200000e+01 : f32
    %129 = vector.broadcast %cst_49 : f32 to vector<72x1xf32>
    %130 = arith.divf %128, %129 : vector<72x1xf32>
    %131 = vector.broadcast %130 : vector<72x1xf32> to vector<72x32xf32>
    %132 = arith.subf %126, %131 : vector<72x32xf32>
    %133 = arith.mulf %132, %132 : vector<72x32xf32>
    %cst_50 = arith.constant dense<0.000000e+00> : vector<72xf32>
    %134 = vector.multi_reduction <add>, %133, %cst_50 [1] : vector<72x32xf32> to vector<72xf32>
    %135 = vector.shape_cast %134 : vector<72xf32> to vector<72x1xf32>
    %cst_51 = arith.constant 3.200000e+01 : f32
    %136 = vector.broadcast %cst_51 : f32 to vector<72x1xf32>
    %137 = arith.divf %135, %136 : vector<72x1xf32>
    %138 = vector.broadcast %130 : vector<72x1xf32> to vector<72x32xf32>
    %139 = arith.subf %126, %138 : vector<72x32xf32>
    %cst_52 = arith.constant 9.99999974E-6 : f32
    %140 = vector.broadcast %cst_52 : f32 to vector<72x1xf32>
    %141 = arith.addf %137, %140 : vector<72x1xf32>
    %142 = math.rsqrt %141 : vector<72x1xf32>
    %143 = vector.broadcast %142 : vector<72x1xf32> to vector<72x32xf32>
    %144 = arith.mulf %139, %143 : vector<72x32xf32>
    %145 = vector.broadcast %10 : vector<1x32xf32> to vector<72x32xf32>
    %146 = arith.mulf %144, %145 : vector<72x32xf32>
    %147 = vector.broadcast %11 : vector<1x32xf32> to vector<72x32xf32>
    %148 = arith.addf %146, %147 : vector<72x32xf32>
    %cst_53 = arith.constant dense<0.000000e+00> : vector<72x64xf32>
    %149 = tpu.matmul %148, %18, %cst_53 {dimension_numbers = #tpu.dot_dimension_numbers<[1], [0], [0], [1], [0, 0, 1, 1], [], []>} : vector<72x32xf32>, vector<32x64xf32>, vector<72x64xf32> -> vector<72x64xf32>
    %150 = vector.broadcast %14 : vector<1x64xf32> to vector<72x64xf32>
    %151 = arith.addf %149, %150 : vector<72x64xf32>
    %cst_54 = arith.constant 0.000000e+00 : f32
    %152 = vector.broadcast %cst_54 : f32 to vector<72x64xf32>
    %153 = arith.maximumf %151, %152 : vector<72x64xf32>
    %cst_55 = arith.constant dense<0.000000e+00> : vector<72x32xf32>
    %154 = tpu.matmul %153, %20, %cst_55 {dimension_numbers = #tpu.dot_dimension_numbers<[1], [0], [0], [1], [0, 0, 1, 1], [], []>} : vector<72x64xf32>, vector<64x32xf32>, vector<72x32xf32> -> vector<72x32xf32>
    %155 = arith.addf %126, %154 : vector<72x32xf32>
    %156 = vector.broadcast %13 : vector<1x32xf32> to vector<72x32xf32>
    %157 = arith.addf %155, %156 : vector<72x32xf32>
    %c1 = arith.constant 1 : index
    %c0_56 = arith.constant 0 : index
    %c0_57 = arith.constant 0 : index
    %158 = vector.load %arg3[%c1, %c0_56, %c0_57] : memref<2x32x192xf32, #tpu.memory_space<vmem>>, vector<1x32x192xf32>
    %159 = vector.shape_cast %158 : vector<1x32x192xf32> to vector<32x192xf32>
    %c1_58 = arith.constant 1 : index
    %c0_59 = arith.constant 0 : index
    %c0_60 = arith.constant 0 : index
    %160 = vector.load %arg5[%c1_58, %c0_59, %c0_60] : memref<2x8x128xf32, #tpu.memory_space<vmem>>, vector<1x8x128xf32>
    %161 = vector.shape_cast %160 : vector<1x8x128xf32> to vector<8x128xf32>
    %162 = vector.extract_strided_slice %161 {offsets = [0, 0], sizes = [1, 32], strides = [1, 1]} : vector<8x128xf32> to vector<1x32xf32>
    %163 = vector.extract_strided_slice %161 {offsets = [1, 0], sizes = [1, 32], strides = [1, 1]} : vector<8x128xf32> to vector<1x32xf32>
    %164 = vector.extract_strided_slice %161 {offsets = [2, 0], sizes = [1, 32], strides = [1, 1]} : vector<8x128xf32> to vector<1x32xf32>
    %165 = vector.extract_strided_slice %161 {offsets = [3, 0], sizes = [1, 32], strides = [1, 1]} : vector<8x128xf32> to vector<1x32xf32>
    %166 = vector.extract_strided_slice %161 {offsets = [4, 0], sizes = [1, 32], strides = [1, 1]} : vector<8x128xf32> to vector<1x32xf32>
    %167 = vector.extract_strided_slice %161 {offsets = [5, 0], sizes = [1, 32], strides = [1, 1]} : vector<8x128xf32> to vector<1x32xf32>
    %168 = vector.extract_strided_slice %161 {offsets = [6, 0], sizes = [1, 64], strides = [1, 1]} : vector<8x128xf32> to vector<1x64xf32>
    %169 = vector.extract_strided_slice %161 {offsets = [7, 0], sizes = [1, 96], strides = [1, 1]} : vector<8x128xf32> to vector<1x96xf32>
    %170 = vector.extract_strided_slice %159 {offsets = [0, 0], sizes = [32, 96], strides = [1, 1]} : vector<32x192xf32> to vector<32x96xf32>
    %171 = vector.extract_strided_slice %159 {offsets = [0, 96], sizes = [32, 32], strides = [1, 1]} : vector<32x192xf32> to vector<32x32xf32>
    %172 = vector.extract_strided_slice %159 {offsets = [0, 128], sizes = [32, 64], strides = [1, 1]} : vector<32x192xf32> to vector<32x64xf32>
    %c1_61 = arith.constant 1 : index
    %c0_62 = arith.constant 0 : index
    %c0_63 = arith.constant 0 : index
    %173 = vector.load %arg4[%c1_61, %c0_62, %c0_63] : memref<2x64x32xf32, #tpu.memory_space<vmem>>, vector<1x64x32xf32>
    %174 = vector.shape_cast %173 : vector<1x64x32xf32> to vector<64x32xf32>
    %cst_64 = arith.constant dense<0.000000e+00> : vector<72xf32>
    %175 = vector.multi_reduction <add>, %157, %cst_64 [1] : vector<72x32xf32> to vector<72xf32>
    %176 = vector.shape_cast %175 : vector<72xf32> to vector<72x1xf32>
    %cst_65 = arith.constant 3.200000e+01 : f32
    %177 = vector.broadcast %cst_65 : f32 to vector<72x1xf32>
    %178 = arith.divf %176, %177 : vector<72x1xf32>
    %179 = vector.broadcast %178 : vector<72x1xf32> to vector<72x32xf32>
    %180 = arith.subf %157, %179 : vector<72x32xf32>
    %181 = arith.mulf %180, %180 : vector<72x32xf32>
    %cst_66 = arith.constant dense<0.000000e+00> : vector<72xf32>
    %182 = vector.multi_reduction <add>, %181, %cst_66 [1] : vector<72x32xf32> to vector<72xf32>
    %183 = vector.shape_cast %182 : vector<72xf32> to vector<72x1xf32>
    %cst_67 = arith.constant 3.200000e+01 : f32
    %184 = vector.broadcast %cst_67 : f32 to vector<72x1xf32>
    %185 = arith.divf %183, %184 : vector<72x1xf32>
    %186 = vector.broadcast %178 : vector<72x1xf32> to vector<72x32xf32>
    %187 = arith.subf %157, %186 : vector<72x32xf32>
    %cst_68 = arith.constant 9.99999974E-6 : f32
    %188 = vector.broadcast %cst_68 : f32 to vector<72x1xf32>
    %189 = arith.addf %185, %188 : vector<72x1xf32>
    %190 = math.rsqrt %189 : vector<72x1xf32>
    %191 = vector.broadcast %190 : vector<72x1xf32> to vector<72x32xf32>
    %192 = arith.mulf %187, %191 : vector<72x32xf32>
    %193 = vector.broadcast %162 : vector<1x32xf32> to vector<72x32xf32>
    %194 = arith.mulf %192, %193 : vector<72x32xf32>
    %195 = vector.broadcast %163 : vector<1x32xf32> to vector<72x32xf32>
    %196 = arith.addf %194, %195 : vector<72x32xf32>
    %cst_69 = arith.constant dense<0.000000e+00> : vector<72x96xf32>
    %197 = tpu.matmul %196, %170, %cst_69 {dimension_numbers = #tpu.dot_dimension_numbers<[1], [0], [0], [1], [0, 0, 1, 1], [], []>} : vector<72x32xf32>, vector<32x96xf32>, vector<72x96xf32> -> vector<72x96xf32>
    %198 = vector.broadcast %169 : vector<1x96xf32> to vector<72x96xf32>
    %199 = arith.addf %197, %198 : vector<72x96xf32>
    %200 = vector.extract_strided_slice %199 {offsets = [0, 0], sizes = [72, 8], strides = [1, 1]} : vector<72x96xf32> to vector<72x8xf32>
    %201 = vector.extract_strided_slice %199 {offsets = [0, 32], sizes = [72, 8], strides = [1, 1]} : vector<72x96xf32> to vector<72x8xf32>
    %202 = vector.extract_strided_slice %199 {offsets = [0, 64], sizes = [72, 8], strides = [1, 1]} : vector<72x96xf32> to vector<72x8xf32>
    %cst_70 = arith.constant dense<0.000000e+00> : vector<72x72xf32>
    %203 = tpu.matmul %200, %201, %cst_70 {dimension_numbers = #tpu.dot_dimension_numbers<[1], [1], [0], [0], [0, 0, 1, 0], [], []>} : vector<72x8xf32>, vector<72x8xf32>, vector<72x72xf32> -> vector<72x72xf32>
    %cst_71 = arith.constant 0.353553385 : f32
    %204 = vector.broadcast %cst_71 : f32 to vector<72x72xf32>
    %205 = arith.mulf %203, %204 : vector<72x72xf32>
    %206 = arith.addf %205, %3 : vector<72x72xf32>
    %cst_72 = arith.constant dense<0xFF800000> : vector<72xf32>
    %207 = vector.multi_reduction <maximumf>, %206, %cst_72 [1] : vector<72x72xf32> to vector<72xf32>
    %208 = vector.shape_cast %207 : vector<72xf32> to vector<72x1xf32>
    %209 = vector.broadcast %208 : vector<72x1xf32> to vector<72x72xf32>
    %210 = arith.subf %206, %209 : vector<72x72xf32>
    %211 = math.exp %210 : vector<72x72xf32>
    %cst_73 = arith.constant dense<0.000000e+00> : vector<72xf32>
    %212 = vector.multi_reduction <add>, %211, %cst_73 [1] : vector<72x72xf32> to vector<72xf32>
    %213 = vector.shape_cast %212 : vector<72xf32> to vector<72x1xf32>
    %214 = tpu.reciprocal %213 {approx = true} : vector<72x1xf32> -> vector<72x1xf32>
    %215 = vector.broadcast %214 : vector<72x1xf32> to vector<72x72xf32>
    %216 = arith.mulf %211, %215 : vector<72x72xf32>
    %cst_74 = arith.constant dense<0.000000e+00> : vector<72x8xf32>
    %217 = tpu.matmul %216, %202, %cst_74 {dimension_numbers = #tpu.dot_dimension_numbers<[1], [0], [0], [1], [0, 0, 1, 1], [], []>} : vector<72x72xf32>, vector<72x8xf32>, vector<72x8xf32> -> vector<72x8xf32>
    %c0_75 = arith.constant 0 : index
    %c0_76 = arith.constant 0 : index
    %218 = vector.load %arg11[%c0_75, %c0_76] : memref<72x32xf32, #tpu.memory_space<vmem>>, vector<72x8xf32>
    tpu.vector_store %arg11[%c0_75, %c0_76], %217 {strides = array<i32>} : memref<72x32xf32, #tpu.memory_space<vmem>>, vector<72x8xf32>,
    %219 = vector.extract_strided_slice %199 {offsets = [0, 8], sizes = [72, 8], strides = [1, 1]} : vector<72x96xf32> to vector<72x8xf32>
    %220 = vector.extract_strided_slice %199 {offsets = [0, 40], sizes = [72, 8], strides = [1, 1]} : vector<72x96xf32> to vector<72x8xf32>
    %221 = vector.extract_strided_slice %199 {offsets = [0, 72], sizes = [72, 8], strides = [1, 1]} : vector<72x96xf32> to vector<72x8xf32>
    %cst_77 = arith.constant dense<0.000000e+00> : vector<72x72xf32>
    %222 = tpu.matmul %219, %220, %cst_77 {dimension_numbers = #tpu.dot_dimension_numbers<[1], [1], [0], [0], [0, 0, 1, 0], [], []>} : vector<72x8xf32>, vector<72x8xf32>, vector<72x72xf32> -> vector<72x72xf32>
    %cst_78 = arith.constant 0.353553385 : f32
    %223 = vector.broadcast %cst_78 : f32 to vector<72x72xf32>
    %224 = arith.mulf %222, %223 : vector<72x72xf32>
    %225 = arith.addf %224, %3 : vector<72x72xf32>
    %cst_79 = arith.constant dense<0xFF800000> : vector<72xf32>
    %226 = vector.multi_reduction <maximumf>, %225, %cst_79 [1] : vector<72x72xf32> to vector<72xf32>
    %227 = vector.shape_cast %226 : vector<72xf32> to vector<72x1xf32>
    %228 = vector.broadcast %227 : vector<72x1xf32> to vector<72x72xf32>
    %229 = arith.subf %225, %228 : vector<72x72xf32>
    %230 = math.exp %229 : vector<72x72xf32>
    %cst_80 = arith.constant dense<0.000000e+00> : vector<72xf32>
    %231 = vector.multi_reduction <add>, %230, %cst_80 [1] : vector<72x72xf32> to vector<72xf32>
    %232 = vector.shape_cast %231 : vector<72xf32> to vector<72x1xf32>
    %233 = tpu.reciprocal %232 {approx = true} : vector<72x1xf32> -> vector<72x1xf32>
    %234 = vector.broadcast %233 : vector<72x1xf32> to vector<72x72xf32>
    %235 = arith.mulf %230, %234 : vector<72x72xf32>
    %cst_81 = arith.constant dense<0.000000e+00> : vector<72x8xf32>
    %236 = tpu.matmul %235, %221, %cst_81 {dimension_numbers = #tpu.dot_dimension_numbers<[1], [0], [0], [1], [0, 0, 1, 1], [], []>} : vector<72x72xf32>, vector<72x8xf32>, vector<72x8xf32> -> vector<72x8xf32>
    %c0_82 = arith.constant 0 : index
    %c8_83 = arith.constant 8 : index
    %237 = vector.load %arg11[%c0_82, %c8_83] : memref<72x32xf32, #tpu.memory_space<vmem>>, vector<72x8xf32>
    tpu.vector_store %arg11[%c0_82, %c8_83], %236 {strides = array<i32>} : memref<72x32xf32, #tpu.memory_space<vmem>>, vector<72x8xf32>,
    %238 = vector.extract_strided_slice %199 {offsets = [0, 16], sizes = [72, 8], strides = [1, 1]} : vector<72x96xf32> to vector<72x8xf32>
    %239 = vector.extract_strided_slice %199 {offsets = [0, 48], sizes = [72, 8], strides = [1, 1]} : vector<72x96xf32> to vector<72x8xf32>
    %240 = vector.extract_strided_slice %199 {offsets = [0, 80], sizes = [72, 8], strides = [1, 1]} : vector<72x96xf32> to vector<72x8xf32>
    %cst_84 = arith.constant dense<0.000000e+00> : vector<72x72xf32>
    %241 = tpu.matmul %238, %239, %cst_84 {dimension_numbers = #tpu.dot_dimension_numbers<[1], [1], [0], [0], [0, 0, 1, 0], [], []>} : vector<72x8xf32>, vector<72x8xf32>, vector<72x72xf32> -> vector<72x72xf32>
    %cst_85 = arith.constant 0.353553385 : f32
    %242 = vector.broadcast %cst_85 : f32 to vector<72x72xf32>
    %243 = arith.mulf %241, %242 : vector<72x72xf32>
    %244 = arith.addf %243, %3 : vector<72x72xf32>
    %cst_86 = arith.constant dense<0xFF800000> : vector<72xf32>
    %245 = vector.multi_reduction <maximumf>, %244, %cst_86 [1] : vector<72x72xf32> to vector<72xf32>
    %246 = vector.shape_cast %245 : vector<72xf32> to vector<72x1xf32>
    %247 = vector.broadcast %246 : vector<72x1xf32> to vector<72x72xf32>
    %248 = arith.subf %244, %247 : vector<72x72xf32>
    %249 = math.exp %248 : vector<72x72xf32>
    %cst_87 = arith.constant dense<0.000000e+00> : vector<72xf32>
    %250 = vector.multi_reduction <add>, %249, %cst_87 [1] : vector<72x72xf32> to vector<72xf32>
    %251 = vector.shape_cast %250 : vector<72xf32> to vector<72x1xf32>
    %252 = tpu.reciprocal %251 {approx = true} : vector<72x1xf32> -> vector<72x1xf32>
    %253 = vector.broadcast %252 : vector<72x1xf32> to vector<72x72xf32>
    %254 = arith.mulf %249, %253 : vector<72x72xf32>
    %cst_88 = arith.constant dense<0.000000e+00> : vector<72x8xf32>
    %255 = tpu.matmul %254, %240, %cst_88 {dimension_numbers = #tpu.dot_dimension_numbers<[1], [0], [0], [1], [0, 0, 1, 1], [], []>} : vector<72x72xf32>, vector<72x8xf32>, vector<72x8xf32> -> vector<72x8xf32>
    %c0_89 = arith.constant 0 : index
    %c16_90 = arith.constant 16 : index
    %256 = vector.load %arg11[%c0_89, %c16_90] : memref<72x32xf32, #tpu.memory_space<vmem>>, vector<72x8xf32>
    tpu.vector_store %arg11[%c0_89, %c16_90], %255 {strides = array<i32>} : memref<72x32xf32, #tpu.memory_space<vmem>>, vector<72x8xf32>,
    %257 = vector.extract_strided_slice %199 {offsets = [0, 24], sizes = [72, 8], strides = [1, 1]} : vector<72x96xf32> to vector<72x8xf32>
    %258 = vector.extract_strided_slice %199 {offsets = [0, 56], sizes = [72, 8], strides = [1, 1]} : vector<72x96xf32> to vector<72x8xf32>
    %259 = vector.extract_strided_slice %199 {offsets = [0, 88], sizes = [72, 8], strides = [1, 1]} : vector<72x96xf32> to vector<72x8xf32>
    %cst_91 = arith.constant dense<0.000000e+00> : vector<72x72xf32>
    %260 = tpu.matmul %257, %258, %cst_91 {dimension_numbers = #tpu.dot_dimension_numbers<[1], [1], [0], [0], [0, 0, 1, 0], [], []>} : vector<72x8xf32>, vector<72x8xf32>, vector<72x72xf32> -> vector<72x72xf32>
    %cst_92 = arith.constant 0.353553385 : f32
    %261 = vector.broadcast %cst_92 : f32 to vector<72x72xf32>
    %262 = arith.mulf %260, %261 : vector<72x72xf32>
    %263 = arith.addf %262, %3 : vector<72x72xf32>
    %cst_93 = arith.constant dense<0xFF800000> : vector<72xf32>
    %264 = vector.multi_reduction <maximumf>, %263, %cst_93 [1] : vector<72x72xf32> to vector<72xf32>
    %265 = vector.shape_cast %264 : vector<72xf32> to vector<72x1xf32>
    %266 = vector.broadcast %265 : vector<72x1xf32> to vector<72x72xf32>
    %267 = arith.subf %263, %266 : vector<72x72xf32>
    %268 = math.exp %267 : vector<72x72xf32>
    %cst_94 = arith.constant dense<0.000000e+00> : vector<72xf32>
    %269 = vector.multi_reduction <add>, %268, %cst_94 [1] : vector<72x72xf32> to vector<72xf32>
    %270 = vector.shape_cast %269 : vector<72xf32> to vector<72x1xf32>
    %271 = tpu.reciprocal %270 {approx = true} : vector<72x1xf32> -> vector<72x1xf32>
    %272 = vector.broadcast %271 : vector<72x1xf32> to vector<72x72xf32>
    %273 = arith.mulf %268, %272 : vector<72x72xf32>
    %cst_95 = arith.constant dense<0.000000e+00> : vector<72x8xf32>
    %274 = tpu.matmul %273, %259, %cst_95 {dimension_numbers = #tpu.dot_dimension_numbers<[1], [0], [0], [1], [0, 0, 1, 1], [], []>} : vector<72x72xf32>, vector<72x8xf32>, vector<72x8xf32> -> vector<72x8xf32>
    %c0_96 = arith.constant 0 : index
    %c24_97 = arith.constant 24 : index
    %275 = vector.load %arg11[%c0_96, %c24_97] : memref<72x32xf32, #tpu.memory_space<vmem>>, vector<72x8xf32>
    tpu.vector_store %arg11[%c0_96, %c24_97], %274 {strides = array<i32>} : memref<72x32xf32, #tpu.memory_space<vmem>>, vector<72x8xf32>,
    %c0_98 = arith.constant 0 : index
    %c0_99 = arith.constant 0 : index
    %276 = vector.load %arg11[%c0_98, %c0_99] : memref<72x32xf32, #tpu.memory_space<vmem>>, vector<72x32xf32>
    %cst_100 = arith.constant dense<0.000000e+00> : vector<72x32xf32>
    %277 = tpu.matmul %276, %171, %cst_100 {dimension_numbers = #tpu.dot_dimension_numbers<[1], [0], [0], [1], [0, 0, 1, 1], [], []>} : vector<72x32xf32>, vector<32x32xf32>, vector<72x32xf32> -> vector<72x32xf32>
    %278 = arith.addf %157, %277 : vector<72x32xf32>
    %279 = vector.broadcast %166 : vector<1x32xf32> to vector<72x32xf32>
    %280 = arith.addf %278, %279 : vector<72x32xf32>
    %cst_101 = arith.constant dense<0.000000e+00> : vector<72xf32>
    %281 = vector.multi_reduction <add>, %280, %cst_101 [1] : vector<72x32xf32> to vector<72xf32>
    %282 = vector.shape_cast %281 : vector<72xf32> to vector<72x1xf32>
    %cst_102 = arith.constant 3.200000e+01 : f32
    %283 = vector.broadcast %cst_102 : f32 to vector<72x1xf32>
    %284 = arith.divf %282, %283 : vector<72x1xf32>
    %285 = vector.broadcast %284 : vector<72x1xf32> to vector<72x32xf32>
    %286 = arith.subf %280, %285 : vector<72x32xf32>
    %287 = arith.mulf %286, %286 : vector<72x32xf32>
    %cst_103 = arith.constant dense<0.000000e+00> : vector<72xf32>
    %288 = vector.multi_reduction <add>, %287, %cst_103 [1] : vector<72x32xf32> to vector<72xf32>
    %289 = vector.shape_cast %288 : vector<72xf32> to vector<72x1xf32>
    %cst_104 = arith.constant 3.200000e+01 : f32
    %290 = vector.broadcast %cst_104 : f32 to vector<72x1xf32>
    %291 = arith.divf %289, %290 : vector<72x1xf32>
    %292 = vector.broadcast %284 : vector<72x1xf32> to vector<72x32xf32>
    %293 = arith.subf %280, %292 : vector<72x32xf32>
    %cst_105 = arith.constant 9.99999974E-6 : f32
    %294 = vector.broadcast %cst_105 : f32 to vector<72x1xf32>
    %295 = arith.addf %291, %294 : vector<72x1xf32>
    %296 = math.rsqrt %295 : vector<72x1xf32>
    %297 = vector.broadcast %296 : vector<72x1xf32> to vector<72x32xf32>
    %298 = arith.mulf %293, %297 : vector<72x32xf32>
    %299 = vector.broadcast %164 : vector<1x32xf32> to vector<72x32xf32>
    %300 = arith.mulf %298, %299 : vector<72x32xf32>
    %301 = vector.broadcast %165 : vector<1x32xf32> to vector<72x32xf32>
    %302 = arith.addf %300, %301 : vector<72x32xf32>
    %cst_106 = arith.constant dense<0.000000e+00> : vector<72x64xf32>
    %303 = tpu.matmul %302, %172, %cst_106 {dimension_numbers = #tpu.dot_dimension_numbers<[1], [0], [0], [1], [0, 0, 1, 1], [], []>} : vector<72x32xf32>, vector<32x64xf32>, vector<72x64xf32> -> vector<72x64xf32>
    %304 = vector.broadcast %168 : vector<1x64xf32> to vector<72x64xf32>
    %305 = arith.addf %303, %304 : vector<72x64xf32>
    %cst_107 = arith.constant 0.000000e+00 : f32
    %306 = vector.broadcast %cst_107 : f32 to vector<72x64xf32>
    %307 = arith.maximumf %305, %306 : vector<72x64xf32>
    %cst_108 = arith.constant dense<0.000000e+00> : vector<72x32xf32>
    %308 = tpu.matmul %307, %174, %cst_108 {dimension_numbers = #tpu.dot_dimension_numbers<[1], [0], [0], [1], [0, 0, 1, 1], [], []>} : vector<72x64xf32>, vector<64x32xf32>, vector<72x32xf32> -> vector<72x32xf32>
    %309 = arith.addf %280, %308 : vector<72x32xf32>
    %310 = vector.broadcast %167 : vector<1x32xf32> to vector<72x32xf32>
    %311 = arith.addf %309, %310 : vector<72x32xf32>
    %c0_109 = arith.constant 0 : index
    %c0_110 = arith.constant 0 : index
    %312 = vector.load %arg6[%c0_109, %c0_110] : memref<16x128xf32, #tpu.memory_space<vmem>>, vector<16x128xf32>
    %313 = vector.extract_strided_slice %312 {offsets = [0, 0], sizes = [9, 32], strides = [1, 1]} : vector<16x128xf32> to vector<9x32xf32>
    %314 = vector.extract_strided_slice %312 {offsets = [9, 0], sizes = [1, 32], strides = [1, 1]} : vector<16x128xf32> to vector<1x32xf32>
    %315 = vector.extract_strided_slice %312 {offsets = [10, 0], sizes = [1, 32], strides = [1, 1]} : vector<16x128xf32> to vector<1x32xf32>
    %316 = vector.extract_strided_slice %312 {offsets = [11, 0], sizes = [1, 32], strides = [1, 1]} : vector<16x128xf32> to vector<1x32xf32>
    %317 = vector.extract_strided_slice %312 {offsets = [12, 0], sizes = [1, 1], strides = [1, 1]} : vector<16x128xf32> to vector<1x1xf32>
    %318 = vector.extract_strided_slice %312 {offsets = [12, 1], sizes = [1, 1], strides = [1, 1]} : vector<16x128xf32> to vector<1x1xf32>
    %cst_111 = arith.constant 0.000000e+00 : f32
    %319 = vector.broadcast %cst_111 : f32 to vector<72x32xf32>
    %320 = arith.maximumf %311, %319 : vector<72x32xf32>
    %cst_112 = arith.constant dense<0.000000e+00> : vector<72xf32>
    %321 = vector.multi_reduction <add>, %320, %cst_112 [1] : vector<72x32xf32> to vector<72xf32>
    %322 = vector.shape_cast %321 : vector<72xf32> to vector<72x1xf32>
    %cst_113 = arith.constant 3.200000e+01 : f32
    %323 = vector.broadcast %cst_113 : f32 to vector<72x1xf32>
    %324 = arith.divf %322, %323 : vector<72x1xf32>
    %325 = vector.broadcast %324 : vector<72x1xf32> to vector<72x32xf32>
    %326 = arith.subf %320, %325 : vector<72x32xf32>
    %327 = arith.mulf %326, %326 : vector<72x32xf32>
    %cst_114 = arith.constant dense<0.000000e+00> : vector<72xf32>
    %328 = vector.multi_reduction <add>, %327, %cst_114 [1] : vector<72x32xf32> to vector<72xf32>
    %329 = vector.shape_cast %328 : vector<72xf32> to vector<72x1xf32>
    %cst_115 = arith.constant 3.200000e+01 : f32
    %330 = vector.broadcast %cst_115 : f32 to vector<72x1xf32>
    %331 = arith.divf %329, %330 : vector<72x1xf32>
    %332 = vector.broadcast %324 : vector<72x1xf32> to vector<72x32xf32>
    %333 = arith.subf %320, %332 : vector<72x32xf32>
    %cst_116 = arith.constant 9.99999974E-6 : f32
    %334 = vector.broadcast %cst_116 : f32 to vector<72x1xf32>
    %335 = arith.addf %331, %334 : vector<72x1xf32>
    %336 = math.rsqrt %335 : vector<72x1xf32>
    %337 = vector.broadcast %336 : vector<72x1xf32> to vector<72x32xf32>
    %338 = arith.mulf %333, %337 : vector<72x32xf32>
    %339 = vector.broadcast %314 : vector<1x32xf32> to vector<72x32xf32>
    %340 = arith.mulf %338, %339 : vector<72x32xf32>
    %341 = vector.broadcast %315 : vector<1x32xf32> to vector<72x32xf32>
    %342 = arith.addf %340, %341 : vector<72x32xf32>
    %c0_117 = arith.constant 0 : index
    %c0_118 = arith.constant 0 : index
    %343 = vector.load %arg8[%c0_117, %c0_118] : memref<72x9xf32, #tpu.memory_space<vmem>>, vector<72x9xf32>
    %c0_119 = arith.constant 0 : index
    %c0_120 = arith.constant 0 : index
    %344 = vector.load %arg9[%c0_119, %c0_120] : memref<8x72xf32, #tpu.memory_space<vmem>>, vector<8x72xf32>
    %345 = vector.broadcast %316 : vector<1x32xf32> to vector<72x32xf32>
    %346 = arith.mulf %342, %345 : vector<72x32xf32>
    %cst_121 = arith.constant dense<0.000000e+00> : vector<72xf32>
    %347 = vector.multi_reduction <add>, %346, %cst_121 [1] : vector<72x32xf32> to vector<72xf32>
    %348 = vector.shape_cast %347 : vector<72xf32> to vector<72x1xf32>
    %349 = vector.broadcast %348 : vector<72x1xf32> to vector<72x9xf32>
    %350 = arith.mulf %349, %343 : vector<72x9xf32>
    %cst_122 = arith.constant dense<0.000000e+00> : vector<8x9xf32>
    %351 = tpu.matmul %344, %350, %cst_122 {dimension_numbers = #tpu.dot_dimension_numbers<[1], [0], [0], [1], [0, 0, 1, 1], [], []>} : vector<8x72xf32>, vector<72x9xf32>, vector<8x9xf32> -> vector<8x9xf32>
    %352 = vector.broadcast %317 : vector<1x1xf32> to vector<8x9xf32>
    %353 = arith.addf %351, %352 : vector<8x9xf32>
    %cst_123 = arith.constant dense<0.000000e+00> : vector<72x32xf32>
    %354 = tpu.matmul %343, %313, %cst_123 {dimension_numbers = #tpu.dot_dimension_numbers<[1], [0], [0], [1], [0, 0, 1, 1], [], []>} : vector<72x9xf32>, vector<9x32xf32>, vector<72x32xf32> -> vector<72x32xf32>
    %355 = arith.mulf %342, %354 : vector<72x32xf32>
    %cst_124 = arith.constant dense<0.000000e+00> : vector<72xf32>
    %356 = vector.multi_reduction <add>, %355, %cst_124 [1] : vector<72x32xf32> to vector<72xf32>
    %357 = vector.shape_cast %356 : vector<72xf32> to vector<72x1xf32>
    %358 = vector.broadcast %357 : vector<72x1xf32> to vector<72x9xf32>
    %359 = arith.mulf %358, %343 : vector<72x9xf32>
    %cst_125 = arith.constant dense<0.000000e+00> : vector<8x9xf32>
    %360 = tpu.matmul %344, %359, %cst_125 {dimension_numbers = #tpu.dot_dimension_numbers<[1], [0], [0], [1], [0, 0, 1, 1], [], []>} : vector<8x72xf32>, vector<72x9xf32>, vector<8x9xf32> -> vector<8x9xf32>
    %cst_126 = arith.constant dense<0.000000e+00> : vector<8xf32>
    %361 = vector.multi_reduction <add>, %360, %cst_126 [1] : vector<8x9xf32> to vector<8xf32>
    %362 = vector.shape_cast %361 : vector<8xf32> to vector<8x1xf32>
    %363 = vector.broadcast %318 : vector<1x1xf32> to vector<8x1xf32>
    %364 = arith.addf %362, %363 : vector<8x1xf32>
    %365 = math.tanh %364 : vector<8x1xf32>
    %cst_127 = arith.constant 0.000000e+00 : f32
    %366 = vector.broadcast %cst_127 : f32 to vector<8x16xf32>
    %c0_128 = arith.constant 0 : index
    %c0_129 = arith.constant 0 : index
    %367 = vector.load %arg10[%c0_128, %c0_129] : memref<8x16xf32, #tpu.memory_space<vmem>>, vector<8x16xf32>
    tpu.vector_store %arg10[%c0_128, %c0_129], %366 {strides = array<i32>} : memref<8x16xf32, #tpu.memory_space<vmem>>, vector<8x16xf32>,
    %c0_130 = arith.constant 0 : index
    %c0_131 = arith.constant 0 : index
    %368 = vector.load %arg10[%c0_130, %c0_131] : memref<8x16xf32, #tpu.memory_space<vmem>>, vector<8x9xf32>
    tpu.vector_store %arg10[%c0_130, %c0_131], %353 {strides = array<i32>} : memref<8x16xf32, #tpu.memory_space<vmem>>, vector<8x9xf32>,
    %c0_132 = arith.constant 0 : index
    %c9 = arith.constant 9 : index
    %369 = vector.load %arg10[%c0_132, %c9] : memref<8x16xf32, #tpu.memory_space<vmem>>, vector<8x1xf32>
    tpu.vector_store %arg10[%c0_132, %c9], %365 {strides = array<i32>} : memref<8x16xf32, #tpu.memory_space<vmem>>, vector<8x1xf32>,
    return
  }
  func.func @transform_0(%arg0: i32) -> (i32, i32) {
    %c0_i32 = arith.constant 0 : i32
    %c0_i32_0 = arith.constant 0 : i32
    return %arg0, %c0_i32 : i32, i32
  }
  func.func @transform_1(%arg0: i32) -> (i32, i32) {
    %c0_i32 = arith.constant 0 : i32
    %c0_i32_0 = arith.constant 0 : i32
    %c0_i32_1 = arith.constant 0 : i32
    return %c0_i32, %c0_i32_0 : i32, i32
  }
  func.func @transform_2(%arg0: i32) -> (i32, i32, i32) {
    %c0_i32 = arith.constant 0 : i32
    %c0_i32_0 = arith.constant 0 : i32
    %c0_i32_1 = arith.constant 0 : i32
    %c0_i32_2 = arith.constant 0 : i32
    return %c0_i32, %c0_i32_0, %c0_i32_1 : i32, i32, i32
  }
  func.func @transform_3(%arg0: i32) -> (i32, i32, i32) {
    %c0_i32 = arith.constant 0 : i32
    %c0_i32_0 = arith.constant 0 : i32
    %c0_i32_1 = arith.constant 0 : i32
    %c0_i32_2 = arith.constant 0 : i32
    return %c0_i32, %c0_i32_0, %c0_i32_1 : i32, i32, i32
  }
  func.func @transform_4(%arg0: i32) -> (i32, i32, i32) {
    %c0_i32 = arith.constant 0 : i32
    %c0_i32_0 = arith.constant 0 : i32
    %c0_i32_1 = arith.constant 0 : i32
    %c0_i32_2 = arith.constant 0 : i32
    return %c0_i32, %c0_i32_0, %c0_i32_1 : i32, i32, i32
  }
  func.func @transform_5(%arg0: i32) -> (i32, i32) {
    %c0_i32 = arith.constant 0 : i32
    %c0_i32_0 = arith.constant 0 : i32
    %c0_i32_1 = arith.constant 0 : i32
    return %c0_i32, %c0_i32_0 : i32, i32
  }
  func.func @transform_6(%arg0: i32) -> (i32, i32) {
    %c0_i32 = arith.constant 0 : i32
    %c0_i32_0 = arith.constant 0 : i32
    %c0_i32_1 = arith.constant 0 : i32
    return %c0_i32, %c0_i32_0 : i32, i32
  }
  func.func @transform_7(%arg0: i32) -> (i32, i32) {
    %c0_i32 = arith.constant 0 : i32
    %c0_i32_0 = arith.constant 0 : i32
    %c0_i32_1 = arith.constant 0 : i32
    return %c0_i32, %c0_i32_0 : i32, i32
  }
  func.func @transform_8(%arg0: i32) -> (i32, i32) {
    %c0_i32 = arith.constant 0 : i32
    %c0_i32_0 = arith.constant 0 : i32
    %c0_i32_1 = arith.constant 0 : i32
    return %c0_i32, %c0_i32_0 : i32, i32
  }
  func.func @transform_9(%arg0: i32) -> (i32, i32) {
    %c0_i32 = arith.constant 0 : i32
    %c0_i32_0 = arith.constant 0 : i32
    return %arg0, %c0_i32 : i32, i32
  }
}

</mosaic_0001>

<bundles_post_ra>
// kernel: tpu_custom_call.1
= control target key start
LH: loop header
LB: loop body
LE: loop exit
PB: predicated region body
PF: predicated region fallthrough
CT: control target
= control target key end

     0   :  { %vm72_vm0 = vcmask 1043456   ;;  %v13353_v2 = vmov 0.0|0.0   ;;  %vm9620_vm1 = vmmov 1   ;;  %vm9621_vm3 = vmmov 0   ;;  %s13341_s0 = inlined_call_operand.vmem [shape: f32[72,12], index: 0, kind: input, shape index: {}]   ;;  %s13342_s1 = inlined_call_operand.vmem [shape: f32[12,32], index: 1, kind: input, shape index: {}]   ;;  %s13343_s2 = inlined_call_operand.vmem [shape: f32[2,32,192], index: 2, kind: input, shape index: {}]   ;;  %s13344_s3 = inlined_call_operand.vmem [shape: f32[2,64,32], index: 3, kind: input, shape index: {}]   ;;  %s13345_s4 = inlined_call_operand.vmem [shape: f32[2,8,128], index: 4, kind: input, shape index: {}]   ;;  %s13346_s5 = inlined_call_operand.vmem [shape: f32[16,128], index: 5, kind: input, shape index: {}]   ;;  %s13347_s6 = inlined_call_operand.vmem [shape: f32[72,72], index: 6, kind: input, shape index: {}]   ;;  %s13348_s7 = inlined_call_operand.vmem [shape: f32[72,9], index: 7, kind: input, shape index: {}]   ;;  %s13349_s8 = inlined_call_operand.vmem [shape: f32[8,72], index: 8, kind: input, shape index: {}]   ;;  %s13350_s9 = inlined_call_operand.hbm [shape: f32[8,16], index: 9, kind: output, shape index: {}]  }
   0x1   :  { %v42_v0 = vld [vmem:[%s13342_s1] sm:$0xff]  ;;  %v43_v1 = vld [vmem:[%s13342_s1 + $0x8] sm:$0xf]  ;;  %8522 = vmatprep.subr.bf16.mxu0 %v13353_v2  ;;  %vm8524_vm2 = vmpackc.low %vm72_vm0, %vm9620_vm1  ;;  %8526 = vmatprep.subr.bf16.mxu1 %v13353_v2  ;;  %v13355_v4 = vmov 0.0   ;;  %vm44_vm4 = vcmask 97280  }
   0x2   :  { %v8523_v3 = vpack.c.bf16 %v43_v1, %v42_v0  ;;  %7406 = vmatprep.mubr.msk.f32.mxu0 %vm9621_vm3, %v13355_v4  ;;  %7441 = vmatprep.mubr.msk.f32.mxu1 %vm9621_vm3, %v13355_v4  ;;  %v33_v5 = vld [vmem:[%s13341_s0] sm:$0xff] }
   0x4   :  { %8525 = vmatpush3.bf16.msk.msra.mxu0 %vm8524_vm2, %v8523_v3 }
   0x5   :  { %8532 = vmatprep.subr.bf16.mxu0 %v13353_v2 }
   0x6   :  { %14 = vsyncpa [#allocation4], 0  ;;  %v34_v6 = vld [vmem:[%s13341_s0 + $0x8] sm:$0xff]  ;;  %v35_v7 = vld [vmem:[%s13341_s0 + $0x10] sm:$0xff]  ;;  %vm212_vm5 = vcmask 261120   ;;  %s9623_s17 = smov 96  }
   0x7   :  { %7407 = vmatmul.mubr.msk.f32.vlgmr.msra.gmra.mrb[0].mxu0 %vm44_vm4, %v33_v5  ;;  %v36_v8 = vld [vmem:[%s13341_s0 + $0x18] sm:$0xff]  ;;  %v37_v9 = vld [vmem:[%s13341_s0 + $0x20] sm:$0xff]  ;;  %v38_v10 = vld [vmem:[%s13341_s0 + $0x28] sm:$0xff]  ;;  %s9624_s18 = smov 88   ;;  %s9625_s19 = smov 80   ;;  %vm525_vm6 = vcmask 64512  }
   0x8   :  { %7409 = vmatprep.mubr.msk.f32.mxu0 %vm9621_vm3, %v13355_v4  ;;  %v39_v11 = vld [vmem:[%s13341_s0 + $0x30] sm:$0xff]  ;;  %v40_v12 = vld [vmem:[%s13341_s0 + $0x38] sm:$0xff]  ;;  %v41_v13 = vld [vmem:[%s13341_s0 + $0x40] sm:$0xff]  ;;  %s9626_s20 = smov 120   ;;  %s9627_s21 = smov 72   ;;  %vm690_vm8 = vcmask 588800  }
   0x9   :  { %s9628_s22 = smov 112   ;;  %s9629_s23 = smov 104   ;;  %vm10091_vm7 = vmpackc.low %vm525_vm6, %vm525_vm6  ;;  %vm1462_vm9 = vcmask 130112   ;;  %vm1971_vm10 = vcmask 195712   ;;  %vm2480_vm11 = vcmask 261312   ;;  %vm2967_vm12 = vcmask 523264  }
   0xa   :  { %s9630_s24 = smov 64   ;;  %s9631_s25 = smov 56   ;;  %vm6373_vm13 = vcmask 1040384   ;;  %vm6345_vm15 = vcmask 72704   ;;  %vm6610_vm0 = vcmask 130048  }
   0xb   :  { %7410 = vmatmul.mubr.msk.f32.gmra.mrb[2].mxu0 %vm44_vm4, %v34_v6  ;;  %s9632_s26 = smov 48   ;;  %s9633_s28 = smov 40   ;;  %vm8824_vm14 = vmpackc.low %vm6373_vm13, %vm9620_vm1  ;;  %vm6617_vm1 = vcmask 80968  }
   0xc   :  { %7412 = vmatprep.mubr.msk.f32.mxu0 %vm9621_vm3, %v13355_v4  ;;  %s9634_s11 = smov 32   ;;  %s9635_s12 = smov 8  }
   0xd   :  { %s9636_s1 = smov 16   ;;  %s13377_s13 = smov 24  }
   0xf   :  { %7413 = vmatmul.mubr.msk.f32.gmra.mrb[4].mxu0 %vm44_vm4, %v35_v7 }
  0x10   :  { %7415 = vmatprep.mubr.msk.f32.mxu0 %vm9621_vm3, %v13355_v4 }
  0x13   :  { %7416 = vmatmul.mubr.msk.f32.gmra.mrb[6].mxu0 %vm44_vm4, %v36_v8 }
  0x14   :  { %7418 = vmatprep.mubr.msk.f32.mxu0 %vm9621_vm3, %v13355_v4 }
  0x17   :  { %7419 = vmatmul.mubr.msk.f32.gmra.mrb[8].mxu0 %vm44_vm4, %v37_v9 }
  0x18   :  { %7421 = vmatprep.mubr.msk.f32.mxu0 %vm9621_vm3, %v13355_v4 }
  0x1b   :  { %7422 = vmatmul.mubr.msk.f32.gmra.mrb[10].mxu0 %vm44_vm4, %v38_v10 }
  0x1c   :  { %7424 = vmatprep.mubr.msk.f32.mxu0 %vm9621_vm3, %v13355_v4 }
  0x1f   :  { %7425 = vmatmul.mubr.msk.f32.gmra.mrb[12].mxu0 %vm44_vm4, %v39_v11 }
  0x20   :  { %7427 = vmatprep.mubr.msk.f32.mxu0 %vm9621_vm3, %v13355_v4 }
  0x23   :  { %7428 = vmatmul.mubr.msk.f32.gmra.mrb[14].mxu0 %vm44_vm4, %v40_v12 }
  0x24   :  { %7430 = vmatprep.mubr.msk.f32.mxu0 %vm9621_vm3, %v13355_v4 }
  0x27   :  { %7431 = vmatmul.mubr.msk.f32.gmra.mrb[16].mxu0 %vm44_vm4, %v41_v13 }
  0x28   :  { %7486 = vmatprep.mubr.msk.f32.mxu0 %vm9621_vm3, %v13355_v4 }
  0xda   :  { %v9757_v14 = vpop.f32.mrb[0].mxu0 }
  0xdb   :  { %13404 = vst [vmem:[#allocation6_spill] sm:$0xff] %v9757_v14  ;;  %v7408_v15 = vpop.f32.mrb[1].mxu0  ;;  %v213_v16 = vsel %vm212_vm5, %v9757_v14, 0.0 }
  0xdc   :  { %214 = vadd.xlane.f32.xlu0 %v213_v16 }
  0xde   :  { %v9761_v17 = vpop.f32.mrb[2].mxu0 }
  0xdf   :  { %13405 = vst [vmem:[#allocation7_spill] sm:$0xff] %v9761_v17  ;;  %v7411_v18 = vpop.f32.mrb[3].mxu0  ;;  %v216_v19 = vsel %vm212_vm5, %v9761_v17, 0.0 }
  0xe0   :  { %217 = vadd.xlane.f32.xlu0 %v216_v19 }
  0xe2   :  { %v9765_v20 = vpop.f32.mrb[4].mxu0 }
  0xe3   :  { %13406 = vst [vmem:[#allocation8_spill] sm:$0xff] %v9765_v20  ;;  %v7414_v21 = vpop.f32.mrb[5].mxu0  ;;  %v219_v22 = vsel %vm212_vm5, %v9765_v20, 0.0 }
  0xe4   :  { %220 = vadd.xlane.f32.xlu1 %v219_v22 }
  0xe6   :  { %v9769_v23 = vpop.f32.mrb[6].mxu0 }
  0xe7   :  { %13407 = vst [vmem:[#allocation9_spill] sm:$0xff] %v9769_v23  ;;  %v7417_v24 = vpop.f32.mrb[7].mxu0  ;;  %v222_v25 = vsel %vm212_vm5, %v9769_v23, 0.0 }
  0xe8   :  { %223 = vadd.xlane.f32.xlu1 %v222_v25  ;;  %v9843_v24 = vld [vmem:[%s13343_s2] sm:$0xff]  ;;  %v9848_v25 = vld [vmem:[%s13343_s2 + $0x10] sm:$0xff] }
  0xe9   :  { %13413 = vst [vmem:[#allocation15_spill] sm:$0xff] %v9843_v24  ;;  %13414 = vst [vmem:[#allocation16_spill] sm:$0xff] %v9848_v25 }
  0xea   :  { %v9773_v26 = vpop.f32.mrb[8].mxu0 }
  0xeb   :  { %13408 = vst [vmem:[#allocation10_spill] sm:$0xff] %v9773_v26  ;;  %v7420_v27 = vpop.f32.mrb[9].mxu0  ;;  %v225_v28 = vsel %vm212_vm5, %v9773_v26, 0.0 }
  0xec   :  { %226 = vadd.xlane.f32.xlu0 %v225_v28  ;;  %v8527_v27 = vpack.c.bf16 %v9848_v25, %v9843_v24 }
  0xee   :  { %v9777_v29 = vpop.f32.mrb[10].mxu0  ;;  %8528 = vmatpush3.bf16.msra.mxu1 %v8527_v27 }
  0xef   :  { %13409 = vst [vmem:[#allocation11_spill] sm:$0xff] %v9777_v29  ;;  %v7423_v30 = vpop.f32.mrb[11].mxu0  ;;  %v228_v31 = vsel %vm212_vm5, %v9777_v29, 0.0  ;;  %8529 = vmatprep.subr.bf16.mxu1 %v13353_v2 }
  0xf0   :  { %229 = vadd.xlane.f32.xlu1 %v228_v31 }
  0xf2   :  { %v9781_v32 = vpop.f32.mrb[12].mxu0 }
  0xf3   :  { %13410 = vst [vmem:[#allocation12_spill] sm:$0xff] %v9781_v32  ;;  %v7426_v33 = vpop.f32.mrb[13].mxu0  ;;  %v231_v34 = vsel %vm212_vm5, %v9781_v32, 0.0 }
  0xf4   :  { %232 = vadd.xlane.f32.xlu0 %v231_v34  ;;  %v9862_v33 = vld [vmem:[%s13343_s2 + $0x20] sm:$0xff]  ;;  %v9867_v34 = vld [vmem:[%s13343_s2 + $0x30] sm:$0xff] }
  0xf5   :  { %13415 = vst [vmem:[#allocation17_spill] sm:$0xff] %v9862_v33  ;;  %13416 = vst [vmem:[#allocation18_spill] sm:$0xff] %v9867_v34 }
  0xf6   :  { %v9785_v35 = vpop.f32.mrb[14].mxu0 }
  0xf7   :  { %13411 = vst [vmem:[#allocation13_spill] sm:$0xff] %v9785_v35  ;;  %v7429_v36 = vpop.f32.mrb[15].mxu0  ;;  %v234_v37 = vsel %vm212_vm5, %v9785_v35, 0.0 }
  0xf8   :  { %235 = vadd.xlane.f32.xlu1 %v234_v37  ;;  %v8530_v37 = vpack.c.bf16 %v9867_v34, %v9862_v33 }
  0xfa   :  { %v9789_v38 = vpop.f32.mrb[16].mxu0  ;;  %8531 = vmatpush3.bf16.msra.mxu1 %v8530_v37 }
  0xfb   :  { %13412 = vst [vmem:[#allocation14_spill] sm:$0xff] %v9789_v38  ;;  %v237_v39 = vsel %vm212_vm5, %v9789_v38, 0.0  ;;  %v7432_v40 = vpop.f32.mrb[17].mxu0  ;;  %8548 = vmatprep.subr.bf16.mxu1 %v13353_v2 }
  0xfc   :  { %238 = vadd.xlane.f32.xlu0 %v237_v39 }
 0x169   :  { %v215_v41 = vpop.xlane.xlu0 %214 }
 0x16a   :  { %v241_v42 = vmul.f32 0.03125, %v215_v41 }
 0x16c   :  { %v9794_v43 = vsub.f32 %v9757_v14, %v241_v42 }
 0x16d   :  { %v218_v44 = vpop.xlane.xlu0 %217 }
 0x16e   :  { %v242_v45 = vmul.f32 0.03125, %v218_v44  ;;  %v259_v46 = vmul.f32 %v9794_v43, %v9794_v43  ;;  %v331_v44 = vlaneseq }
 0x170   :  { %v9799_v47 = vsub.f32 %v9761_v17, %v242_v45  ;;  %v268_v48 = vsel %vm212_vm5, %v259_v46, 0.0 }
 0x171   :  { %v221_v49 = vpop.xlane.xlu1 %220  ;;  %269 = vadd.xlane.f32.xlu1 %v268_v48 }
 0x172   :  { %v243_v50 = vmul.f32 0.03125, %v221_v49  ;;  %v260_v51 = vmul.f32 %v9799_v47, %v9799_v47  ;;  %v9877_v49 = vshrl.u32 %v331_v44, 7 }
 0x174   :  { %v9805_v52 = vsub.f32 %v9765_v20, %v243_v50  ;;  %v271_v53 = vsel %vm212_vm5, %v260_v51, 0.0  ;;  %13417 = vst [vmem:[#allocation19_spill] sm:$0xff] %v9877_v49 }
 0x175   :  { %v224_v54 = vpop.xlane.xlu1 %223  ;;  %272 = vadd.xlane.f32.xlu0 %v271_v53 }
 0x176   :  { %v244_v55 = vmul.f32 0.03125, %v224_v54  ;;  %v261_v56 = vmul.f32 %v9805_v52, %v9805_v52  ;;  %v13352_v54 = vsub.s32 0, %v9877_v49 }
 0x178   :  { %v9811_v57 = vsub.f32 %v9769_v23, %v244_v55  ;;  %v274_v58 = vsel %vm212_vm5, %v261_v56, 0.0  ;;  %v9883_v56 = vld [vmem:[%s13345_s4] sm:$0xff] }
 0x179   :  { %v227_v59 = vpop.xlane.xlu0 %226  ;;  %275 = vadd.xlane.f32.xlu1 %v274_v58 }
 0x17a   :  { %v245_v60 = vmul.f32 0.03125, %v227_v59  ;;  %v262_v61 = vmul.f32 %v9811_v57, %v9811_v57  ;;  %v9886_v59 = vsub.s32 1, %v9877_v49 }
 0x17c   :  { %v9817_v62 = vsub.f32 %v9773_v26, %v245_v60  ;;  %v277_v63 = vsel %vm212_vm5, %v262_v61, 0.0  ;;  %13418 = vst [vmem:[#allocation20_spill] sm:$0xff] %v9886_v59  ;;  %v9891_v61 = vrot.slane %v9883_v56, %v13352_v54 }
 0x17d   :  { %v230_v0 = vpop.xlane.xlu1 %229  ;;  %278 = vadd.xlane.f32.xlu0 %v277_v63 }
 0x17e   :  { %v246_v1 = vmul.f32 0.03125, %v230_v0  ;;  %v263_v3 = vmul.f32 %v9817_v62, %v9817_v62 }
 0x180   :  { %v9823_v5 = vsub.f32 %v9777_v29, %v246_v1  ;;  %v280_v6 = vsel %vm212_vm5, %v263_v3, 0.0 }
 0x181   :  { %v233_v7 = vpop.xlane.xlu0 %232  ;;  %281 = vadd.xlane.f32.xlu1 %v280_v6  ;;  %v9896_v6 = vrot.slane %v9883_v56, %v9886_v59 }
 0x182   :  { %v247_v8 = vmul.f32 0.03125, %v233_v7  ;;  %v264_v9 = vmul.f32 %v9823_v5, %v9823_v5 }
 0x184   :  { %v9829_v10 = vsub.f32 %v9781_v32, %v247_v8  ;;  %v283_v11 = vsel %vm212_vm5, %v264_v9, 0.0 }
 0x185   :  { %v236_v12 = vpop.xlane.xlu1 %235  ;;  %284 = vadd.xlane.f32.xlu0 %v283_v11 }
 0x186   :  { %v248_v13 = vmul.f32 0.03125, %v236_v12  ;;  %v265_v15 = vmul.f32 %v9829_v10, %v9829_v10 }
 0x188   :  { %v9835_v16 = vsub.f32 %v9785_v35, %v248_v13  ;;  %v286_v18 = vsel %vm212_vm5, %v265_v15, 0.0 }
 0x189   :  { %287 = vadd.xlane.f32.xlu1 %v286_v18  ;;  %v239_v19 = vpop.xlane.xlu0 %238 }
 0x18a   :  { %v249_v21 = vmul.f32 0.03125, %v239_v19  ;;  %v266_v22 = vmul.f32 %v9835_v16, %v9835_v16 }
 0x18c   :  { %v9853_v28 = vsub.f32 %v9789_v38, %v249_v21  ;;  %v289_v30 = vsel %vm212_vm5, %v266_v22, 0.0 }
 0x18d   :  { %290 = vadd.xlane.f32.xlu0 %v289_v30 }
 0x18e   :  { %v267_v31 = vmul.f32 %v9853_v28, %v9853_v28 }
 0x190   :  { %v292_v39 = vsel %vm212_vm5, %v267_v31, 0.0 }
 0x191   :  { %293 = vadd.xlane.f32.xlu1 %v292_v39 }
 0x1fe   :  { %v270_v41 = vpop.xlane.xlu1 %269 }
 0x1ff   :  { %v295_v42 = vmul.f32 0.03125, %v270_v41 }
 0x201   :  { %v304_v45 = vadd.f32 1e-05, %v295_v42 }
 0x202   :  { %v273_v46 = vpop.xlane.xlu0 %272 }
 0x203   :  { %9200 = vrsqrt.f32 %v304_v45  ;;  %v296_v48 = vmul.f32 0.03125, %v273_v46 }
 0x205   :  { %v305_v50 = vadd.f32 1e-05, %v296_v48 }
 0x206   :  { %v276_v51 = vpop.xlane.xlu1 %275 }
 0x207   :  { %9202 = vrsqrt.f32 %v305_v50  ;;  %v297_v53 = vmul.f32 0.03125, %v276_v51 }
 0x209   :  { %v306_v55 = vadd.f32 1e-05, %v297_v53 }
 0x20a   :  { %v279_v58 = vpop.xlane.xlu0 %278 }
 0x20b   :  { %9204 = vrsqrt.f32 %v306_v55  ;;  %v298_v60 = vmul.f32 0.03125, %v279_v58 }
 0x20d   :  { %v9201_v63 = vpop.eup %9200  ;;  %v307_v0 = vadd.f32 1e-05, %v298_v60 }
 0x20e   :  { %v282_v1 = vpop.xlane.xlu1 %281  ;;  %v322_v3 = vmul.f32 %v9201_v63, %v9794_v43 }
 0x20f   :  { %9206 = vrsqrt.f32 %v307_v0  ;;  %v299_v7 = vmul.f32 0.03125, %v282_v1 }
 0x210   :  { %v335_v8 = vmul.f32 %v9891_v61, %v322_v3 }
 0x211   :  { %v9203_v9 = vpop.eup %9202  ;;  %v308_v11 = vadd.f32 1e-05, %v299_v7 }
 0x212   :  { %v285_v12 = vpop.xlane.xlu0 %284  ;;  %v348_v13 = vadd.f32 %v9896_v6, %v335_v8  ;;  %v323_v15 = vmul.f32 %v9203_v9, %v9799_v47 }
 0x213   :  { %9208 = vrsqrt.f32 %v308_v11  ;;  %v300_v18 = vmul.f32 0.03125, %v285_v12 }
 0x214   :  { %7442 = vmatmul.mubr.msk.f32.vlgmr.msra.gmra.mrb[0].mxu1 %vm212_vm5, %v348_v13  ;;  %v336_v43 = vmul.f32 %v9891_v61, %v323_v15 }
 0x215   :  { %v9205_v19 = vpop.eup %9204  ;;  %v309_v21 = vadd.f32 1e-05, %v300_v18  ;;  %7444 = vmatprep.mubr.msk.f32.mxu1 %vm9621_vm3, %v13355_v4 }
 0x216   :  { %v288_v22 = vpop.xlane.xlu1 %287  ;;  %v349_v27 = vadd.f32 %v9896_v6, %v336_v43  ;;  %v324_v30 = vmul.f32 %v9205_v19, %v9805_v52  ;;  %v13351_v43 = vsub.s32 7, %v9877_v49 }
 0x217   :  { %9210 = vrsqrt.f32 %v309_v21  ;;  %v301_v31 = vmul.f32 0.03125, %v288_v22 }
 0x218   :  { %7445 = vmatmul.mubr.msk.f32.gmra.mrb[2].mxu1 %vm212_vm5, %v349_v27  ;;  %v337_v47 = vmul.f32 %v9891_v61, %v324_v30 }
 0x219   :  { %v9207_v37 = vpop.eup %9206  ;;  %v310_v39 = vadd.f32 1e-05, %v301_v31  ;;  %7447 = vmatprep.mubr.msk.f32.mxu1 %vm9621_vm3, %v13355_v4 }
 0x21a   :  { %v291_v41 = vpop.xlane.xlu0 %290  ;;  %v350_v42 = vadd.f32 %v9896_v6, %v337_v47  ;;  %v325_v44 = vmul.f32 %v9207_v37, %v9811_v57 }
 0x21b   :  { %9212 = vrsqrt.f32 %v310_v39  ;;  %v302_v45 = vmul.f32 0.03125, %v291_v41 }
 0x21c   :  { %7448 = vmatmul.mubr.msk.f32.gmra.mrb[4].mxu1 %vm212_vm5, %v350_v42  ;;  %v338_v52 = vmul.f32 %v9891_v61, %v325_v44 }
 0x21d   :  { %v9209_v46 = vpop.eup %9208  ;;  %v311_v48 = vadd.f32 1e-05, %v302_v45  ;;  %7450 = vmatprep.mubr.msk.f32.mxu1 %vm9621_vm3, %v13355_v4 }
 0x21e   :  { %v294_v50 = vpop.xlane.xlu1 %293  ;;  %v351_v51 = vadd.f32 %v9896_v6, %v338_v52  ;;  %v326_v53 = vmul.f32 %v9209_v46, %v9817_v62 }
 0x21f   :  { %9214 = vrsqrt.f32 %v311_v48  ;;  %v303_v55 = vmul.f32 0.03125, %v294_v50 }
 0x220   :  { %7451 = vmatmul.mubr.msk.f32.gmra.mrb[6].mxu1 %vm212_vm5, %v351_v51  ;;  %v339_v57 = vmul.f32 %v9891_v61, %v326_v53 }
 0x221   :  { %v9211_v58 = vpop.eup %9210  ;;  %v312_v60 = vadd.f32 1e-05, %v303_v55  ;;  %7453 = vmatprep.mubr.msk.f32.mxu1 %vm9621_vm3, %v13355_v4 }
 0x222   :  { %v352_v63 = vadd.f32 %v9896_v6, %v339_v57  ;;  %v327_v0 = vmul.f32 %v9211_v58, %v9823_v5 }
 0x223   :  { %9216 = vrsqrt.f32 %v312_v60 }
 0x224   :  { %7454 = vmatmul.mubr.msk.f32.gmra.mrb[8].mxu1 %vm212_vm5, %v352_v63  ;;  %v340_v62 = vmul.f32 %v9891_v61, %v327_v0 }
 0x225   :  { %v9213_v1 = vpop.eup %9212  ;;  %7456 = vmatprep.mubr.msk.f32.mxu1 %vm9621_vm3, %v13355_v4 }
 0x226   :  { %v353_v3 = vadd.f32 %v9896_v6, %v340_v62  ;;  %v328_v7 = vmul.f32 %v9213_v1, %v9829_v10 }
 0x228   :  { %7457 = vmatmul.mubr.msk.f32.gmra.mrb[10].mxu1 %vm212_vm5, %v353_v3  ;;  %v341_v8 = vmul.f32 %v9891_v61, %v328_v7 }
 0x229   :  { %v9215_v9 = vpop.eup %9214  ;;  %7459 = vmatprep.mubr.msk.f32.mxu1 %vm9621_vm3, %v13355_v4 }
 0x22a   :  { %v354_v5 = vadd.f32 %v9896_v6, %v341_v8  ;;  %v329_v11 = vmul.f32 %v9215_v9, %v9835_v16 }
 0x22c   :  { %7460 = vmatmul.mubr.msk.f32.gmra.mrb[12].mxu1 %vm212_vm5, %v354_v5  ;;  %v342_v12 = vmul.f32 %v9891_v61, %v329_v11  ;;  %v13419_v5 = vmov 0 }
 0x22d   :  { %v9217_v13 = vpop.eup %9216  ;;  %7462 = vmatprep.mubr.msk.f32.mxu1 %vm9621_vm3, %v13355_v4  ;;  %v13420_v5 = vsel %vm10091_vm7, 4294967295, %v13419_v5 }
 0x22e   :  { %v355_v10 = vadd.f32 %v9896_v6, %v342_v12  ;;  %v330_v15 = vmul.f32 %v9217_v13, %v9853_v28  ;;  %v360_v28 = vrot.slane %v9883_v56, %v13351_v43  ;;  %13421 = vst [vmem:[#allocation21_spill] sm:$0xff] %v13420_v5 }
 0x230   :  { %7463 = vmatmul.mubr.msk.f32.gmra.mrb[14].mxu1 %vm212_vm5, %v355_v10  ;;  %v343_v18 = vmul.f32 %v9891_v61, %v330_v15 }
 0x231   :  { %7465 = vmatprep.mubr.msk.f32.mxu1 %vm9621_vm3, %v13355_v4 }
 0x232   :  { %v356_v16 = vadd.f32 %v9896_v6, %v343_v18 }
 0x234   :  { %7466 = vmatmul.mubr.msk.f32.gmra.mrb[16].mxu1 %vm212_vm5, %v356_v16 }
 0x235   :  { %7531 = vmatprep.mubr.msk.f32.mxu1 %vm9621_vm3, %v13355_v4 }
 0x2e7   :  { %v454_v19 = vpop.f32.mrb[0].mxu1 }
 0x2e8   :  { %v7443_v21 = vpop.f32.mrb[1].mxu1  ;;  %v9955_v61 = vadd.f32 %v454_v19, %v360_v28 }
 0x2eb   :  { %v459_v22 = vpop.f32.mrb[2].mxu1 }
 0x2ec   :  { %v9957_v27 = vadd.f32 %v459_v22, %v360_v28  ;;  %v7446_v30 = vpop.f32.mrb[3].mxu1 }
 0x2ee   :  { %v9961_v6 = vpack.i.bf16 %v9957_v27, %v9955_v61 }
 0x2ef   :  { %v464_v31 = vpop.f32.mrb[4].mxu1 }
 0x2f0   :  { %8861 = vrot.lane.b32.xlu0 %v9961_v6, %s9623_s17  ;;  %v7449_v47 = vpop.f32.mrb[5].mxu1  ;;  %v9965_v39 = vadd.f32 %v464_v31, %v360_v28 }
 0x2f3   :  { %v469_v37 = vpop.f32.mrb[6].mxu1 }
 0x2f4   :  { %v9967_v56 = vadd.f32 %v469_v37, %v360_v28  ;;  %v7452_v41 = vpop.f32.mrb[7].mxu1 }
 0x2f6   :  { %v9971_v42 = vpack.i.bf16 %v9967_v56, %v9965_v39 }
 0x2f7   :  { %v474_v44 = vpop.f32.mrb[8].mxu1 }
 0x2f8   :  { %8866 = vrot.lane.b32.xlu1 %v9971_v42, %s9623_s17  ;;  %v7455_v45 = vpop.f32.mrb[9].mxu1  ;;  %v9975_v46 = vadd.f32 %v474_v44, %v360_v28 }
 0x2fb   :  { %v479_v52 = vpop.f32.mrb[10].mxu1 }
 0x2fc   :  { %v9977_v48 = vadd.f32 %v479_v52, %v360_v28  ;;  %v7458_v50 = vpop.f32.mrb[11].mxu1 }
 0x2fe   :  { %v9981_v51 = vpack.i.bf16 %v9977_v48, %v9975_v46 }
 0x2ff   :  { %v484_v53 = vpop.f32.mrb[12].mxu1 }
 0x300   :  { %8871 = vrot.lane.b32.xlu1 %v9981_v51, %s9623_s17  ;;  %v7461_v55 = vpop.f32.mrb[13].mxu1  ;;  %v9985_v58 = vadd.f32 %v484_v53, %v360_v28 }
 0x303   :  { %v489_v57 = vpop.f32.mrb[14].mxu1 }
 0x304   :  { %v9987_v60 = vadd.f32 %v489_v57, %v360_v28  ;;  %v7464_v63 = vpop.f32.mrb[15].mxu1 }
 0x306   :  { %v9991_v0 = vpack.i.bf16 %v9987_v60, %v9985_v58 }
 0x307   :  { %v494_v62 = vpop.f32.mrb[16].mxu1 }
 0x308   :  { %v9993_v1 = vadd.f32 %v494_v62, %v360_v28  ;;  %8876 = vrot.lane.b32.xlu1 %v9991_v0, %s9623_s17  ;;  %v7467_v3 = vpop.f32.mrb[17].mxu1 }
 0x30a   :  { %523 = vrot.lane.b32.xlu0 %v9993_v1, %s9623_s17 }
 0x30c   :  { %8881 = vrot.lane.b32.xlu1 %v9961_v6, %s9624_s18 }
 0x30e   :  { %8886 = vrot.lane.b32.xlu0 %v9971_v42, %s9624_s18 }
 0x310   :  { %8891 = vrot.lane.b32.xlu1 %v9981_v51, %s9624_s18 }
 0x312   :  { %8896 = vrot.lane.b32.xlu0 %v9991_v0, %s9624_s18 }
 0x314   :  { %997 = vrot.lane.b32.xlu1 %v9993_v1, %s9624_s18 }
 0x316   :  { %8901 = vrot.lane.b32.xlu0 %v9961_v6, %s9625_s19 }
 0x318   :  { %963 = vrot.lane.b32.xlu1 %v9955_v61, %s9626_s20 }
 0x31a   :  { %965 = vrot.lane.b32.xlu0 %v9957_v27, %s9626_s20 }
 0x31c   :  { %8906 = vrot.lane.b32.xlu1 %v9971_v42, %s9625_s19 }
 0x31e   :  { %967 = vrot.lane.b32.xlu0 %v9965_v39, %s9626_s20 }
 0x320   :  { %969 = vrot.lane.b32.xlu1 %v9967_v56, %s9626_s20 }
 0x322   :  { %8911 = vrot.lane.b32.xlu0 %v9981_v51, %s9625_s19 }
 0x324   :  { %971 = vrot.lane.b32.xlu1 %v9975_v46, %s9626_s20 }
 0x326   :  { %973 = vrot.lane.b32.xlu0 %v9977_v48, %s9626_s20 }
 0x328   :  { %8916 = vrot.lane.b32.xlu1 %v9991_v0, %s9625_s19 }
 0x32a   :  { %975 = vrot.lane.b32.xlu0 %v9985_v58, %s9626_s20 }
 0x32c   :  { %977 = vrot.lane.b32.xlu1 %v9987_v60, %s9626_s20 }
 0x32e   :  { %979 = vrot.lane.b32.xlu0 %v9993_v1, %s9626_s20 }
 0x330   :  { %1506 = vrot.lane.b32.xlu1 %v9993_v1, %s9625_s19 }
 0x332   :  { %8921 = vrot.lane.b32.xlu0 %v9961_v6, %s9627_s21 }
 0x334   :  { %1472 = vrot.lane.b32.xlu1 %v9955_v61, %s9628_s22 }
 0x336   :  { %1474 = vrot.lane.b32.xlu0 %v9957_v27, %s9628_s22 }
 0x338   :  { %8926 = vrot.lane.b32.xlu1 %v9971_v42, %s9627_s21 }
 0x33a   :  { %1476 = vrot.lane.b32.xlu0 %v9965_v39, %s9628_s22 }
 0x33c   :  { %1478 = vrot.lane.b32.xlu1 %v9967_v56, %s9628_s22 }
 0x33e   :  { %8931 = vrot.lane.b32.xlu0 %v9981_v51, %s9627_s21 }
 0x340   :  { %1480 = vrot.lane.b32.xlu1 %v9975_v46, %s9628_s22 }
 0x342   :  { %1482 = vrot.lane.b32.xlu0 %v9977_v48, %s9628_s22 }
 0x344   :  { %8936 = vrot.lane.b32.xlu1 %v9991_v0, %s9627_s21 }
 0x346   :  { %1484 = vrot.lane.b32.xlu0 %v9985_v58, %s9628_s22 }
 0x348   :  { %1486 = vrot.lane.b32.xlu1 %v9987_v60, %s9628_s22 }
 0x34a   :  { %1488 = vrot.lane.b32.xlu0 %v9993_v1, %s9628_s22 }
 0x34c   :  { %2015 = vrot.lane.b32.xlu1 %v9993_v1, %s9627_s21 }
 0x34e   :  { %1981 = vrot.lane.b32.xlu0 %v9955_v61, %s9629_s23 }
 0x350   :  { %1983 = vrot.lane.b32.xlu1 %v9957_v27, %s9629_s23 }
 0x352   :  { %1985 = vrot.lane.b32.xlu0 %v9965_v39, %s9629_s23 }
 0x354   :  { %1987 = vrot.lane.b32.xlu1 %v9967_v56, %s9629_s23 }
 0x356   :  { %1989 = vrot.lane.b32.xlu0 %v9975_v46, %s9629_s23 }
 0x358   :  { %1991 = vrot.lane.b32.xlu1 %v9977_v48, %s9629_s23 }
 0x35a   :  { %1993 = vrot.lane.b32.xlu0 %v9985_v58, %s9629_s23 }
 0x35c   :  { %1995 = vrot.lane.b32.xlu1 %v9987_v60, %s9629_s23 }
 0x35e   :  { %1997 = vrot.lane.b32.xlu0 %v9993_v1, %s9629_s23 }
 0x360   :  { %8946 = vrot.lane.b32.xlu1 %v9971_v42, %s9630_s24 }
 0x362   :  { %8941 = vrot.lane.b32.xlu0 %v9961_v6, %s9630_s24  ;;  %v8862_v7 = vpop.permute.xlu0 %8861 }
 0x363   :  { %v8864_v8 = vunpack.i.h.bf16 %v8862_v7  ;;  %v8863_v9 = vunpack.i.l.bf16 %v8862_v7 }
 0x364   :  { %8956 = vrot.lane.b32.xlu1 %v9991_v0, %s9630_s24 }
 0x365   :  { %v8533_v11 = vpack.c.bf16 %v8864_v8, %v8863_v9 }
 0x366   :  { %8951 = vrot.lane.b32.xlu0 %v9981_v51, %s9630_s24 }
 0x367   :  { %8535 = vmatpush3.bf16.xpose.msk.msra.mxu0 %vm10091_vm7, %v8533_v11 }
 0x368   :  { %8961 = vrot.lane.b32.xlu1 %v9961_v6, %s9631_s25  ;;  %8536 = vmatprep.subr.bf16.mxu0 %v13353_v2 }
 0x36a   :  { %v8867_v12 = vpop.permute.xlu1 %8866  ;;  %8966 = vrot.lane.b32.xlu0 %v9971_v42, %s9631_s25 }
 0x36b   :  { %v8869_v13 = vunpack.i.h.bf16 %v8867_v12  ;;  %v8868_v10 = vunpack.i.l.bf16 %v8867_v12 }
 0x36c   :  { %8971 = vrot.lane.b32.xlu1 %v9981_v51, %s9631_s25 }
 0x36d   :  { %v8537_v15 = vpack.c.bf16 %v8869_v13, %v8868_v10 }
 0x36e   :  { %8986 = vrot.lane.b32.xlu0 %v9971_v42, %s9632_s26 }
 0x36f   :  { %8539 = vmatpush3.bf16.xpose.msk.msra.mxu0 %vm10091_vm7, %v8537_v15 }
 0x370   :  { %8976 = vrot.lane.b32.xlu1 %v9991_v0, %s9631_s25  ;;  %8540 = vmatprep.subr.bf16.mxu0 %v13353_v2 }
 0x372   :  { %v8872_v18 = vpop.permute.xlu1 %8871  ;;  %8991 = vrot.lane.b32.xlu0 %v9981_v51, %s9632_s26 }
 0x373   :  { %v8874_v16 = vunpack.i.h.bf16 %v8872_v18  ;;  %v8873_v19 = vunpack.i.l.bf16 %v8872_v18 }
 0x374   :  { %8981 = vrot.lane.b32.xlu1 %v9961_v6, %s9632_s26 }
 0x375   :  { %v8541_v28 = vpack.c.bf16 %v8874_v16, %v8873_v19 }
 0x376   :  { %806 = vrot.lane.b32.xlu0 %v9993_v1, %s9630_s24 }
 0x377   :  { %8543 = vmatpush3.bf16.xpose.msk.msra.mxu0 %vm10091_vm7, %v8541_v28 }
 0x378   :  { %8996 = vrot.lane.b32.xlu1 %v9991_v0, %s9632_s26  ;;  %8544 = vmatprep.subr.bf16.mxu0 %v13353_v2 }
 0x37a   :  { %v8877_v21 = vpop.permute.xlu1 %8876  ;;  %1278 = vrot.lane.b32.xlu0 %v9993_v1, %s9631_s25 }
 0x37b   :  { %v8879_v22 = vunpack.i.h.bf16 %v8877_v21  ;;  %v8878_v30 = vunpack.i.l.bf16 %v8877_v21 }
 0x37c   :  { %v524_v31 = vpop.permute.xlu0 %523 }
 0x37d   :  { %v8545_v47 = vpack.c.bf16 %v8879_v22, %v8878_v30 }
 0x37e   :  { %v8882_v37 = vpop.permute.xlu1 %8881  ;;  %1787 = vrot.lane.b32.xlu0 %v9993_v1, %s9632_s26 }
 0x37f   :  { %8547 = vmatpush3.bf16.xpose.msk.msra.mxu0 %vm10091_vm7, %v8545_v47  ;;  %v8884_v52 = vunpack.i.h.bf16 %v8882_v37  ;;  %v8883_v50 = vunpack.i.l.bf16 %v8882_v37 }
 0x380   :  { %v8887_v41 = vpop.permute.xlu0 %8886  ;;  %7484 = vmatprep.subr.mxu0 %v13355_v4 }
 0x381   :  { %v8561_v57 = vpack.c.bf16 %v8884_v52, %v8883_v50  ;;  %v8889_v3 = vunpack.i.h.bf16 %v8887_v41  ;;  %v8888_v7 = vunpack.i.l.bf16 %v8887_v41 }
 0x382   :  { %v8892_v44 = vpop.permute.xlu1 %8891 }
 0x383   :  { %v8565_v9 = vpack.c.bf16 %v8889_v3, %v8888_v7  ;;  %v8893_v13 = vunpack.i.l.bf16 %v8892_v44 }
 0x384   :  { %v8897_v45 = vpop.permute.xlu0 %8896 }
 0x385   :  { %v8898_v19 = vunpack.i.l.bf16 %v8897_v45 }
 0x386   :  { %v998_v53 = vpop.permute.xlu1 %997 }
 0x387   :  { %7485 = vmatpush3.xpose.msk.msra.mxu0 %vm525_vm6, %v524_v31 }
 0x388   :  { %v8902_v55 = vpop.permute.xlu0 %8901  ;;  %8560 = vmatprep.subr.bf16.mxu0 %v13353_v2 }
 0x389   :  { %v8903_v47 = vunpack.i.l.bf16 %v8902_v55 }
 0x38a   :  { %v964_v63 = vpop.permute.xlu1 %963  ;;  %7487 = vmatmul.mubr.msk.f32.vlgmr.msra.gmra.mrb[18].mxu0 %vm525_vm6, %v9955_v61 }
 0x38b   :  { %8563 = vmatpush3.bf16.xpose.msk.msra.mxu0 %vm10091_vm7, %v8561_v57  ;;  %7489 = vmatprep.mubr.msk.f32.mxu0 %vm9621_vm3, %v13355_v4 }
 0x38c   :  { %v10139_v62 = vpop.permute.xlu0 %965  ;;  %8564 = vmatprep.subr.bf16.mxu0 %v13353_v2 }
 0x38e   :  { %v10142_v8 = vpop.permute.xlu1 %8906  ;;  %7490 = vmatmul.mubr.msk.f32.gmra.mrb[20].mxu0 %vm525_vm6, %v9957_v27  ;;  %v8894_v27 = vunpack.i.h.bf16 %v8892_v44 }
 0x38f   :  { %7492 = vmatprep.mubr.msk.f32.mxu0 %vm9621_vm3, %v13355_v4  ;;  %v8909_v52 = vunpack.i.h.bf16 %v10142_v8  ;;  %v8908_v50 = vunpack.i.l.bf16 %v10142_v8 }
 0x390   :  { %v968_v61 = vpop.permute.xlu0 %967  ;;  %v8569_v15 = vpack.c.bf16 %v8894_v27, %v8893_v13 }
 0x391   :  { %v8593_v57 = vpack.c.bf16 %v8909_v52, %v8908_v50 }
 0x392   :  { %v10148_v11 = vpop.permute.xlu1 %969  ;;  %7493 = vmatmul.mubr.msk.f32.gmra.mrb[22].mxu0 %vm525_vm6, %v9965_v39 }
 0x393   :  { %8567 = vmatpush3.bf16.xpose.msk.msra.mxu0 %vm10091_vm7, %v8565_v9  ;;  %7495 = vmatprep.mubr.msk.f32.mxu0 %vm9621_vm3, %v13355_v4 }
 0x394   :  { %v10156_v12 = vpop.permute.xlu0 %8911  ;;  %8568 = vmatprep.subr.bf16.mxu0 %v13353_v2 }
 0x395   :  { %v8913_v7 = vunpack.i.l.bf16 %v10156_v12 }
 0x396   :  { %v10159_v10 = vpop.permute.xlu1 %971  ;;  %7496 = vmatmul.mubr.msk.f32.gmra.mrb[24].mxu0 %vm525_vm6, %v9967_v56  ;;  %v8899_v56 = vunpack.i.h.bf16 %v8897_v45 }
 0x397   :  { %7498 = vmatprep.mubr.msk.f32.mxu0 %vm9621_vm3, %v13355_v4 }
 0x398   :  { %v10165_v39 = vpop.permute.xlu0 %973  ;;  %v8573_v21 = vpack.c.bf16 %v8899_v56, %v8898_v19 }
 0x39a   :  { %v10167_v18 = vpop.permute.xlu1 %8916  ;;  %7499 = vmatmul.mubr.msk.f32.gmra.mrb[26].mxu0 %vm525_vm6, %v9975_v46 }
 0x39b   :  { %8571 = vmatpush3.bf16.xpose.msk.msra.mxu0 %vm10091_vm7, %v8569_v15  ;;  %7501 = vmatprep.mubr.msk.f32.mxu0 %vm9621_vm3, %v13355_v4  ;;  %v8918_v13 = vunpack.i.l.bf16 %v10167_v18 }
 0x39c   :  { %v10175_v16 = vpop.permute.xlu0 %975  ;;  %8572 = vmatprep.subr.bf16.mxu0 %v13353_v2 }
 0x39e   :  { %v10178_v28 = vpop.permute.xlu1 %977  ;;  %7502 = vmatmul.mubr.msk.f32.gmra.mrb[28].mxu0 %vm525_vm6, %v9977_v48 }
 0x39f   :  { %7504 = vmatprep.mubr.msk.f32.mxu0 %vm9621_vm3, %v13355_v4 }
 0x3a0   :  { %v10184_v46 = vpop.permute.xlu0 %979 }
 0x3a2   :  { %v10186_v22 = vpop.permute.xlu1 %1506  ;;  %7505 = vmatmul.mubr.msk.f32.gmra.mrb[30].mxu0 %vm525_vm6, %v9985_v58  ;;  %v8904_v58 = vunpack.i.h.bf16 %v8902_v55 }
 0x3a3   :  { %8575 = vmatpush3.bf16.xpose.msk.msra.mxu0 %vm10091_vm7, %v8573_v21  ;;  %7507 = vmatprep.mubr.msk.f32.mxu0 %vm9621_vm3, %v13355_v4 }
 0x3a4   :  { %v10194_v30 = vpop.permute.xlu0 %8921  ;;  %7574 = vmatprep.subr.mxu0 %v13355_v4 }
 0x3a6   :  { %v10197_v48 = vpop.permute.xlu1 %1472  ;;  %7508 = vmatmul.mubr.msk.f32.gmra.mrb[32].mxu0 %vm525_vm6, %v9987_v60  ;;  %v8589_v60 = vpack.c.bf16 %v8904_v58, %v8903_v47  ;;  %v8923_v58 = vunpack.i.l.bf16 %v10194_v30 }
 0x3a7   :  { %7510 = vmatprep.mubr.msk.f32.mxu0 %vm9621_vm3, %v13355_v4 }
 0x3a8   :  { %v10203_v31 = vpop.permute.xlu0 %1474 }
 0x3aa   :  { %v10205_v37 = vpop.permute.xlu1 %8926  ;;  %7511 = vmatmul.mubr.msk.f32.gmra.mrb[34].mxu0 %vm525_vm6, %v9993_v1 }
 0x3ab   :  { %7575 = vmatpush3.xpose.msk.msra.mxu0 %vm525_vm6, %v998_v53  ;;  %7576 = vmatprep.mubr.msk.f32.mxu0 %vm9621_vm3, %v13355_v4  ;;  %v8928_v52 = vunpack.i.l.bf16 %v10205_v37 }
 0x3ac   :  { %v10212_v41 = vpop.permute.xlu0 %1476  ;;  %8588 = vmatprep.subr.bf16.mxu0 %v13353_v2 }
 0x3ae   :  { %v10215_v44 = vpop.permute.xlu1 %1478  ;;  %7577 = vmatmul.mubr.msk.f32.vlgmr.msra.gmra.mrb[36].mxu0 %vm525_vm6, %v964_v63 }
 0x3af   :  { %8591 = vmatpush3.bf16.xpose.msk.msra.mxu0 %vm10091_vm7, %v8589_v60  ;;  %7579 = vmatprep.mubr.msk.f32.mxu0 %vm9621_vm3, %v13355_v4 }
 0x3b0   :  { %v10222_v45 = vpop.permute.xlu0 %8931  ;;  %8592 = vmatprep.subr.bf16.mxu0 %v13353_v2 }
 0x3b2   :  { %v10227_v53 = vpop.permute.xlu1 %1480  ;;  %7580 = vmatmul.mubr.msk.f32.gmra.mrb[38].mxu0 %vm525_vm6, %v10139_v62  ;;  %v8914_v62 = vunpack.i.h.bf16 %v10156_v12 }
 0x3b3   :  { %7582 = vmatprep.mubr.msk.f32.mxu0 %vm9621_vm3, %v13355_v4 }
 0x3b4   :  { %v10233_v55 = vpop.permute.xlu0 %1482  ;;  %v8597_v9 = vpack.c.bf16 %v8914_v62, %v8913_v7 }
 0x3b6   :  { %v10235_v63 = vpop.permute.xlu1 %8936  ;;  %7583 = vmatmul.mubr.msk.f32.gmra.mrb[40].mxu0 %vm525_vm6, %v968_v61 }
 0x3b7   :  { %8595 = vmatpush3.bf16.xpose.msk.msra.mxu0 %vm10091_vm7, %v8593_v57  ;;  %7585 = vmatprep.mubr.msk.f32.mxu0 %vm9621_vm3, %v13355_v4 }
 0x3b8   :  { %v10242_v3 = vpop.permute.xlu0 %1484  ;;  %8596 = vmatprep.subr.bf16.mxu0 %v13353_v2 }
 0x3ba   :  { %v10247_v8 = vpop.permute.xlu1 %1486  ;;  %7586 = vmatmul.mubr.msk.f32.gmra.mrb[42].mxu0 %vm525_vm6, %v10148_v11  ;;  %v8919_v11 = vunpack.i.h.bf16 %v10167_v18 }
 0x3bb   :  { %7588 = vmatprep.mubr.msk.f32.mxu0 %vm9621_vm3, %v13355_v4 }
 0x3bc   :  { %v10253_v61 = vpop.permute.xlu0 %1488  ;;  %v8601_v56 = vpack.c.bf16 %v8919_v11, %v8918_v13 }
 0x3be   :  { %v10255_v27 = vpop.permute.xlu1 %2015  ;;  %7589 = vmatmul.mubr.msk.f32.gmra.mrb[44].mxu0 %vm525_vm6, %v10159_v10 }
 0x3bf   :  { %8599 = vmatpush3.bf16.xpose.msk.msra.mxu0 %vm10091_vm7, %v8597_v9  ;;  %7591 = vmatprep.mubr.msk.f32.mxu0 %vm9621_vm3, %v13355_v4 }
 0x3c0   :  { %v10263_v12 = vpop.permute.xlu0 %1981  ;;  %8600 = vmatprep.subr.bf16.mxu0 %v13353_v2 }
 0x3c2   :  { %v10268_v15 = vpop.permute.xlu1 %1983  ;;  %7592 = vmatmul.mubr.msk.f32.gmra.mrb[46].mxu0 %vm525_vm6, %v10165_v39 }
 0x3c3   :  { %7594 = vmatprep.mubr.msk.f32.mxu0 %vm9621_vm3, %v13355_v4 }
 0x3c4   :  { %v10274_v10 = vpop.permute.xlu0 %1985 }
 0x3c6   :  { %v10276_v19 = vpop.permute.xlu1 %1987  ;;  %7595 = vmatmul.mubr.msk.f32.gmra.mrb[48].mxu0 %vm525_vm6, %v10175_v16  ;;  %v8924_v16 = vunpack.i.h.bf16 %v10194_v30 }
 0x3c7   :  { %8603 = vmatpush3.bf16.xpose.msk.msra.mxu0 %vm10091_vm7, %v8601_v56  ;;  %7597 = vmatprep.mubr.msk.f32.mxu0 %vm9621_vm3, %v13355_v4 }
 0x3c8   :  { %v10284_v18 = vpop.permute.xlu0 %1989  ;;  %7664 = vmatprep.subr.mxu0 %v13355_v4  ;;  %v8617_v60 = vpack.c.bf16 %v8924_v16, %v8923_v58  ;;  %v8934_v58 = vunpack.i.h.bf16 %v10222_v45 }
 0x3ca   :  { %v10287_v39 = vpop.permute.xlu1 %1991  ;;  %7598 = vmatmul.mubr.msk.f32.gmra.mrb[50].mxu0 %vm525_vm6, %v10178_v28 }
 0x3cb   :  { %7600 = vmatprep.mubr.msk.f32.mxu0 %vm9621_vm3, %v13355_v4 }
 0x3cc   :  { %v10293_v21 = vpop.permute.xlu0 %1993 }
 0x3ce   :  { %v10297_v47 = vpop.permute.xlu1 %1995  ;;  %7601 = vmatmul.mubr.msk.f32.gmra.mrb[52].mxu0 %vm525_vm6, %v10184_v46 }
 0x3cf   :  { %7665 = vmatpush3.xpose.msk.msra.mxu0 %vm525_vm6, %v10186_v22  ;;  %7666 = vmatprep.mubr.msk.f32.mxu0 %vm9621_vm3, %v13355_v4  ;;  %v8929_v22 = vunpack.i.h.bf16 %v10205_v37 }
 0x3d0   :  { %v10305_v28 = vpop.permute.xlu0 %1997  ;;  %8616 = vmatprep.subr.bf16.mxu0 %v13353_v2 }
 0x3d1   :  { %v8621_v11 = vpack.c.bf16 %v8929_v22, %v8928_v52 }
 0x3d2   :  { %7667 = vmatmul.mubr.msk.f32.vlgmr.msra.gmra.mrb[54].mxu0 %vm525_vm6, %v10197_v48  ;;  %v8947_v46 = vpop.permute.xlu1 %8946 }
 0x3d3   :  { %8619 = vmatpush3.bf16.xpose.msk.msra.mxu0 %vm10091_vm7, %v8617_v60  ;;  %7669 = vmatprep.mubr.msk.f32.mxu0 %vm9621_vm3, %v13355_v4  ;;  %v8949_v48 = vunpack.i.h.bf16 %v8947_v46  ;;  %v8948_v62 = vunpack.i.l.bf16 %v8947_v46 }
 0x3d4   :  { %v8942_v30 = vpop.permute.xlu0 %8941  ;;  %8620 = vmatprep.subr.bf16.mxu0 %v13353_v2 }
 0x3d5   :  { %v8944_v50 = vunpack.i.h.bf16 %v8942_v30  ;;  %v8943_v57 = vunpack.i.l.bf16 %v8942_v30  ;;  %v8552_v37 = vpack.c.bf16 %v8949_v48, %v8948_v62 }
 0x3d6   :  { %7670 = vmatmul.mubr.msk.f32.gmra.mrb[56].mxu0 %vm525_vm6, %v10203_v31  ;;  %v8957_v31 = vpop.permute.xlu1 %8956 }
 0x3d7   :  { %v8549_v7 = vpack.c.bf16 %v8944_v50, %v8943_v57  ;;  %7672 = vmatprep.mubr.msk.f32.mxu0 %vm9621_vm3, %v13355_v4  ;;  %v8959_v60 = vunpack.i.h.bf16 %v8957_v31  ;;  %v8958_v46 = vunpack.i.l.bf16 %v8957_v31  ;;  %v8939_v50 = vunpack.i.h.bf16 %v10235_v63 }
 0x3d8   :  { %v8952_v9 = vpop.permute.xlu0 %8951  ;;  %v8938_v57 = vunpack.i.l.bf16 %v10235_v63  ;;  %v10415_v63 = vld [vmem:[%s13347_s6] sm:$0xff] }
 0x3d9   :  { %8550 = vmatpush3.bf16.msra.mxu1 %v8549_v7  ;;  %v8954_v13 = vunpack.i.h.bf16 %v8952_v9  ;;  %v8953_v56 = vunpack.i.l.bf16 %v8952_v9 }
 0x3da   :  { %7673 = vmatmul.mubr.msk.f32.gmra.mrb[58].mxu0 %vm525_vm6, %v10212_v41  ;;  %8551 = vmatprep.subr.bf16.mxu1 %v13353_v2  ;;  %v8933_v41 = vunpack.i.l.bf16 %v10222_v45  ;;  %v8558_v45 = vpack.c.bf16 %v8959_v60, %v8958_v46  ;;  %v8629_v48 = vpack.c.bf16 %v8939_v50, %v8938_v57  ;;  %v10463_v50 = vld [vmem:[%s13347_s6 + $0x28] sm:$0xff] }
 0x3db   :  { %8623 = vmatpush3.bf16.xpose.msk.msra.mxu0 %vm10091_vm7, %v8621_v11  ;;  %7675 = vmatprep.mubr.msk.f32.mxu0 %vm9621_vm3, %v13355_v4  ;;  %v8555_v30 = vpack.c.bf16 %v8954_v13, %v8953_v56  ;;  %v10443_v11 = vld [vmem:[%s13347_s6 + $0x18] sm:$0xff] }
 0x3dc   :  { %v10328_v16 = vpop.permute.xlu0 %8966  ;;  %8624 = vmatprep.subr.bf16.mxu0 %v13353_v2  ;;  %v8625_v52 = vpack.c.bf16 %v8934_v58, %v8933_v41  ;;  %v10453_v41 = vld [vmem:[%s13347_s6 + $0x20] sm:$0xff] }
 0x3dd   :  { %8553 = vmatpush3.bf16.msra.mxu1 %v8552_v37 }
 0x3de   :  { %7676 = vmatmul.mubr.msk.f32.gmra.mrb[60].mxu0 %vm525_vm6, %v10215_v44  ;;  %8554 = vmatprep.subr.bf16.mxu1 %v13353_v2 }
 0x3df   :  { %7678 = vmatprep.mubr.msk.f32.mxu0 %vm9621_vm3, %v13355_v4 }
 0x3e0   :  { %v10338_v22 = vpop.permute.xlu0 %8986 }
 0x3e1   :  { %8556 = vmatpush3.bf16.msra.mxu1 %v8555_v30 }
 0x3e2   :  { %7679 = vmatmul.mubr.msk.f32.gmra.mrb[62].mxu0 %vm525_vm6, %v10227_v53  ;;  %8557 = vmatprep.subr.bf16.mxu1 %v13353_v2 }
 0x3e3   :  { %8627 = vmatpush3.bf16.xpose.msk.msra.mxu0 %vm10091_vm7, %v8625_v52  ;;  %7681 = vmatprep.mubr.msk.f32.mxu0 %vm9621_vm3, %v13355_v4 }
 0x3e4   :  { %v10347_v44 = vpop.permute.xlu0 %8991  ;;  %8628 = vmatprep.subr.bf16.mxu0 %v13353_v2 }
 0x3e5   :  { %8559 = vmatpush3.bf16.msra.mxu1 %v8558_v45 }
 0x3e6   :  { %7682 = vmatmul.mubr.msk.f32.gmra.mrb[64].mxu0 %vm525_vm6, %v10233_v55  ;;  %7529 = vmatprep.subr.mxu1 %v13355_v4 }
 0x3e7   :  { %7684 = vmatprep.mubr.msk.f32.mxu0 %vm9621_vm3, %v13355_v4 }
 0x3e8   :  { %v807_v53 = vpop.permute.xlu0 %806 }
 0x3e9   :  { %7530 = vmatpush3.msra.mxu1 %v807_v53 }
 0x3ea   :  { %7685 = vmatmul.mubr.msk.f32.gmra.mrb[66].mxu0 %vm525_vm6, %v10242_v3  ;;  %8576 = vmatprep.subr.bf16.mxu1 %v13353_v2 }
 0x3eb   :  { %8631 = vmatpush3.bf16.xpose.msk.msra.mxu0 %vm10091_vm7, %v8629_v48  ;;  %7687 = vmatprep.mubr.msk.f32.mxu0 %vm9621_vm3, %v13355_v4 }
 0x3ec   :  { %7754 = vmatprep.subr.mxu0 %v13355_v4 }
 0x3ee   :  { %7688 = vmatmul.mubr.msk.f32.gmra.mrb[68].mxu0 %vm525_vm6, %v10247_v8 }
 0x3ef   :  { %7690 = vmatprep.mubr.msk.f32.mxu0 %vm9621_vm3, %v13355_v4 }
 0x3f2   :  { %7691 = vmatmul.mubr.msk.f32.gmra.mrb[70].mxu0 %vm525_vm6, %v10253_v61 }
 0x3f3   :  { %7755 = vmatpush3.xpose.msk.msra.mxu0 %vm525_vm6, %v10255_v27  ;;  %7756 = vmatprep.mubr.msk.f32.mxu0 %vm9621_vm3, %v13355_v4 }
 0x3f4   :  { %8644 = vmatprep.subr.bf16.mxu0 %v13353_v2 }
 0x3f6   :  { %7757 = vmatmul.mubr.msk.f32.vlgmr.msra.gmra.mrb[72].mxu0 %vm525_vm6, %v10263_v12  ;;  %v10423_v12 = vld [vmem:[%s13347_s6 + $0x8] sm:$0xff] }
 0x3f7   :  { %7759 = vmatprep.mubr.msk.f32.mxu0 %vm9621_vm3, %v13355_v4 }
 0x3fa   :  { %7760 = vmatmul.mubr.msk.f32.gmra.mrb[74].mxu0 %vm525_vm6, %v10268_v15 }
 0x3fb   :  { %7762 = vmatprep.mubr.msk.f32.mxu0 %vm9621_vm3, %v13355_v4 }
 0x3fe   :  { %7763 = vmatmul.mubr.msk.f32.gmra.mrb[76].mxu0 %vm525_vm6, %v10274_v10 }
 0x3ff   :  { %7765 = vmatprep.mubr.msk.f32.mxu0 %vm9621_vm3, %v13355_v4 }
 0x402   :  { %7766 = vmatmul.mubr.msk.f32.gmra.mrb[78].mxu0 %vm525_vm6, %v10276_v19 }
 0x403   :  { %7768 = vmatprep.mubr.msk.f32.mxu0 %vm9621_vm3, %v13355_v4 }
 0x406   :  { %7769 = vmatmul.mubr.msk.f32.gmra.mrb[80].mxu0 %vm525_vm6, %v10284_v18 }
 0x407   :  { %7771 = vmatprep.mubr.msk.f32.mxu0 %vm9621_vm3, %v13355_v4 }
 0x40a   :  { %7772 = vmatmul.mubr.msk.f32.gmra.mrb[82].mxu0 %vm525_vm6, %v10287_v39 }
 0x40b   :  { %7774 = vmatprep.mubr.msk.f32.mxu0 %vm9621_vm3, %v13355_v4 }
 0x40e   :  { %7775 = vmatmul.mubr.msk.f32.gmra.mrb[84].mxu0 %vm525_vm6, %v10293_v21  ;;  %v10433_v21 = vld [vmem:[%s13347_s6 + $0x10] sm:$0xff] }
 0x40f   :  { %7777 = vmatprep.mubr.msk.f32.mxu0 %vm9621_vm3, %v13355_v4 }
 0x412   :  { %7778 = vmatmul.mubr.msk.f32.gmra.mrb[86].mxu0 %vm525_vm6, %v10297_v47 }
 0x413   :  { %7780 = vmatprep.mubr.msk.f32.mxu0 %vm9621_vm3, %v13355_v4 }
 0x416   :  { %7781 = vmatmul.mubr.msk.f32.gmra.mrb[88].mxu0 %vm525_vm6, %v10305_v28 }
 0x417   :  { %7836 = vmatprep.mubr.msk.f32.mxu0 %vm9621_vm3, %v13355_v4 }
 0x45d   :  { %v628_v55 = vpop.f32.mrb[18].mxu0 }
 0x45e   :  { %v672_v3 = vmul.f32 0.35355338, %v628_v55  ;;  %v7488_v8 = vpop.f32.mrb[19].mxu0 }
 0x45f   :  { %v10473_v8 = vld [vmem:[%s13347_s6 + $0x30] sm:$0xff] }
 0x460   :  { %v10418_v61 = vadd.f32 %v672_v3, %v10415_v63 }
 0x461   :  { %v633_v27 = vpop.f32.mrb[20].mxu0 }
 0x462   :  { %v673_v15 = vmul.f32 0.35355338, %v633_v27  ;;  %v7491_v10 = vpop.f32.mrb[21].mxu0  ;;  %v691_v19 = vsel %vm690_vm8, %v10418_v61, -inf }
 0x463   :  { %692 = vmax.xlane.f32.xlu1 %v691_v19 }
 0x464   :  { %v10428_v18 = vadd.f32 %v673_v15, %v10423_v12 }
 0x465   :  { %v638_v39 = vpop.f32.mrb[22].mxu0 }
 0x466   :  { %v674_v47 = vmul.f32 0.35355338, %v638_v39  ;;  %v7494_v28 = vpop.f32.mrb[23].mxu0  ;;  %v694_v62 = vsel %vm690_vm8, %v10428_v18, -inf }
 0x467   :  { %695 = vmax.xlane.f32.xlu0 %v694_v62 }
 0x468   :  { %v10438_v7 = vadd.f32 %v674_v47, %v10433_v21 }
 0x469   :  { %v643_v9 = vpop.f32.mrb[24].mxu0 }
 0x46a   :  { %v675_v37 = vmul.f32 0.35355338, %v643_v9  ;;  %v7497_v13 = vpop.f32.mrb[25].mxu0  ;;  %v697_v56 = vsel %vm690_vm8, %v10438_v7, -inf }
 0x46b   :  { %698 = vmax.xlane.f32.xlu0 %v697_v56 }
 0x46c   :  { %v10448_v31 = vadd.f32 %v675_v37, %v10443_v11 }
 0x46d   :  { %v648_v58 = vpop.f32.mrb[26].mxu0 }
 0x46e   :  { %v676_v60 = vmul.f32 0.35355338, %v648_v58  ;;  %v7500_v46 = vpop.f32.mrb[27].mxu0  ;;  %v700_v30 = vsel %vm690_vm8, %v10448_v31, -inf }
 0x46f   :  { %701 = vmax.xlane.f32.xlu0 %v700_v30 }
 0x470   :  { %v10458_v52 = vadd.f32 %v676_v60, %v10453_v41 }
 0x471   :  { %v653_v45 = vpop.f32.mrb[28].mxu0 }
 0x472   :  { %v677_v57 = vmul.f32 0.35355338, %v653_v45  ;;  %v7503_v53 = vpop.f32.mrb[29].mxu0  ;;  %v703_v48 = vsel %vm690_vm8, %v10458_v52, -inf }
 0x473   :  { %704 = vmax.xlane.f32.xlu1 %v703_v48 }
 0x474   :  { %v10468_v55 = vadd.f32 %v677_v57, %v10463_v50 }
 0x475   :  { %v658_v3 = vpop.f32.mrb[30].mxu0 }
 0x476   :  { %v678_v27 = vmul.f32 0.35355338, %v658_v3  ;;  %v7506_v15 = vpop.f32.mrb[31].mxu0  ;;  %v706_v10 = vsel %vm690_vm8, %v10468_v55, -inf }
 0x477   :  { %707 = vmax.xlane.f32.xlu0 %v706_v10 }
 0x478   :  { %v10478_v19 = vadd.f32 %v678_v27, %v10473_v8 }
 0x479   :  { %v663_v39 = vpop.f32.mrb[32].mxu0 }
 0x47a   :  { %v7509_v47 = vpop.f32.mrb[33].mxu0  ;;  %v709_v28 = vsel %vm690_vm8, %v10478_v19, -inf }
 0x47b   :  { %710 = vmax.xlane.f32.xlu1 %v709_v28 }
 0x47d   :  { %v668_v62 = vpop.f32.mrb[34].mxu0 }
 0x47e   :  { %v7512_v9 = vpop.f32.mrb[35].mxu0 }
 0x481   :  { %v1101_v37 = vpop.f32.mrb[36].mxu0 }
 0x482   :  { %v7578_v13 = vpop.f32.mrb[37].mxu0 }
 0x483   :  { %v679_v13 = vmul.f32 0.35355338, %v663_v39 }
 0x485   :  { %v1106_v56 = vpop.f32.mrb[38].mxu0 }
 0x486   :  { %v7581_v58 = vpop.f32.mrb[39].mxu0 }
 0x489   :  { %v1111_v60 = vpop.f32.mrb[40].mxu0 }
 0x48a   :  { %v7584_v46 = vpop.f32.mrb[41].mxu0  ;;  %v1147_v43 = vmul.f32 0.35355338, %v1111_v60 }
 0x48c   :  { %9001 = vrot.lane.b32.xlu1 %v9961_v6, %s9633_s28  ;;  %v10489_v6 = vld [vmem:[%s13347_s6 + $0x38] sm:$0xff] }
 0x48d   :  { %9006 = vrot.lane.b32.xlu0 %v9971_v42, %s9633_s28  ;;  %v1116_v30 = vpop.f32.mrb[42].mxu0  ;;  %v680_v42 = vmul.f32 0.35355338, %v668_v62 }
 0x48e   :  { %v7587_v45 = vpop.f32.mrb[43].mxu0 }
 0x48f   :  { %v1145_v45 = vmul.f32 0.35355338, %v1101_v37 }
 0x491   :  { %v1121_v57 = vpop.f32.mrb[44].mxu0  ;;  %v10505_v37 = vadd.f32 %v1145_v45, %v10415_v63 }
 0x492   :  { %v7590_v53 = vpop.f32.mrb[45].mxu0 }
 0x493   :  { %v10494_v53 = vld [vmem:[%s13347_s6 + $0x40] sm:$0xff]  ;;  %v1163_v60 = vsel %vm690_vm8, %v10505_v37, -inf }
 0x495   :  { %v1126_v48 = vpop.f32.mrb[46].mxu0 }
 0x496   :  { %v7593_v3 = vpop.f32.mrb[47].mxu0 }
 0x497   :  { %v10497_v3 = vadd.f32 %v679_v13, %v10489_v6 }
 0x499   :  { %v1131_v27 = vpop.f32.mrb[48].mxu0  ;;  %v712_v62 = vsel %vm690_vm8, %v10497_v3, -inf }
 0x49a   :  { %v7596_v15 = vpop.f32.mrb[49].mxu0  ;;  %v1151_v2 = vmul.f32 0.35355338, %v1131_v27 }
 0x49d   :  { %v1136_v10 = vpop.f32.mrb[50].mxu0 }
 0x49e   :  { %v7599_v47 = vpop.f32.mrb[51].mxu0 }
 0x49f   :  { %v1146_v47 = vmul.f32 0.35355338, %v1106_v56  ;;  %v1148_v56 = vmul.f32 0.35355338, %v1116_v30 }
 0x4a1   :  { %v1141_v28 = vpop.f32.mrb[52].mxu0  ;;  %v10510_v40 = vadd.f32 %v1146_v47, %v10423_v12  ;;  %v10522_v30 = vadd.f32 %v1148_v56, %v10443_v11 }
 0x4a2   :  { %v7602_v9 = vpop.f32.mrb[53].mxu0  ;;  %v1153_v27 = vmul.f32 0.35355338, %v1141_v28 }
 0x4a3   :  { %v10500_v9 = vadd.f32 %v680_v42, %v10494_v53  ;;  %v10515_v42 = vadd.f32 %v1147_v43, %v10433_v21  ;;  %v1172_v4 = vsel %vm690_vm8, %v10522_v30, -inf }
 0x4a5   :  { %v1610_v58 = vpop.f32.mrb[54].mxu0  ;;  %v715_v13 = vsel %vm690_vm8, %v10500_v9, -inf  ;;  %v1169_v47 = vsel %vm690_vm8, %v10515_v42, -inf }
 0x4a6   :  { %v7668_v46 = vpop.f32.mrb[55].mxu0  ;;  %v1654_v28 = vmul.f32 0.35355338, %v1610_v58 }
 0x4a8   :  { %v10550_v59 = vadd.f32 %v1654_v28, %v10415_v63 }
 0x4a9   :  { %v1615_v15 = vpop.f32.mrb[56].mxu0 }
 0x4aa   :  { %v7671_v39 = vpop.f32.mrb[57].mxu0 }
 0x4ab   :  { %v1149_v39 = vmul.f32 0.35355338, %v1121_v57 }
 0x4ac   :  { %713 = vmax.xlane.f32.xlu0 %v712_v62  ;;  %v1150_v62 = vmul.f32 0.35355338, %v1126_v48  ;;  %v10531_v48 = vadd.f32 %v1151_v2, %v10473_v8  ;;  %v10543_v2 = vadd.f32 %v1153_v27, %v10494_v53 }
 0x4ad   :  { %v1620_v46 = vpop.f32.mrb[58].mxu0  ;;  %v10525_v57 = vadd.f32 %v1149_v39, %v10453_v41 }
 0x4ae   :  { %v7674_v54 = vpop.f32.mrb[59].mxu0  ;;  %v1187_v58 = vsel %vm690_vm8, %v10543_v2, -inf }
 0x4af   :  { %v1166_v54 = vsel %vm690_vm8, %v10510_v40, -inf  ;;  %v1175_v56 = vsel %vm690_vm8, %v10525_v57, -inf }
 0x4b0   :  { %716 = vmax.xlane.f32.xlu1 %v715_v13  ;;  %1164 = vmax.xlane.f32.xlu0 %v1163_v60  ;;  %v1152_v13 = vmul.f32 0.35355338, %v1136_v10 }
 0x4b1   :  { %v1625_v45 = vpop.f32.mrb[60].mxu0 }
 0x4b2   :  { %v7677_v36 = vpop.f32.mrb[61].mxu0  ;;  %v1657_v27 = vmul.f32 0.35355338, %v1625_v45 }
 0x4b3   :  { %v10528_v36 = vadd.f32 %v1150_v62, %v10463_v50  ;;  %v10540_v62 = vadd.f32 %v1152_v13, %v10489_v6 }
 0x4b4   :  { %1167 = vmax.xlane.f32.xlu1 %v1166_v54  ;;  %1170 = vmax.xlane.f32.xlu0 %v1169_v47  ;;  %v1655_v47 = vmul.f32 0.35355338, %v1615_v15 }
 0x4b5   :  { %v1630_v43 = vpop.f32.mrb[62].mxu0  ;;  %v1178_v10 = vsel %vm690_vm8, %v10528_v36, -inf }
 0x4b6   :  { %v7680_v60 = vpop.f32.mrb[63].mxu0  ;;  %v10553_v13 = vadd.f32 %v1655_v47, %v10423_v12  ;;  %v1672_v47 = vsel %vm690_vm8, %v10550_v59, -inf }
 0x4b7   :  { %v1181_v60 = vsel %vm690_vm8, %v10531_v48, -inf }
 0x4b8   :  { %1173 = vmax.xlane.f32.xlu1 %v1172_v4  ;;  %1176 = vmax.xlane.f32.xlu0 %v1175_v56  ;;  %v1656_v56 = vmul.f32 0.35355338, %v1620_v46  ;;  %v1675_v45 = vsel %vm690_vm8, %v10553_v13, -inf }
 0x4b9   :  { %v1635_v39 = vpop.f32.mrb[64].mxu0 }
 0x4ba   :  { %v7683_v54 = vpop.f32.mrb[65].mxu0 }
 0x4bb   :  { %v1184_v54 = vsel %vm690_vm8, %v10540_v62, -inf }
 0x4bc   :  { %1179 = vmax.xlane.f32.xlu1 %v1178_v10  ;;  %1182 = vmax.xlane.f32.xlu0 %v1181_v60  ;;  %v10558_v10 = vadd.f32 %v1656_v56, %v10433_v21  ;;  %v10561_v60 = vadd.f32 %v1657_v27, %v10443_v11 }
 0x4bd   :  { %v1640_v4 = vpop.f32.mrb[66].mxu0 }
 0x4be   :  { %v7686_v5 = vpop.f32.mrb[67].mxu0  ;;  %v1660_v28 = vmul.f32 0.35355338, %v1640_v4  ;;  %v1681_v38 = vsel %vm690_vm8, %v10561_v60, -inf }
 0x4bf   :  { %v1658_v5 = vmul.f32 0.35355338, %v1630_v43  ;;  %v1678_v43 = vsel %vm690_vm8, %v10558_v10, -inf }
 0x4c0   :  { %1185 = vmax.xlane.f32.xlu1 %v1184_v54  ;;  %1188 = vmax.xlane.f32.xlu0 %v1187_v58  ;;  %v10573_v27 = vadd.f32 %v1660_v28, %v10473_v8 }
 0x4c1   :  { %v1645_v15 = vpop.f32.mrb[68].mxu0  ;;  %v10568_v58 = vadd.f32 %v1658_v5, %v10453_v41 }
 0x4c2   :  { %v7689_v46 = vpop.f32.mrb[69].mxu0  ;;  %v1661_v35 = vmul.f32 0.35355338, %v1645_v15  ;;  %v1690_v28 = vsel %vm690_vm8, %v10573_v27, -inf }
 0x4c3   :  { %v1659_v46 = vmul.f32 0.35355338, %v1635_v39  ;;  %v1684_v5 = vsel %vm690_vm8, %v10568_v58, -inf }
 0x4c4   :  { %1673 = vmax.xlane.f32.xlu1 %v1672_v47  ;;  %1676 = vmax.xlane.f32.xlu0 %v1675_v45 }
 0x4c5   :  { %v1650_v54 = vpop.f32.mrb[70].mxu0 }
 0x4c6   :  { %v7692_v56 = vpop.f32.mrb[71].mxu0  ;;  %v1662_v4 = vmul.f32 0.35355338, %v1650_v54 }
 0x4c7   :  { %v10580_v56 = vadd.f32 %v1659_v46, %v10463_v50 }
 0x4c8   :  { %1679 = vmax.xlane.f32.xlu1 %v1678_v43  ;;  %1682 = vmax.xlane.f32.xlu0 %v1681_v38  ;;  %v10583_v39 = vadd.f32 %v1662_v4, %v10494_v53  ;;  %v10588_v38 = vadd.f32 %v1661_v35, %v10489_v6 }
 0x4c9   :  { %v2119_v47 = vpop.f32.mrb[72].mxu0  ;;  %v1687_v32 = vsel %vm690_vm8, %v10580_v56, -inf }
 0x4ca   :  { %v7758_v45 = vpop.f32.mrb[73].mxu0  ;;  %v1696_v15 = vsel %vm690_vm8, %v10583_v39, -inf  ;;  %v1693_v35 = vsel %vm690_vm8, %v10588_v38, -inf }
 0x4cb   :  { %v2163_v45 = vmul.f32 0.35355338, %v2119_v47 }
 0x4cc   :  { %1685 = vmax.xlane.f32.xlu0 %v1684_v5  ;;  %1691 = vmax.xlane.f32.xlu1 %v1690_v28 }
 0x4cd   :  { %v2124_v54 = vpop.f32.mrb[74].mxu0  ;;  %v10595_v5 = vadd.f32 %v2163_v45, %v10415_v63 }
 0x4ce   :  { %v7761_v43 = vpop.f32.mrb[75].mxu0  ;;  %v2164_v28 = vmul.f32 0.35355338, %v2124_v54 }
 0x4cf   :  { %v10599_v43 = vpop.permute.xlu1 %8961  ;;  %v2181_v54 = vsel %vm690_vm8, %v10595_v5, -inf }
 0x4d0   :  { %1688 = vmax.xlane.f32.xlu0 %v1687_v32  ;;  %1697 = vmax.xlane.f32.xlu1 %v1696_v15 }
 0x4d1   :  { %v2129_v46 = vpop.f32.mrb[76].mxu0 }
 0x4d2   :  { %v2165_v4 = vmul.f32 0.35355338, %v2129_v46  ;;  %v7764_v29 = vpop.f32.mrb[77].mxu0 }
 0x4d3   :  { %v10607_v29 = vadd.f32 %v2164_v28, %v10423_v12  ;;  %v10611_v15 = vpop.permute.xlu1 %8971 }
 0x4d4   :  { %v10602_v47 = vadd.f32 %v2165_v4, %v10433_v21  ;;  %1694 = vmax.xlane.f32.xlu0 %v1693_v35 }
 0x4d5   :  { %v2134_v26 = vpop.f32.mrb[78].mxu0 }
 0x4d6   :  { %v7767_v23 = vpop.f32.mrb[79].mxu0  ;;  %v2187_v32 = vsel %vm690_vm8, %v10602_v47, -inf  ;;  %v2166_v63 = vmul.f32 0.35355338, %v2134_v26 }
 0x4d7   :  { %2188 = vmax.xlane.f32.xlu1 %v2187_v32  ;;  %v2184_v23 = vsel %vm690_vm8, %v10607_v29, -inf }
 0x4d8   :  { %2182 = vmax.xlane.f32.xlu0 %v2181_v54  ;;  %v10614_v4 = vadd.f32 %v2166_v63, %v10443_v11 }
 0x4d9   :  { %v2139_v45 = vpop.f32.mrb[80].mxu0 }
 0x4da   :  { %v2167_v21 = vmul.f32 0.35355338, %v2139_v45  ;;  %v7770_v46 = vpop.f32.mrb[81].mxu0  ;;  %v2190_v54 = vsel %vm690_vm8, %v10614_v4, -inf  ;;  %v10625_v45 = vpop.permute.xlu1 %8976 }
 0x4dc   :  { %v10619_v12 = vadd.f32 %v2167_v21, %v10453_v41  ;;  %2185 = vmax.xlane.f32.xlu0 %v2184_v23 }
 0x4dd   :  { %v2144_v26 = vpop.f32.mrb[82].mxu0 }
 0x4de   :  { %v2168_v28 = vmul.f32 0.35355338, %v2144_v26  ;;  %v7773_v35 = vpop.f32.mrb[83].mxu0  ;;  %v2193_v32 = vsel %vm690_vm8, %v10619_v12, -inf }
 0x4df   :  { %2194 = vmax.xlane.f32.xlu1 %v2193_v32  ;;  %v10635_v35 = vpop.permute.xlu1 %8981 }
 0x4e0   :  { %v10628_v11 = vadd.f32 %v2168_v28, %v10463_v50  ;;  %2191 = vmax.xlane.f32.xlu0 %v2190_v54 }
 0x4e1   :  { %v2149_v63 = vpop.f32.mrb[84].mxu0 }
 0x4e2   :  { %v2169_v41 = vmul.f32 0.35355338, %v2149_v63  ;;  %v7776_v21 = vpop.f32.mrb[85].mxu0  ;;  %v2196_v46 = vsel %vm690_vm8, %v10628_v11, -inf  ;;  %v10642_v63 = vpop.permute.xlu0 %1278 }
 0x4e3   :  { %2197 = vmax.xlane.f32.xlu1 %v2196_v46 }
 0x4e4   :  { %v10633_v23 = vadd.f32 %v2169_v41, %v10473_v8  ;;  %v10646_v41 = vpop.permute.xlu1 %8996 }
 0x4e5   :  { %v2154_v26 = vpop.f32.mrb[86].mxu0 }
 0x4e6   :  { %v2170_v32 = vmul.f32 0.35355338, %v2154_v26  ;;  %v7779_v20 = vpop.f32.mrb[87].mxu0  ;;  %v2199_v50 = vsel %vm690_vm8, %v10633_v23, -inf }
 0x4e7   :  { %2200 = vmax.xlane.f32.xlu0 %v2199_v50 }
 0x4e8   :  { %v10640_v28 = vadd.f32 %v2170_v32, %v10489_v6  ;;  %v10653_v6 = vpop.permute.xlu0 %1787 }
 0x4e9   :  { %v2159_v54 = vpop.f32.mrb[88].mxu0 }
 0x4ea   :  { %v2171_v21 = vmul.f32 0.35355338, %v2159_v54  ;;  %v7782_v46 = vpop.f32.mrb[89].mxu0  ;;  %v2202_v8 = vsel %vm690_vm8, %v10640_v28, -inf }
 0x4eb   :  { %2203 = vmax.xlane.f32.xlu1 %v2202_v8 }
 0x4ec   :  { %v10649_v20 = vadd.f32 %v2171_v21, %v10494_v53 }
 0x4ee   :  { %v2205_v26 = vsel %vm690_vm8, %v10649_v20, -inf }
 0x4ef   :  { %2206 = vmax.xlane.f32.xlu0 %v2205_v26 }
 0x4f0   :  { %v693_v32 = vpop.xlane.xlu1 %692 }
 0x4f1   :  { %v718_v50 = vsub.f32 %v10418_v61, %v693_v32 }
 0x4f3   :  { %v727_v54 = vmul.f32 1.442695, %v718_v50 }
 0x4f4   :  { %v696_v46 = vpop.xlane.xlu0 %695 }
 0x4f5   :  { %9218 = vpow2.f32 %v727_v54  ;;  %v719_v17 = vsub.f32 %v10428_v18, %v696_v46 }
 0x4f7   :  { %v729_v8 = vmul.f32 1.442695, %v719_v17 }
 0x4f8   :  { %v699_v14 = vpop.xlane.xlu0 %698 }
 0x4f9   :  { %9220 = vpow2.f32 %v729_v8  ;;  %v720_v53 = vsub.f32 %v10438_v7, %v699_v14 }
 0x4fb   :  { %v731_v21 = vmul.f32 1.442695, %v720_v53 }
 0x4fc   :  { %v702_v49 = vpop.xlane.xlu0 %701 }
 0x4fd   :  { %9222 = vpow2.f32 %v731_v21  ;;  %v721_v26 = vsub.f32 %v10448_v31, %v702_v49 }
 0x4ff   :  { %v10659_v33 = vpop.eup %9218  ;;  %v733_v34 = vmul.f32 1.442695, %v721_v26 }
 0x500   :  { %v705_v24 = vpop.xlane.xlu1 %704  ;;  %v745_v61 = vsel %vm690_vm8, %v10659_v33, 0.0 }
 0x501   :  { %9224 = vpow2.f32 %v733_v34  ;;  %v722_v18 = vsub.f32 %v10458_v52, %v705_v24  ;;  %746 = vadd.xlane.f32.xlu1 %v745_v61 }
 0x503   :  { %v10664_v17 = vpop.eup %9220  ;;  %v735_v32 = vmul.f32 1.442695, %v722_v18 }
 0x504   :  { %v708_v14 = vpop.xlane.xlu0 %707  ;;  %v748_v7 = vsel %vm690_vm8, %v10664_v17, 0.0 }
 0x505   :  { %9226 = vpow2.f32 %v735_v32  ;;  %v723_v49 = vsub.f32 %v10468_v55, %v708_v14  ;;  %749 = vadd.xlane.f32.xlu1 %v748_v7 }
 0x507   :  { %v10669_v31 = vpop.eup %9222  ;;  %v737_v50 = vmul.f32 1.442695, %v723_v49 }
 0x508   :  { %v711_v54 = vpop.xlane.xlu1 %710  ;;  %v751_v34 = vsel %vm690_vm8, %v10669_v31, 0.0  ;;  %v10690_v18 = vpop.permute.xlu0 %9006 }
 0x509   :  { %9228 = vpow2.f32 %v737_v50  ;;  %v724_v24 = vsub.f32 %v10478_v19, %v711_v54  ;;  %752 = vadd.xlane.f32.xlu1 %v751_v34  ;;  %13422 = vst [vmem:[#allocation22_spill] sm:$0xff] %v10690_v18 }
 0x50b   :  { %v10674_v52 = vpop.eup %9224  ;;  %v739_v46 = vmul.f32 1.442695, %v724_v24 }
 0x50c   :  { %v754_v8 = vsel %vm690_vm8, %v10674_v52, 0.0  ;;  %v10692_v32 = vpop.permute.xlu1 %9001 }
 0x50d   :  { %9230 = vpow2.f32 %v739_v46  ;;  %755 = vadd.xlane.f32.xlu1 %v754_v8 }
 0x50f   :  { %v10678_v55 = vpop.eup %9226 }
 0x510   :  { %v757_v53 = vsel %vm690_vm8, %v10678_v55, 0.0 }
 0x511   :  { %758 = vadd.xlane.f32.xlu1 %v757_v53 }
 0x513   :  { %v10682_v21 = vpop.eup %9228 }
 0x514   :  { %v760_v19 = vsel %vm690_vm8, %v10682_v21, 0.0 }
 0x515   :  { %761 = vadd.xlane.f32.xlu1 %v760_v19 }
 0x517   :  { %v10686_v26 = vpop.eup %9230 }
 0x518   :  { %v763_v61 = vsel %vm690_vm8, %v10686_v26, 0.0 }
 0x519   :  { %764 = vadd.xlane.f32.xlu1 %v763_v61 }
 0x539   :  { %v714_v14 = vpop.xlane.xlu0 %713 }
 0x53a   :  { %v725_v7 = vsub.f32 %v10497_v3, %v714_v14 }
 0x53c   :  { %v741_v49 = vmul.f32 1.442695, %v725_v7 }
 0x53d   :  { %v717_v50 = vpop.xlane.xlu1 %716  ;;  %v1165_v54 = vpop.xlane.xlu0 %1164 }
 0x53e   :  { %9232 = vpow2.f32 %v741_v49  ;;  %v726_v34 = vsub.f32 %v10500_v9, %v717_v50  ;;  %v1190_v24 = vsub.f32 %v10505_v37, %v1165_v54 }
 0x540   :  { %v743_v46 = vmul.f32 1.442695, %v726_v34  ;;  %v1199_v8 = vmul.f32 1.442695, %v1190_v24 }
 0x541   :  { %v1168_v53 = vpop.xlane.xlu1 %1167  ;;  %v1171_v19 = vpop.xlane.xlu0 %1170 }
 0x542   :  { %9234 = vpow2.f32 %v743_v46  ;;  %v1191_v61 = vsub.f32 %v10510_v40, %v1168_v53  ;;  %v1192_v25 = vsub.f32 %v10515_v42, %v1171_v19 }
 0x543   :  { %9236 = vpow2.f32 %v1199_v8 }
 0x544   :  { %v1201_v18 = vmul.f32 1.442695, %v1191_v61  ;;  %v1203_v9 = vmul.f32 1.442695, %v1192_v25 }
 0x545   :  { %v1174_v3 = vpop.xlane.xlu1 %1173  ;;  %v1177_v14 = vpop.xlane.xlu0 %1176 }
 0x546   :  { %v1193_v7 = vsub.f32 %v10522_v30, %v1174_v3  ;;  %v1194_v49 = vsub.f32 %v10525_v57, %v1177_v14  ;;  %9238 = vpow2.f32 %v1201_v18 }
 0x548   :  { %v10701_v50 = vpop.eup %9232  ;;  %v1205_v37 = vmul.f32 1.442695, %v1193_v7  ;;  %v1207_v54 = vmul.f32 1.442695, %v1194_v49 }
 0x549   :  { %v1180_v34 = vpop.xlane.xlu1 %1179  ;;  %v1183_v24 = vpop.xlane.xlu0 %1182  ;;  %v766_v40 = vsel %vm690_vm8, %v10701_v50, 0.0 }
 0x54a   :  { %9240 = vpow2.f32 %v1205_v37  ;;  %v1195_v42 = vsub.f32 %v10528_v36, %v1180_v34  ;;  %v1196_v46 = vsub.f32 %v10531_v48, %v1183_v24  ;;  %767 = vadd.xlane.f32.xlu1 %v766_v40 }
 0x54b   :  { %9242 = vpow2.f32 %v1203_v9 }
 0x54c   :  { %v10707_v30 = vpop.eup %9234  ;;  %9244 = vpow2.f32 %v1207_v54  ;;  %v1209_v25 = vmul.f32 1.442695, %v1195_v42  ;;  %v1211_v57 = vmul.f32 1.442695, %v1196_v46 }
 0x54d   :  { %v1186_v18 = vpop.xlane.xlu1 %1185  ;;  %v1189_v8 = vpop.xlane.xlu0 %1188  ;;  %v769_v53 = vsel %vm690_vm8, %v10707_v30, 0.0 }
 0x54e   :  { %v10711_v19 = vpop.eup %9236  ;;  %v1197_v61 = vsub.f32 %v10540_v62, %v1186_v18  ;;  %v1198_v36 = vsub.f32 %v10543_v2, %v1189_v8  ;;  %770 = vadd.xlane.f32.xlu1 %v769_v53  ;;  %9246 = vpow2.f32 %v1209_v25 }
 0x54f   :  { %9248 = vpow2.f32 %v1211_v57  ;;  %v1217_v49 = vsel %vm690_vm8, %v10711_v19, 0.0 }
 0x550   :  { %v1213_v48 = vmul.f32 1.442695, %v1197_v61  ;;  %v1215_v3 = vmul.f32 1.442695, %v1198_v36  ;;  %v10717_v9 = vpop.eup %9238 }
 0x551   :  { %v1674_v14 = vpop.xlane.xlu1 %1673  ;;  %v1677_v7 = vpop.xlane.xlu0 %1676  ;;  %v1220_v42 = vsel %vm690_vm8, %v10717_v9, 0.0 }
 0x552   :  { %v1699_v37 = vsub.f32 %v10550_v59, %v1674_v14  ;;  %1218 = vadd.xlane.f32.xlu1 %v1217_v49  ;;  %9250 = vpow2.f32 %v1213_v48  ;;  %v1700_v2 = vsub.f32 %v10553_v13, %v1677_v7 }
 0x553   :  { %9252 = vpow2.f32 %v1215_v3 }
 0x554   :  { %v10720_v54 = vpop.eup %9240  ;;  %v1708_v62 = vmul.f32 1.442695, %v1699_v37  ;;  %v1710_v25 = vmul.f32 1.442695, %v1700_v2 }
 0x555   :  { %v10723_v34 = vpop.eup %9242  ;;  %v1680_v24 = vpop.xlane.xlu1 %1679  ;;  %v1226_v46 = vsel %vm690_vm8, %v10720_v54, 0.0 }
 0x556   :  { %v10725_v40 = vpop.xlane.xlu0 %1682  ;;  %v10731_v59 = vpop.eup %9244  ;;  %1221 = vadd.xlane.f32.xlu1 %v1220_v42  ;;  %1227 = vadd.xlane.f32.xlu0 %v1226_v46  ;;  %9254 = vpow2.f32 %v1708_v62  ;;  %v1701_v57 = vsub.f32 %v10558_v10, %v1680_v24  ;;  %v1223_v8 = vsel %vm690_vm8, %v10723_v34, 0.0 }
 0x557   :  { %v1229_v53 = vsel %vm690_vm8, %v10731_v59, 0.0  ;;  %9256 = vpow2.f32 %v1710_v25 }
 0x558   :  { %v10734_v13 = vpop.eup %9246  ;;  %v1712_v36 = vmul.f32 1.442695, %v1701_v57 }
 0x559   :  { %v10740_v61 = vpop.eup %9248  ;;  %v1232_v7 = vsel %vm690_vm8, %v10734_v13, 0.0  ;;  %v10753_v37 = vpop.xlane.xlu1 %1691 }
 0x55a   :  { %v1686_v18 = vpop.xlane.xlu0 %1685  ;;  %1224 = vadd.xlane.f32.xlu1 %v1223_v8  ;;  %1230 = vadd.xlane.f32.xlu0 %v1229_v53  ;;  %v1235_v14 = vsel %vm690_vm8, %v10740_v61, 0.0  ;;  %9258 = vpow2.f32 %v1712_v36 }
 0x55b   :  { %v1703_v48 = vsub.f32 %v10568_v58, %v1686_v18 }
 0x55c   :  { %v10743_v3 = vpop.eup %9250 }
 0x55d   :  { %v10751_v49 = vpop.eup %9252  ;;  %v1716_v62 = vmul.f32 1.442695, %v1703_v48  ;;  %v1238_v24 = vsel %vm690_vm8, %v10743_v3, 0.0  ;;  %v1698_v57 = vpop.xlane.xlu1 %1697 }
 0x55e   :  { %v10745_v10 = vpop.xlane.xlu0 %1688  ;;  %1236 = vadd.xlane.f32.xlu1 %v1235_v14  ;;  %1233 = vadd.xlane.f32.xlu0 %v1232_v7  ;;  %v1241_v58 = vsel %vm690_vm8, %v10751_v49, 0.0 }
 0x55f   :  { %9260 = vpow2.f32 %v1716_v62 }
 0x560   :  { %v10759_v42 = vpop.eup %9254 }
 0x561   :  { %v1726_v8 = vsel %vm690_vm8, %v10759_v42, 0.0  ;;  %v10764_v53 = vpop.eup %9256 }
 0x562   :  { %v1695_v2 = vpop.xlane.xlu0 %1694  ;;  %1242 = vadd.xlane.f32.xlu1 %v1241_v58  ;;  %1239 = vadd.xlane.f32.xlu0 %v1238_v24 }
 0x563   :  { %v1706_v46 = vsub.f32 %v10588_v38, %v1695_v2  ;;  %v1729_v38 = vsel %vm690_vm8, %v10764_v53, 0.0 }
 0x564   :  { %v2189_v14 = vpop.xlane.xlu1 %2188  ;;  %v10769_v2 = vpop.eup %9258 }
 0x565   :  { %v1722_v25 = vmul.f32 1.442695, %v1706_v46  ;;  %v2210_v58 = vsub.f32 %v10602_v47, %v2189_v14 }
 0x566   :  { %v2183_v18 = vpop.xlane.xlu0 %2182  ;;  %1727 = vadd.xlane.f32.xlu1 %v1726_v8 }
 0x567   :  { %v2208_v36 = vsub.f32 %v10595_v5, %v2183_v18  ;;  %9262 = vpow2.f32 %v1722_v25  ;;  %v1732_v5 = vsel %vm690_vm8, %v10769_v2, 0.0  ;;  %v2221_v18 = vmul.f32 1.442695, %v2210_v58 }
 0x568   :  { %v1702_v58 = vsub.f32 %v10561_v60, %v10725_v40 }
 0x569   :  { %v2217_v48 = vmul.f32 1.442695, %v2208_v36  ;;  %v10775_v25 = vpop.eup %9260 }
 0x56a   :  { %v2186_v7 = vpop.xlane.xlu0 %2185  ;;  %1730 = vadd.xlane.f32.xlu1 %v1729_v38  ;;  %v1738_v36 = vsel %vm690_vm8, %v10775_v25, 0.0 }
 0x56b   :  { %v2209_v62 = vsub.f32 %v10607_v29, %v2186_v7  ;;  %9264 = vpow2.f32 %v2217_v48 }
 0x56c   :  { %v2195_v46 = vpop.xlane.xlu1 %2194 }
 0x56d   :  { %v2219_v24 = vmul.f32 1.442695, %v2209_v62  ;;  %v2212_v8 = vsub.f32 %v10619_v12, %v2195_v46 }
 0x56e   :  { %1733 = vadd.xlane.f32.xlu1 %v1732_v5  ;;  %v1704_v5 = vsub.f32 %v10580_v56, %v10745_v10 }
 0x56f   :  { %9266 = vpow2.f32 %v2219_v24  ;;  %v2225_v47 = vmul.f32 1.442695, %v2212_v8 }
 0x570   :  { %9268 = vpow2.f32 %v2221_v18  ;;  %v2198_v8 = vpop.xlane.xlu1 %2197  ;;  %v1718_v60 = vmul.f32 1.442695, %v1704_v5 }
 0x571   :  { %v10780_v29 = vpop.eup %9262  ;;  %9270 = vpow2.f32 %v2225_v47 }
 0x572   :  { %1739 = vadd.xlane.f32.xlu1 %v1738_v36  ;;  %v1747_v48 = vsel %vm690_vm8, %v10780_v29, 0.0  ;;  %v1705_v36 = vsub.f32 %v10573_v27, %v10753_v37  ;;  %v2213_v37 = vsub.f32 %v10628_v11, %v2198_v8 }
 0x574   :  { %v1720_v47 = vmul.f32 1.442695, %v1705_v36  ;;  %v8963_v36 = vunpack.i.l.bf16 %v10599_v43 }
 0x575   :  { %v10784_v14 = vpop.eup %9264 }
 0x576   :  { %1748 = vadd.xlane.f32.xlu1 %v1747_v48  ;;  %v2235_v12 = vsel %vm690_vm8, %v10784_v14, 0.0  ;;  %v1707_v48 = vsub.f32 %v10583_v39, %v1698_v57 }
 0x578   :  { %9011 = vrot.lane.b32.xlu0 %v9981_v51, %s9633_s28  ;;  %v1714_v51 = vmul.f32 1.442695, %v1702_v58  ;;  %v10808_v40 = vpop.xlane.xlu1 %2203  ;;  %v1724_v56 = vmul.f32 1.442695, %v1707_v48 }
 0x579   :  { %v10790_v7 = vpop.eup %9266 }
 0x57a   :  { %2236 = vadd.xlane.f32.xlu1 %v2235_v12  ;;  %v2238_v38 = vsel %vm690_vm8, %v10790_v7, 0.0  ;;  %v10794_v62 = vpop.eup %9268  ;;  %9272 = vpow2.f32 %v1714_v51  ;;  %v2192_v12 = vpop.xlane.xlu0 %2191 }
 0x57b   :  { %v2241_v24 = vsel %vm690_vm8, %v10794_v62, 0.0  ;;  %v10800_v46 = vpop.eup %9270  ;;  %9274 = vpow2.f32 %v1718_v60  ;;  %v2211_v10 = vsub.f32 %v10614_v4, %v2192_v12  ;;  %v2227_v60 = vmul.f32 1.442695, %v2213_v37 }
 0x57c   :  { %v2247_v18 = vsel %vm690_vm8, %v10800_v46, 0.0 }
 0x57d   :  { %v2223_v27 = vmul.f32 1.442695, %v2211_v10 }
 0x57e   :  { %2239 = vadd.xlane.f32.xlu1 %v2238_v38  ;;  %v2201_v51 = vpop.xlane.xlu0 %2200 }
 0x57f   :  { %v2214_v11 = vsub.f32 %v10633_v23, %v2201_v51 }
 0x581   :  { %v2229_v23 = vmul.f32 1.442695, %v2214_v11  ;;  %v8979_v11 = vunpack.i.h.bf16 %v10625_v45 }
 0x582   :  { %2242 = vadd.xlane.f32.xlu1 %v2241_v24 }
 0x584   :  { %v10812_v24 = vpop.eup %9272 }
 0x585   :  { %v1735_v39 = vsel %vm690_vm8, %v10812_v24, 0.0  ;;  %v10817_v57 = vpop.eup %9274 }
 0x586   :  { %2248 = vadd.xlane.f32.xlu1 %v2247_v18  ;;  %v8964_v18 = vunpack.i.h.bf16 %v10599_v43  ;;  %v1741_v48 = vsel %vm690_vm8, %v10817_v57, 0.0  ;;  %v8969_v43 = vunpack.i.h.bf16 %v10328_v16 }
 0x58e   :  { %v747_v38 = vpop.xlane.xlu1 %746 }
 0x58f   :  { %9276 = vrcp.f32 %v747_v38  ;;  %v8577_v38 = vpack.c.bf16 %v8964_v18, %v8963_v36 }
 0x590   :  { %9278 = vpow2.f32 %v1720_v47 }
 0x592   :  { %v750_v58 = vpop.xlane.xlu1 %749 }
 0x593   :  { %9280 = vrcp.f32 %v750_v58  ;;  %v13424_v58 = vmov 0.0|0.0  }
 0x594   :  { %9282 = vpow2.f32 %v1724_v56  ;;  %v8968_v56 = vunpack.i.l.bf16 %v10328_v16 }
 0x596   :  { %v753_v5 = vpop.xlane.xlu1 %752  ;;  %v8580_v51 = vpack.c.bf16 %v8969_v43, %v8968_v56 }
 0x597   :  { %9284 = vrcp.f32 %v753_v5  ;;  %9016 = vrot.lane.b32.xlu1 %v9991_v0, %s9633_s28  ;;  %1736 = vadd.xlane.f32.xlu0 %v1735_v39  ;;  %v8974_v5 = vunpack.i.h.bf16 %v10611_v15  ;;  %v8973_v39 = vunpack.i.l.bf16 %v10611_v15 }
 0x598   :  { %9286 = vpow2.f32 %v2223_v27 }
 0x599   :  { %v9277_v4 = vpop.eup %9276  ;;  %v8583_v15 = vpack.c.bf16 %v8974_v5, %v8973_v39  ;;  %v2207_v5 = vpop.xlane.xlu0 %2206 }
 0x59a   :  { %v781_v8 = vmul.f32 %v9277_v4, %v10659_v33  ;;  %v756_v47 = vpop.xlane.xlu1 %755  ;;  %v10827_v12 = vpop.eup %9278  ;;  %v13423_v33 = vmov 0.0   ;;  %v2216_v39 = vsub.f32 %v10649_v20, %v2207_v5 }
 0x59b   :  { %9288 = vrcp.f32 %v756_v47  ;;  %1742 = vadd.xlane.f32.xlu0 %v1741_v48  ;;  %v1744_v27 = vsel %vm690_vm8, %v10827_v12, 0.0  ;;  %v2215_v48 = vsub.f32 %v10640_v28, %v10808_v40  ;;  %6611 = vst.msk [vmem:[#allocation3] sm:$0xff] %vm6610_vm0, %v13423_v33 }
 0x59c   :  { %7532 = vmatmul.mubr.msk.f32.vlgmr.msra.gmra.mrb[18].mxu1 %vm690_vm8, %v781_v8  ;;  %9290 = vpow2.f32 %v2227_v60  ;;  %v8978_v8 = vunpack.i.l.bf16 %v10625_v45 }
 0x59d   :  { %v9281_v0 = vpop.eup %9280  ;;  %8578 = vmatpush3.bf16.msra.mxu1 %v8577_v38  ;;  %7534 = vmatprep.mubr.msk.f32.mxu1 %vm9621_vm3, %v13423_v33  ;;  %v2231_v40 = vmul.f32 1.442695, %v2215_v48 }
 0x59e   :  { %v759_v10 = vpop.xlane.xlu1 %758  ;;  %8579 = vmatprep.subr.bf16.mxu1 %v13424_v58  ;;  %v782_v37 = vmul.f32 %v9281_v0, %v10664_v17  ;;  %v10838_v16 = vpop.eup %9282  ;;  %v8586_v56 = vpack.c.bf16 %v8979_v11, %v8978_v8 }
 0x59f   :  { %9292 = vrcp.f32 %v759_v10  ;;  %1745 = vadd.xlane.f32.xlu0 %v1744_v27  ;;  %v1750_v17 = vsel %vm690_vm8, %v10838_v16, 0.0 }
 0x5a0   :  { %7535 = vmatmul.mubr.msk.f32.gmra.mrb[20].mxu1 %vm690_vm8, %v782_v37  ;;  %9294 = vpow2.f32 %v2229_v23 }
 0x5a1   :  { %v9285_v18 = vpop.eup %9284  ;;  %8581 = vmatpush3.bf16.msra.mxu1 %v8580_v51  ;;  %7537 = vmatprep.mubr.msk.f32.mxu1 %vm9621_vm3, %v13423_v33 }
 0x5a2   :  { %v762_v36 = vpop.xlane.xlu1 %761  ;;  %8582 = vmatprep.subr.bf16.mxu1 %v13424_v58  ;;  %v783_v4 = vmul.f32 %v9285_v18, %v10669_v31  ;;  %v10849_v60 = vpop.eup %9286  ;;  %v2233_v18 = vmul.f32 1.442695, %v2216_v39 }
 0x5a3   :  { %9296 = vrcp.f32 %v762_v36  ;;  %1751 = vadd.xlane.f32.xlu0 %v1750_v17  ;;  %v2244_v38 = vsel %vm690_vm8, %v10849_v60, 0.0 }
 0x5a4   :  { %7538 = vmatmul.mubr.msk.f32.gmra.mrb[22].mxu1 %vm690_vm8, %v783_v4 }
 0x5a5   :  { %v9289_v47 = vpop.eup %9288  ;;  %8584 = vmatpush3.bf16.msra.mxu1 %v8583_v15  ;;  %7540 = vmatprep.mubr.msk.f32.mxu1 %vm9621_vm3, %v13423_v33 }
 0x5a6   :  { %v765_v31 = vpop.xlane.xlu1 %764  ;;  %8585 = vmatprep.subr.bf16.mxu1 %v13424_v58  ;;  %v784_v45 = vmul.f32 %v9289_v47, %v10674_v52  ;;  %v10862_v43 = vpop.eup %9290 }
 0x5a7   :  { %9298 = vrcp.f32 %v765_v31  ;;  %2245 = vadd.xlane.f32.xlu0 %v2244_v38  ;;  %v2250_v0 = vsel %vm690_vm8, %v10862_v43, 0.0  ;;  %v8984_v38 = vunpack.i.h.bf16 %v10635_v35 }
 0x5a8   :  { %7541 = vmatmul.mubr.msk.f32.gmra.mrb[24].mxu1 %vm690_vm8, %v784_v45  ;;  %9300 = vpow2.f32 %v2231_v40  ;;  %v8983_v45 = vunpack.i.l.bf16 %v10635_v35 }
 0x5a9   :  { %v9293_v28 = vpop.eup %9292  ;;  %8587 = vmatpush3.bf16.msra.mxu1 %v8586_v56  ;;  %7543 = vmatprep.mubr.msk.f32.mxu1 %vm9621_vm3, %v13423_v33  ;;  %9302 = vpow2.f32 %v2233_v18  ;;  %v8999_v18 = vunpack.i.h.bf16 %v10646_v41 }
 0x5aa   :  { %7619 = vmatprep.subr.mxu1 %v13423_v33  ;;  %v785_v52 = vmul.f32 %v9293_v28, %v10678_v55  ;;  %v10871_v23 = vpop.eup %9294 }
 0x5ab   :  { %2251 = vadd.xlane.f32.xlu0 %v2250_v0  ;;  %v2253_v27 = vsel %vm690_vm8, %v10871_v23, 0.0  ;;  %v8989_v0 = vunpack.i.h.bf16 %v10338_v22 }
 0x5ac   :  { %7544 = vmatmul.mubr.msk.f32.gmra.mrb[26].mxu1 %vm690_vm8, %v785_v52  ;;  %v8605_v52 = vpack.c.bf16 %v8984_v38, %v8983_v45 }
 0x5ad   :  { %v9297_v10 = vpop.eup %9296  ;;  %7620 = vmatpush3.msra.mxu1 %v10642_v63  ;;  %7546 = vmatprep.mubr.msk.f32.mxu1 %vm9621_vm3, %v13423_v33 }
 0x5ae   :  { %v786_v37 = vmul.f32 %v9297_v10, %v10682_v21  ;;  %8604 = vmatprep.subr.bf16.mxu1 %v13424_v58 }
 0x5af   :  { %2254 = vadd.xlane.f32.xlu0 %v2253_v27 }
 0x5b0   :  { %7547 = vmatmul.mubr.msk.f32.gmra.mrb[28].mxu1 %vm690_vm8, %v786_v37 }
 0x5b1   :  { %v9299_v55 = vpop.eup %9298  ;;  %7549 = vmatprep.mubr.msk.f32.mxu1 %vm9621_vm3, %v13423_v33 }
 0x5b2   :  { %v787_v51 = vmul.f32 %v9299_v55, %v10686_v26  ;;  %v10888_v63 = vpop.eup %9300  ;;  %v8994_v55 = vunpack.i.h.bf16 %v10347_v44 }
 0x5b3   :  { %v2256_v21 = vsel %vm690_vm8, %v10888_v63, 0.0  ;;  %v10895_v4 = vpop.eup %9302 }
 0x5b4   :  { %7550 = vmatmul.mubr.msk.f32.gmra.mrb[30].mxu1 %vm690_vm8, %v787_v51  ;;  %v2259_v47 = vsel %vm690_vm8, %v10895_v4, 0.0 }
 0x5b5   :  { %7552 = vmatprep.mubr.msk.f32.mxu1 %vm9621_vm3, %v13423_v33 }
 0x5bb   :  { %2257 = vadd.xlane.f32.xlu1 %v2256_v21 }
 0x5c5   :  { %2296 = vrot.lane.b32.xlu0 %v9993_v1, %s9633_s28 }
 0x5d7   :  { %v768_v26 = vpop.xlane.xlu1 %767 }
 0x5d8   :  { %9304 = vrcp.f32 %v768_v26  ;;  %v8998_v26 = vunpack.i.l.bf16 %v10646_v41 }
 0x5db   :  { %v771_v36 = vpop.xlane.xlu1 %770 }
 0x5dc   :  { %9306 = vrcp.f32 %v771_v36 }
 0x5df   :  { %v1219_v17 = vpop.xlane.xlu1 %1218 }
 0x5e0   :  { %9308 = vrcp.f32 %v1219_v17 }
 0x5e2   :  { %v9305_v15 = vpop.eup %9304 }
 0x5e3   :  { %v1222_v11 = vpop.xlane.xlu1 %1221  ;;  %v1228_v8 = vpop.xlane.xlu0 %1227  ;;  %v788_v1 = vmul.f32 %v9305_v15, %v10701_v50  ;;  %v8614_v15 = vpack.c.bf16 %v8999_v18, %v8998_v26 }
 0x5e4   :  { %9310 = vrcp.f32 %v1222_v11  ;;  %2260 = vadd.xlane.f32.xlu0 %v2259_v47 }
 0x5e5   :  { %7553 = vmatmul.mubr.msk.f32.gmra.mrb[32].mxu1 %vm690_vm8, %v788_v1 }
 0x5e6   :  { %v9307_v20 = vpop.eup %9306  ;;  %7555 = vmatprep.mubr.msk.f32.mxu1 %vm9621_vm3, %v13423_v33 }
 0x5e7   :  { %v1225_v48 = vpop.xlane.xlu1 %1224  ;;  %v789_v31 = vmul.f32 %v9307_v20, %v10707_v30  ;;  %v1231_v56 = vpop.xlane.xlu0 %1230  ;;  %v8988_v30 = vunpack.i.l.bf16 %v10338_v22  ;;  %v8993_v22 = vunpack.i.l.bf16 %v10347_v44 }
 0x5e8   :  { %9312 = vrcp.f32 %v1225_v48 }
 0x5e9   :  { %7556 = vmatmul.mubr.msk.f32.gmra.mrb[34].mxu1 %vm690_vm8, %v789_v31  ;;  %9314 = vrcp.f32 %v1228_v8  ;;  %v8608_v37 = vpack.c.bf16 %v8989_v0, %v8988_v30  ;;  %v13425_v0 = vld [vmem:[#allocation22_spill] sm:$0xff] }
 0x5ea   :  { %v9309_v50 = vpop.eup %9308  ;;  %7621 = vmatprep.mubr.msk.f32.mxu1 %vm9621_vm3, %v13423_v33  ;;  %9316 = vrcp.f32 %v1231_v56  ;;  %v9004_v56 = vunpack.i.h.bf16 %v10692_v32  ;;  %v9009_v30 = vunpack.i.h.bf16 %v13425_v0 }
 0x5eb   :  { %v1253_v28 = vmul.f32 %v9309_v50, %v10711_v19  ;;  %v1237_v40 = vpop.xlane.xlu1 %1236  ;;  %v1234_v10 = vpop.xlane.xlu0 %1233  ;;  %v9003_v50 = vunpack.i.l.bf16 %v10692_v32 }
 0x5ec   :  { %9318 = vrcp.f32 %v1234_v10 }
 0x5ed   :  { %7622 = vmatmul.mubr.msk.f32.vlgmr.msra.gmra.mrb[36].mxu1 %vm690_vm8, %v1253_v28  ;;  %9320 = vrcp.f32 %v1237_v40 }
 0x5ee   :  { %v9311_v35 = vpop.eup %9310  ;;  %8606 = vmatpush3.bf16.msra.mxu1 %v8605_v52  ;;  %7624 = vmatprep.mubr.msk.f32.mxu1 %vm9621_vm3, %v13423_v33  ;;  %v9008_v52 = vunpack.i.l.bf16 %v13425_v0 }
 0x5ef   :  { %v1243_v27 = vpop.xlane.xlu1 %1242  ;;  %8607 = vmatprep.subr.bf16.mxu1 %v13424_v58  ;;  %v1254_v19 = vmul.f32 %v9311_v35, %v10717_v9  ;;  %v8611_v9 = vpack.c.bf16 %v8994_v55, %v8993_v22  ;;  %v1240_v44 = vpop.xlane.xlu0 %1239 }
 0x5f0   :  { %9322 = vrcp.f32 %v1240_v44 }
 0x5f1   :  { %7625 = vmatmul.mubr.msk.f32.gmra.mrb[38].mxu1 %vm690_vm8, %v1254_v19  ;;  %9324 = vrcp.f32 %v1243_v27  ;;  %v8636_v27 = vpack.c.bf16 %v9009_v30, %v9008_v52 }
 0x5f2   :  { %v9313_v51 = vpop.eup %9312  ;;  %8609 = vmatpush3.bf16.msra.mxu1 %v8608_v37  ;;  %7627 = vmatprep.mubr.msk.f32.mxu1 %vm9621_vm3, %v13423_v33 }
 0x5f3   :  { %v1728_v21 = vpop.xlane.xlu1 %1727  ;;  %8610 = vmatprep.subr.bf16.mxu1 %v13424_v58  ;;  %v1255_v5 = vmul.f32 %v9313_v51, %v10723_v34  ;;  %v9315_v39 = vpop.eup %9314 }
 0x5f4   :  { %v1256_v17 = vmul.f32 %v9315_v39, %v10720_v54  ;;  %v9317_v34 = vpop.eup %9316  ;;  %9326 = vrcp.f32 %v1728_v21  ;;  %v9012_v35 = vpop.permute.xlu0 %9011 }
 0x5f5   :  { %7628 = vmatmul.mubr.msk.f32.gmra.mrb[40].mxu1 %vm690_vm8, %v1255_v5  ;;  %v1257_v11 = vmul.f32 %v9317_v34, %v10731_v59  ;;  %v9014_v19 = vunpack.i.h.bf16 %v9012_v35  ;;  %v9013_v37 = vunpack.i.l.bf16 %v9012_v35 }
 0x5f6   :  { %8612 = vmatpush3.bf16.msra.mxu1 %v8611_v9  ;;  %7630 = vmatprep.mubr.msk.f32.mxu1 %vm9621_vm3, %v13423_v33  ;;  %v9319_v8 = vpop.eup %9318 }
 0x5f7   :  { %v1731_v36 = vpop.xlane.xlu1 %1730  ;;  %8613 = vmatprep.subr.bf16.mxu1 %v13424_v58  ;;  %v1258_v47 = vmul.f32 %v9319_v8, %v10734_v13  ;;  %v9321_v1 = vpop.eup %9320  ;;  %v8639_v51 = vpack.c.bf16 %v9014_v19, %v9013_v37  ;;  %v13426_v8 = vld [vmem:[#allocation16_spill] sm:$0xff] }
 0x5f8   :  { %v1259_v20 = vmul.f32 %v9321_v1, %v10740_v61  ;;  %9328 = vrcp.f32 %v1731_v36 }
 0x5f9   :  { %7631 = vmatmul.mubr.msk.f32.gmra.mrb[42].mxu1 %vm690_vm8, %v1256_v17 }
 0x5fa   :  { %8615 = vmatpush3.bf16.msra.mxu1 %v8614_v15  ;;  %7633 = vmatprep.mubr.msk.f32.mxu1 %vm9621_vm3, %v13423_v33 }
 0x5fb   :  { %v1734_v41 = vpop.xlane.xlu1 %1733  ;;  %7709 = vmatprep.subr.mxu1 %v13423_v33 }
 0x5fc   :  { %9330 = vrcp.f32 %v1734_v41 }
 0x5fd   :  { %7634 = vmatmul.mubr.msk.f32.gmra.mrb[44].mxu1 %vm690_vm8, %v1257_v11 }
 0x5fe   :  { %7710 = vmatpush3.msra.mxu1 %v10653_v6  ;;  %7636 = vmatprep.mubr.msk.f32.mxu1 %vm9621_vm3, %v13423_v33  ;;  %v9323_v6 = vpop.eup %9322 }
 0x5ff   :  { %v1740_v54 = vpop.xlane.xlu1 %1739  ;;  %8632 = vmatprep.subr.bf16.mxu1 %v13424_v58  ;;  %v1260_v48 = vmul.f32 %v9323_v6, %v10743_v3  ;;  %v9325_v31 = vpop.eup %9324 }
 0x600   :  { %v1261_v61 = vmul.f32 %v9325_v31, %v10751_v49  ;;  %v9327_v45 = vpop.eup %9326  ;;  %v8633_v49 = vpack.c.bf16 %v9004_v56, %v9003_v50 }
 0x601   :  { %7637 = vmatmul.mubr.msk.f32.gmra.mrb[46].mxu1 %vm690_vm8, %v1258_v47  ;;  %v1762_v3 = vmul.f32 %v9327_v45, %v10759_v42 }
 0x602   :  { %7639 = vmatprep.mubr.msk.f32.mxu1 %vm9621_vm3, %v13423_v33  ;;  %v9329_v40 = vpop.eup %9328 }
 0x603   :  { %v10945_v59 = vpop.xlane.xlu1 %1748  ;;  %v1763_v42 = vmul.f32 %v9329_v40, %v10764_v53 }
 0x605   :  { %7640 = vmatmul.mubr.msk.f32.gmra.mrb[48].mxu1 %vm690_vm8, %v1259_v20  ;;  %v13430_v20 = vld [vmem:[#allocation17_spill] sm:$0xff] }
 0x606   :  { %7642 = vmatprep.mubr.msk.f32.mxu1 %vm9621_vm3, %v13423_v33  ;;  %v9331_v10 = vpop.eup %9330 }
 0x607   :  { %v10951_v13 = vpop.xlane.xlu1 %2236  ;;  %v1764_v22 = vmul.f32 %v9331_v10, %v10769_v2 }
 0x609   :  { %7643 = vmatmul.mubr.msk.f32.gmra.mrb[50].mxu1 %vm690_vm8, %v1260_v48 }
 0x60a   :  { %7645 = vmatprep.mubr.msk.f32.mxu1 %vm9621_vm3, %v13423_v33 }
 0x60b   :  { %v10957_v38 = vpop.xlane.xlu1 %2239 }
 0x60d   :  { %7646 = vmatmul.mubr.msk.f32.gmra.mrb[52].mxu1 %vm690_vm8, %v1261_v61 }
 0x60e   :  { %7711 = vmatprep.mubr.msk.f32.mxu1 %vm9621_vm3, %v13423_v33 }
 0x60f   :  { %v10966_v28 = vpop.xlane.xlu1 %2242 }
 0x611   :  { %7712 = vmatmul.mubr.msk.f32.vlgmr.msra.gmra.mrb[54].mxu1 %vm690_vm8, %v1762_v3 }
 0x612   :  { %8634 = vmatpush3.bf16.msra.mxu1 %v8633_v49  ;;  %7714 = vmatprep.mubr.msk.f32.mxu1 %vm9621_vm3, %v13423_v33 }
 0x613   :  { %v10973_v32 = vpop.xlane.xlu1 %2248  ;;  %8635 = vmatprep.subr.bf16.mxu1 %v13424_v58 }
 0x615   :  { %7715 = vmatmul.mubr.msk.f32.gmra.mrb[56].mxu1 %vm690_vm8, %v1763_v42 }
 0x616   :  { %8637 = vmatpush3.bf16.msra.mxu1 %v8636_v27  ;;  %7717 = vmatprep.mubr.msk.f32.mxu1 %vm9621_vm3, %v13423_v33 }
 0x617   :  { %v9017_v55 = vpop.permute.xlu1 %9016  ;;  %8638 = vmatprep.subr.bf16.mxu1 %v13424_v58 }
 0x618   :  { %v9019_v21 = vunpack.i.h.bf16 %v9017_v55  ;;  %v9018_v5 = vunpack.i.l.bf16 %v9017_v55 }
 0x619   :  { %7718 = vmatmul.mubr.msk.f32.gmra.mrb[58].mxu1 %vm690_vm8, %v1764_v22 }
 0x61a   :  { %v8642_v53 = vpack.c.bf16 %v9019_v21, %v9018_v5  ;;  %8640 = vmatpush3.bf16.msra.mxu1 %v8639_v51  ;;  %7720 = vmatprep.mubr.msk.f32.mxu1 %vm9621_vm3, %v13423_v33 }
 0x61b   :  { %8641 = vmatprep.subr.bf16.mxu1 %v13424_v58 }
 0x61e   :  { %8643 = vmatpush3.bf16.msra.mxu1 %v8642_v53 }
 0x61f   :  { %7799 = vmatprep.subr.mxu1 %v13423_v33 }
 0x624   :  { %v1737_v39 = vpop.xlane.xlu0 %1736 }
 0x625   :  { %9332 = vrcp.f32 %v1737_v39 }
 0x626   :  { %9334 = vrcp.f32 %v1740_v54  ;;  %v13427_v54 = vld [vmem:[#allocation15_spill] sm:$0xff] }
 0x627   :  { %v13428_v47 = vpack.i.bf16 %v13426_v8, %v13427_v54 }
 0x628   :  { %v1743_v9 = vpop.xlane.xlu0 %1742 }
 0x629   :  { %9336 = vrcp.f32 %v1743_v9  ;;  %9021 = vrot.lane.b32.xlu1 %v13428_v47, %s9634_s11 }
 0x62c   :  { %v1746_v2 = vpop.xlane.xlu0 %1745 }
 0x62d   :  { %9338 = vrcp.f32 %v1746_v2 }
 0x62e   :  { %9340 = vrcp.f32 %v10945_v59 }
 0x62f   :  { %v9333_v18 = vpop.eup %9332 }
 0x630   :  { %v1752_v26 = vpop.xlane.xlu0 %1751  ;;  %v1765_v44 = vmul.f32 %v9333_v18, %v10812_v24  ;;  %v9335_v36 = vpop.eup %9334 }
 0x631   :  { %v1766_v34 = vmul.f32 %v9335_v36, %v10775_v25  ;;  %9342 = vrcp.f32 %v1752_v26 }
 0x632   :  { %7721 = vmatmul.mubr.msk.f32.gmra.mrb[60].mxu1 %vm690_vm8, %v1765_v44  ;;  %9344 = vrcp.f32 %v10951_v13 }
 0x633   :  { %7723 = vmatprep.mubr.msk.f32.mxu1 %vm9621_vm3, %v13423_v33  ;;  %v9337_v15 = vpop.eup %9336  ;;  %9346 = vrcp.f32 %v10957_v38 }
 0x634   :  { %v2246_v17 = vpop.xlane.xlu0 %2245  ;;  %v1767_v24 = vmul.f32 %v9337_v15, %v10817_v57  ;;  %v13429_v57 = vld [vmem:[#allocation18_spill] sm:$0xff]  ;;  %9348 = vrcp.f32 %v10966_v28 }
 0x635   :  { %v13431_v6 = vpack.i.bf16 %v13429_v57, %v13430_v20  ;;  %9350 = vrcp.f32 %v2246_v17 }
 0x636   :  { %7724 = vmatmul.mubr.msk.f32.gmra.mrb[62].mxu1 %vm690_vm8, %v1766_v34  ;;  %9352 = vrcp.f32 %v10973_v32 }
 0x637   :  { %7726 = vmatprep.mubr.msk.f32.mxu1 %vm9621_vm3, %v13423_v33  ;;  %v9339_v11 = vpop.eup %9338  ;;  %9026 = vrot.lane.b32.xlu1 %v13431_v6, %s9634_s11 }
 0x638   :  { %v2252_v41 = vpop.xlane.xlu0 %2251  ;;  %v1768_v1 = vmul.f32 %v9339_v11, %v10827_v12  ;;  %v9341_v59 = vpop.eup %9340 }
 0x639   :  { %v1769_v48 = vmul.f32 %v9341_v59, %v10780_v29  ;;  %9354 = vrcp.f32 %v2252_v41 }
 0x63a   :  { %7727 = vmatmul.mubr.msk.f32.gmra.mrb[64].mxu1 %vm690_vm8, %v1767_v24 }
 0x63b   :  { %7729 = vmatprep.mubr.msk.f32.mxu1 %vm9621_vm3, %v13423_v33  ;;  %v9343_v31 = vpop.eup %9342 }
 0x63c   :  { %v2255_v25 = vpop.xlane.xlu0 %2254  ;;  %v1770_v12 = vmul.f32 %v9343_v31, %v10838_v16  ;;  %v9345_v38 = vpop.eup %9344 }
 0x63d   :  { %v2271_v29 = vmul.f32 %v9345_v38, %v10784_v14  ;;  %v9347_v61 = vpop.eup %9346  ;;  %9356 = vrcp.f32 %v2255_v25 }
 0x63e   :  { %7730 = vmatmul.mubr.msk.f32.gmra.mrb[66].mxu1 %vm690_vm8, %v1768_v1  ;;  %v2272_v45 = vmul.f32 %v9347_v61, %v10790_v7  ;;  %v9349_v16 = vpop.eup %9348 }
 0x63f   :  { %7732 = vmatprep.mubr.msk.f32.mxu1 %vm9621_vm3, %v13423_v33  ;;  %v2273_v56 = vmul.f32 %v9349_v16, %v10794_v62  ;;  %v9351_v14 = vpop.eup %9350 }
 0x640   :  { %v2297_v13 = vpop.permute.xlu0 %2296  ;;  %v2274_v3 = vmul.f32 %v9351_v14, %v10849_v60  ;;  %v9353_v7 = vpop.eup %9352 }
 0x641   :  { %7800 = vmatpush3.msra.mxu1 %v2297_v13  ;;  %v2275_v28 = vmul.f32 %v9353_v7, %v10800_v46 }
 0x642   :  { %7733 = vmatmul.mubr.msk.f32.gmra.mrb[68].mxu1 %vm690_vm8, %v1769_v48  ;;  %8650 = vmatprep.subr.bf16.mxu1 %v13424_v58 }
 0x643   :  { %7735 = vmatprep.mubr.msk.f32.mxu1 %vm9621_vm3, %v13423_v33  ;;  %v9355_v62 = vpop.eup %9354 }
 0x644   :  { %v2276_v40 = vmul.f32 %v9355_v62, %v10862_v43 }
 0x646   :  { %7736 = vmatmul.mubr.msk.f32.gmra.mrb[70].mxu1 %vm690_vm8, %v1770_v12 }
 0x647   :  { %7801 = vmatprep.mubr.msk.f32.mxu1 %vm9621_vm3, %v13423_v33  ;;  %v9357_v0 = vpop.eup %9356 }
 0x648   :  { %v2258_v50 = vpop.xlane.xlu1 %2257  ;;  %v2277_v60 = vmul.f32 %v9357_v0, %v10871_v23 }
 0x649   :  { %9358 = vrcp.f32 %v2258_v50 }
 0x64a   :  { %7802 = vmatmul.mubr.msk.f32.vlgmr.msra.gmra.mrb[72].mxu1 %vm690_vm8, %v2271_v29 }
 0x64b   :  { %7804 = vmatprep.mubr.msk.f32.mxu1 %vm9621_vm3, %v13423_v33 }
 0x64e   :  { %7805 = vmatmul.mubr.msk.f32.gmra.mrb[74].mxu1 %vm690_vm8, %v2272_v45 }
 0x64f   :  { %7807 = vmatprep.mubr.msk.f32.mxu1 %vm9621_vm3, %v13423_v33 }
 0x652   :  { %7808 = vmatmul.mubr.msk.f32.gmra.mrb[76].mxu1 %vm690_vm8, %v2273_v56 }
 0x653   :  { %7810 = vmatprep.mubr.msk.f32.mxu1 %vm9621_vm3, %v13423_v33  ;;  %v9359_v30 = vpop.eup %9358 }
 0x654   :  { %v2278_v46 = vmul.f32 %v9359_v30, %v10888_v63 }
 0x656   :  { %7811 = vmatmul.mubr.msk.f32.gmra.mrb[78].mxu1 %vm690_vm8, %v2274_v3 }
 0x657   :  { %7813 = vmatprep.mubr.msk.f32.mxu1 %vm9621_vm3, %v13423_v33 }
 0x65a   :  { %7814 = vmatmul.mubr.msk.f32.gmra.mrb[80].mxu1 %vm690_vm8, %v2275_v28 }
 0x65b   :  { %7816 = vmatprep.mubr.msk.f32.mxu1 %vm9621_vm3, %v13423_v33 }
 0x65e   :  { %7817 = vmatmul.mubr.msk.f32.gmra.mrb[82].mxu1 %vm690_vm8, %v2276_v40 }
 0x65f   :  { %7819 = vmatprep.mubr.msk.f32.mxu1 %vm9621_vm3, %v13423_v33 }
 0x662   :  { %7820 = vmatmul.mubr.msk.f32.gmra.mrb[84].mxu1 %vm690_vm8, %v2277_v60 }
 0x663   :  { %7822 = vmatprep.mubr.msk.f32.mxu1 %vm9621_vm3, %v13423_v33 }
 0x666   :  { %7823 = vmatmul.mubr.msk.f32.gmra.mrb[86].mxu1 %vm690_vm8, %v2278_v46 }
 0x667   :  { %7825 = vmatprep.mubr.msk.f32.mxu1 %vm9621_vm3, %v13423_v33 }
 0x66f   :  { %v910_v43 = vpop.f32.mrb[18].mxu1 }
 0x670   :  { %954 = vst.msk [vmem:[#allocation2] sm:$0xff] %vm525_vm6, %v910_v43  ;;  %v7533_v52 = vpop.f32.mrb[19].mxu1 }
 0x671   :  { %v2261_v49 = vpop.xlane.xlu0 %2260 }
 0x672   :  { %9360 = vrcp.f32 %v2261_v49 }
 0x673   :  { %v915_v23 = vpop.f32.mrb[20].mxu1 }
 0x674   :  { %955 = vst.msk [vmem:[#allocation2 + $0x8] sm:$0xff] %vm525_vm6, %v915_v23  ;;  %v7536_v35 = vpop.f32.mrb[21].mxu1 }
 0x677   :  { %v920_v32 = vpop.f32.mrb[22].mxu1 }
 0x678   :  { %956 = vst.msk [vmem:[#allocation2 + $0x10] sm:$0xff] %vm525_vm6, %v920_v32  ;;  %v7539_v42 = vpop.f32.mrb[23].mxu1 }
 0x67b   :  { %v925_v63 = vpop.f32.mrb[24].mxu1 }
 0x67c   :  { %v9361_v10 = vpop.eup %9360  ;;  %957 = vst.msk [vmem:[#allocation2 + $0x18] sm:$0xff] %vm525_vm6, %v925_v63  ;;  %v7542_v27 = vpop.f32.mrb[25].mxu1 }
 0x67d   :  { %v2279_v19 = vmul.f32 %v9361_v10, %v10895_v4 }
 0x67f   :  { %v930_v37 = vpop.f32.mrb[26].mxu1  ;;  %7826 = vmatmul.mubr.msk.f32.gmra.mrb[88].mxu1 %vm690_vm8, %v2279_v19 }
 0x680   :  { %958 = vst.msk [vmem:[#allocation2 + $0x20] sm:$0xff] %vm525_vm6, %v930_v37  ;;  %v7545_v55 = vpop.f32.mrb[27].mxu1  ;;  %7871 = vmatprep.mubr.msk.f32.mxu1 %vm9621_vm3, %v13423_v33 }
 0x683   :  { %v935_v22 = vpop.f32.mrb[28].mxu1 }
 0x684   :  { %959 = vst.msk [vmem:[#allocation2 + $0x28] sm:$0xff] %vm525_vm6, %v935_v22  ;;  %v7548_v51 = vpop.f32.mrb[29].mxu1 }
 0x687   :  { %v940_v21 = vpop.f32.mrb[30].mxu1 }
 0x688   :  { %960 = vst.msk [vmem:[#allocation2 + $0x30] sm:$0xff] %vm525_vm6, %v940_v21  ;;  %v7551_v5 = vpop.f32.mrb[31].mxu1 }
 0x69b   :  { %v9022_v53 = vpop.permute.xlu1 %9021 }
 0x69c   :  { %v9024_v39 = vunpack.i.h.bf16 %v9022_v53  ;;  %v9023_v4 = vunpack.i.l.bf16 %v9022_v53 }
 0x69e   :  { %v8645_v9 = vpack.c.bf16 %v9024_v39, %v9023_v4 }
 0x6a0   :  { %8646 = vmatpush3.bf16.msra.mxu0 %v8645_v9 }
 0x6a1   :  { %8647 = vmatprep.subr.bf16.mxu0 %v13424_v58 }
 0x6a9   :  { %v9027_v2 = vpop.permute.xlu1 %9026 }
 0x6aa   :  { %v9029_v18 = vunpack.i.h.bf16 %v9027_v2  ;;  %v9028_v26 = vunpack.i.l.bf16 %v9027_v2 }
 0x6ac   :  { %v8648_v44 = vpack.c.bf16 %v9029_v18, %v9028_v26 }
 0x6ae   :  { %8649 = vmatpush3.bf16.msra.mxu0 %v8648_v44 }
 0x6af   :  { %8656 = vmatprep.subr.bf16.mxu0 %v13424_v58 }
 0x6b8   :  { %v945_v36 = vpop.f32.mrb[32].mxu1 }
 0x6b9   :  { %961 = vst.msk [vmem:[#allocation2 + $0x38] sm:$0xff] %vm525_vm6, %v945_v36  ;;  %v7554_v17 = vpop.f32.mrb[33].mxu1 }
 0x6bc   :  { %v950_v34 = vpop.f32.mrb[34].mxu1 }
 0x6bd   :  { %962 = vst.msk [vmem:[#allocation2 + $0x40] sm:$0xff] %vm525_vm6, %v950_v34  ;;  %v7557_v15 = vpop.f32.mrb[35].mxu1 }
 0x6c0   :  { %v1382_v41 = vpop.f32.mrb[36].mxu1 }
 0x6c1   :  { %1435 = vrot.lane.b32.xlu1 %v1382_v41, %s9635_s12  ;;  %v7623_v24 = vpop.f32.mrb[37].mxu1 }
 0x6c4   :  { %v1387_v11 = vpop.f32.mrb[38].mxu1 }
 0x6c5   :  { %1437 = vrot.lane.b32.xlu1 %v1387_v11, %s9635_s12  ;;  %v7626_v8 = vpop.f32.mrb[39].mxu1 }
 0x6c8   :  { %v1392_v54 = vpop.f32.mrb[40].mxu1 }
 0x6c9   :  { %v7629_v47 = vpop.f32.mrb[41].mxu1  ;;  %1439 = vrot.lane.b32.xlu0 %v1392_v54, %s9635_s12 }
 0x6cc   :  { %v1397_v25 = vpop.f32.mrb[42].mxu1 }
 0x6cd   :  { %1441 = vrot.lane.b32.xlu1 %v1397_v25, %s9635_s12  ;;  %v7632_v1 = vpop.f32.mrb[43].mxu1 }
 0x6d0   :  { %v1402_v59 = vpop.f32.mrb[44].mxu1 }
 0x6d1   :  { %1443 = vrot.lane.b32.xlu0 %v1402_v59, %s9635_s12  ;;  %v7635_v57 = vpop.f32.mrb[45].mxu1 }
 0x6d4   :  { %v1407_v20 = vpop.f32.mrb[46].mxu1 }
 0x6d5   :  { %v7638_v6 = vpop.f32.mrb[47].mxu1 }
 0x6d8   :  { %v1412_v13 = vpop.f32.mrb[48].mxu1 }
 0x6d9   :  { %v7641_v48 = vpop.f32.mrb[49].mxu1 }
 0x6dc   :  { %v1417_v31 = vpop.f32.mrb[50].mxu1 }
 0x6dd   :  { %v7644_v12 = vpop.f32.mrb[51].mxu1 }
 0x6e0   :  { %v11077_v38 = vpop.f32.mrb[52].mxu1 }
 0x6e1   :  { %v7647_v29 = vpop.f32.mrb[53].mxu1 }
 0x6e4   :  { %v1891_v61 = vpop.f32.mrb[54].mxu1 }
 0x6e5   :  { %1944 = vrot.lane.b32.xlu0 %v1891_v61, %s9636_s1  ;;  %v7713_v45 = vpop.f32.mrb[55].mxu1 }
 0x6e8   :  { %v1896_v16 = vpop.f32.mrb[56].mxu1 }
 0x6e9   :  { %1946 = vrot.lane.b32.xlu1 %v1896_v16, %s9636_s1  ;;  %v7716_v56 = vpop.f32.mrb[57].mxu1 }
 0x6ec   :  { %v1901_v14 = vpop.f32.mrb[58].mxu1 }
 0x6ed   :  { %1948 = vrot.lane.b32.xlu1 %v1901_v14, %s9636_s1  ;;  %v7719_v50 = vpop.f32.mrb[59].mxu1 }
 0x705   :  { %v1906_v3 = vpop.f32.mrb[60].mxu1 }
 0x706   :  { %1950 = vrot.lane.b32.xlu0 %v1906_v3, %s9636_s1  ;;  %v7722_v7 = vpop.f32.mrb[61].mxu1 }
 0x709   :  { %v1911_v28 = vpop.f32.mrb[62].mxu1 }
 0x70a   :  { %1952 = vrot.lane.b32.xlu1 %v1911_v28, %s9636_s1  ;;  %v7725_v62 = vpop.f32.mrb[63].mxu1 }
 0x70d   :  { %v1916_v40 = vpop.f32.mrb[64].mxu1 }
 0x70e   :  { %v7728_v0 = vpop.f32.mrb[65].mxu1 }
 0x711   :  { %v1921_v60 = vpop.f32.mrb[66].mxu1 }
 0x712   :  { %v7731_v30 = vpop.f32.mrb[67].mxu1 }
 0x715   :  { %v1926_v46 = vpop.f32.mrb[68].mxu1 }
 0x716   :  { %v7734_v43 = vpop.f32.mrb[69].mxu1 }
 0x717   :  { %v13434_v43 = vld [vmem:[#allocation6_spill] sm:$0xff] }
 0x719   :  { %v1931_v52 = vpop.f32.mrb[70].mxu1 }
 0x71a   :  { %v7737_v49 = vpop.f32.mrb[71].mxu1 }
 0x71d   :  { %v2400_v23 = vpop.f32.mrb[72].mxu1 }
 0x71e   :  { %2453 = vrot.lane.b32.xlu1 %v2400_v23, %s13377_s13  ;;  %v7803_v35 = vpop.f32.mrb[73].mxu1 }
 0x721   :  { %v2405_v32 = vpop.f32.mrb[74].mxu1 }
 0x722   :  { %2455 = vrot.lane.b32.xlu1 %v2405_v32, %s13377_s13  ;;  %v7806_v42 = vpop.f32.mrb[75].mxu1  ;;  %v13435_v32 = vld [vmem:[#allocation7_spill] sm:$0xff] }
 0x725   :  { %v2410_v63 = vpop.f32.mrb[76].mxu1 }
 0x726   :  { %1445 = vrot.lane.b32.xlu1 %v1407_v20, %s9635_s12  ;;  %2457 = vrot.lane.b32.xlu0 %v2410_v63, %s13377_s13  ;;  %v7809_v10 = vpop.f32.mrb[77].mxu1 }
 0x729   :  { %v2415_v27 = vpop.f32.mrb[78].mxu1 }
 0x72a   :  { %1954 = vrot.lane.b32.xlu0 %v1916_v40, %s9636_s1  ;;  %2459 = vrot.lane.b32.xlu1 %v2415_v27, %s13377_s13  ;;  %v7812_v19 = vpop.f32.mrb[79].mxu1  ;;  %v13432_v40 = vld [vmem:[#allocation19_spill] sm:$0xff] }
 0x72b   :  { %v11157_v0 = vsub.s32 4, %v13432_v40 }
 0x72d   :  { %v2420_v37 = vpop.f32.mrb[80].mxu1  ;;  %13433 = vst [vmem:[#allocation22_spill] sm:$0xff] %v11157_v0 }
 0x72e   :  { %1956 = vrot.lane.b32.xlu1 %v1921_v60, %s9636_s1  ;;  %2461 = vrot.lane.b32.xlu0 %v2420_v37, %s13377_s13  ;;  %v7815_v55 = vpop.f32.mrb[81].mxu1  ;;  %v11162_v60 = vld [vmem:[%s13345_s4] sm:$0xff]  ;;  %v13436_v37 = vld [vmem:[#allocation8_spill] sm:$0xff] }
 0x72f   :  { %v2664_v30 = vrot.slane %v11162_v60, %v11157_v0 }
 0x731   :  { %v2425_v22 = vpop.f32.mrb[82].mxu1 }
 0x732   :  { %1447 = vrot.lane.b32.xlu0 %v1412_v13, %s9635_s12  ;;  %2463 = vrot.lane.b32.xlu1 %v2425_v22, %s13377_s13  ;;  %v7818_v51 = vpop.f32.mrb[83].mxu1 }
 0x733   :  { %v1436_v21 = vpop.permute.xlu1 %1435 }
 0x734   :  { %1463 = vst.msk [vmem:[#allocation2] sm:$0xff] %vm1462_vm9, %v1436_v21 }
 0x735   :  { %v2430_v5 = vpop.f32.mrb[84].mxu1 }
 0x736   :  { %1449 = vrot.lane.b32.xlu1 %v1417_v31, %s9635_s12  ;;  %2465 = vrot.lane.b32.xlu0 %v2430_v5, %s13377_s13  ;;  %v7821_v53 = vpop.f32.mrb[85].mxu1 }
 0x737   :  { %v1438_v39 = vpop.permute.xlu1 %1437  ;;  %v13437_v53 = vld [vmem:[#allocation9_spill] sm:$0xff] }
 0x738   :  { %1464 = vst.msk [vmem:[#allocation2 + $0x8] sm:$0xff] %vm1462_vm9, %v1438_v39 }
 0x739   :  { %v2435_v4 = vpop.f32.mrb[86].mxu1 }
 0x73a   :  { %1958 = vrot.lane.b32.xlu0 %v1926_v46, %s9636_s1  ;;  %2467 = vrot.lane.b32.xlu1 %v2435_v4, %s13377_s13  ;;  %v7824_v9 = vpop.f32.mrb[87].mxu1 }
 0x73b   :  { %v1440_v2 = vpop.permute.xlu0 %1439 }
 0x73c   :  { %1465 = vst.msk [vmem:[#allocation2 + $0x10] sm:$0xff] %vm1462_vm9, %v1440_v2 }
 0x73e   :  { %1451 = vrot.lane.b32.xlu0 %v11077_v38, %s9635_s12  ;;  %1960 = vrot.lane.b32.xlu1 %v1931_v52, %s9636_s1 }
 0x73f   :  { %v1442_v18 = vpop.permute.xlu1 %1441 }
 0x740   :  { %1466 = vst.msk [vmem:[#allocation2 + $0x18] sm:$0xff] %vm1462_vm9, %v1442_v18 }
 0x743   :  { %v1444_v26 = vpop.permute.xlu0 %1443 }
 0x744   :  { %1467 = vst.msk [vmem:[#allocation2 + $0x20] sm:$0xff] %vm1462_vm9, %v1444_v26  ;;  %v13438_v26 = vld [vmem:[#allocation10_spill] sm:$0xff] }
 0x752   :  { %v2440_v44 = vpop.f32.mrb[88].mxu1 }
 0x753   :  { %2469 = vrot.lane.b32.xlu0 %v2440_v44, %s13377_s13  ;;  %v7827_v36 = vpop.f32.mrb[89].mxu1 }
 0x757   :  { %v1945_v17 = vpop.permute.xlu0 %1944 }
 0x758   :  { %1972 = vst.msk [vmem:[#allocation2] sm:$0xff] %vm1971_vm10, %v1945_v17 }
 0x75b   :  { %v1947_v34 = vpop.permute.xlu1 %1946 }
 0x75c   :  { %1973 = vst.msk [vmem:[#allocation2 + $0x8] sm:$0xff] %vm1971_vm10, %v1947_v34 }
 0x75f   :  { %v1949_v15 = vpop.permute.xlu1 %1948 }
 0x760   :  { %1974 = vst.msk [vmem:[#allocation2 + $0x10] sm:$0xff] %vm1971_vm10, %v1949_v15 }
 0x778   :  { %v1951_v41 = vpop.permute.xlu0 %1950 }
 0x779   :  { %1975 = vst.msk [vmem:[#allocation2 + $0x18] sm:$0xff] %vm1971_vm10, %v1951_v41  ;;  %v13439_v41 = vld [vmem:[#allocation11_spill] sm:$0xff] }
 0x77c   :  { %v1953_v24 = vpop.permute.xlu1 %1952 }
 0x77d   :  { %1976 = vst.msk [vmem:[#allocation2 + $0x20] sm:$0xff] %vm1971_vm10, %v1953_v24 }
 0x790   :  { %v2454_v11 = vpop.permute.xlu1 %2453 }
 0x791   :  { %2481 = vst.msk [vmem:[#allocation2] sm:$0xff] %vm2480_vm11, %v2454_v11 }
 0x794   :  { %v2456_v8 = vpop.permute.xlu1 %2455 }
 0x795   :  { %2482 = vst.msk [vmem:[#allocation2 + $0x8] sm:$0xff] %vm2480_vm11, %v2456_v8 }
 0x798   :  { %v1446_v54 = vpop.permute.xlu1 %1445  ;;  %v2458_v47 = vpop.permute.xlu0 %2457  ;;  %v2490_v25 = vld [vmem:[#allocation2] sm:$0xff] }
 0x799   :  { %1468 = vst.msk [vmem:[#allocation2 + $0x28] sm:$0xff] %vm1462_vm9, %v1446_v54  ;;  %7837 = vmatmul.mubr.msk.f32.vlgmr.msra.gmra.mrb[90].mxu0 %vm212_vm5, %v2490_v25  ;;  %v13440_v25 = vld [vmem:[#allocation12_spill] sm:$0xff] }
 0x79a   :  { %2483 = vst.msk [vmem:[#allocation2 + $0x10] sm:$0xff] %vm2480_vm11, %v2458_v47  ;;  %7839 = vmatprep.mubr.msk.f32.mxu0 %vm9621_vm3, %v13423_v33 }
 0x79c   :  { %v1955_v1 = vpop.permute.xlu0 %1954  ;;  %v2460_v59 = vpop.permute.xlu1 %2459  ;;  %v2491_v57 = vld [vmem:[#allocation2 + $0x8] sm:$0xff] }
 0x79d   :  { %1977 = vst.msk [vmem:[#allocation2 + $0x28] sm:$0xff] %vm1971_vm10, %v1955_v1  ;;  %7840 = vmatmul.mubr.msk.f32.gmra.mrb[92].mxu0 %vm212_vm5, %v2491_v57 }
 0x79e   :  { %2484 = vst.msk [vmem:[#allocation2 + $0x18] sm:$0xff] %vm2480_vm11, %v2460_v59  ;;  %7842 = vmatprep.mubr.msk.f32.mxu0 %vm9621_vm3, %v13423_v33 }
 0x7a0   :  { %v1957_v20 = vpop.permute.xlu1 %1956  ;;  %v2462_v6 = vpop.permute.xlu0 %2461 }
 0x7a1   :  { %v2492_v13 = vld [vmem:[#allocation2 + $0x10] sm:$0xff]  ;;  %2485 = vst.msk [vmem:[#allocation2 + $0x20] sm:$0xff] %vm2480_vm11, %v2462_v6 }
 0x7a2   :  { %7843 = vmatmul.mubr.msk.f32.gmra.mrb[94].mxu0 %vm212_vm5, %v2492_v13 }
 0x7a3   :  { %7845 = vmatprep.mubr.msk.f32.mxu0 %vm9621_vm3, %v13423_v33 }
 0x7a4   :  { %v1448_v48 = vpop.permute.xlu0 %1447  ;;  %v2464_v31 = vpop.permute.xlu1 %2463 }
 0x7a5   :  { %v2493_v12 = vld [vmem:[#allocation2 + $0x18] sm:$0xff]  ;;  %1469 = vst.msk [vmem:[#allocation2 + $0x30] sm:$0xff] %vm1462_vm9, %v1448_v48  ;;  %v13441_v48 = vld [vmem:[#allocation13_spill] sm:$0xff] }
 0x7a6   :  { %2486 = vst.msk [vmem:[#allocation2 + $0x28] sm:$0xff] %vm2480_vm11, %v2464_v31  ;;  %7846 = vmatmul.mubr.msk.f32.gmra.mrb[96].mxu0 %vm212_vm5, %v2493_v12 }
 0x7a7   :  { %1978 = vst.msk [vmem:[#allocation2 + $0x30] sm:$0xff] %vm1971_vm10, %v1957_v20  ;;  %7848 = vmatprep.mubr.msk.f32.mxu0 %vm9621_vm3, %v13423_v33 }
 0x7a8   :  { %v1450_v38 = vpop.permute.xlu1 %1449  ;;  %v2466_v29 = vpop.permute.xlu0 %2465  ;;  %v2494_v61 = vld [vmem:[#allocation2 + $0x20] sm:$0xff] }
 0x7a9   :  { %1470 = vst.msk [vmem:[#allocation2 + $0x38] sm:$0xff] %vm1462_vm9, %v1450_v38 }
 0x7aa   :  { %2487 = vst.msk [vmem:[#allocation2 + $0x30] sm:$0xff] %vm2480_vm11, %v2466_v29  ;;  %7849 = vmatmul.mubr.msk.f32.gmra.mrb[98].mxu0 %vm212_vm5, %v2494_v61 }
 0x7ab   :  { %7851 = vmatprep.mubr.msk.f32.mxu0 %vm9621_vm3, %v13423_v33 }
 0x7ac   :  { %v1959_v45 = vpop.permute.xlu0 %1958  ;;  %v2468_v16 = vpop.permute.xlu1 %2467 }
 0x7ad   :  { %v2495_v56 = vld [vmem:[#allocation2 + $0x28] sm:$0xff]  ;;  %1979 = vst.msk [vmem:[#allocation2 + $0x38] sm:$0xff] %vm1971_vm10, %v1959_v45  ;;  %v13442_v45 = vld [vmem:[#allocation14_spill] sm:$0xff] }
 0x7ae   :  { %7852 = vmatmul.mubr.msk.f32.gmra.mrb[100].mxu0 %vm212_vm5, %v2495_v56  ;;  %2488 = vst.msk [vmem:[#allocation2 + $0x38] sm:$0xff] %vm2480_vm11, %v2468_v16 }
 0x7af   :  { %7854 = vmatprep.mubr.msk.f32.mxu0 %vm9621_vm3, %v13423_v33 }
 0x7b0   :  { %v1452_v14 = vpop.permute.xlu0 %1451  ;;  %v1961_v50 = vpop.permute.xlu1 %1960 }
 0x7b1   :  { %v2496_v3 = vld [vmem:[#allocation2 + $0x30] sm:$0xff]  ;;  %1471 = vst.msk [vmem:[#allocation2 + $0x40] sm:$0xff] %vm1462_vm9, %v1452_v14 }
 0x7b2   :  { %7855 = vmatmul.mubr.msk.f32.gmra.mrb[102].mxu0 %vm212_vm5, %v2496_v3  ;;  %1980 = vst.msk [vmem:[#allocation2 + $0x40] sm:$0xff] %vm1971_vm10, %v1961_v50 }
 0x7b3   :  { %7857 = vmatprep.mubr.msk.f32.mxu0 %vm9621_vm3, %v13423_v33 }
 0x7b5   :  { %v2497_v7 = vld [vmem:[#allocation2 + $0x38] sm:$0xff] }
 0x7b6   :  { %7858 = vmatmul.mubr.msk.f32.gmra.mrb[104].mxu0 %vm212_vm5, %v2497_v7 }
 0x7b7   :  { %7860 = vmatprep.mubr.msk.f32.mxu0 %vm9621_vm3, %v13423_v33 }
 0x7c5   :  { %v2470_v28 = vpop.permute.xlu0 %2469 }
 0x7c6   :  { %2489 = vst.msk [vmem:[#allocation2 + $0x40] sm:$0xff] %vm2480_vm11, %v2470_v28 }
 0x7cd   :  { %v2498_v62 = vld [vmem:[#allocation2 + $0x40] sm:$0xff] }
 0x7ce   :  { %7861 = vmatmul.mubr.msk.f32.gmra.mrb[106].mxu0 %vm212_vm5, %v2498_v62 }
 0x7cf   :  { %7914 = vmatprep.mubr.msk.f32.mxu0 %vm9621_vm3, %v13423_v33 }
 0x86c   :  { %v2608_v46 = vpop.f32.mrb[90].mxu0 }
 0x86d   :  { %v2652_v52 = vadd.f32 %v2608_v46, %v13434_v43  ;;  %v7838_v49 = vpop.f32.mrb[91].mxu0 }
 0x86f   :  { %v11167_v23 = vadd.f32 %v2664_v30, %v2652_v52 }
 0x870   :  { %v2613_v35 = vpop.f32.mrb[92].mxu0 }
 0x871   :  { %v2653_v42 = vadd.f32 %v2613_v35, %v13435_v32  ;;  %v7841_v63 = vpop.f32.mrb[93].mxu0  ;;  %v2674_v10 = vsel %vm212_vm5, %v11167_v23, 0.0 }
 0x872   :  { %2675 = vadd.xlane.f32.xlu1 %v2674_v10 }
 0x873   :  { %v11172_v27 = vadd.f32 %v2664_v30, %v2653_v42 }
 0x875   :  { %v2618_v19 = vpop.f32.mrb[94].mxu0  ;;  %v2677_v51 = vsel %vm212_vm5, %v11172_v27, 0.0 }
 0x876   :  { %v2654_v55 = vadd.f32 %v2618_v19, %v13436_v37  ;;  %v7844_v22 = vpop.f32.mrb[95].mxu0  ;;  %2678 = vadd.xlane.f32.xlu0 %v2677_v51 }
 0x878   :  { %v11177_v21 = vadd.f32 %v2664_v30, %v2654_v55 }
 0x879   :  { %v2623_v5 = vpop.f32.mrb[96].mxu0 }
 0x87a   :  { %v2655_v39 = vadd.f32 %v2623_v5, %v13437_v53  ;;  %v7847_v4 = vpop.f32.mrb[97].mxu0  ;;  %v2680_v9 = vsel %vm212_vm5, %v11177_v21, 0.0 }
 0x87b   :  { %2681 = vadd.xlane.f32.xlu0 %v2680_v9 }
 0x87c   :  { %v11182_v2 = vadd.f32 %v2664_v30, %v2655_v39 }
 0x87d   :  { %v2628_v18 = vpop.f32.mrb[98].mxu0 }
 0x87e   :  { %v2656_v44 = vadd.f32 %v2628_v18, %v13438_v26  ;;  %v7850_v36 = vpop.f32.mrb[99].mxu0  ;;  %v2683_v17 = vsel %vm212_vm5, %v11182_v2, 0.0 }
 0x87f   :  { %2684 = vadd.xlane.f32.xlu1 %v2683_v17 }
 0x880   :  { %v11187_v34 = vadd.f32 %v2664_v30, %v2656_v44 }
 0x881   :  { %v2633_v15 = vpop.f32.mrb[100].mxu0 }
 0x882   :  { %v2657_v24 = vadd.f32 %v2633_v15, %v13439_v41  ;;  %v7853_v11 = vpop.f32.mrb[101].mxu0  ;;  %v2686_v8 = vsel %vm212_vm5, %v11187_v34, 0.0 }
 0x883   :  { %2687 = vadd.xlane.f32.xlu0 %v2686_v8 }
 0x884   :  { %v11192_v54 = vadd.f32 %v2664_v30, %v2657_v24 }
 0x885   :  { %v2638_v47 = vpop.f32.mrb[102].mxu0 }
 0x886   :  { %v2658_v1 = vadd.f32 %v2638_v47, %v13440_v25  ;;  %v7856_v59 = vpop.f32.mrb[103].mxu0  ;;  %v2689_v57 = vsel %vm212_vm5, %v11192_v54, 0.0 }
 0x887   :  { %2690 = vadd.xlane.f32.xlu1 %v2689_v57 }
 0x888   :  { %v11197_v20 = vadd.f32 %v2664_v30, %v2658_v1 }
 0x889   :  { %v2643_v6 = vpop.f32.mrb[104].mxu0 }
 0x88a   :  { %v2692_v13 = vsel %vm212_vm5, %v11197_v20, 0.0  ;;  %v2659_v31 = vadd.f32 %v2643_v6, %v13441_v48  ;;  %v7859_v12 = vpop.f32.mrb[105].mxu0  ;;  %v196_v6 = vld [vmem:[%s13343_s2 + $0x8] sm:$0xff] }
 0x88b   :  { %2693 = vadd.xlane.f32.xlu0 %v2692_v13  ;;  %v198_v13 = vld [vmem:[%s13343_s2 + $0x18] sm:$0xff]  ;;  %v200_v12 = vld [vmem:[%s13343_s2 + $0x28] sm:$0xff] }
 0x88c   :  { %v11202_v38 = vadd.f32 %v2664_v30, %v2659_v31  ;;  %v8651_v48 = vpack.c.bf16 %v198_v13, %v196_v6 }
 0x88e   :  { %v2695_v29 = vsel %vm212_vm5, %v11202_v38, 0.0  ;;  %8652 = vmatpush3.bf16.msra.mxu1 %v8651_v48 }
 0x88f   :  { %2696 = vadd.xlane.f32.xlu1 %v2695_v29  ;;  %8653 = vmatprep.subr.bf16.mxu1 %v13424_v58  ;;  %v202_v29 = vld [vmem:[%s13343_s2 + $0x38] sm:$0xff] }
 0x8a1   :  { %v2648_v61 = vpop.f32.mrb[106].mxu0 }
 0x8a2   :  { %v2660_v16 = vadd.f32 %v2648_v61, %v13442_v45  ;;  %v7862_v56 = vpop.f32.mrb[107].mxu0  ;;  %v8654_v61 = vpack.c.bf16 %v202_v29, %v200_v12 }
 0x8a4   :  { %v11207_v14 = vadd.f32 %v2664_v30, %v2660_v16  ;;  %8655 = vmatpush3.bf16.msra.mxu1 %v8654_v61 }
 0x8a5   :  { %8668 = vmatprep.subr.bf16.mxu1 %v13424_v58 }
 0x8a6   :  { %v2698_v50 = vsel %vm212_vm5, %v11207_v14, 0.0 }
 0x8a7   :  { %2699 = vadd.xlane.f32.xlu0 %v2698_v50 }
 0x8ff   :  { %v2676_v3 = vpop.xlane.xlu1 %2675 }
 0x900   :  { %v2701_v7 = vmul.f32 0.03125, %v2676_v3 }
 0x902   :  { %v11212_v28 = vsub.f32 %v11167_v23, %v2701_v7  ;;  %v204_v7 = vld [vmem:[%s13344_s3] sm:$0xff] }
 0x903   :  { %v2679_v62 = vpop.xlane.xlu0 %2678 }
 0x904   :  { %v2702_v46 = vmul.f32 0.03125, %v2679_v62  ;;  %v2719_v43 = vmul.f32 %v11212_v28, %v11212_v28  ;;  %v205_v62 = vld [vmem:[%s13344_s3 + $0x8] sm:$0xff] }
 0x906   :  { %v11217_v52 = vsub.f32 %v11172_v27, %v2702_v46  ;;  %v2728_v30 = vsel %vm212_vm5, %v2719_v43, 0.0  ;;  %v206_v46 = vld [vmem:[%s13344_s3 + $0x10] sm:$0xff]  ;;  %v8657_v43 = vpack.c.bf16 %v205_v62, %v204_v7 }
 0x907   :  { %2729 = vadd.xlane.f32.xlu1 %v2728_v30  ;;  %v207_v30 = vld [vmem:[%s13344_s3 + $0x18] sm:$0xff] }
 0x908   :  { %v2682_v49 = vpop.xlane.xlu0 %2681  ;;  %v2720_v32 = vmul.f32 %v11217_v52, %v11217_v52  ;;  %8658 = vmatpush3.bf16.msra.mxu0 %v8657_v43 }
 0x909   :  { %v2703_v35 = vmul.f32 0.03125, %v2682_v49  ;;  %v8660_v49 = vpack.c.bf16 %v207_v30, %v206_v46  ;;  %8659 = vmatprep.subr.bf16.mxu0 %v13424_v58 }
 0x90a   :  { %v2731_v63 = vsel %vm212_vm5, %v2720_v32, 0.0  ;;  %v209_v32 = vld [vmem:[%s13344_s3 + $0x28] sm:$0xff] }
 0x90b   :  { %v11223_v42 = vsub.f32 %v11177_v21, %v2703_v35  ;;  %2732 = vadd.xlane.f32.xlu0 %v2731_v63  ;;  %v208_v35 = vld [vmem:[%s13344_s3 + $0x20] sm:$0xff] }
 0x90c   :  { %v2685_v10 = vpop.xlane.xlu1 %2684  ;;  %8661 = vmatpush3.bf16.msra.mxu0 %v8660_v49  ;;  %v8663_v63 = vpack.c.bf16 %v209_v32, %v208_v35 }
 0x90d   :  { %v2704_v19 = vmul.f32 0.03125, %v2685_v10  ;;  %v2721_v37 = vmul.f32 %v11223_v42, %v11223_v42  ;;  %8662 = vmatprep.subr.bf16.mxu0 %v13424_v58 }
 0x90f   :  { %v11229_v55 = vsub.f32 %v11182_v2, %v2704_v19  ;;  %v2734_v22 = vsel %vm212_vm5, %v2721_v37, 0.0 }
 0x910   :  { %v2688_v51 = vpop.xlane.xlu0 %2687  ;;  %2735 = vadd.xlane.f32.xlu1 %v2734_v22  ;;  %8664 = vmatpush3.bf16.msra.mxu0 %v8663_v63 }
 0x911   :  { %v2705_v5 = vmul.f32 0.03125, %v2688_v51  ;;  %v2722_v53 = vmul.f32 %v11229_v55, %v11229_v55  ;;  %8665 = vmatprep.subr.bf16.mxu0 %v13424_v58 }
 0x913   :  { %v11235_v39 = vsub.f32 %v11187_v34, %v2705_v5  ;;  %v2737_v4 = vsel %vm212_vm5, %v2722_v53, 0.0 }
 0x914   :  { %v2691_v9 = vpop.xlane.xlu1 %2690  ;;  %2738 = vadd.xlane.f32.xlu0 %v2737_v4 }
 0x915   :  { %v2706_v18 = vmul.f32 0.03125, %v2691_v9  ;;  %v2723_v26 = vmul.f32 %v11235_v39, %v11235_v39  ;;  %v11301_v9 = vsub.s32 2, %v13432_v40 }
 0x917   :  { %v11241_v44 = vsub.f32 %v11192_v54, %v2706_v18  ;;  %v2740_v36 = vsel %vm212_vm5, %v2723_v26, 0.0  ;;  %13443 = vst [vmem:[#allocation16_spill] sm:$0xff] %v11301_v9 }
 0x918   :  { %v2694_v17 = vpop.xlane.xlu0 %2693  ;;  %2741 = vadd.xlane.f32.xlu1 %v2740_v36  ;;  %v11304_v36 = vsub.s32 3, %v13432_v40 }
 0x919   :  { %v2707_v15 = vmul.f32 0.03125, %v2694_v17  ;;  %v2724_v41 = vmul.f32 %v11241_v44, %v11241_v44 }
 0x91a   :  { %13444 = vst [vmem:[#allocation15_spill] sm:$0xff] %v11304_v36 }
 0x91b   :  { %v11247_v24 = vsub.f32 %v11197_v20, %v2707_v15  ;;  %v2743_v11 = vsel %vm212_vm5, %v2724_v41, 0.0  ;;  %v11308_v15 = vrot.slane %v11162_v60, %v11301_v9 }
 0x91c   :  { %2744 = vadd.xlane.f32.xlu0 %v2743_v11  ;;  %v2697_v8 = vpop.xlane.xlu1 %2696 }
 0x91d   :  { %v2725_v47 = vmul.f32 %v11247_v24, %v11247_v24  ;;  %v2708_v25 = vmul.f32 0.03125, %v2697_v8 }
 0x91f   :  { %v2746_v1 = vsel %vm212_vm5, %v2725_v47, 0.0  ;;  %v11254_v59 = vsub.f32 %v11202_v38, %v2708_v25  ;;  %v11313_v25 = vrot.slane %v11162_v60, %v11304_v36 }
 0x920   :  { %2747 = vadd.xlane.f32.xlu1 %v2746_v1 }
 0x921   :  { %v2726_v57 = vmul.f32 %v11254_v59, %v11254_v59 }
 0x923   :  { %v2749_v31 = vsel %vm212_vm5, %v2726_v57, 0.0 }
 0x924   :  { %2750 = vadd.xlane.f32.xlu0 %v2749_v31 }
 0x934   :  { %v2700_v45 = vpop.xlane.xlu0 %2699 }
 0x935   :  { %v2709_v16 = vmul.f32 0.03125, %v2700_v45 }
 0x937   :  { %v11274_v56 = vsub.f32 %v11207_v14, %v2709_v16 }
 0x939   :  { %v2727_v50 = vmul.f32 %v11274_v56, %v11274_v56 }
 0x93b   :  { %v2752_v3 = vsel %vm212_vm5, %v2727_v50, 0.0 }
 0x93c   :  { %2753 = vadd.xlane.f32.xlu1 %v2752_v3 }
 0x994   :  { %v2730_v10 = vpop.xlane.xlu1 %2729 }
 0x995   :  { %v2755_v19 = vmul.f32 0.03125, %v2730_v10 }
 0x997   :  { %v2764_v37 = vadd.f32 1e-05, %v2755_v19 }
 0x998   :  { %v2733_v22 = vpop.xlane.xlu0 %2732 }
 0x999   :  { %9362 = vrsqrt.f32 %v2764_v37  ;;  %v2756_v51 = vmul.f32 0.03125, %v2733_v22 }
 0x99b   :  { %v2765_v5 = vadd.f32 1e-05, %v2756_v51 }
 0x99d   :  { %v2736_v53 = vpop.xlane.xlu1 %2735  ;;  %9364 = vrsqrt.f32 %v2765_v5 }
 0x99e   :  { %v2757_v4 = vmul.f32 0.03125, %v2736_v53 }
 0x9a0   :  { %v2766_v18 = vadd.f32 1e-05, %v2757_v4 }
 0x9a1   :  { %v2739_v26 = vpop.xlane.xlu0 %2738 }
 0x9a2   :  { %9366 = vrsqrt.f32 %v2766_v18  ;;  %v2758_v17 = vmul.f32 0.03125, %v2739_v26 }
 0x9a3   :  { %v9363_v41 = vpop.eup %9362 }
 0x9a4   :  { %v2767_v11 = vadd.f32 1e-05, %v2758_v17  ;;  %v2782_v8 = vmul.f32 %v9363_v41, %v11212_v28 }
 0x9a5   :  { %v2742_v47 = vpop.xlane.xlu1 %2741 }
 0x9a6   :  { %9368 = vrsqrt.f32 %v2767_v11  ;;  %v2759_v1 = vmul.f32 0.03125, %v2742_v47  ;;  %v2795_v57 = vmul.f32 %v11308_v15, %v2782_v8 }
 0x9a7   :  { %v9365_v6 = vpop.eup %9364 }
 0x9a8   :  { %v2768_v13 = vadd.f32 1e-05, %v2759_v1  ;;  %v2808_v31 = vadd.f32 %v11313_v25, %v2795_v57  ;;  %v2783_v12 = vmul.f32 %v9365_v6, %v11217_v52 }
 0x9a9   :  { %v2745_v48 = vpop.xlane.xlu0 %2744 }
 0x9aa   :  { %9370 = vrsqrt.f32 %v2768_v13  ;;  %v2760_v29 = vmul.f32 0.03125, %v2745_v48  ;;  %7872 = vmatmul.mubr.msk.f32.vlgmr.msra.gmra.mrb[90].mxu1 %vm212_vm5, %v2808_v31  ;;  %v2796_v28 = vmul.f32 %v11308_v15, %v2783_v12  ;;  %v210_v13 = vld [vmem:[%s13344_s3 + $0x30] sm:$0xff]  ;;  %v211_v48 = vld [vmem:[%s13344_s3 + $0x38] sm:$0xff] }
 0x9ab   :  { %7874 = vmatprep.mubr.msk.f32.mxu1 %vm9621_vm3, %v13423_v33  ;;  %v8666_v31 = vpack.c.bf16 %v211_v48, %v210_v13 }
 0x9ac   :  { %v9367_v61 = vpop.eup %9366  ;;  %v2769_v45 = vadd.f32 1e-05, %v2760_v29  ;;  %v2809_v50 = vadd.f32 %v11313_v25, %v2796_v28 }
 0x9ad   :  { %v2748_v16 = vpop.xlane.xlu1 %2747  ;;  %v2784_v3 = vmul.f32 %v9367_v61, %v11223_v42  ;;  %8667 = vmatpush3.bf16.msra.mxu0 %v8666_v31 }
 0x9ae   :  { %9372 = vrsqrt.f32 %v2769_v45  ;;  %v2761_v7 = vmul.f32 0.03125, %v2748_v16  ;;  %7875 = vmatmul.mubr.msk.f32.gmra.mrb[92].mxu1 %vm212_vm5, %v2809_v50  ;;  %8674 = vmatprep.subr.bf16.mxu0 %v13424_v58 }
 0x9af   :  { %v2797_v52 = vmul.f32 %v11308_v15, %v2784_v3  ;;  %7877 = vmatprep.mubr.msk.f32.mxu1 %vm9621_vm3, %v13423_v33 }
 0x9b0   :  { %v9369_v62 = vpop.eup %9368  ;;  %v2770_v46 = vadd.f32 1e-05, %v2761_v7 }
 0x9b1   :  { %v2810_v43 = vadd.f32 %v11313_v25, %v2797_v52  ;;  %v2785_v30 = vmul.f32 %v9369_v62, %v11229_v55  ;;  %v2751_v49 = vpop.xlane.xlu0 %2750 }
 0x9b2   :  { %9374 = vrsqrt.f32 %v2770_v46  ;;  %v2762_v35 = vmul.f32 0.03125, %v2751_v49 }
 0x9b3   :  { %7878 = vmatmul.mubr.msk.f32.gmra.mrb[94].mxu1 %vm212_vm5, %v2810_v43  ;;  %v2798_v42 = vmul.f32 %v11308_v15, %v2785_v30 }
 0x9b4   :  { %v9371_v32 = vpop.eup %9370  ;;  %7880 = vmatprep.mubr.msk.f32.mxu1 %vm9621_vm3, %v13423_v33  ;;  %v2771_v63 = vadd.f32 1e-05, %v2762_v35 }
 0x9b5   :  { %v2811_v10 = vadd.f32 %v11313_v25, %v2798_v42  ;;  %v2786_v19 = vmul.f32 %v9371_v32, %v11235_v39 }
 0x9b6   :  { %9376 = vrsqrt.f32 %v2771_v63 }
 0x9b7   :  { %7881 = vmatmul.mubr.msk.f32.gmra.mrb[96].mxu1 %vm212_vm5, %v2811_v10  ;;  %v2799_v55 = vmul.f32 %v11308_v15, %v2786_v19 }
 0x9b8   :  { %v9373_v37 = vpop.eup %9372  ;;  %7883 = vmatprep.mubr.msk.f32.mxu1 %vm9621_vm3, %v13423_v33 }
 0x9b9   :  { %v2812_v22 = vadd.f32 %v11313_v25, %v2799_v55  ;;  %v2787_v51 = vmul.f32 %v9373_v37, %v11241_v44 }
 0x9bb   :  { %7884 = vmatmul.mubr.msk.f32.gmra.mrb[98].mxu1 %vm212_vm5, %v2812_v22  ;;  %v2800_v5 = vmul.f32 %v11308_v15, %v2787_v51 }
 0x9bc   :  { %v9375_v53 = vpop.eup %9374  ;;  %7886 = vmatprep.mubr.msk.f32.mxu1 %vm9621_vm3, %v13423_v33 }
 0x9bd   :  { %v2813_v39 = vadd.f32 %v11313_v25, %v2800_v5  ;;  %v2788_v4 = vmul.f32 %v9375_v53, %v11247_v24 }
 0x9bf   :  { %7887 = vmatmul.mubr.msk.f32.gmra.mrb[100].mxu1 %vm212_vm5, %v2813_v39  ;;  %v2801_v18 = vmul.f32 %v11308_v15, %v2788_v4 }
 0x9c0   :  { %7889 = vmatprep.mubr.msk.f32.mxu1 %vm9621_vm3, %v13423_v33  ;;  %v9377_v44 = vpop.eup %9376 }
 0x9c1   :  { %v2814_v26 = vadd.f32 %v11313_v25, %v2801_v18  ;;  %v2789_v17 = vmul.f32 %v9377_v44, %v11254_v59 }
 0x9c3   :  { %7890 = vmatmul.mubr.msk.f32.gmra.mrb[102].mxu1 %vm212_vm5, %v2814_v26  ;;  %v2802_v41 = vmul.f32 %v11308_v15, %v2789_v17 }
 0x9c4   :  { %7892 = vmatprep.mubr.msk.f32.mxu1 %vm9621_vm3, %v13423_v33 }
 0x9c5   :  { %v2815_v24 = vadd.f32 %v11313_v25, %v2802_v41 }
 0x9c7   :  { %7893 = vmatmul.mubr.msk.f32.gmra.mrb[104].mxu1 %vm212_vm5, %v2815_v24 }
 0x9c8   :  { %7895 = vmatprep.mubr.msk.f32.mxu1 %vm9621_vm3, %v13423_v33 }
 0x9c9   :  { %v2754_v11 = vpop.xlane.xlu1 %2753 }
 0x9ca   :  { %v2763_v8 = vmul.f32 0.03125, %v2754_v11  ;;  %v13379_v11 = vsub.s32 5, %v13432_v40 }
 0x9cc   :  { %v2772_v47 = vadd.f32 1e-05, %v2763_v8  ;;  %v3117_v8 = vrot.slane %v11162_v60, %v13379_v11 }
 0x9ce   :  { %9378 = vrsqrt.f32 %v2772_v47 }
 0x9d8   :  { %v9379_v1 = vpop.eup %9378 }
 0x9d9   :  { %v2790_v59 = vmul.f32 %v9379_v1, %v11274_v56  ;;  %v13380_v56 = vsub.s32 6, %v13432_v40 }
 0x9db   :  { %v2803_v57 = vmul.f32 %v11308_v15, %v2790_v59  ;;  %v2820_v15 = vrot.slane %v11162_v60, %v13380_v56 }
 0x9dd   :  { %v2816_v6 = vadd.f32 %v11313_v25, %v2803_v57 }
 0x9df   :  { %7896 = vmatmul.mubr.msk.f32.gmra.mrb[106].mxu1 %vm212_vm5, %v2816_v6 }
 0x9e0   :  { %7949 = vmatprep.mubr.msk.f32.mxu1 %vm9621_vm3, %v13423_v33 }
 0xa7d   :  { %v2914_v25 = vpop.f32.mrb[90].mxu1 }
 0xa7e   :  { %v2915_v12 = vadd.f32 %v2914_v25, %v2820_v15  ;;  %v7873_v29 = vpop.f32.mrb[91].mxu1 }
 0xa80   :  { %v2958_v28 = vmax.f32 %v2915_v12, 0.0 }
 0xa81   :  { %v2919_v61 = vpop.f32.mrb[92].mxu1 }
 0xa82   :  { %v2920_v45 = vadd.f32 %v2919_v61, %v2820_v15  ;;  %v7876_v16 = vpop.f32.mrb[93].mxu1  ;;  %7915 = vmatmul.mubr.msk.f32.vlgmr.msra.gmra.mrb[108].mxu0 %vm2967_vm12, %v2958_v28 }
 0xa83   :  { %7917 = vmatprep.mubr.msk.f32.mxu0 %vm9621_vm3, %v13423_v33 }
 0xa84   :  { %v2959_v50 = vmax.f32 %v2920_v45, 0.0 }
 0xa86   :  { %v2924_v3 = vpop.f32.mrb[94].mxu1  ;;  %7918 = vmatmul.mubr.msk.f32.gmra.mrb[110].mxu0 %vm2967_vm12, %v2959_v50 }
 0xa87   :  { %v2925_v7 = vadd.f32 %v2924_v3, %v2820_v15  ;;  %v7879_v52 = vpop.f32.mrb[95].mxu1  ;;  %7920 = vmatprep.mubr.msk.f32.mxu0 %vm9621_vm3, %v13423_v33 }
 0xa89   :  { %v2960_v62 = vmax.f32 %v2925_v7, 0.0 }
 0xa8a   :  { %v2929_v46 = vpop.f32.mrb[96].mxu1 }
 0xa8b   :  { %v2930_v43 = vadd.f32 %v2929_v46, %v2820_v15  ;;  %v7882_v30 = vpop.f32.mrb[97].mxu1  ;;  %7921 = vmatmul.mubr.msk.f32.gmra.mrb[112].mxu0 %vm2967_vm12, %v2960_v62 }
 0xa8c   :  { %7923 = vmatprep.mubr.msk.f32.mxu0 %vm9621_vm3, %v13423_v33 }
 0xa8d   :  { %v2961_v49 = vmax.f32 %v2930_v43, 0.0 }
 0xa8e   :  { %v2934_v35 = vpop.f32.mrb[98].mxu1 }
 0xa8f   :  { %v2935_v42 = vadd.f32 %v2934_v35, %v2820_v15  ;;  %v7885_v32 = vpop.f32.mrb[99].mxu1  ;;  %7924 = vmatmul.mubr.msk.f32.gmra.mrb[114].mxu0 %vm2967_vm12, %v2961_v49 }
 0xa90   :  { %7926 = vmatprep.mubr.msk.f32.mxu0 %vm9621_vm3, %v13423_v33 }
 0xa91   :  { %v2962_v63 = vmax.f32 %v2935_v42, 0.0 }
 0xa92   :  { %v2939_v10 = vpop.f32.mrb[100].mxu1 }
 0xa93   :  { %v2940_v19 = vadd.f32 %v2939_v10, %v2820_v15  ;;  %v7888_v55 = vpop.f32.mrb[101].mxu1  ;;  %7927 = vmatmul.mubr.msk.f32.gmra.mrb[116].mxu0 %vm2967_vm12, %v2962_v63 }
 0xa94   :  { %7929 = vmatprep.mubr.msk.f32.mxu0 %vm9621_vm3, %v13423_v33 }
 0xa95   :  { %v2963_v37 = vmax.f32 %v2940_v19, 0.0 }
 0xa96   :  { %v2944_v22 = vpop.f32.mrb[102].mxu1 }
 0xa97   :  { %v2945_v51 = vadd.f32 %v2944_v22, %v2820_v15  ;;  %v7891_v5 = vpop.f32.mrb[103].mxu1  ;;  %7930 = vmatmul.mubr.msk.f32.gmra.mrb[118].mxu0 %vm2967_vm12, %v2963_v37 }
 0xa98   :  { %7932 = vmatprep.mubr.msk.f32.mxu0 %vm9621_vm3, %v13423_v33 }
 0xa99   :  { %v2964_v53 = vmax.f32 %v2945_v51, 0.0 }
 0xa9a   :  { %v2949_v39 = vpop.f32.mrb[104].mxu1 }
 0xa9b   :  { %7933 = vmatmul.mubr.msk.f32.gmra.mrb[120].mxu0 %vm2967_vm12, %v2964_v53  ;;  %v2950_v4 = vadd.f32 %v2949_v39, %v2820_v15  ;;  %v7894_v18 = vpop.f32.mrb[105].mxu1 }
 0xa9c   :  { %7935 = vmatprep.mubr.msk.f32.mxu0 %vm9621_vm3, %v13423_v33 }
 0xa9d   :  { %v2965_v44 = vmax.f32 %v2950_v4, 0.0 }
 0xa9f   :  { %7936 = vmatmul.mubr.msk.f32.gmra.mrb[122].mxu0 %vm2967_vm12, %v2965_v44 }
 0xaa0   :  { %7938 = vmatprep.mubr.msk.f32.mxu0 %vm9621_vm3, %v13423_v33 }
 0xab2   :  { %v2954_v26 = vpop.f32.mrb[106].mxu1 }
 0xab3   :  { %v2955_v17 = vadd.f32 %v2954_v26, %v2820_v15  ;;  %v7897_v41 = vpop.f32.mrb[107].mxu1 }
 0xab5   :  { %v2966_v24 = vmax.f32 %v2955_v17, 0.0 }
 0xab7   :  { %7939 = vmatmul.mubr.msk.f32.gmra.mrb[124].mxu0 %vm2967_vm12, %v2966_v24 }
 0xab8   :  { %7994 = vmatprep.mubr.msk.f32.mxu0 %vm9621_vm3, %v13423_v33 }
 0xb55   :  { %v3061_v47 = vpop.f32.mrb[108].mxu0 }
 0xb56   :  { %v3105_v1 = vadd.f32 %v3061_v47, %v11167_v23  ;;  %v7916_v59 = vpop.f32.mrb[109].mxu0 }
 0xb58   :  { %v11411_v57 = vadd.f32 %v3117_v8, %v3105_v1 }
 0xb59   :  { %v3066_v6 = vpop.f32.mrb[110].mxu0 }
 0xb5a   :  { %13445 = vst [vmem:[#allocation18_spill] sm:$0xff] %v11411_v57  ;;  %v3106_v13 = vadd.f32 %v3066_v6, %v11172_v27  ;;  %v7919_v48 = vpop.f32.mrb[111].mxu0  ;;  %v3147_v31 = vsel %vm212_vm5, %v11411_v57, 0.0 }
 0xb5b   :  { %3148 = vadd.xlane.f32.xlu0 %v3147_v31 }
 0xb5c   :  { %v11416_v15 = vadd.f32 %v3117_v8, %v3106_v13 }
 0xb5e   :  { %13446 = vst [vmem:[#allocation17_spill] sm:$0xff] %v11416_v15  ;;  %v3071_v25 = vpop.f32.mrb[112].mxu0  ;;  %v3150_v23 = vsel %vm212_vm5, %v11416_v15, 0.0 }
 0xb5f   :  { %v3107_v12 = vadd.f32 %v3071_v25, %v11177_v21  ;;  %v7922_v60 = vpop.f32.mrb[113].mxu0  ;;  %3151 = vadd.xlane.f32.xlu1 %v3150_v23 }
 0xb61   :  { %v11421_v29 = vadd.f32 %v3117_v8, %v3107_v12 }
 0xb62   :  { %v3076_v28 = vpop.f32.mrb[114].mxu0 }
 0xb63   :  { %13447 = vst [vmem:[#allocation6_spill] sm:$0xff] %v11421_v29  ;;  %v3108_v27 = vadd.f32 %v3076_v28, %v11182_v2  ;;  %v7925_v61 = vpop.f32.mrb[115].mxu0  ;;  %v3153_v45 = vsel %vm212_vm5, %v11421_v29, 0.0 }
 0xb64   :  { %3154 = vadd.xlane.f32.xlu0 %v3153_v45 }
 0xb65   :  { %v11426_v16 = vadd.f32 %v3117_v8, %v3108_v27 }
 0xb66   :  { %v3081_v50 = vpop.f32.mrb[116].mxu0 }
 0xb67   :  { %13448 = vst [vmem:[#allocation7_spill] sm:$0xff] %v11426_v16  ;;  %v3109_v21 = vadd.f32 %v3081_v50, %v11187_v34  ;;  %v7928_v3 = vpop.f32.mrb[117].mxu0  ;;  %v3156_v7 = vsel %vm212_vm5, %v11426_v16, 0.0 }
 0xb68   :  { %3157 = vadd.xlane.f32.xlu1 %v3156_v7 }
 0xb69   :  { %v11431_v52 = vadd.f32 %v3117_v8, %v3109_v21 }
 0xb6a   :  { %v3086_v62 = vpop.f32.mrb[118].mxu0 }
 0xb6b   :  { %13449 = vst [vmem:[#allocation8_spill] sm:$0xff] %v11431_v52  ;;  %v3110_v2 = vadd.f32 %v3086_v62, %v11192_v54  ;;  %v7931_v46 = vpop.f32.mrb[119].mxu0  ;;  %v3159_v43 = vsel %vm212_vm5, %v11431_v52, 0.0 }
 0xb6c   :  { %3160 = vadd.xlane.f32.xlu0 %v3159_v43 }
 0xb6d   :  { %v11436_v30 = vadd.f32 %v3117_v8, %v3110_v2 }
 0xb6e   :  { %v3091_v49 = vpop.f32.mrb[120].mxu0 }
 0xb6f   :  { %13450 = vst [vmem:[#allocation9_spill] sm:$0xff] %v11436_v30  ;;  %v3111_v34 = vadd.f32 %v3091_v49, %v11197_v20  ;;  %v7934_v35 = vpop.f32.mrb[121].mxu0  ;;  %v3162_v42 = vsel %vm212_vm5, %v11436_v30, 0.0 }
 0xb70   :  { %3163 = vadd.xlane.f32.xlu1 %v3162_v42 }
 0xb71   :  { %v11441_v32 = vadd.f32 %v3117_v8, %v3111_v34 }
 0xb72   :  { %v3096_v63 = vpop.f32.mrb[122].mxu0 }
 0xb73   :  { %13451 = vst [vmem:[#allocation10_spill] sm:$0xff] %v11441_v32  ;;  %v3165_v54 = vsel %vm212_vm5, %v11441_v32, 0.0  ;;  %v3112_v10 = vadd.f32 %v3096_v63, %v11202_v38  ;;  %v7937_v19 = vpop.f32.mrb[123].mxu0 }
 0xb74   :  { %3166 = vadd.xlane.f32.xlu0 %v3165_v54  ;;  %v6787_v54 = vld [vmem:[%s13343_s2 + $0x40] sm:$0xff] }
 0xb75   :  { %v11446_v55 = vadd.f32 %v3117_v8, %v3112_v10  ;;  %v6789_v10 = vld [vmem:[%s13343_s2 + $0x50] sm:$0xff] }
 0xb76   :  { %v8669_v19 = vpack.c.bf16 %v6789_v10, %v6787_v54 }
 0xb77   :  { %13452 = vst [vmem:[#allocation11_spill] sm:$0xff] %v11446_v55  ;;  %v3168_v20 = vsel %vm212_vm5, %v11446_v55, 0.0 }
 0xb78   :  { %3169 = vadd.xlane.f32.xlu1 %v3168_v20  ;;  %8670 = vmatpush3.bf16.msra.mxu1 %v8669_v19 }
 0xb79   :  { %8671 = vmatprep.subr.bf16.mxu1 %v13424_v58 }
 0xb8a   :  { %v3101_v37 = vpop.f32.mrb[124].mxu0 }
 0xb8b   :  { %v3113_v22 = vadd.f32 %v3101_v37, %v11207_v14  ;;  %v7940_v51 = vpop.f32.mrb[125].mxu0  ;;  %v6791_v37 = vld [vmem:[%s13343_s2 + $0x60] sm:$0xff] }
 0xb8d   :  { %v11451_v5 = vadd.f32 %v3117_v8, %v3113_v22  ;;  %v6793_v22 = vld [vmem:[%s13343_s2 + $0x70] sm:$0xff] }
 0xb8e   :  { %v8672_v51 = vpack.c.bf16 %v6793_v22, %v6791_v37 }
 0xb8f   :  { %13453 = vst [vmem:[#allocation12_spill] sm:$0xff] %v11451_v5  ;;  %v3171_v53 = vsel %vm212_vm5, %v11451_v5, 0.0 }
 0xb90   :  { %3172 = vadd.xlane.f32.xlu0 %v3171_v53  ;;  %8673 = vmatpush3.bf16.msra.mxu1 %v8672_v51 }
 0xb91   :  { %8690 = vmatprep.subr.bf16.mxu1 %v13424_v58 }
 0xbe8   :  { %v3149_v39 = vpop.xlane.xlu0 %3148 }
 0xbe9   :  { %v3174_v38 = vmul.f32 0.03125, %v3149_v39 }
 0xbeb   :  { %v11456_v4 = vsub.f32 %v11411_v57, %v3174_v38 }
 0xbec   :  { %v3152_v18 = vpop.xlane.xlu1 %3151 }
 0xbed   :  { %v3175_v44 = vmul.f32 0.03125, %v3152_v18  ;;  %v3192_v26 = vmul.f32 %v11456_v4, %v11456_v4 }
 0xbef   :  { %v11461_v17 = vsub.f32 %v11416_v15, %v3175_v44  ;;  %v3201_v14 = vsel %vm212_vm5, %v3192_v26, 0.0 }
 0xbf0   :  { %3202 = vadd.xlane.f32.xlu1 %v3201_v14 }
 0xbf1   :  { %v3155_v41 = vpop.xlane.xlu0 %3154  ;;  %v3193_v8 = vmul.f32 %v11461_v17, %v11461_v17 }
 0xbf2   :  { %v3176_v24 = vmul.f32 0.03125, %v3155_v41 }
 0xbf3   :  { %v3204_v1 = vsel %vm212_vm5, %v3193_v8, 0.0 }
 0xbf4   :  { %v11467_v47 = vsub.f32 %v11421_v29, %v3176_v24  ;;  %3205 = vadd.xlane.f32.xlu0 %v3204_v1 }
 0xbf5   :  { %v3158_v59 = vpop.xlane.xlu1 %3157 }
 0xbf6   :  { %v3177_v6 = vmul.f32 0.03125, %v3158_v59  ;;  %v3194_v13 = vmul.f32 %v11467_v47, %v11467_v47 }
 0xbf8   :  { %v11473_v48 = vsub.f32 %v11426_v16, %v3177_v6  ;;  %v3207_v31 = vsel %vm212_vm5, %v3194_v13, 0.0  ;;  %v11526_v13 = vld [vmem:[%s13345_s4 + $0x8] sm:$0xff] }
 0xbf9   :  { %v3161_v25 = vpop.xlane.xlu0 %3160  ;;  %3208 = vadd.xlane.f32.xlu1 %v3207_v31 }
 0xbfa   :  { %v3178_v12 = vmul.f32 0.03125, %v3161_v25  ;;  %v3195_v60 = vmul.f32 %v11473_v48, %v11473_v48 }
 0xbfc   :  { %v11479_v23 = vsub.f32 %v11431_v52, %v3178_v12  ;;  %v3210_v28 = vsel %vm212_vm5, %v3195_v60, 0.0  ;;  %v13454_v60 = vsub.s32 0, %v13432_v40 }
 0xbfd   :  { %v3164_v27 = vpop.xlane.xlu1 %3163  ;;  %3211 = vadd.xlane.f32.xlu0 %v3210_v28 }
 0xbfe   :  { %v3179_v61 = vmul.f32 0.03125, %v3164_v27  ;;  %v3196_v45 = vmul.f32 %v11479_v23, %v11479_v23  ;;  %v11531_v28 = vrot.slane %v11526_v13, %v13454_v60 }
 0xc00   :  { %v11485_v50 = vsub.f32 %v11436_v30, %v3179_v61  ;;  %v3213_v21 = vsel %vm212_vm5, %v3196_v45, 0.0  ;;  %v13455_v45 = vld [vmem:[#allocation20_spill] sm:$0xff] }
 0xc01   :  { %v3167_v3 = vpop.xlane.xlu0 %3166  ;;  %3214 = vadd.xlane.f32.xlu1 %v3213_v21  ;;  %v11535_v21 = vrot.slane %v11526_v13, %v13455_v45 }
 0xc02   :  { %v3180_v7 = vmul.f32 0.03125, %v3167_v3  ;;  %v3197_v62 = vmul.f32 %v11485_v50, %v11485_v50 }
 0xc04   :  { %v11491_v2 = vsub.f32 %v11441_v32, %v3180_v7  ;;  %v3216_v46 = vsel %vm212_vm5, %v3197_v62, 0.0 }
 0xc05   :  { %3217 = vadd.xlane.f32.xlu0 %v3216_v46  ;;  %v3170_v43 = vpop.xlane.xlu1 %3169 }
 0xc06   :  { %v3198_v49 = vmul.f32 %v11491_v2, %v11491_v2  ;;  %v3181_v34 = vmul.f32 0.03125, %v3170_v43 }
 0xc08   :  { %v3219_v35 = vsel %vm212_vm5, %v3198_v49, 0.0  ;;  %v11498_v42 = vsub.f32 %v11446_v55, %v3181_v34 }
 0xc09   :  { %3220 = vadd.xlane.f32.xlu1 %v3219_v35 }
 0xc0a   :  { %v3199_v63 = vmul.f32 %v11498_v42, %v11498_v42 }
 0xc0c   :  { %v3222_v20 = vsel %vm212_vm5, %v3199_v63, 0.0 }
 0xc0d   :  { %3223 = vadd.xlane.f32.xlu0 %v3222_v20 }
 0xc1d   :  { %v3173_v53 = vpop.xlane.xlu0 %3172 }
 0xc1e   :  { %v3182_v39 = vmul.f32 0.03125, %v3173_v53 }
 0xc20   :  { %v11518_v38 = vsub.f32 %v11451_v5, %v3182_v39 }
 0xc22   :  { %v3200_v18 = vmul.f32 %v11518_v38, %v11518_v38 }
 0xc24   :  { %v3225_v44 = vsel %vm212_vm5, %v3200_v18, 0.0 }
 0xc25   :  { %3226 = vadd.xlane.f32.xlu1 %v3225_v44 }
 0xc7d   :  { %v3203_v26 = vpop.xlane.xlu1 %3202 }
 0xc7e   :  { %v3228_v14 = vmul.f32 0.03125, %v3203_v26 }
 0xc80   :  { %v3237_v41 = vadd.f32 1e-05, %v3228_v14 }
 0xc81   :  { %v3206_v24 = vpop.xlane.xlu0 %3205 }
 0xc82   :  { %9380 = vrsqrt.f32 %v3237_v41  ;;  %v3229_v8 = vmul.f32 0.03125, %v3206_v24 }
 0xc84   :  { %v3238_v1 = vadd.f32 1e-05, %v3229_v8 }
 0xc86   :  { %v3209_v59 = vpop.xlane.xlu1 %3208  ;;  %9382 = vrsqrt.f32 %v3238_v1 }
 0xc87   :  { %v3230_v6 = vmul.f32 0.03125, %v3209_v59 }
 0xc89   :  { %v3239_v31 = vadd.f32 1e-05, %v3230_v6 }
 0xc8a   :  { %v3212_v25 = vpop.xlane.xlu0 %3211 }
 0xc8b   :  { %9384 = vrsqrt.f32 %v3239_v31  ;;  %v3231_v12 = vmul.f32 0.03125, %v3212_v25 }
 0xc8c   :  { %v9381_v27 = vpop.eup %9380 }
 0xc8d   :  { %v3240_v61 = vadd.f32 1e-05, %v3231_v12  ;;  %v3255_v3 = vmul.f32 %v9381_v27, %v11456_v4 }
 0xc8e   :  { %v3215_v7 = vpop.xlane.xlu1 %3214 }
 0xc8f   :  { %9386 = vrsqrt.f32 %v3240_v61  ;;  %v3232_v62 = vmul.f32 0.03125, %v3215_v7  ;;  %v3268_v46 = vmul.f32 %v11531_v28, %v3255_v3 }
 0xc90   :  { %v9383_v43 = vpop.eup %9382 }
 0xc91   :  { %v3241_v49 = vadd.f32 1e-05, %v3232_v62  ;;  %v3281_v35 = vadd.f32 %v11535_v21, %v3268_v46  ;;  %v3256_v63 = vmul.f32 %v9383_v43, %v11461_v17 }
 0xc92   :  { %v3218_v34 = vpop.xlane.xlu0 %3217 }
 0xc93   :  { %9388 = vrsqrt.f32 %v3241_v49  ;;  %v3233_v54 = vmul.f32 0.03125, %v3218_v34  ;;  %7950 = vmatmul.mubr.msk.f32.vlgmr.msra.gmra.mrb[108].mxu1 %vm212_vm5, %v3281_v35  ;;  %v3269_v10 = vmul.f32 %v11531_v28, %v3256_v63 }
 0xc94   :  { %7952 = vmatprep.mubr.msk.f32.mxu1 %vm9621_vm3, %v13423_v33 }
 0xc95   :  { %v9385_v19 = vpop.eup %9384  ;;  %v3242_v4 = vadd.f32 1e-05, %v3233_v54  ;;  %v3282_v37 = vadd.f32 %v11535_v21, %v3269_v10  ;;  %v13456_v54 = vsub.s32 7, %v13432_v40 }
 0xc96   :  { %v3221_v20 = vpop.xlane.xlu1 %3220  ;;  %v3257_v22 = vmul.f32 %v9385_v19, %v11467_v47 }
 0xc97   :  { %9390 = vrsqrt.f32 %v3242_v4  ;;  %v3234_v51 = vmul.f32 0.03125, %v3221_v20  ;;  %7953 = vmatmul.mubr.msk.f32.gmra.mrb[110].mxu1 %vm212_vm5, %v3282_v37  ;;  %v3293_v10 = vrot.slane %v11526_v13, %v13456_v54 }
 0xc98   :  { %v3270_v17 = vmul.f32 %v11531_v28, %v3257_v22  ;;  %7955 = vmatprep.mubr.msk.f32.mxu1 %vm9621_vm3, %v13423_v33 }
 0xc99   :  { %v9387_v53 = vpop.eup %9386  ;;  %v3243_v39 = vadd.f32 1e-05, %v3234_v51 }
 0xc9a   :  { %v3283_v18 = vadd.f32 %v11535_v21, %v3270_v17  ;;  %v3258_v44 = vmul.f32 %v9387_v53, %v11473_v48  ;;  %v3224_v26 = vpop.xlane.xlu0 %3223 }
 0xc9b   :  { %9392 = vrsqrt.f32 %v3243_v39  ;;  %v3235_v14 = vmul.f32 0.03125, %v3224_v26 }
 0xc9c   :  { %7956 = vmatmul.mubr.msk.f32.gmra.mrb[112].mxu1 %vm212_vm5, %v3283_v18  ;;  %v3271_v47 = vmul.f32 %v11531_v28, %v3258_v44 }
 0xc9d   :  { %v9389_v41 = vpop.eup %9388  ;;  %7958 = vmatprep.mubr.msk.f32.mxu1 %vm9621_vm3, %v13423_v33  ;;  %v3244_v24 = vadd.f32 1e-05, %v3235_v14 }
 0xc9e   :  { %v3284_v8 = vadd.f32 %v11535_v21, %v3271_v47  ;;  %v3259_v1 = vmul.f32 %v9389_v41, %v11479_v23 }
 0xc9f   :  { %9394 = vrsqrt.f32 %v3244_v24 }
 0xca0   :  { %7959 = vmatmul.mubr.msk.f32.gmra.mrb[114].mxu1 %vm212_vm5, %v3284_v8  ;;  %v3272_v48 = vmul.f32 %v11531_v28, %v3259_v1 }
 0xca1   :  { %v9391_v59 = vpop.eup %9390  ;;  %7961 = vmatprep.mubr.msk.f32.mxu1 %vm9621_vm3, %v13423_v33 }
 0xca2   :  { %v3285_v6 = vadd.f32 %v11535_v21, %v3272_v48  ;;  %v3260_v31 = vmul.f32 %v9391_v59, %v11485_v50 }
 0xca4   :  { %7962 = vmatmul.mubr.msk.f32.gmra.mrb[116].mxu1 %vm212_vm5, %v3285_v6  ;;  %v3273_v25 = vmul.f32 %v11531_v28, %v3260_v31 }
 0xca5   :  { %v9393_v12 = vpop.eup %9392  ;;  %7964 = vmatprep.mubr.msk.f32.mxu1 %vm9621_vm3, %v13423_v33 }
 0xca6   :  { %v3286_v23 = vadd.f32 %v11535_v21, %v3273_v25  ;;  %v3261_v60 = vmul.f32 %v9393_v12, %v11491_v2 }
 0xca8   :  { %7965 = vmatmul.mubr.msk.f32.gmra.mrb[118].mxu1 %vm212_vm5, %v3286_v23  ;;  %v3274_v27 = vmul.f32 %v11531_v28, %v3261_v60 }
 0xca9   :  { %7967 = vmatprep.mubr.msk.f32.mxu1 %vm9621_vm3, %v13423_v33  ;;  %v9395_v50 = vpop.eup %9394 }
 0xcaa   :  { %v3287_v61 = vadd.f32 %v11535_v21, %v3274_v27  ;;  %v3262_v3 = vmul.f32 %v9395_v50, %v11498_v42 }
 0xcac   :  { %7968 = vmatmul.mubr.msk.f32.gmra.mrb[120].mxu1 %vm212_vm5, %v3287_v61  ;;  %v3275_v7 = vmul.f32 %v11531_v28, %v3262_v3 }
 0xcad   :  { %7970 = vmatprep.mubr.msk.f32.mxu1 %vm9621_vm3, %v13423_v33 }
 0xcae   :  { %v3288_v2 = vadd.f32 %v11535_v21, %v3275_v7 }
 0xcb0   :  { %7971 = vmatmul.mubr.msk.f32.gmra.mrb[122].mxu1 %vm212_vm5, %v3288_v2 }
 0xcb1   :  { %7973 = vmatprep.mubr.msk.f32.mxu1 %vm9621_vm3, %v13423_v33 }
 0xcb2   :  { %v3227_v62 = vpop.xlane.xlu1 %3226 }
 0xcb3   :  { %v3236_v46 = vmul.f32 0.03125, %v3227_v62 }
 0xcb5   :  { %v3245_v43 = vadd.f32 1e-05, %v3236_v46 }
 0xcb7   :  { %9396 = vrsqrt.f32 %v3245_v43 }
 0xcc1   :  { %v9397_v49 = vpop.eup %9396 }
 0xcc2   :  { %v3263_v42 = vmul.f32 %v9397_v49, %v11518_v38 }
 0xcc4   :  { %v3276_v34 = vmul.f32 %v11531_v28, %v3263_v42 }
 0xcc6   :  { %v3289_v35 = vadd.f32 %v11535_v21, %v3276_v34 }
 0xcc8   :  { %7974 = vmatmul.mubr.msk.f32.gmra.mrb[124].mxu1 %vm212_vm5, %v3289_v35 }
 0xcc9   :  { %8039 = vmatprep.mubr.msk.f32.mxu1 %vm9621_vm3, %v13423_v33 }
 0xd66   :  { %v3387_v63 = vpop.f32.mrb[108].mxu1 }
 0xd67   :  { %v7951_v19 = vpop.f32.mrb[109].mxu1  ;;  %v11594_v20 = vadd.f32 %v3387_v63, %v3293_v10 }
 0xd6a   :  { %v3392_v4 = vpop.f32.mrb[110].mxu1 }
 0xd6b   :  { %v11596_v37 = vadd.f32 %v3392_v4, %v3293_v10  ;;  %v7954_v38 = vpop.f32.mrb[111].mxu1 }
 0xd6d   :  { %v11600_v28 = vpack.i.bf16 %v11596_v37, %v11594_v20 }
 0xd6f   :  { %v3397_v21 = vpop.f32.mrb[112].mxu1  ;;  %9031 = vrot.lane.b32.xlu0 %v11600_v28, %s9623_s17 }
 0xd70   :  { %v7957_v22 = vpop.f32.mrb[113].mxu1  ;;  %v11604_v17 = vadd.f32 %v3397_v21, %v3293_v10 }
 0xd73   :  { %v3402_v51 = vpop.f32.mrb[114].mxu1 }
 0xd74   :  { %v11606_v13 = vadd.f32 %v3402_v51, %v3293_v10  ;;  %v7960_v53 = vpop.f32.mrb[115].mxu1 }
 0xd76   :  { %v11610_v39 = vpack.i.bf16 %v11606_v13, %v11604_v17 }
 0xd77   :  { %v3407_v18 = vpop.f32.mrb[116].mxu1 }
 0xd78   :  { %9036 = vrot.lane.b32.xlu1 %v11610_v39, %s9623_s17  ;;  %v7963_v44 = vpop.f32.mrb[117].mxu1  ;;  %v11614_v14 = vadd.f32 %v3407_v18, %v3293_v10 }
 0xd7b   :  { %v3412_v26 = vpop.f32.mrb[118].mxu1 }
 0xd7c   :  { %v11616_v47 = vadd.f32 %v3412_v26, %v3293_v10  ;;  %v7966_v41 = vpop.f32.mrb[119].mxu1 }
 0xd7e   :  { %v11620_v24 = vpack.i.bf16 %v11616_v47, %v11614_v14 }
 0xd7f   :  { %v3417_v8 = vpop.f32.mrb[120].mxu1 }
 0xd80   :  { %9041 = vrot.lane.b32.xlu1 %v11620_v24, %s9623_s17  ;;  %v7969_v1 = vpop.f32.mrb[121].mxu1  ;;  %v11624_v59 = vadd.f32 %v3417_v8, %v3293_v10 }
 0xd83   :  { %v3422_v48 = vpop.f32.mrb[122].mxu1 }
 0xd84   :  { %v11626_v6 = vadd.f32 %v3422_v48, %v3293_v10  ;;  %v7972_v31 = vpop.f32.mrb[123].mxu1 }
 0xd86   :  { %v11630_v25 = vpack.i.bf16 %v11626_v6, %v11624_v59 }
 0xd88   :  { %9046 = vrot.lane.b32.xlu0 %v11630_v25, %s9623_s17 }
 0xd8c   :  { %9051 = vrot.lane.b32.xlu0 %v11600_v28, %s9624_s18 }
 0xd90   :  { %9061 = vrot.lane.b32.xlu0 %v11620_v24, %s9624_s18 }
 0xd9b   :  { %v3427_v12 = vpop.f32.mrb[124].mxu1 }
 0xd9c   :  { %v11638_v23 = vadd.f32 %v3427_v12, %v3293_v10  ;;  %v7975_v60 = vpop.f32.mrb[125].mxu1 }
 0xd9e   :  { %3928 = vrot.lane.b32.xlu0 %v11638_v23, %s9624_s18  ;;  %3456 = vrot.lane.b32.xlu1 %v11638_v23, %s9623_s17 }
 0xda2   :  { %3894 = vrot.lane.b32.xlu0 %v11594_v20, %s9626_s20  ;;  %9056 = vrot.lane.b32.xlu1 %v11610_v39, %s9624_s18 }
 0xda6   :  { %9076 = vrot.lane.b32.xlu0 %v11610_v39, %s9625_s19  ;;  %9066 = vrot.lane.b32.xlu1 %v11630_v25, %s9624_s18 }
 0xdaa   :  { %3900 = vrot.lane.b32.xlu0 %v11606_v13, %s9626_s20  ;;  %9071 = vrot.lane.b32.xlu1 %v11600_v28, %s9625_s19 }
 0xdae   :  { %3902 = vrot.lane.b32.xlu0 %v11614_v14, %s9626_s20  ;;  %3896 = vrot.lane.b32.xlu1 %v11596_v37, %s9626_s20 }
 0xdb2   :  { %9086 = vrot.lane.b32.xlu0 %v11630_v25, %s9625_s19  ;;  %3898 = vrot.lane.b32.xlu1 %v11604_v17, %s9626_s20 }
 0xdb6   :  { %3908 = vrot.lane.b32.xlu0 %v11626_v6, %s9626_s20  ;;  %9081 = vrot.lane.b32.xlu1 %v11620_v24, %s9625_s19 }
 0xdba   :  { %4436 = vrot.lane.b32.xlu0 %v11638_v23, %s9625_s19  ;;  %3904 = vrot.lane.b32.xlu1 %v11616_v47, %s9626_s20 }
 0xdbe   :  { %4402 = vrot.lane.b32.xlu0 %v11594_v20, %s9628_s22  ;;  %3906 = vrot.lane.b32.xlu1 %v11624_v59, %s9626_s20 }
 0xdc2   :  { %9096 = vrot.lane.b32.xlu0 %v11610_v39, %s9627_s21  ;;  %3910 = vrot.lane.b32.xlu1 %v11638_v23, %s9626_s20 }
 0xdc6   :  { %4408 = vrot.lane.b32.xlu0 %v11606_v13, %s9628_s22  ;;  %9091 = vrot.lane.b32.xlu1 %v11600_v28, %s9627_s21 }
 0xdca   :  { %4410 = vrot.lane.b32.xlu0 %v11614_v14, %s9628_s22  ;;  %4404 = vrot.lane.b32.xlu1 %v11596_v37, %s9628_s22 }
 0xdce   :  { %9106 = vrot.lane.b32.xlu0 %v11630_v25, %s9627_s21  ;;  %4406 = vrot.lane.b32.xlu1 %v11604_v17, %s9628_s22 }
 0xdd2   :  { %4416 = vrot.lane.b32.xlu0 %v11626_v6, %s9628_s22  ;;  %9101 = vrot.lane.b32.xlu1 %v11620_v24, %s9627_s21 }
 0xdd6   :  { %4944 = vrot.lane.b32.xlu0 %v11638_v23, %s9627_s21  ;;  %4412 = vrot.lane.b32.xlu1 %v11616_v47, %s9628_s22 }
 0xdda   :  { %4912 = vrot.lane.b32.xlu0 %v11596_v37, %s9629_s23  ;;  %4414 = vrot.lane.b32.xlu1 %v11624_v59, %s9628_s22 }
 0xdde   :  { %4916 = vrot.lane.b32.xlu0 %v11606_v13, %s9629_s23  ;;  %4418 = vrot.lane.b32.xlu1 %v11638_v23, %s9628_s22 }
 0xde1   :  { %v9032_v27 = vpop.permute.xlu0 %9031 }
 0xde2   :  { %v9034_v50 = vunpack.i.h.bf16 %v9032_v27  ;;  %v9033_v61 = vunpack.i.l.bf16 %v9032_v27  ;;  %4920 = vrot.lane.b32.xlu0 %v11616_v47, %s9629_s23  ;;  %4910 = vrot.lane.b32.xlu1 %v11594_v20, %s9629_s23 }
 0xde4   :  { %v8675_v3 = vpack.c.bf16 %v9034_v50, %v9033_v61 }
 0xde6   :  { %4924 = vrot.lane.b32.xlu0 %v11626_v6, %s9629_s23  ;;  %4914 = vrot.lane.b32.xlu1 %v11604_v17, %s9629_s23 }
 0xde7   :  { %8677 = vmatpush3.bf16.xpose.msk.msra.mxu0 %vm10091_vm7, %v8675_v3 }
 0xde8   :  { %8678 = vmatprep.subr.bf16.mxu0 %v13424_v58 }
 0xdea   :  { %v9037_v2 = vpop.permute.xlu1 %9036  ;;  %9111 = vrot.lane.b32.xlu0 %v11600_v28, %s9630_s24  ;;  %4918 = vrot.lane.b32.xlu1 %v11614_v14, %s9629_s23 }
 0xdeb   :  { %v9039_v62 = vunpack.i.h.bf16 %v9037_v2  ;;  %v9038_v46 = vunpack.i.l.bf16 %v9037_v2 }
 0xded   :  { %v8679_v43 = vpack.c.bf16 %v9039_v62, %v9038_v46 }
 0xdee   :  { %9121 = vrot.lane.b32.xlu0 %v11620_v24, %s9630_s24  ;;  %4922 = vrot.lane.b32.xlu1 %v11624_v59, %s9629_s23 }
 0xdef   :  { %8681 = vmatpush3.bf16.xpose.msk.msra.mxu0 %vm10091_vm7, %v8679_v43 }
 0xdf0   :  { %8682 = vmatprep.subr.bf16.mxu0 %v13424_v58 }
 0xdf2   :  { %v9042_v49 = vpop.permute.xlu1 %9041  ;;  %9136 = vrot.lane.b32.xlu0 %v11610_v39, %s9631_s25  ;;  %4926 = vrot.lane.b32.xlu1 %v11638_v23, %s9629_s23 }
 0xdf3   :  { %v9044_v42 = vunpack.i.h.bf16 %v9042_v49  ;;  %v9043_v34 = vunpack.i.l.bf16 %v9042_v49 }
 0xdf5   :  { %v8683_v35 = vpack.c.bf16 %v9044_v42, %v9043_v34 }
 0xdf6   :  { %9146 = vrot.lane.b32.xlu0 %v11630_v25, %s9631_s25  ;;  %9116 = vrot.lane.b32.xlu1 %v11610_v39, %s9630_s24 }
 0xdf7   :  { %8685 = vmatpush3.bf16.xpose.msk.msra.mxu0 %vm10091_vm7, %v8683_v35 }
 0xdf8   :  { %8686 = vmatprep.subr.bf16.mxu0 %v13424_v58 }
 0xdfa   :  { %9151 = vrot.lane.b32.xlu0 %v11600_v28, %s9632_s26  ;;  %9126 = vrot.lane.b32.xlu1 %v11630_v25, %s9630_s24  ;;  %v9047_v63 = vpop.permute.xlu0 %9046 }
 0xdfb   :  { %v9049_v54 = vunpack.i.h.bf16 %v9047_v63  ;;  %v9048_v10 = vunpack.i.l.bf16 %v9047_v63 }
 0xdfd   :  { %v8687_v19 = vpack.c.bf16 %v9049_v54, %v9048_v10 }
 0xdfe   :  { %9156 = vrot.lane.b32.xlu0 %v11610_v39, %s9632_s26  ;;  %9131 = vrot.lane.b32.xlu1 %v11600_v28, %s9631_s25  ;;  %v9052_v4 = vpop.permute.xlu0 %9051 }
 0xdff   :  { %8689 = vmatpush3.bf16.xpose.msk.msra.mxu0 %vm10091_vm7, %v8687_v19  ;;  %v9054_v21 = vunpack.i.h.bf16 %v9052_v4  ;;  %v9053_v22 = vunpack.i.l.bf16 %v9052_v4 }
 0xe00   :  { %7992 = vmatprep.subr.mxu0 %v13423_v33 }
 0xe01   :  { %v8703_v18 = vpack.c.bf16 %v9054_v21, %v9053_v22 }
 0xe02   :  { %9161 = vrot.lane.b32.xlu0 %v11620_v24, %s9632_s26  ;;  %9141 = vrot.lane.b32.xlu1 %v11620_v24, %s9631_s25  ;;  %v9062_v38 = vpop.permute.xlu0 %9061 }
 0xe03   :  { %v9064_v60 = vunpack.i.h.bf16 %v9062_v38 }
 0xe06   :  { %9166 = vrot.lane.b32.xlu0 %v11630_v25, %s9632_s26  ;;  %4209 = vrot.lane.b32.xlu1 %v11638_v23, %s9631_s25 }
 0xe0a   :  { %3737 = vrot.lane.b32.xlu0 %v11638_v23, %s9630_s24 }
 0xe10   :  { %v3457_v51 = vpop.permute.xlu1 %3456  ;;  %v3929_v53 = vpop.permute.xlu0 %3928 }
 0xe11   :  { %7993 = vmatpush3.xpose.msk.msra.mxu0 %vm525_vm6, %v3457_v51 }
 0xe12   :  { %8702 = vmatprep.subr.bf16.mxu0 %v13424_v58 }
 0xe14   :  { %v9057_v44 = vpop.permute.xlu1 %9056  ;;  %v3895_v26 = vpop.permute.xlu0 %3894  ;;  %7995 = vmatmul.mubr.msk.f32.vlgmr.msra.gmra.mrb[126].mxu0 %vm525_vm6, %v11594_v20 }
 0xe15   :  { %8705 = vmatpush3.bf16.xpose.msk.msra.mxu0 %vm10091_vm7, %v8703_v18  ;;  %7997 = vmatprep.mubr.msk.f32.mxu0 %vm9621_vm3, %v13423_v33  ;;  %v9059_v41 = vunpack.i.h.bf16 %v9057_v44  ;;  %v9058_v8 = vunpack.i.l.bf16 %v9057_v44 }
 0xe16   :  { %8706 = vmatprep.subr.bf16.mxu0 %v13424_v58 }
 0xe17   :  { %v8707_v31 = vpack.c.bf16 %v9059_v41, %v9058_v8 }
 0xe18   :  { %v9067_v1 = vpop.permute.xlu1 %9066  ;;  %v9077_v48 = vpop.permute.xlu0 %9076  ;;  %7998 = vmatmul.mubr.msk.f32.gmra.mrb[128].mxu0 %vm525_vm6, %v11596_v37  ;;  %v9063_v37 = vunpack.i.l.bf16 %v9062_v38 }
 0xe19   :  { %8000 = vmatprep.mubr.msk.f32.mxu0 %vm9621_vm3, %v13423_v33  ;;  %v9069_v2 = vunpack.i.h.bf16 %v9067_v1  ;;  %v9079_v19 = vunpack.i.h.bf16 %v9077_v48  ;;  %v9078_v4 = vunpack.i.l.bf16 %v9077_v48 }
 0xe1b   :  { %v8735_v22 = vpack.c.bf16 %v9079_v19, %v9078_v4 }
 0xe1c   :  { %v9072_v20 = vpop.permute.xlu1 %9071  ;;  %v11775_v12 = vpop.permute.xlu0 %3900  ;;  %8001 = vmatmul.mubr.msk.f32.gmra.mrb[130].mxu0 %vm525_vm6, %v11604_v17  ;;  %v8711_v17 = vpack.c.bf16 %v9064_v60, %v9063_v37 }
 0xe1d   :  { %8709 = vmatpush3.bf16.xpose.msk.msra.mxu0 %vm10091_vm7, %v8707_v31  ;;  %8003 = vmatprep.mubr.msk.f32.mxu0 %vm9621_vm3, %v13423_v33  ;;  %v9074_v34 = vunpack.i.h.bf16 %v9072_v20  ;;  %v9073_v35 = vunpack.i.l.bf16 %v9072_v20 }
 0xe1e   :  { %8710 = vmatprep.subr.bf16.mxu0 %v13424_v58 }
 0xe1f   :  { %v8731_v54 = vpack.c.bf16 %v9074_v34, %v9073_v35 }
 0xe20   :  { %v3897_v27 = vpop.permute.xlu1 %3896  ;;  %v11784_v50 = vpop.permute.xlu0 %3902  ;;  %8004 = vmatmul.mubr.msk.f32.gmra.mrb[132].mxu0 %vm525_vm6, %v11606_v13  ;;  %v9068_v13 = vunpack.i.l.bf16 %v9067_v1 }
 0xe21   :  { %8006 = vmatprep.mubr.msk.f32.mxu0 %vm9621_vm3, %v13423_v33 }
 0xe24   :  { %v3899_v61 = vpop.permute.xlu1 %3898  ;;  %v11790_v3 = vpop.permute.xlu0 %9086  ;;  %8007 = vmatmul.mubr.msk.f32.gmra.mrb[134].mxu0 %vm525_vm6, %v11614_v14  ;;  %v8715_v14 = vpack.c.bf16 %v9069_v2, %v9068_v13 }
 0xe25   :  { %8713 = vmatpush3.bf16.xpose.msk.msra.mxu0 %vm10091_vm7, %v8711_v17  ;;  %8009 = vmatprep.mubr.msk.f32.mxu0 %vm9621_vm3, %v13423_v33  ;;  %v9089_v31 = vunpack.i.h.bf16 %v11790_v3  ;;  %v9088_v20 = vunpack.i.l.bf16 %v11790_v3 }
 0xe26   :  { %8714 = vmatprep.subr.bf16.mxu0 %v13424_v58 }
 0xe27   :  { %v8743_v37 = vpack.c.bf16 %v9089_v31, %v9088_v20 }
 0xe28   :  { %v9082_v62 = vpop.permute.xlu1 %9081  ;;  %v11799_v46 = vpop.permute.xlu0 %3908  ;;  %8010 = vmatmul.mubr.msk.f32.gmra.mrb[136].mxu0 %vm525_vm6, %v11616_v47 }
 0xe29   :  { %8012 = vmatprep.mubr.msk.f32.mxu0 %vm9621_vm3, %v13423_v33  ;;  %v9084_v18 = vunpack.i.h.bf16 %v9082_v62  ;;  %v9083_v44 = vunpack.i.l.bf16 %v9082_v62 }
 0xe2b   :  { %v8739_v8 = vpack.c.bf16 %v9084_v18, %v9083_v44 }
 0xe2c   :  { %v3905_v43 = vpop.permute.xlu1 %3904  ;;  %v11805_v49 = vpop.permute.xlu0 %4436  ;;  %8013 = vmatmul.mubr.msk.f32.gmra.mrb[138].mxu0 %vm525_vm6, %v11624_v59 }
 0xe2d   :  { %8717 = vmatpush3.bf16.xpose.msk.msra.mxu0 %vm10091_vm7, %v8715_v14  ;;  %8015 = vmatprep.mubr.msk.f32.mxu0 %vm9621_vm3, %v13423_v33 }
 0xe2e   :  { %8082 = vmatprep.subr.mxu0 %v13423_v33 }
 0xe30   :  { %v3907_v42 = vpop.permute.xlu1 %3906  ;;  %v11814_v47 = vpop.permute.xlu0 %4402  ;;  %8016 = vmatmul.mubr.msk.f32.gmra.mrb[140].mxu0 %vm525_vm6, %v11626_v6 }
 0xe31   :  { %8018 = vmatprep.mubr.msk.f32.mxu0 %vm9621_vm3, %v13423_v33 }
 0xe34   :  { %v3911_v59 = vpop.permute.xlu1 %3910  ;;  %v11820_v63 = vpop.permute.xlu0 %9096  ;;  %8019 = vmatmul.mubr.msk.f32.gmra.mrb[142].mxu0 %vm525_vm6, %v11638_v23 }
 0xe35   :  { %8083 = vmatpush3.xpose.msk.msra.mxu0 %vm525_vm6, %v3929_v53  ;;  %8084 = vmatprep.mubr.msk.f32.mxu0 %vm9621_vm3, %v13423_v33  ;;  %v9098_v35 = vunpack.i.l.bf16 %v11820_v63 }
 0xe36   :  { %8730 = vmatprep.subr.bf16.mxu0 %v13424_v58 }
 0xe38   :  { %v9092_v6 = vpop.permute.xlu1 %9091  ;;  %v11828_v10 = vpop.permute.xlu0 %4408  ;;  %8085 = vmatmul.mubr.msk.f32.vlgmr.msra.gmra.mrb[144].mxu0 %vm525_vm6, %v3895_v26 }
 0xe39   :  { %8733 = vmatpush3.bf16.xpose.msk.msra.mxu0 %vm10091_vm7, %v8731_v54  ;;  %8087 = vmatprep.mubr.msk.f32.mxu0 %vm9621_vm3, %v13423_v33  ;;  %v9094_v3 = vunpack.i.h.bf16 %v9092_v6  ;;  %v9093_v2 = vunpack.i.l.bf16 %v9092_v6 }
 0xe3a   :  { %8734 = vmatprep.subr.bf16.mxu0 %v13424_v58 }
 0xe3c   :  { %v11836_v38 = vpop.permute.xlu1 %4404  ;;  %v11838_v21 = vpop.permute.xlu0 %4410  ;;  %8088 = vmatmul.mubr.msk.f32.gmra.mrb[146].mxu0 %vm525_vm6, %v3897_v27 }
 0xe3d   :  { %8090 = vmatprep.mubr.msk.f32.mxu0 %vm9621_vm3, %v13423_v33 }
 0xe40   :  { %v11843_v51 = vpop.permute.xlu1 %4406  ;;  %v11845_v53 = vpop.permute.xlu0 %9106  ;;  %8091 = vmatmul.mubr.msk.f32.gmra.mrb[148].mxu0 %vm525_vm6, %v3899_v61 }
 0xe41   :  { %8737 = vmatpush3.bf16.xpose.msk.msra.mxu0 %vm10091_vm7, %v8735_v22  ;;  %8093 = vmatprep.mubr.msk.f32.mxu0 %vm9621_vm3, %v13423_v33 }
 0xe42   :  { %8738 = vmatprep.subr.bf16.mxu0 %v13424_v58 }
 0xe44   :  { %v11853_v26 = vpop.permute.xlu1 %9101  ;;  %v11855_v41 = vpop.permute.xlu0 %4416  ;;  %8094 = vmatmul.mubr.msk.f32.gmra.mrb[150].mxu0 %vm525_vm6, %v11775_v12 }
 0xe45   :  { %8096 = vmatprep.mubr.msk.f32.mxu0 %vm9621_vm3, %v13423_v33 }
 0xe48   :  { %v11861_v1 = vpop.permute.xlu1 %4412  ;;  %v11863_v48 = vpop.permute.xlu0 %4944  ;;  %8097 = vmatmul.mubr.msk.f32.gmra.mrb[152].mxu0 %vm525_vm6, %v11784_v50 }
 0xe49   :  { %8741 = vmatpush3.bf16.xpose.msk.msra.mxu0 %vm10091_vm7, %v8739_v8  ;;  %8099 = vmatprep.mubr.msk.f32.mxu0 %vm9621_vm3, %v13423_v33 }
 0xe4a   :  { %8742 = vmatprep.subr.bf16.mxu0 %v13424_v58 }
 0xe4c   :  { %v11874_v12 = vpop.permute.xlu1 %4414  ;;  %v11876_v60 = vpop.permute.xlu0 %4912  ;;  %8100 = vmatmul.mubr.msk.f32.gmra.mrb[154].mxu0 %vm525_vm6, %v3905_v43 }
 0xe4d   :  { %8102 = vmatprep.mubr.msk.f32.mxu0 %vm9621_vm3, %v13423_v33 }
 0xe50   :  { %v11881_v27 = vpop.permute.xlu1 %4418  ;;  %v11883_v50 = vpop.permute.xlu0 %4916  ;;  %8103 = vmatmul.mubr.msk.f32.gmra.mrb[156].mxu0 %vm525_vm6, %v3907_v42 }
 0xe51   :  { %8745 = vmatpush3.bf16.xpose.msk.msra.mxu0 %vm10091_vm7, %v8743_v37  ;;  %8105 = vmatprep.mubr.msk.f32.mxu0 %vm9621_vm3, %v13423_v33 }
 0xe52   :  { %8172 = vmatprep.subr.mxu0 %v13423_v33 }
 0xe54   :  { %v11891_v17 = vpop.permute.xlu1 %4910  ;;  %v11893_v61 = vpop.permute.xlu0 %4920  ;;  %8106 = vmatmul.mubr.msk.f32.gmra.mrb[158].mxu0 %vm525_vm6, %v11799_v46  ;;  %v8759_v46 = vpack.c.bf16 %v9094_v3, %v9093_v2 }
 0xe55   :  { %8108 = vmatprep.mubr.msk.f32.mxu0 %vm9621_vm3, %v13423_v33 }
 0xe58   :  { %v11899_v13 = vpop.permute.xlu1 %4914  ;;  %v11901_v62 = vpop.permute.xlu0 %4924  ;;  %8109 = vmatmul.mubr.msk.f32.gmra.mrb[160].mxu0 %vm525_vm6, %v3911_v59 }
 0xe59   :  { %8173 = vmatpush3.xpose.msk.msra.mxu0 %vm525_vm6, %v11805_v49  ;;  %8174 = vmatprep.mubr.msk.f32.mxu0 %vm9621_vm3, %v13423_v33  ;;  %v9099_v49 = vunpack.i.h.bf16 %v11820_v63  ;;  %v9104_v63 = vunpack.i.h.bf16 %v11853_v26 }
 0xe5a   :  { %8758 = vmatprep.subr.bf16.mxu0 %v13424_v58 }
 0xe5c   :  { %v11909_v14 = vpop.permute.xlu1 %4918  ;;  %v9112_v43 = vpop.permute.xlu0 %9111  ;;  %8175 = vmatmul.mubr.msk.f32.vlgmr.msra.gmra.mrb[162].mxu0 %vm525_vm6, %v11814_v47  ;;  %v8763_v47 = vpack.c.bf16 %v9099_v49, %v9098_v35 }
 0xe5d   :  { %v9114_v42 = vunpack.i.h.bf16 %v9112_v43  ;;  %v9113_v34 = vunpack.i.l.bf16 %v9112_v43  ;;  %8761 = vmatpush3.bf16.xpose.msk.msra.mxu0 %vm10091_vm7, %v8759_v46  ;;  %8177 = vmatprep.mubr.msk.f32.mxu0 %vm9621_vm3, %v13423_v33 }
 0xe5e   :  { %8762 = vmatprep.subr.bf16.mxu0 %v13424_v58 }
 0xe5f   :  { %v8691_v59 = vpack.c.bf16 %v9114_v42, %v9113_v34 }
 0xe60   :  { %v11920_v54 = vpop.permute.xlu1 %4922  ;;  %v9122_v6 = vpop.permute.xlu0 %9121  ;;  %8178 = vmatmul.mubr.msk.f32.gmra.mrb[164].mxu0 %vm525_vm6, %v11836_v38  ;;  %v9103_v38 = vunpack.i.l.bf16 %v11853_v26  ;;  %v9108_v26 = vunpack.i.l.bf16 %v11845_v53 }
 0xe61   :  { %8692 = vmatpush3.bf16.msra.mxu1 %v8691_v59  ;;  %8180 = vmatprep.mubr.msk.f32.mxu0 %vm9621_vm3, %v13423_v33  ;;  %v9124_v31 = vunpack.i.h.bf16 %v9122_v6  ;;  %v9123_v20 = vunpack.i.l.bf16 %v9122_v6 }
 0xe62   :  { %8693 = vmatprep.subr.bf16.mxu1 %v13424_v58  ;;  %v8767_v8 = vpack.c.bf16 %v9104_v63, %v9103_v38 }
 0xe63   :  { %v8697_v46 = vpack.c.bf16 %v9124_v31, %v9123_v20 }
 0xe64   :  { %v11927_v19 = vpop.permute.xlu1 %4926  ;;  %v11929_v4 = vpop.permute.xlu0 %9136  ;;  %8181 = vmatmul.mubr.msk.f32.gmra.mrb[166].mxu0 %vm525_vm6, %v11843_v51 }
 0xe65   :  { %8765 = vmatpush3.bf16.xpose.msk.msra.mxu0 %vm10091_vm7, %v8763_v47  ;;  %8183 = vmatprep.mubr.msk.f32.mxu0 %vm9621_vm3, %v13423_v33  ;;  %v12048_v47 = vld [vmem:[%s13347_s6 + $0x10] sm:$0xff] }
 0xe66   :  { %8766 = vmatprep.subr.bf16.mxu0 %v13424_v58 }
 0xe68   :  { %v9117_v22 = vpop.permute.xlu1 %9116  ;;  %v11940_v18 = vpop.permute.xlu0 %9146  ;;  %8184 = vmatmul.mubr.msk.f32.gmra.mrb[168].mxu0 %vm525_vm6, %v11828_v10  ;;  %v9109_v10 = vunpack.i.h.bf16 %v11845_v53 }
 0xe69   :  { %v9119_v44 = vunpack.i.h.bf16 %v9117_v22  ;;  %v9118_v51 = vunpack.i.l.bf16 %v9117_v22  ;;  %8186 = vmatprep.mubr.msk.f32.mxu0 %vm9621_vm3, %v13423_v33 }
 0xe6b   :  { %v8694_v37 = vpack.c.bf16 %v9119_v44, %v9118_v51  ;;  %v12058_v51 = vld [vmem:[%s13347_s6 + $0x18] sm:$0xff] }
 0xe6c   :  { %v9127_v3 = vpop.permute.xlu1 %9126  ;;  %v11946_v2 = vpop.permute.xlu0 %9151  ;;  %8187 = vmatmul.mubr.msk.f32.gmra.mrb[170].mxu0 %vm525_vm6, %v11838_v21  ;;  %v8771_v21 = vpack.c.bf16 %v9109_v10, %v9108_v26 }
 0xe6d   :  { %13458 = vst [vmem:[#allocation13_spill] sm:$0xff] %v11946_v2  ;;  %8695 = vmatpush3.bf16.msra.mxu1 %v8694_v37  ;;  %8769 = vmatpush3.bf16.xpose.msk.msra.mxu0 %vm10091_vm7, %v8767_v8  ;;  %v9129_v43 = vunpack.i.h.bf16 %v9127_v3  ;;  %v9128_v42 = vunpack.i.l.bf16 %v9127_v3 }
 0xe6e   :  { %8189 = vmatprep.mubr.msk.f32.mxu0 %vm9621_vm3, %v13423_v33  ;;  %8696 = vmatprep.subr.bf16.mxu1 %v13424_v58 }
 0xe6f   :  { %8770 = vmatprep.subr.bf16.mxu0 %v13424_v58  ;;  %v8700_v49 = vpack.c.bf16 %v9129_v43, %v9128_v42 }
 0xe70   :  { %v11958_v34 = vpop.permute.xlu0 %9156  ;;  %8190 = vmatmul.mubr.msk.f32.gmra.mrb[172].mxu0 %vm525_vm6, %v11861_v1 }
 0xe71   :  { %13459 = vst [vmem:[#allocation14_spill] sm:$0xff] %v11958_v34  ;;  %8698 = vmatpush3.bf16.msra.mxu1 %v8697_v46  ;;  %8192 = vmatprep.mubr.msk.f32.mxu0 %vm9621_vm3, %v13423_v33 }
 0xe72   :  { %8699 = vmatprep.subr.bf16.mxu1 %v13424_v58 }
 0xe74   :  { %v11965_v35 = vpop.permute.xlu0 %9161  ;;  %8193 = vmatmul.mubr.msk.f32.gmra.mrb[174].mxu0 %vm525_vm6, %v11874_v12  ;;  %v12028_v12 = vld [vmem:[%s13347_s6] sm:$0xff] }
 0xe75   :  { %13460 = vst [vmem:[#allocation21_spill] sm:$0xff] %v11965_v35  ;;  %8701 = vmatpush3.bf16.msra.mxu1 %v8700_v49  ;;  %8773 = vmatpush3.bf16.xpose.msk.msra.mxu0 %vm10091_vm7, %v8771_v21 }
 0xe76   :  { %8195 = vmatprep.mubr.msk.f32.mxu0 %vm9621_vm3, %v13423_v33  ;;  %8037 = vmatprep.subr.mxu1 %v13423_v33 }
 0xe77   :  { %8262 = vmatprep.subr.mxu0 %v13423_v33 }
 0xe78   :  { %v11975_v53 = vpop.permute.xlu0 %9166  ;;  %8196 = vmatmul.mubr.msk.f32.gmra.mrb[176].mxu0 %vm525_vm6, %v11855_v41 }
 0xe79   :  { %13461 = vst [vmem:[#allocation23_spill] sm:$0xff] %v11975_v53  ;;  %8198 = vmatprep.mubr.msk.f32.mxu0 %vm9621_vm3, %v13423_v33 }
 0xe7c   :  { %v3738_v1 = vpop.permute.xlu0 %3737  ;;  %8199 = vmatmul.mubr.msk.f32.gmra.mrb[178].mxu0 %vm525_vm6, %v11881_v27 }
 0xe7d   :  { %8038 = vmatpush3.msra.mxu1 %v3738_v1  ;;  %8263 = vmatpush3.xpose.msk.msra.mxu0 %vm525_vm6, %v11863_v48 }
 0xe7e   :  { %8264 = vmatprep.mubr.msk.f32.mxu0 %vm9621_vm3, %v13423_v33  ;;  %8718 = vmatprep.subr.bf16.mxu1 %v13424_v58 }
 0xe7f   :  { %8786 = vmatprep.subr.bf16.mxu0 %v13424_v58 }
 0xe80   :  { %8265 = vmatmul.mubr.msk.f32.vlgmr.msra.gmra.mrb[180].mxu0 %vm525_vm6, %v11891_v17 }
 0xe81   :  { %8267 = vmatprep.mubr.msk.f32.mxu0 %vm9621_vm3, %v13423_v33 }
 0xe84   :  { %8268 = vmatmul.mubr.msk.f32.gmra.mrb[182].mxu0 %vm525_vm6, %v11876_v60 }
 0xe85   :  { %8270 = vmatprep.mubr.msk.f32.mxu0 %vm9621_vm3, %v13423_v33 }
 0xe88   :  { %8271 = vmatmul.mubr.msk.f32.gmra.mrb[184].mxu0 %vm525_vm6, %v11899_v13  ;;  %v12038_v13 = vld [vmem:[%s13347_s6 + $0x8] sm:$0xff] }
 0xe89   :  { %8273 = vmatprep.mubr.msk.f32.mxu0 %vm9621_vm3, %v13423_v33 }
 0xe8c   :  { %8274 = vmatmul.mubr.msk.f32.gmra.mrb[186].mxu0 %vm525_vm6, %v11883_v50 }
 0xe8d   :  { %8276 = vmatprep.mubr.msk.f32.mxu0 %vm9621_vm3, %v13423_v33 }
 0xe90   :  { %8277 = vmatmul.mubr.msk.f32.gmra.mrb[188].mxu0 %vm525_vm6, %v11909_v14 }
 0xe91   :  { %8279 = vmatprep.mubr.msk.f32.mxu0 %vm9621_vm3, %v13423_v33 }
 0xe94   :  { %8280 = vmatmul.mubr.msk.f32.gmra.mrb[190].mxu0 %vm525_vm6, %v11893_v61 }
 0xe95   :  { %8282 = vmatprep.mubr.msk.f32.mxu0 %vm9621_vm3, %v13423_v33 }
 0xe98   :  { %8283 = vmatmul.mubr.msk.f32.gmra.mrb[192].mxu0 %vm525_vm6, %v11920_v54 }
 0xe99   :  { %8285 = vmatprep.mubr.msk.f32.mxu0 %vm9621_vm3, %v13423_v33 }
 0xe9c   :  { %8286 = vmatmul.mubr.msk.f32.gmra.mrb[194].mxu0 %vm525_vm6, %v11901_v62 }
 0xe9d   :  { %8288 = vmatprep.mubr.msk.f32.mxu0 %vm9621_vm3, %v13423_v33 }
 0xea0   :  { %8289 = vmatmul.mubr.msk.f32.gmra.mrb[196].mxu0 %vm525_vm6, %v11927_v19 }
 0xea1   :  { %8344 = vmatprep.mubr.msk.f32.mxu0 %vm9621_vm3, %v13423_v33 }
 0xee7   :  { %v3560_v7 = vpop.f32.mrb[126].mxu0 }
 0xee8   :  { %v3604_v41 = vmul.f32 0.35355338, %v3560_v7  ;;  %v7996_v48 = vpop.f32.mrb[127].mxu0 }
 0xeea   :  { %v12031_v60 = vadd.f32 %v12028_v12, %v3604_v41 }
 0xeeb   :  { %v3565_v27 = vpop.f32.mrb[128].mxu0 }
 0xeec   :  { %v3605_v50 = vmul.f32 0.35355338, %v3565_v27  ;;  %v7999_v17 = vpop.f32.mrb[129].mxu0  ;;  %v3622_v61 = vsel %vm690_vm8, %v12031_v60, -inf }
 0xeed   :  { %3623 = vmax.xlane.f32.xlu0 %v3622_v61 }
 0xeee   :  { %v12041_v62 = vadd.f32 %v12038_v13, %v3605_v50 }
 0xeef   :  { %v3570_v14 = vpop.f32.mrb[130].mxu0 }
 0xef0   :  { %v3606_v59 = vmul.f32 0.35355338, %v3570_v14  ;;  %v8002_v54 = vpop.f32.mrb[131].mxu0  ;;  %v3625_v6 = vsel %vm690_vm8, %v12041_v62, -inf }
 0xef1   :  { %3626 = vmax.xlane.f32.xlu1 %v3625_v6 }
 0xef2   :  { %v12051_v19 = vadd.f32 %v12048_v47, %v3606_v59 }
 0xef3   :  { %v3575_v63 = vpop.f32.mrb[132].mxu0 }
 0xef4   :  { %v3607_v38 = vmul.f32 0.35355338, %v3575_v63  ;;  %v8005_v22 = vpop.f32.mrb[133].mxu0  ;;  %v3628_v44 = vsel %vm690_vm8, %v12051_v19, -inf  ;;  %v12072_v63 = vld [vmem:[%s13347_s6 + $0x20] sm:$0xff] }
 0xef5   :  { %3629 = vmax.xlane.f32.xlu0 %v3628_v44 }
 0xef6   :  { %v12061_v8 = vadd.f32 %v12058_v51, %v3607_v38 }
 0xef7   :  { %v3580_v31 = vpop.f32.mrb[134].mxu0 }
 0xef8   :  { %v8008_v20 = vpop.f32.mrb[135].mxu0  ;;  %v3631_v37 = vsel %vm690_vm8, %v12061_v8, -inf  ;;  %v3608_v54 = vmul.f32 0.35355338, %v3580_v31 }
 0xef9   :  { %3632 = vmax.xlane.f32.xlu0 %v3631_v37 }
 0xefa   :  { %v12075_v38 = vadd.f32 %v12072_v63, %v3608_v54  ;;  %v12108_v54 = vld [vmem:[%s13347_s6 + $0x38] sm:$0xff] }
 0xefb   :  { %v3585_v3 = vpop.f32.mrb[136].mxu0 }
 0xefc   :  { %v8011_v10 = vpop.f32.mrb[137].mxu0  ;;  %v3609_v37 = vmul.f32 0.35355338, %v3585_v3  ;;  %v12090_v3 = vld [vmem:[%s13347_s6 + $0x28] sm:$0xff] }
 0xefd   :  { %v12080_v10 = vld [vmem:[%s13347_s6 + $0x30] sm:$0xff] }
 0xeff   :  { %v3590_v26 = vpop.f32.mrb[138].mxu0 }
 0xf00   :  { %v8014_v46 = vpop.f32.mrb[139].mxu0  ;;  %v3610_v22 = vmul.f32 0.35355338, %v3590_v26  ;;  %v12093_v26 = vadd.f32 %v12090_v3, %v3609_v37 }
 0xf02   :  { %9171 = vrot.lane.b32.xlu1 %v11600_v28, %s9633_s28  ;;  %v12083_v31 = vadd.f32 %v12080_v10, %v3610_v22 }
 0xf03   :  { %v3595_v43 = vpop.f32.mrb[140].mxu0 }
 0xf04   :  { %v8017_v42 = vpop.f32.mrb[141].mxu0 }
 0xf05   :  { %v3634_v42 = vsel %vm690_vm8, %v12075_v38, -inf }
 0xf07   :  { %v3600_v21 = vpop.f32.mrb[142].mxu0 }
 0xf08   :  { %v8020_v49 = vpop.f32.mrb[143].mxu0  ;;  %v3612_v46 = vmul.f32 0.35355338, %v3600_v21 }
 0xf0b   :  { %v4032_v1 = vpop.f32.mrb[144].mxu0 }
 0xf0c   :  { %v8086_v7 = vpop.f32.mrb[145].mxu0  ;;  %v4076_v22 = vmul.f32 0.35355338, %v4032_v1 }
 0xf0d   :  { %v3611_v7 = vmul.f32 0.35355338, %v3595_v43  ;;  %v3640_v43 = vsel %vm690_vm8, %v12083_v31, -inf }
 0xf0f   :  { %4717 = vrot.lane.b32.xlu0 %v11638_v23, %s9632_s26  ;;  %v4037_v41 = vpop.f32.mrb[146].mxu0 }
 0xf10   :  { %v8089_v48 = vpop.f32.mrb[147].mxu0 }
 0xf13   :  { %v4042_v27 = vpop.f32.mrb[148].mxu0 }
 0xf14   :  { %v8092_v50 = vpop.f32.mrb[149].mxu0 }
 0xf15   :  { %v12098_v50 = vld [vmem:[%s13347_s6 + $0x40] sm:$0xff] }
 0xf16   :  { %v12101_v21 = vadd.f32 %v12098_v50, %v3612_v46 }
 0xf17   :  { %v4047_v17 = vpop.f32.mrb[150].mxu0 }
 0xf18   :  { %v8095_v61 = vpop.f32.mrb[151].mxu0  ;;  %v4079_v46 = vmul.f32 0.35355338, %v4047_v17 }
 0xf19   :  { %v4077_v61 = vmul.f32 0.35355338, %v4037_v41  ;;  %v3637_v41 = vsel %vm690_vm8, %v12093_v26, -inf }
 0xf1b   :  { %v4052_v14 = vpop.f32.mrb[152].mxu0  ;;  %v12114_v37 = vadd.f32 %v12038_v13, %v4077_v61  ;;  %v12126_v61 = vadd.f32 %v12058_v51, %v4079_v46 }
 0xf1c   :  { %v8098_v59 = vpop.f32.mrb[153].mxu0 }
 0xf1d   :  { %v4097_v11 = vsel %vm690_vm8, %v12114_v37, -inf }
 0xf1f   :  { %v4057_v6 = vpop.f32.mrb[154].mxu0 }
 0xf20   :  { %v8101_v28 = vpop.f32.mrb[155].mxu0  ;;  %v4081_v17 = vmul.f32 0.35355338, %v4057_v6  ;;  %v4103_v6 = vsel %vm690_vm8, %v12126_v61, -inf }
 0xf21   :  { %v12111_v28 = vadd.f32 %v12108_v54, %v3611_v7 }
 0xf23   :  { %v4062_v44 = vpop.f32.mrb[156].mxu0  ;;  %v3643_v1 = vsel %vm690_vm8, %v12111_v28, -inf }
 0xf24   :  { %v8104_v20 = vpop.f32.mrb[157].mxu0 }
 0xf26   :  { %3635 = vmax.xlane.f32.xlu1 %v3634_v42  ;;  %v3646_v42 = vsel %vm690_vm8, %v12101_v21, -inf }
 0xf27   :  { %v4067_v49 = vpop.f32.mrb[158].mxu0 }
 0xf28   :  { %v8107_v48 = vpop.f32.mrb[159].mxu0  ;;  %v4083_v46 = vmul.f32 0.35355338, %v4067_v49 }
 0xf2a   :  { %3641 = vmax.xlane.f32.xlu1 %v3640_v43  ;;  %v12121_v43 = vadd.f32 %v12028_v12, %v4076_v22  ;;  %v12144_v45 = vadd.f32 %v12108_v54, %v4083_v46 }
 0xf2b   :  { %v4072_v59 = vpop.f32.mrb[160].mxu0 }
 0xf2c   :  { %v8110_v20 = vpop.f32.mrb[161].mxu0  ;;  %v4094_v22 = vsel %vm690_vm8, %v12121_v43, -inf  ;;  %v4115_v40 = vsel %vm690_vm8, %v12144_v45, -inf }
 0xf2d   :  { %v4078_v20 = vmul.f32 0.35355338, %v4042_v27  ;;  %v12136_v27 = vadd.f32 %v12090_v3, %v4081_v17 }
 0xf2e   :  { %3638 = vmax.xlane.f32.xlu0 %v3637_v41  ;;  %3647 = vmax.xlane.f32.xlu1 %v3646_v42  ;;  %v4080_v42 = vmul.f32 0.35355338, %v4052_v14 }
 0xf2f   :  { %v4540_v48 = vpop.f32.mrb[162].mxu0  ;;  %v4109_v49 = vsel %vm690_vm8, %v12136_v27, -inf }
 0xf30   :  { %v8176_v7 = vpop.f32.mrb[163].mxu0 }
 0xf31   :  { %v12133_v7 = vadd.f32 %v12048_v47, %v4078_v20  ;;  %v4584_v20 = vmul.f32 0.35355338, %v4540_v48 }
 0xf32   :  { %3644 = vmax.xlane.f32.xlu0 %v3643_v1  ;;  %4098 = vmax.xlane.f32.xlu1 %v4097_v11  ;;  %v12141_v11 = vadd.f32 %v12072_v63, %v4080_v42 }
 0xf33   :  { %v4545_v41 = vpop.f32.mrb[164].mxu0  ;;  %v4100_v17 = vsel %vm690_vm8, %v12133_v7, -inf  ;;  %v12156_v46 = vadd.f32 %v12028_v12, %v4584_v20 }
 0xf34   :  { %v8179_v56 = vpop.f32.mrb[165].mxu0  ;;  %v4585_v36 = vmul.f32 0.35355338, %v4545_v41 }
 0xf35   :  { %v4082_v56 = vmul.f32 0.35355338, %v4062_v44  ;;  %v4106_v44 = vsel %vm690_vm8, %v12141_v11, -inf }
 0xf36   :  { %4095 = vmax.xlane.f32.xlu0 %v4094_v22  ;;  %4104 = vmax.xlane.f32.xlu1 %v4103_v6 }
 0xf37   :  { %v4550_v1 = vpop.f32.mrb[166].mxu0  ;;  %v12151_v6 = vadd.f32 %v12080_v10, %v4082_v56 }
 0xf38   :  { %v8182_v14 = vpop.f32.mrb[167].mxu0  ;;  %v4586_v48 = vmul.f32 0.35355338, %v4550_v1  ;;  %v4602_v1 = vsel %vm690_vm8, %v12156_v46, -inf }
 0xf39   :  { %v4084_v14 = vmul.f32 0.35355338, %v4072_v59  ;;  %v4112_v56 = vsel %vm690_vm8, %v12151_v6, -inf }
 0xf3a   :  { %4101 = vmax.xlane.f32.xlu0 %v4100_v17  ;;  %4110 = vmax.xlane.f32.xlu1 %v4109_v49  ;;  %v12166_v59 = vadd.f32 %v12048_v47, %v4586_v48 }
 0xf3b   :  { %v4555_v22 = vpop.f32.mrb[168].mxu0 }
 0xf3c   :  { %v8185_v42 = vpop.f32.mrb[169].mxu0  ;;  %v4608_v41 = vsel %vm690_vm8, %v12166_v59, -inf }
 0xf3d   :  { %v12163_v42 = vadd.f32 %v12098_v50, %v4084_v14 }
 0xf3e   :  { %4107 = vmax.xlane.f32.xlu0 %v4106_v44  ;;  %4116 = vmax.xlane.f32.xlu1 %v4115_v40  ;;  %v12171_v40 = vadd.f32 %v12038_v13, %v4585_v36 }
 0xf3f   :  { %v4560_v17 = vpop.f32.mrb[170].mxu0  ;;  %v4118_v9 = vsel %vm690_vm8, %v12163_v42, -inf }
 0xf40   :  { %v8188_v49 = vpop.f32.mrb[171].mxu0  ;;  %v4605_v36 = vsel %vm690_vm8, %v12171_v40, -inf }
 0xf41   :  { %v4587_v49 = vmul.f32 0.35355338, %v4555_v22 }
 0xf42   :  { %4113 = vmax.xlane.f32.xlu0 %v4112_v56  ;;  %4603 = vmax.xlane.f32.xlu1 %v4602_v1  ;;  %v4588_v1 = vmul.f32 0.35355338, %v4560_v17 }
 0xf43   :  { %v4565_v20 = vpop.f32.mrb[172].mxu0  ;;  %v12178_v56 = vadd.f32 %v12058_v51, %v4587_v49 }
 0xf44   :  { %v8191_v44 = vpop.f32.mrb[173].mxu0 }
 0xf45   :  { %v4611_v17 = vsel %vm690_vm8, %v12178_v56, -inf }
 0xf46   :  { %4119 = vmax.xlane.f32.xlu0 %v4118_v9  ;;  %4609 = vmax.xlane.f32.xlu1 %v4608_v41  ;;  %v12188_v41 = vadd.f32 %v12072_v63, %v4588_v1 }
 0xf47   :  { %v4570_v14 = vpop.f32.mrb[174].mxu0 }
 0xf48   :  { %v4590_v48 = vmul.f32 0.35355338, %v4570_v14  ;;  %v8194_v5 = vpop.f32.mrb[175].mxu0 }
 0xf49   :  { %v4589_v5 = vmul.f32 0.35355338, %v4565_v20 }
 0xf4a   :  { %v12183_v22 = vadd.f32 %v12080_v10, %v4590_v48  ;;  %4606 = vmax.xlane.f32.xlu0 %v4605_v36 }
 0xf4b   :  { %v4575_v44 = vpop.f32.mrb[176].mxu0  ;;  %v12193_v48 = vadd.f32 %v12090_v3, %v4589_v5 }
 0xf4c   :  { %v8197_v55 = vpop.f32.mrb[177].mxu0  ;;  %v4620_v9 = vsel %vm690_vm8, %v12183_v22, -inf  ;;  %v4591_v36 = vmul.f32 0.35355338, %v4575_v44 }
 0xf4d   :  { %4621 = vmax.xlane.f32.xlu1 %v4620_v9  ;;  %v4614_v55 = vsel %vm690_vm8, %v12188_v41, -inf  ;;  %v4617_v44 = vsel %vm690_vm8, %v12193_v48, -inf }
 0xf4e   :  { %4612 = vmax.xlane.f32.xlu0 %v4611_v17  ;;  %v12203_v17 = vadd.f32 %v12108_v54, %v4591_v36 }
 0xf4f   :  { %v4580_v49 = vpop.f32.mrb[178].mxu0 }
 0xf50   :  { %v4592_v14 = vmul.f32 0.35355338, %v4580_v49  ;;  %v8200_v32 = vpop.f32.mrb[179].mxu0 }
 0xf52   :  { %v12198_v30 = vadd.f32 %v12098_v50, %v4592_v14  ;;  %4615 = vmax.xlane.f32.xlu0 %v4614_v55 }
 0xf53   :  { %v5048_v20 = vpop.f32.mrb[180].mxu0 }
 0xf54   :  { %v8266_v1 = vpop.f32.mrb[181].mxu0  ;;  %v4626_v9 = vsel %vm690_vm8, %v12198_v30, -inf  ;;  %v5092_v32 = vmul.f32 0.35355338, %v5048_v20 }
 0xf55   :  { %4627 = vmax.xlane.f32.xlu1 %v4626_v9  ;;  %v4623_v1 = vsel %vm690_vm8, %v12203_v17, -inf }
 0xf56   :  { %4618 = vmax.xlane.f32.xlu0 %v4617_v44  ;;  %v12208_v14 = vadd.f32 %v12028_v12, %v5092_v32 }
 0xf57   :  { %v5053_v5 = vpop.f32.mrb[182].mxu0 }
 0xf58   :  { %v8269_v49 = vpop.f32.mrb[183].mxu0  ;;  %v5093_v55 = vmul.f32 0.35355338, %v5053_v5  ;;  %v5110_v9 = vsel %vm690_vm8, %v12208_v14, -inf }
 0xf5a   :  { %4624 = vmax.xlane.f32.xlu0 %v4623_v1  ;;  %v12213_v20 = vadd.f32 %v12038_v13, %v5093_v55 }
 0xf5b   :  { %v5058_v52 = vpop.f32.mrb[184].mxu0 }
 0xf5c   :  { %v5094_v16 = vmul.f32 0.35355338, %v5058_v52  ;;  %v8272_v36 = vpop.f32.mrb[185].mxu0  ;;  %v5113_v52 = vsel %vm690_vm8, %v12213_v20, -inf }
 0xf5e   :  { %v12218_v44 = vadd.f32 %v12048_v47, %v5094_v16  ;;  %5111 = vmax.xlane.f32.xlu0 %v5110_v9 }
 0xf5f   :  { %v5063_v12 = vpop.f32.mrb[186].mxu0 }
 0xf60   :  { %v5095_v32 = vmul.f32 0.35355338, %v5063_v12  ;;  %v8275_v5 = vpop.f32.mrb[187].mxu0  ;;  %v5116_v49 = vsel %vm690_vm8, %v12218_v44, -inf }
 0xf61   :  { %5117 = vmax.xlane.f32.xlu1 %v5116_v49 }
 0xf62   :  { %v12225_v13 = vadd.f32 %v12058_v51, %v5095_v32  ;;  %5114 = vmax.xlane.f32.xlu0 %v5113_v52 }
 0xf63   :  { %v5068_v55 = vpop.f32.mrb[188].mxu0 }
 0xf64   :  { %v5096_v1 = vmul.f32 0.35355338, %v5068_v55  ;;  %v8278_v36 = vpop.f32.mrb[189].mxu0  ;;  %v5119_v16 = vsel %vm690_vm8, %v12225_v13, -inf }
 0xf65   :  { %5120 = vmax.xlane.f32.xlu1 %v5119_v16  ;;  %v12239_v16 = vpop.permute.xlu1 %9131 }
 0xf66   :  { %v12230_v47 = vadd.f32 %v12072_v63, %v5096_v1 }
 0xf67   :  { %v5073_v9 = vpop.f32.mrb[190].mxu0 }
 0xf68   :  { %v5097_v12 = vmul.f32 0.35355338, %v5073_v9  ;;  %v8281_v5 = vpop.f32.mrb[191].mxu0  ;;  %v5122_v49 = vsel %vm690_vm8, %v12230_v47, -inf }
 0xf69   :  { %5123 = vmax.xlane.f32.xlu1 %v5122_v49 }
 0xf6a   :  { %v12235_v51 = vadd.f32 %v12090_v3, %v5097_v12 }
 0xf6b   :  { %v5078_v32 = vpop.f32.mrb[192].mxu0 }
 0xf6c   :  { %v5098_v52 = vmul.f32 0.35355338, %v5078_v32  ;;  %v8284_v55 = vpop.f32.mrb[193].mxu0  ;;  %v5125_v36 = vsel %vm690_vm8, %v12235_v51, -inf  ;;  %v12249_v32 = vpop.permute.xlu1 %9141 }
 0xf6d   :  { %5126 = vmax.xlane.f32.xlu1 %v5125_v36 }
 0xf6e   :  { %v12242_v63 = vadd.f32 %v12080_v10, %v5098_v52 }
 0xf6f   :  { %v5083_v1 = vpop.f32.mrb[194].mxu0 }
 0xf70   :  { %v5099_v9 = vmul.f32 0.35355338, %v5083_v1  ;;  %v8287_v5 = vpop.f32.mrb[195].mxu0  ;;  %v5128_v49 = vsel %vm690_vm8, %v12242_v63, -inf  ;;  %v12258_v1 = vpop.permute.xlu1 %4209 }
 0xf71   :  { %5129 = vmax.xlane.f32.xlu0 %v5128_v49 }
 0xf72   :  { %v12247_v3 = vadd.f32 %v12108_v54, %v5099_v9 }
 0xf73   :  { %v5088_v12 = vpop.f32.mrb[196].mxu0 }
 0xf74   :  { %v5100_v55 = vmul.f32 0.35355338, %v5088_v12  ;;  %v8290_v36 = vpop.f32.mrb[197].mxu0  ;;  %v5131_v29 = vsel %vm690_vm8, %v12247_v3, -inf }
 0xf75   :  { %5132 = vmax.xlane.f32.xlu1 %v5131_v29 }
 0xf76   :  { %v12254_v10 = vadd.f32 %v12098_v50, %v5100_v55 }
 0xf78   :  { %v5134_v52 = vsel %vm690_vm8, %v12254_v10, -inf }
 0xf79   :  { %5135 = vmax.xlane.f32.xlu0 %v5134_v52 }
 0xf7a   :  { %v3624_v54 = vpop.xlane.xlu0 %3623 }
 0xf7b   :  { %v3649_v9 = vsub.f32 %v12031_v60, %v3624_v54 }
 0xf7d   :  { %v3658_v5 = vmul.f32 1.442695, %v3649_v9 }
 0xf7e   :  { %v3627_v49 = vpop.xlane.xlu1 %3626 }
 0xf7f   :  { %9398 = vpow2.f32 %v3658_v5  ;;  %v3650_v12 = vsub.f32 %v12041_v62, %v3627_v49 }
 0xf81   :  { %v3660_v36 = vmul.f32 1.442695, %v3650_v12 }
 0xf82   :  { %v3630_v15 = vpop.xlane.xlu0 %3629 }
 0xf83   :  { %9400 = vpow2.f32 %v3660_v36  ;;  %v3651_v29 = vsub.f32 %v12051_v19, %v3630_v15 }
 0xf85   :  { %v3662_v50 = vmul.f32 1.442695, %v3651_v29 }
 0xf86   :  { %v3633_v55 = vpop.xlane.xlu0 %3632 }
 0xf87   :  { %9402 = vpow2.f32 %v3662_v50  ;;  %v3652_v52 = vsub.f32 %v12061_v8, %v3633_v55 }
 0xf89   :  { %v12264_v57 = vpop.eup %9398  ;;  %v3664_v0 = vmul.f32 1.442695, %v3652_v52 }
 0xf8a   :  { %v3676_v60 = vsel %vm690_vm8, %v12264_v57, 0.0  ;;  %v12283_v36 = vpop.permute.xlu0 %4717 }
 0xf8b   :  { %9404 = vpow2.f32 %v3664_v0  ;;  %3677 = vadd.xlane.f32.xlu1 %v3676_v60  ;;  %v12280_v0 = vpop.permute.xlu1 %9171  ;;  %13463 = vst [vmem:[#allocation25_spill] sm:$0xff] %v12283_v36 }
 0xf8c   :  { %13462 = vst [vmem:[#allocation24_spill] sm:$0xff] %v12280_v0 }
 0xf8d   :  { %v12268_v54 = vpop.eup %9400 }
 0xf8e   :  { %v3679_v62 = vsel %vm690_vm8, %v12268_v54, 0.0 }
 0xf8f   :  { %3680 = vadd.xlane.f32.xlu1 %v3679_v62 }
 0xf91   :  { %v12272_v15 = vpop.eup %9402 }
 0xf92   :  { %v3682_v19 = vsel %vm690_vm8, %v12272_v15, 0.0 }
 0xf93   :  { %3683 = vadd.xlane.f32.xlu1 %v3682_v19 }
 0xf95   :  { %v12276_v8 = vpop.eup %9404 }
 0xf96   :  { %v3685_v9 = vsel %vm690_vm8, %v12276_v8, 0.0 }
 0xf97   :  { %3686 = vadd.xlane.f32.xlu1 %v3685_v9 }
 0xfb3   :  { %v3636_v5 = vpop.xlane.xlu1 %3635 }
 0xfb4   :  { %v3653_v49 = vsub.f32 %v12075_v38, %v3636_v5 }
 0xfb6   :  { %v3666_v12 = vmul.f32 1.442695, %v3653_v49 }
 0xfb7   :  { %v3642_v29 = vpop.xlane.xlu1 %3641 }
 0xfb8   :  { %9406 = vpow2.f32 %v3666_v12  ;;  %v3655_v50 = vsub.f32 %v12083_v31, %v3642_v29 }
 0xfba   :  { %v3670_v19 = vmul.f32 1.442695, %v3655_v50 }
 0xfbb   :  { %v3639_v55 = vpop.xlane.xlu0 %3638  ;;  %v3648_v52 = vpop.xlane.xlu1 %3647 }
 0xfbc   :  { %v3654_v60 = vsub.f32 %v12093_v26, %v3639_v55  ;;  %v3657_v62 = vsub.f32 %v12101_v21, %v3648_v52 }
 0xfbe   :  { %v3668_v9 = vmul.f32 1.442695, %v3654_v60  ;;  %v3674_v53 = vmul.f32 1.442695, %v3657_v62 }
 0xfbf   :  { %v3645_v0 = vpop.xlane.xlu0 %3644  ;;  %v4099_v50 = vpop.xlane.xlu1 %4098 }
 0xfc0   :  { %9408 = vpow2.f32 %v3668_v9  ;;  %v3656_v38 = vsub.f32 %v12111_v28, %v3645_v0 }
 0xfc1   :  { %9410 = vpow2.f32 %v3674_v53 }
 0xfc2   :  { %v12289_v5 = vpop.eup %9406  ;;  %9412 = vpow2.f32 %v3670_v19  ;;  %v3672_v49 = vmul.f32 1.442695, %v3656_v38 }
 0xfc3   :  { %v3688_v31 = vsel %vm690_vm8, %v12289_v5, 0.0  ;;  %v4105_v52 = vpop.xlane.xlu1 %4104  ;;  %v4096_v60 = vpop.xlane.xlu0 %4095 }
 0xfc4   :  { %3689 = vadd.xlane.f32.xlu1 %v3688_v31  ;;  %9414 = vpow2.f32 %v3672_v49  ;;  %v4124_v31 = vsub.f32 %v12126_v61, %v4105_v52  ;;  %v4121_v35 = vsub.f32 %v12121_v43, %v4096_v60 }
 0xfc7   :  { %v4111_v62 = vpop.xlane.xlu1 %4110  ;;  %v4102_v19 = vpop.xlane.xlu0 %4101 }
 0xfca   :  { %v12293_v26 = vpop.eup %9408 }
 0xfcb   :  { %v12295_v21 = vpop.eup %9410  ;;  %v3691_v12 = vsel %vm690_vm8, %v12293_v26, 0.0  ;;  %v4117_v9 = vpop.xlane.xlu1 %4116 }
 0xfcc   :  { %13464 = vst [vmem:[#allocation26_spill] sm:$0xff] %v12295_v21  ;;  %v12299_v29 = vpop.eup %9412  ;;  %3692 = vadd.xlane.f32.xlu1 %v3691_v12  ;;  %v3700_v53 = vsel %vm690_vm8, %v12295_v21, 0.0  ;;  %v4108_v38 = vpop.xlane.xlu0 %4107  ;;  %v4130_v21 = vmul.f32 1.442695, %v4121_v35  ;;  %v4126_v35 = vsub.f32 %v12136_v27, %v4111_v62 }
 0xfcd   :  { %3701 = vadd.xlane.f32.xlu0 %v3700_v53  ;;  %v3694_v28 = vsel %vm690_vm8, %v12299_v29, 0.0  ;;  %v4136_v53 = vmul.f32 1.442695, %v4124_v31 }
 0xfce   :  { %v12305_v0 = vpop.eup %9414 }
 0xfcf   :  { %13465 = vst [vmem:[#allocation27_spill] sm:$0xff] %v12305_v0  ;;  %v3697_v55 = vsel %vm690_vm8, %v12305_v0, 0.0  ;;  %v4604_v49 = vpop.xlane.xlu1 %4603  ;;  %9416 = vpow2.f32 %v4136_v53 }
 0xfd0   :  { %3695 = vadd.xlane.f32.xlu1 %v3694_v28  ;;  %v4114_v12 = vpop.xlane.xlu0 %4113  ;;  %v4125_v28 = vsub.f32 %v12141_v11, %v4108_v38  ;;  %v4123_v38 = vsub.f32 %v12133_v7, %v4102_v19  ;;  %v4629_v43 = vsub.f32 %v12156_v46, %v4604_v49  ;;  %v4140_v46 = vmul.f32 1.442695, %v4126_v35 }
 0xfd2   :  { %v4138_v34 = vmul.f32 1.442695, %v4125_v28 }
 0xfd4   :  { %3698 = vadd.xlane.f32.xlu1 %v3697_v55  ;;  %v4610_v55 = vpop.xlane.xlu1 %4609  ;;  %v4120_v36 = vpop.xlane.xlu0 %4119  ;;  %9418 = vpow2.f32 %v4138_v34  ;;  %v4134_v34 = vmul.f32 1.442695, %v4123_v38 }
 0xfd5   :  { %v4129_v61 = vsub.f32 %v12163_v42, %v4120_v36  ;;  %9420 = vpow2.f32 %v4130_v21  ;;  %v4638_v42 = vmul.f32 1.442695, %v4629_v43  ;;  %v4631_v19 = vsub.f32 %v12166_v59, %v4610_v55 }
 0xfd7   :  { %v4146_v60 = vmul.f32 1.442695, %v4129_v61 }
 0xfd8   :  { %v4607_v52 = vpop.xlane.xlu0 %4606 }
 0xfd9   :  { %v4630_v36 = vsub.f32 %v12171_v40, %v4607_v52 }
 0xfda   :  { %v12317_v2 = vpop.xlane.xlu1 %4621 }
 0xfdb   :  { %v4640_v27 = vmul.f32 1.442695, %v4630_v36 }
 0xfe2   :  { %v4628_v31 = vpop.xlane.xlu1 %4627 }
 0xfe3   :  { %9176 = vrot.lane.b32.xlu0 %v11610_v39, %s9633_s28  ;;  %v4127_v39 = vsub.f32 %v12151_v6, %v4114_v12  ;;  %v12325_v12 = vpop.eup %9416 }
 0xfe4   :  { %v4157_v7 = vsel %vm690_vm8, %v12325_v12, 0.0  ;;  %v12331_v21 = vpop.eup %9418 }
 0xfe5   :  { %9181 = vrot.lane.b32.xlu1 %v11620_v24, %s9633_s28  ;;  %v4122_v24 = vsub.f32 %v12114_v37, %v4099_v50  ;;  %v4142_v0 = vmul.f32 1.442695, %v4127_v39  ;;  %v4613_v37 = vpop.xlane.xlu0 %4612  ;;  %v12337_v49 = vpop.eup %9420  ;;  %v4160_v40 = vsel %vm690_vm8, %v12331_v21, 0.0 }
 0xfe6   :  { %v4632_v39 = vsub.f32 %v12178_v56, %v4613_v37  ;;  %v4148_v59 = vsel %vm690_vm8, %v12337_v49, 0.0 }
 0xfe7   :  { %v4132_v11 = vmul.f32 1.442695, %v4122_v24  ;;  %9422 = vpow2.f32 %v4142_v0  ;;  %v4128_v0 = vsub.f32 %v12144_v45, %v4117_v9  ;;  %v4642_v45 = vmul.f32 1.442695, %v4631_v19 }
 0xfe8   :  { %v4637_v9 = vsub.f32 %v12198_v30, %v4628_v31  ;;  %v4644_v56 = vmul.f32 1.442695, %v4632_v39 }
 0xfe9   :  { %9424 = vpow2.f32 %v4132_v11  ;;  %v4616_v62 = vpop.xlane.xlu0 %4615  ;;  %v4144_v28 = vmul.f32 1.442695, %v4128_v0 }
 0xfea   :  { %9426 = vpow2.f32 %v4146_v60  ;;  %v4633_v38 = vsub.f32 %v12188_v41, %v4616_v62  ;;  %v4654_v30 = vmul.f32 1.442695, %v4637_v9 }
 0xfeb   :  { %9428 = vpow2.f32 %v4134_v34 }
 0xfec   :  { %9430 = vpow2.f32 %v4638_v42  ;;  %v4646_v35 = vmul.f32 1.442695, %v4633_v38 }
 0xfed   :  { %9432 = vpow2.f32 %v4140_v46  ;;  %v4619_v11 = vpop.xlane.xlu0 %4618 }
 0xfee   :  { %v12323_v6 = vpop.xlane.xlu1 %5117  ;;  %9434 = vpow2.f32 %v4640_v27  ;;  %v4634_v41 = vsub.f32 %v12193_v48, %v4619_v11  ;;  %v4635_v48 = vsub.f32 %v12183_v22, %v12317_v2 }
 0xfef   :  { %9436 = vpow2.f32 %v4144_v28 }
 0xff0   :  { %9438 = vpow2.f32 %v4642_v45  ;;  %v4648_v27 = vmul.f32 1.442695, %v4634_v41 }
 0xff1   :  { %v12341_v53 = vpop.eup %9422  ;;  %9440 = vpow2.f32 %v4644_v56  ;;  %v4625_v42 = vpop.xlane.xlu0 %4624 }
 0xff2   :  { %v12334_v50 = vpop.xlane.xlu1 %5120  ;;  %v4166_v61 = vsel %vm690_vm8, %v12341_v53, 0.0  ;;  %9442 = vpow2.f32 %v4654_v30  ;;  %v4636_v2 = vsub.f32 %v12203_v17, %v4625_v42 }
 0xff3   :  { %v12347_v55 = vpop.eup %9424  ;;  %9444 = vpow2.f32 %v4646_v35 }
 0xff4   :  { %v12351_v52 = vpop.eup %9426  ;;  %v4151_v43 = vsel %vm690_vm8, %v12347_v55, 0.0  ;;  %v4652_v38 = vmul.f32 1.442695, %v4636_v2 }
 0xff5   :  { %v12357_v60 = vpop.eup %9428  ;;  %v4172_v37 = vsel %vm690_vm8, %v12351_v52, 0.0  ;;  %v5112_v9 = vpop.xlane.xlu0 %5111 }
 0xff6   :  { %v5124_v24 = vpop.xlane.xlu1 %5123  ;;  %v12361_v34 = vpop.eup %9430  ;;  %v5137_v30 = vsub.f32 %v12208_v14, %v5112_v9 }
 0xff7   :  { %v5141_v31 = vsub.f32 %v12230_v47, %v5124_v24  ;;  %v12368_v46 = vpop.eup %9432  ;;  %v4656_v0 = vsel %vm690_vm8, %v12361_v34, 0.0 }
 0xff8   :  { %v12372_v19 = vpop.eup %9434  ;;  %v5146_v42 = vmul.f32 1.442695, %v5137_v30 }
 0xff9   :  { %v5154_v36 = vmul.f32 1.442695, %v5141_v31  ;;  %v12380_v28 = vpop.eup %9436  ;;  %v4659_v39 = vsel %vm690_vm8, %v12372_v19, 0.0  ;;  %v5115_v31 = vpop.xlane.xlu0 %5114 }
 0xffa   :  { %v12364_v47 = vpop.xlane.xlu1 %5126  ;;  %v12384_v45 = vpop.eup %9438  ;;  %v4169_v24 = vsel %vm690_vm8, %v12380_v28, 0.0 }
 0xffb   :  { %9446 = vpow2.f32 %v5154_v36  ;;  %v4662_v11 = vsel %vm690_vm8, %v12384_v45, 0.0  ;;  %v5138_v36 = vsub.f32 %v12213_v20, %v5115_v31  ;;  %v5139_v20 = vsub.f32 %v12218_v44, %v12323_v6 }
 0xffc   :  { %9448 = vpow2.f32 %v4648_v27  ;;  %v9133_v27 = vunpack.i.l.bf16 %v12239_v16 }
 0xffd   :  { %v5148_v9 = vmul.f32 1.442695, %v5138_v36  ;;  %v5150_v44 = vmul.f32 1.442695, %v5139_v20 }
0x1002   :  { %4158 = vadd.xlane.f32.xlu0 %v4157_v7  ;;  %v4154_v7 = vsel %vm690_vm8, %v12357_v60, 0.0  ;;  %v12376_v62 = vpop.xlane.xlu1 %5132 }
0x1006   :  { %4161 = vadd.xlane.f32.xlu0 %v4160_v40  ;;  %v4163_v40 = vsel %vm690_vm8, %v12368_v46, 0.0 }
0x1009   :  { %4149 = vadd.xlane.f32.xlu1 %v4148_v59  ;;  %v4650_v59 = vmul.f32 1.442695, %v4635_v48  ;;  %v9134_v48 = vunpack.i.h.bf16 %v12239_v16  ;;  %v9139_v16 = vunpack.i.h.bf16 %v11929_v4 }
0x100a   :  { %4167 = vadd.xlane.f32.xlu0 %v4166_v61  ;;  %v12389_v61 = vpop.eup %9440 }
0x100b   :  { %v12393_v56 = vpop.eup %9442 }
0x100c   :  { %v4680_v35 = vsel %vm690_vm8, %v12393_v56, 0.0 }
0x100d   :  { %4152 = vadd.xlane.f32.xlu1 %v4151_v43  ;;  %v4665_v43 = vsel %vm690_vm8, %v12389_v61, 0.0 }
0x100e   :  { %4173 = vadd.xlane.f32.xlu0 %v4172_v37  ;;  %v12398_v37 = vpop.eup %9444 }
0x100f   :  { %v12402_v41 = vpop.eup %9446 }
0x1011   :  { %4155 = vadd.xlane.f32.xlu1 %v4154_v7  ;;  %v4668_v7 = vsel %vm690_vm8, %v12398_v37, 0.0 }
0x1012   :  { %4657 = vadd.xlane.f32.xlu0 %v4656_v0  ;;  %v12407_v0 = vpop.eup %9448 }
0x1015   :  { %4164 = vadd.xlane.f32.xlu1 %v4163_v40  ;;  %v5176_v40 = vsel %vm690_vm8, %v12402_v41, 0.0 }
0x1016   :  { %4660 = vadd.xlane.f32.xlu0 %v4659_v39 }
0x1018   :  { %v3678_v22 = vpop.xlane.xlu1 %3677 }
0x1019   :  { %9450 = vrcp.f32 %v3678_v22  ;;  %4170 = vadd.xlane.f32.xlu1 %v4169_v24  ;;  %v4671_v22 = vsel %vm690_vm8, %v12407_v0, 0.0 }
0x101a   :  { %4663 = vadd.xlane.f32.xlu0 %v4662_v11  ;;  %9452 = vpow2.f32 %v4650_v59  ;;  %v9138_v11 = vunpack.i.l.bf16 %v11929_v4 }
0x101c   :  { %v3681_v17 = vpop.xlane.xlu1 %3680 }
0x101d   :  { %9454 = vrcp.f32 %v3681_v17  ;;  %4666 = vadd.xlane.f32.xlu1 %v4665_v43  ;;  %v8722_v17 = vpack.c.bf16 %v9139_v16, %v9138_v11  ;;  %v9144_v43 = vunpack.i.h.bf16 %v12249_v32 }
0x101e   :  { %4681 = vadd.xlane.f32.xlu0 %v4680_v35  ;;  %9456 = vpow2.f32 %v4652_v38  ;;  %v8719_v38 = vpack.c.bf16 %v9134_v48, %v9133_v27  ;;  %v9143_v35 = vunpack.i.l.bf16 %v12249_v32 }
0x1020   :  { %v3684_v14 = vpop.xlane.xlu1 %3683  ;;  %v8725_v48 = vpack.c.bf16 %v9144_v43, %v9143_v35 }
0x1021   :  { %9458 = vrcp.f32 %v3684_v14  ;;  %4669 = vadd.xlane.f32.xlu1 %v4668_v7  ;;  %v9149_v14 = vunpack.i.h.bf16 %v11940_v18  ;;  %v9148_v7 = vunpack.i.l.bf16 %v11940_v18 }
0x1022   :  { %5177 = vadd.xlane.f32.xlu0 %v5176_v40  ;;  %9460 = vpow2.f32 %v5146_v42  ;;  %v5142_v42 = vsub.f32 %v12235_v51, %v12364_v47 }
0x1023   :  { %v9451_v39 = vpop.eup %9450  ;;  %v8728_v18 = vpack.c.bf16 %v9149_v14, %v9148_v7  ;;  %v13466_v14 = vld [vmem:[#allocation27_spill] sm:$0xff] }
0x1024   :  { %v3712_v59 = vmul.f32 %v9451_v39, %v12264_v57  ;;  %v3687_v2 = vpop.xlane.xlu1 %3686  ;;  %v12418_v24 = vpop.eup %9452  ;;  %v5140_v57 = vsub.f32 %v12225_v13, %v12334_v50  ;;  %v5156_v47 = vmul.f32 1.442695, %v5142_v42 }
0x1025   :  { %9462 = vrcp.f32 %v3687_v2  ;;  %4672 = vadd.xlane.f32.xlu1 %v4671_v22  ;;  %v4674_v6 = vsel %vm690_vm8, %v12418_v24, 0.0  ;;  %v5130_v22 = vpop.xlane.xlu0 %5129 }
0x1026   :  { %8040 = vmatmul.mubr.msk.f32.vlgmr.msra.gmra.mrb[126].mxu1 %vm690_vm8, %v3712_v59  ;;  %9464 = vpow2.f32 %v5148_v9  ;;  %v5152_v50 = vmul.f32 1.442695, %v5140_v57 }
0x1027   :  { %v9455_v30 = vpop.eup %9454  ;;  %8720 = vmatpush3.bf16.msra.mxu1 %v8719_v38  ;;  %8042 = vmatprep.mubr.msk.f32.mxu1 %vm9621_vm3, %v13423_v33  ;;  %9466 = vpow2.f32 %v5150_v44 }
0x1028   :  { %8721 = vmatprep.subr.bf16.mxu1 %v13424_v58  ;;  %v3713_v4 = vmul.f32 %v9455_v30, %v12268_v54  ;;  %v12431_v31 = vpop.eup %9456  ;;  %9468 = vpow2.f32 %v5152_v50 }
0x1029   :  { %4675 = vadd.xlane.f32.xlu1 %v4674_v6  ;;  %v4677_v54 = vsel %vm690_vm8, %v12431_v31, 0.0  ;;  %9470 = vpow2.f32 %v5156_v47  ;;  %v5136_v16 = vpop.xlane.xlu0 %5135 }
0x102a   :  { %8043 = vmatmul.mubr.msk.f32.gmra.mrb[128].mxu1 %vm690_vm8, %v3713_v4  ;;  %v5145_v38 = vsub.f32 %v12254_v10, %v5136_v16 }
0x102b   :  { %v9459_v13 = vpop.eup %9458  ;;  %8723 = vmatpush3.bf16.msra.mxu1 %v8722_v17  ;;  %8045 = vmatprep.mubr.msk.f32.mxu1 %vm9621_vm3, %v13423_v33 }
0x102c   :  { %8724 = vmatprep.subr.bf16.mxu1 %v13424_v58  ;;  %v3714_v32 = vmul.f32 %v9459_v13, %v12272_v15  ;;  %v12444_v36 = vpop.eup %9460  ;;  %v5162_v30 = vmul.f32 1.442695, %v5145_v38 }
0x102d   :  { %4678 = vadd.xlane.f32.xlu1 %v4677_v54  ;;  %v5164_v15 = vsel %vm690_vm8, %v12444_v36, 0.0 }
0x102e   :  { %8046 = vmatmul.mubr.msk.f32.gmra.mrb[130].mxu1 %vm690_vm8, %v3714_v32 }
0x102f   :  { %v9463_v51 = vpop.eup %9462  ;;  %8726 = vmatpush3.bf16.msra.mxu1 %v8725_v48  ;;  %8048 = vmatprep.mubr.msk.f32.mxu1 %vm9621_vm3, %v13423_v33 }
0x1030   :  { %8727 = vmatprep.subr.bf16.mxu1 %v13424_v58  ;;  %v3715_v27 = vmul.f32 %v9463_v51, %v12276_v8  ;;  %v12455_v40 = vpop.eup %9464 }
0x1031   :  { %5165 = vadd.xlane.f32.xlu1 %v5164_v15  ;;  %v5167_v39 = vsel %vm690_vm8, %v12455_v40, 0.0  ;;  %v12463_v20 = vpop.eup %9466 }
0x1032   :  { %8049 = vmatmul.mubr.msk.f32.gmra.mrb[132].mxu1 %vm690_vm8, %v3715_v27  ;;  %v5170_v8 = vsel %vm690_vm8, %v12463_v20, 0.0  ;;  %v12471_v9 = vpop.eup %9468 }
0x1033   :  { %8729 = vmatpush3.bf16.msra.mxu1 %v8728_v18  ;;  %8051 = vmatprep.mubr.msk.f32.mxu1 %vm9621_vm3, %v13423_v33  ;;  %v5173_v59 = vsel %vm690_vm8, %v12471_v9, 0.0  ;;  %v12475_v2 = vpop.eup %9470 }
0x1034   :  { %8127 = vmatprep.subr.mxu1 %v13423_v33 }
0x1035   :  { %5168 = vadd.xlane.f32.xlu1 %v5167_v39 }
0x1037   :  { %8128 = vmatpush3.msra.mxu1 %v12258_v1  ;;  %v5179_v1 = vsel %vm690_vm8, %v12475_v2, 0.0 }
0x1038   :  { %9186 = vrot.lane.b32.xlu0 %v11630_v25, %s9633_s28  ;;  %8746 = vmatprep.subr.bf16.mxu1 %v13424_v58  ;;  %v5143_v25 = vsub.f32 %v12242_v63, %v5130_v22 }
0x1039   :  { %5171 = vadd.xlane.f32.xlu1 %v5170_v8 }
0x103a   :  { %v5158_v11 = vmul.f32 1.442695, %v5143_v25 }
0x103c   :  { %9472 = vpow2.f32 %v5158_v11 }
0x103d   :  { %5174 = vadd.xlane.f32.xlu1 %v5173_v59  ;;  %9474 = vpow2.f32 %v5162_v30 }
0x1041   :  { %5180 = vadd.xlane.f32.xlu1 %v5179_v1  ;;  %v13468_v1 = vld [vmem:[#allocation13_spill] sm:$0xff] }
0x1042   :  { %v9154_v25 = vunpack.i.h.bf16 %v13468_v1  ;;  %v9153_v16 = vunpack.i.l.bf16 %v13468_v1 }
0x1046   :  { %v12483_v57 = vpop.eup %9472 }
0x1047   :  { %v5182_v6 = vsel %vm690_vm8, %v12483_v57, 0.0  ;;  %v12487_v4 = vpop.eup %9474 }
0x1048   :  { %v5188_v10 = vsel %vm690_vm8, %v12487_v4, 0.0 }
0x1051   :  { %v3690_v44 = vpop.xlane.xlu1 %3689 }
0x1052   :  { %9476 = vrcp.f32 %v3690_v44  ;;  %5225 = vrot.lane.b32.xlu1 %v11638_v23, %s9633_s28  ;;  %v5144_v23 = vsub.f32 %v12247_v3, %v12376_v62 }
0x1054   :  { %v5160_v54 = vmul.f32 1.442695, %v5144_v23 }
0x1057   :  { %5183 = vadd.xlane.f32.xlu0 %v5182_v6  ;;  %v8747_v6 = vpack.c.bf16 %v9154_v25, %v9153_v16 }
0x1059   :  { %v3693_v63 = vpop.xlane.xlu1 %3692 }
0x105a   :  { %9478 = vrcp.f32 %v3693_v63  ;;  %v3702_v13 = vpop.xlane.xlu0 %3701  ;;  %v13469_v63 = vld [vmem:[#allocation14_spill] sm:$0xff] }
0x105b   :  { %5189 = vadd.xlane.f32.xlu0 %v5188_v10  ;;  %v9159_v10 = vunpack.i.h.bf16 %v13469_v63 }
0x105c   :  { %v9477_v17 = vpop.eup %9476 }
0x105d   :  { %v3696_v43 = vpop.xlane.xlu1 %3695  ;;  %v3716_v35 = vmul.f32 %v9477_v17, %v12289_v5  ;;  %v9158_v17 = vunpack.i.l.bf16 %v13469_v63 }
0x105e   :  { %9480 = vrcp.f32 %v3696_v43  ;;  %v12517_v15 = vpop.permute.xlu0 %9176 }
0x105f   :  { %8052 = vmatmul.mubr.msk.f32.gmra.mrb[134].mxu1 %vm690_vm8, %v3716_v35  ;;  %v8750_v23 = vpack.c.bf16 %v9159_v10, %v9158_v17 }
0x1060   :  { %8054 = vmatprep.mubr.msk.f32.mxu1 %vm9621_vm3, %v13423_v33 }
0x1061   :  { %v3699_v50 = vpop.xlane.xlu1 %3698 }
0x1062   :  { %9482 = vrcp.f32 %v3699_v50 }
0x1063   :  { %9484 = vrcp.f32 %v3702_v13  ;;  %v13470_v13 = vld [vmem:[#allocation21_spill] sm:$0xff] }
0x1064   :  { %v9479_v42 = vpop.eup %9478  ;;  %9486 = vpow2.f32 %v5160_v54  ;;  %v9164_v50 = vunpack.i.h.bf16 %v13470_v13 }
0x1065   :  { %v3717_v32 = vmul.f32 %v9479_v42, %v12293_v26  ;;  %v13467_v26 = vld [vmem:[#allocation26_spill] sm:$0xff]  ;;  %v12519_v27 = vpop.permute.xlu1 %9181  ;;  %v9163_v42 = vunpack.i.l.bf16 %v13470_v13 }
0x1067   :  { %8055 = vmatmul.mubr.msk.f32.gmra.mrb[136].mxu1 %vm690_vm8, %v3717_v32 }
0x1068   :  { %v9481_v5 = vpop.eup %9480  ;;  %8057 = vmatprep.mubr.msk.f32.mxu1 %vm9621_vm3, %v13423_v33 }
0x1069   :  { %v3718_v3 = vmul.f32 %v9481_v5, %v12299_v29 }
0x106b   :  { %8058 = vmatmul.mubr.msk.f32.gmra.mrb[138].mxu1 %vm690_vm8, %v3718_v3 }
0x106c   :  { %v9483_v62 = vpop.eup %9482  ;;  %8060 = vmatprep.mubr.msk.f32.mxu1 %vm9621_vm3, %v13423_v33 }
0x106d   :  { %v3719_v7 = vmul.f32 %v9483_v62, %v13466_v14  ;;  %v9485_v48 = vpop.eup %9484  ;;  %v8753_v62 = vpack.c.bf16 %v9164_v50, %v9163_v42  ;;  %v13471_v14 = vld [vmem:[#allocation23_spill] sm:$0xff] }
0x106e   :  { %v3720_v51 = vmul.f32 %v9485_v48, %v13467_v26  ;;  %v12510_v47 = vpop.eup %9486  ;;  %v9168_v48 = vunpack.i.l.bf16 %v13471_v14 }
0x106f   :  { %8061 = vmatmul.mubr.msk.f32.gmra.mrb[140].mxu1 %vm690_vm8, %v3719_v7  ;;  %v5185_v29 = vsel %vm690_vm8, %v12510_v47, 0.0  ;;  %v9169_v7 = vunpack.i.h.bf16 %v13471_v14 }
0x1070   :  { %8063 = vmatprep.mubr.msk.f32.mxu1 %vm9621_vm3, %v13423_v33 }
0x1073   :  { %8064 = vmatmul.mubr.msk.f32.gmra.mrb[142].mxu1 %vm690_vm8, %v3720_v51 }
0x1074   :  { %8129 = vmatprep.mubr.msk.f32.mxu1 %vm9621_vm3, %v13423_v33 }
0x1076   :  { %5186 = vadd.xlane.f32.xlu1 %v5185_v29 }
0x108f   :  { %v4159_v18 = vpop.xlane.xlu0 %4158 }
0x1093   :  { %v4162_v59 = vpop.xlane.xlu0 %4161 }
0x1096   :  { %v4150_v39 = vpop.xlane.xlu1 %4149 }
0x1097   :  { %9488 = vrcp.f32 %v4150_v39  ;;  %v4168_v30 = vpop.xlane.xlu0 %4167 }
0x109a   :  { %v4153_v8 = vpop.xlane.xlu1 %4152 }
0x109b   :  { %9490 = vrcp.f32 %v4153_v8  ;;  %v4174_v54 = vpop.xlane.xlu0 %4173 }
0x109e   :  { %v4156_v22 = vpop.xlane.xlu1 %4155 }
0x109f   :  { %9492 = vrcp.f32 %v4156_v22  ;;  %v4658_v26 = vpop.xlane.xlu0 %4657 }
0x10a0   :  { %9494 = vrcp.f32 %v4159_v18  ;;  %v8756_v18 = vpack.c.bf16 %v9169_v7, %v9168_v48  ;;  %v9184_v48 = vunpack.i.h.bf16 %v12519_v27 }
0x10a1   :  { %v9489_v11 = vpop.eup %9488  ;;  %9496 = vrcp.f32 %v4162_v59 }
0x10a2   :  { %v4184_v38 = vmul.f32 %v9489_v11, %v12337_v49  ;;  %v4165_v44 = vpop.xlane.xlu1 %4164 }
0x10a3   :  { %9498 = vrcp.f32 %v4165_v44  ;;  %v4661_v22 = vpop.xlane.xlu0 %4660 }
0x10a4   :  { %8130 = vmatmul.mubr.msk.f32.vlgmr.msra.gmra.mrb[144].mxu1 %vm690_vm8, %v4184_v38  ;;  %9500 = vrcp.f32 %v4168_v30 }
0x10a5   :  { %v9491_v43 = vpop.eup %9490  ;;  %8748 = vmatpush3.bf16.msra.mxu1 %v8747_v6  ;;  %8132 = vmatprep.mubr.msk.f32.mxu1 %vm9621_vm3, %v13423_v33 }
0x10a6   :  { %v4171_v35 = vpop.xlane.xlu1 %4170  ;;  %8749 = vmatprep.subr.bf16.mxu1 %v13424_v58  ;;  %v4185_v49 = vmul.f32 %v9491_v43, %v12347_v55  ;;  %v13473_v43 = vld [vmem:[#allocation24_spill] sm:$0xff] }
0x10a7   :  { %9502 = vrcp.f32 %v4171_v35  ;;  %v9174_v35 = vunpack.i.h.bf16 %v13473_v43 }
0x10a8   :  { %8133 = vmatmul.mubr.msk.f32.gmra.mrb[146].mxu1 %vm690_vm8, %v4185_v49  ;;  %9504 = vrcp.f32 %v4174_v54  ;;  %v9173_v49 = vunpack.i.l.bf16 %v13473_v43  ;;  %v9178_v54 = vunpack.i.l.bf16 %v12517_v15 }
0x10a9   :  { %v9493_v32 = vpop.eup %9492  ;;  %8751 = vmatpush3.bf16.msra.mxu1 %v8750_v23  ;;  %8135 = vmatprep.mubr.msk.f32.mxu1 %vm9621_vm3, %v13423_v33  ;;  %9506 = vrcp.f32 %v4658_v26  ;;  %v9183_v26 = vunpack.i.l.bf16 %v12519_v27 }
0x10aa   :  { %v4667_v5 = vpop.xlane.xlu1 %4666  ;;  %8752 = vmatprep.subr.bf16.mxu1 %v13424_v58  ;;  %v4186_v3 = vmul.f32 %v9493_v32, %v12357_v60  ;;  %v9495_v55 = vpop.eup %9494  ;;  %9508 = vrcp.f32 %v4661_v22  ;;  %v8775_v42 = vpack.c.bf16 %v9174_v35, %v9173_v49  ;;  %v9590_v32 = vld [vmem:[%s13343_s2 + $0x40] sm:$0xff] }
0x10ab   :  { %v4187_v29 = vmul.f32 %v9495_v55, %v12325_v12  ;;  %v9497_v60 = vpop.eup %9496  ;;  %v13472_v12 = vld [vmem:[#allocation25_spill] sm:$0xff] }
0x10ac   :  { %8136 = vmatmul.mubr.msk.f32.gmra.mrb[148].mxu1 %vm690_vm8, %v4186_v3  ;;  %v4188_v8 = vmul.f32 %v9497_v60, %v12331_v21  ;;  %v4664_v21 = vpop.xlane.xlu0 %4663  ;;  %v9593_v55 = vld [vmem:[%s13343_s2 + $0x70] sm:$0xff] }
0x10ad   :  { %8754 = vmatpush3.bf16.msra.mxu1 %v8753_v62  ;;  %8138 = vmatprep.mubr.msk.f32.mxu1 %vm9621_vm3, %v13423_v33  ;;  %v9499_v59 = vpop.eup %9498  ;;  %9510 = vrcp.f32 %v4664_v21 }
0x10ae   :  { %v4670_v51 = vpop.xlane.xlu1 %4669  ;;  %8755 = vmatprep.subr.bf16.mxu1 %v13424_v58  ;;  %v4189_v25 = vmul.f32 %v9499_v59, %v12368_v46  ;;  %v9501_v16 = vpop.eup %9500  ;;  %9512 = vrcp.f32 %v4667_v5  ;;  %v9591_v5 = vld [vmem:[%s13343_s2 + $0x50] sm:$0xff] }
0x10af   :  { %v4190_v38 = vmul.f32 %v9501_v16, %v12341_v53  ;;  %v9190_v3 = vpack.i.bf16 %v9591_v5, %v9590_v32  ;;  %9514 = vrcp.f32 %v4670_v51 }
0x10b0   :  { %8139 = vmatmul.mubr.msk.f32.gmra.mrb[150].mxu1 %vm690_vm8, %v4187_v29  ;;  %v12572_v63 = vpop.xlane.xlu0 %4681 }
0x10b1   :  { %8757 = vmatpush3.bf16.msra.mxu1 %v8756_v18  ;;  %8141 = vmatprep.mubr.msk.f32.mxu1 %vm9621_vm3, %v13423_v33  ;;  %v9503_v30 = vpop.eup %9502  ;;  %v8781_v18 = vpack.c.bf16 %v9184_v48, %v9183_v26 }
0x10b2   :  { %v12548_v39 = vpop.xlane.xlu1 %4672  ;;  %8217 = vmatprep.subr.mxu1 %v13423_v33  ;;  %v4191_v44 = vmul.f32 %v9503_v30, %v12380_v28  ;;  %v9505_v6 = vpop.eup %9504  ;;  %9191 = vrot.lane.b32.xlu0 %v9190_v3, %s9634_s11 }
0x10b3   :  { %v4192_v10 = vmul.f32 %v9505_v6, %v12351_v52  ;;  %v9507_v17 = vpop.eup %9506  ;;  %v9179_v52 = vunpack.i.h.bf16 %v12517_v15  ;;  %v9592_v15 = vld [vmem:[%s13343_s2 + $0x60] sm:$0xff]  ;;  %9516 = vrcp.f32 %v12548_v39 }
0x10b4   :  { %8142 = vmatmul.mubr.msk.f32.gmra.mrb[152].mxu1 %vm690_vm8, %v4188_v8  ;;  %v4692_v28 = vmul.f32 %v9507_v17, %v12361_v34  ;;  %v12586_v23 = vpop.xlane.xlu0 %5177  ;;  %v9509_v50 = vpop.eup %9508  ;;  %v9195_v62 = vpack.i.bf16 %v9593_v55, %v9592_v15 }
0x10b5   :  { %8218 = vmatpush3.msra.mxu1 %v13472_v12  ;;  %8144 = vmatprep.mubr.msk.f32.mxu1 %vm9621_vm3, %v13423_v33  ;;  %v4693_v34 = vmul.f32 %v9509_v50, %v12372_v19  ;;  %v8778_v7 = vpack.c.bf16 %v9179_v52, %v9178_v54 }
0x10b6   :  { %v12556_v1 = vpop.xlane.xlu1 %4675  ;;  %8774 = vmatprep.subr.bf16.mxu1 %v13424_v58  ;;  %9196 = vrot.lane.b32.xlu0 %v9195_v62, %s9634_s11  ;;  %s13474_s11 = smov 24  }
0x10b7   :  { %v9511_v14 = vpop.eup %9510  ;;  %9518 = vrcp.f32 %v12556_v1 }
0x10b8   :  { %8145 = vmatmul.mubr.msk.f32.gmra.mrb[154].mxu1 %vm690_vm8, %v4189_v25  ;;  %v9187_v51 = vpop.permute.xlu0 %9186  ;;  %v4694_v19 = vmul.f32 %v9511_v14, %v12384_v45  ;;  %v9513_v60 = vpop.eup %9512 }
0x10b9   :  { %8147 = vmatprep.mubr.msk.f32.mxu1 %vm9621_vm3, %v13423_v33  ;;  %v9189_v8 = vunpack.i.h.bf16 %v9187_v51  ;;  %v9188_v27 = vunpack.i.l.bf16 %v9187_v51  ;;  %v4695_v59 = vmul.f32 %v9513_v60, %v12389_v61  ;;  %v9515_v45 = vpop.eup %9514 }
0x10ba   :  { %v12563_v11 = vpop.xlane.xlu1 %4678  ;;  %v4696_v12 = vmul.f32 %v9515_v45, %v12398_v37 }
0x10bb   :  { %v8784_v22 = vpack.c.bf16 %v9189_v8, %v9188_v27  ;;  %9520 = vrcp.f32 %v12563_v11 }
0x10bc   :  { %8148 = vmatmul.mubr.msk.f32.gmra.mrb[156].mxu1 %vm690_vm8, %v4190_v38  ;;  %9522 = vrcp.f32 %v12572_v63 }
0x10bd   :  { %8150 = vmatprep.mubr.msk.f32.mxu1 %vm9621_vm3, %v13423_v33  ;;  %v9517_v1 = vpop.eup %9516 }
0x10be   :  { %v12569_v46 = vpop.xlane.xlu1 %5165  ;;  %v4697_v61 = vmul.f32 %v9517_v1, %v12407_v0 }
0x10bf   :  { %9524 = vrcp.f32 %v12569_v46 }
0x10c0   :  { %8151 = vmatmul.mubr.msk.f32.gmra.mrb[158].mxu1 %vm690_vm8, %v4191_v44 }
0x10c1   :  { %8153 = vmatprep.mubr.msk.f32.mxu1 %vm9621_vm3, %v13423_v33  ;;  %v9519_v16 = vpop.eup %9518 }
0x10c2   :  { %v12577_v53 = vpop.xlane.xlu1 %5168  ;;  %v4698_v37 = vmul.f32 %v9519_v16, %v12418_v24 }
0x10c3   :  { %9526 = vrcp.f32 %v12577_v53 }
0x10c4   :  { %8154 = vmatmul.mubr.msk.f32.gmra.mrb[160].mxu1 %vm690_vm8, %v4192_v10 }
0x10c5   :  { %8219 = vmatprep.mubr.msk.f32.mxu1 %vm9621_vm3, %v13423_v33  ;;  %v9521_v21 = vpop.eup %9520 }
0x10c6   :  { %v12588_v13 = vpop.xlane.xlu1 %5171  ;;  %v4699_v0 = vmul.f32 %v9521_v21, %v12431_v31  ;;  %v9523_v11 = vpop.eup %9522 }
0x10c7   :  { %9528 = vrcp.f32 %v12588_v13  ;;  %v4700_v24 = vmul.f32 %v9523_v11, %v12393_v56 }
0x10c8   :  { %8220 = vmatmul.mubr.msk.f32.vlgmr.msra.gmra.mrb[162].mxu1 %vm690_vm8, %v4692_v28 }
0x10c9   :  { %8776 = vmatpush3.bf16.msra.mxu1 %v8775_v42  ;;  %8222 = vmatprep.mubr.msk.f32.mxu1 %vm9621_vm3, %v13423_v33  ;;  %v9525_v38 = vpop.eup %9524 }
0x10ca   :  { %8777 = vmatprep.subr.bf16.mxu1 %v13424_v58  ;;  %v5175_v29 = vpop.xlane.xlu1 %5174  ;;  %v5200_v30 = vmul.f32 %v9525_v38, %v12444_v36 }
0x10cb   :  { %9530 = vrcp.f32 %v5175_v29 }
0x10cc   :  { %8223 = vmatmul.mubr.msk.f32.gmra.mrb[164].mxu1 %vm690_vm8, %v4693_v34  ;;  %9532 = vrcp.f32 %v12586_v23 }
0x10cd   :  { %8779 = vmatpush3.bf16.msra.mxu1 %v8778_v7  ;;  %8225 = vmatprep.mubr.msk.f32.mxu1 %vm9621_vm3, %v13423_v33  ;;  %v9527_v31 = vpop.eup %9526 }
0x10ce   :  { %8780 = vmatprep.subr.bf16.mxu1 %v13424_v58  ;;  %v5181_v39 = vpop.xlane.xlu1 %5180  ;;  %v5201_v46 = vmul.f32 %v9527_v31, %v12455_v40 }
0x10cf   :  { %9534 = vrcp.f32 %v5181_v39 }
0x10d0   :  { %8226 = vmatmul.mubr.msk.f32.gmra.mrb[166].mxu1 %vm690_vm8, %v4694_v19 }
0x10d1   :  { %8782 = vmatpush3.bf16.msra.mxu1 %v8781_v18  ;;  %8228 = vmatprep.mubr.msk.f32.mxu1 %vm9621_vm3, %v13423_v33  ;;  %v9529_v56 = vpop.eup %9528 }
0x10d2   :  { %8783 = vmatprep.subr.bf16.mxu1 %v13424_v58  ;;  %v5226_v25 = vpop.permute.xlu1 %5225  ;;  %v5202_v36 = vmul.f32 %v9529_v56, %v12463_v20 }
0x10d4   :  { %8229 = vmatmul.mubr.msk.f32.gmra.mrb[168].mxu1 %vm690_vm8, %v4695_v59 }
0x10d5   :  { %8785 = vmatpush3.bf16.msra.mxu1 %v8784_v22  ;;  %8231 = vmatprep.mubr.msk.f32.mxu1 %vm9621_vm3, %v13423_v33  ;;  %v9531_v6 = vpop.eup %9530 }
0x10d6   :  { %8307 = vmatprep.subr.mxu1 %v13423_v33  ;;  %v5203_v63 = vmul.f32 %v9531_v6, %v12471_v9  ;;  %v9533_v40 = vpop.eup %9532 }
0x10d7   :  { %v5204_v20 = vmul.f32 %v9533_v40, %v12402_v41 }
0x10d8   :  { %8232 = vmatmul.mubr.msk.f32.gmra.mrb[170].mxu1 %vm690_vm8, %v4696_v12 }
0x10d9   :  { %8308 = vmatpush3.msra.mxu1 %v5226_v25  ;;  %8234 = vmatprep.mubr.msk.f32.mxu1 %vm9621_vm3, %v13423_v33  ;;  %v9535_v17 = vpop.eup %9534 }
0x10da   :  { %8792 = vmatprep.subr.bf16.mxu1 %v13424_v58  ;;  %v5205_v35 = vmul.f32 %v9535_v17, %v12475_v2 }
0x10dc   :  { %8235 = vmatmul.mubr.msk.f32.gmra.mrb[172].mxu1 %vm690_vm8, %v4697_v61 }
0x10dd   :  { %8237 = vmatprep.mubr.msk.f32.mxu1 %vm9621_vm3, %v13423_v33 }
0x10e0   :  { %8238 = vmatmul.mubr.msk.f32.gmra.mrb[174].mxu1 %vm690_vm8, %v4698_v37 }
0x10e1   :  { %8240 = vmatprep.mubr.msk.f32.mxu1 %vm9621_vm3, %v13423_v33 }
0x10e4   :  { %8241 = vmatmul.mubr.msk.f32.gmra.mrb[176].mxu1 %vm690_vm8, %v4699_v0  ;;  %v5184_v44 = vpop.xlane.xlu0 %5183 }
0x10e5   :  { %8243 = vmatprep.mubr.msk.f32.mxu1 %vm9621_vm3, %v13423_v33  ;;  %9536 = vrcp.f32 %v5184_v44 }
0x10e8   :  { %8244 = vmatmul.mubr.msk.f32.gmra.mrb[178].mxu1 %vm690_vm8, %v4700_v24  ;;  %v5190_v13 = vpop.xlane.xlu0 %5189 }
0x10e9   :  { %8309 = vmatprep.mubr.msk.f32.mxu1 %vm9621_vm3, %v13423_v33 }
0x10ec   :  { %8310 = vmatmul.mubr.msk.f32.vlgmr.msra.gmra.mrb[180].mxu1 %vm690_vm8, %v5200_v30 }
0x10ed   :  { %8312 = vmatprep.mubr.msk.f32.mxu1 %vm9621_vm3, %v13423_v33 }
0x10ef   :  { %v9537_v49 = vpop.eup %9536 }
0x10f0   :  { %8313 = vmatmul.mubr.msk.f32.gmra.mrb[182].mxu1 %vm690_vm8, %v5201_v46  ;;  %v5206_v23 = vmul.f32 %v9537_v49, %v12483_v57 }
0x10f1   :  { %8315 = vmatprep.mubr.msk.f32.mxu1 %vm9621_vm3, %v13423_v33 }
0x10f4   :  { %8316 = vmatmul.mubr.msk.f32.gmra.mrb[184].mxu1 %vm690_vm8, %v5202_v36 }
0x10f5   :  { %8318 = vmatprep.mubr.msk.f32.mxu1 %vm9621_vm3, %v13423_v33 }
0x10f8   :  { %8319 = vmatmul.mubr.msk.f32.gmra.mrb[186].mxu1 %vm690_vm8, %v5203_v63 }
0x10f9   :  { %v3841_v53 = vpop.f32.mrb[126].mxu1  ;;  %8321 = vmatprep.mubr.msk.f32.mxu1 %vm9621_vm3, %v13423_v33 }
0x10fa   :  { %3885 = vst.msk [vmem:[#allocation2] sm:$0xff] %vm525_vm6, %v3841_v53  ;;  %v8041_v10 = vpop.f32.mrb[127].mxu1 }
0x10fc   :  { %8322 = vmatmul.mubr.msk.f32.gmra.mrb[188].mxu1 %vm690_vm8, %v5204_v20 }
0x10fd   :  { %v3846_v43 = vpop.f32.mrb[128].mxu1  ;;  %8324 = vmatprep.mubr.msk.f32.mxu1 %vm9621_vm3, %v13423_v33 }
0x10fe   :  { %3886 = vst.msk [vmem:[#allocation2 + $0x8] sm:$0xff] %vm525_vm6, %v3846_v43  ;;  %v8044_v9 = vpop.f32.mrb[129].mxu1 }
0x1100   :  { %8325 = vmatmul.mubr.msk.f32.gmra.mrb[190].mxu1 %vm690_vm8, %v5205_v35 }
0x1101   :  { %v3851_v28 = vpop.f32.mrb[130].mxu1  ;;  %8327 = vmatprep.mubr.msk.f32.mxu1 %vm9621_vm3, %v13423_v33 }
0x1102   :  { %3887 = vst.msk [vmem:[#allocation2 + $0x10] sm:$0xff] %vm525_vm6, %v3851_v28  ;;  %v8047_v41 = vpop.f32.mrb[131].mxu1 }
0x1103   :  { %v5187_v50 = vpop.xlane.xlu1 %5186 }
0x1104   :  { %9538 = vrcp.f32 %v5187_v50  ;;  %8328 = vmatmul.mubr.msk.f32.gmra.mrb[192].mxu1 %vm690_vm8, %v5206_v23 }
0x1105   :  { %v3856_v42 = vpop.f32.mrb[132].mxu1  ;;  %8330 = vmatprep.mubr.msk.f32.mxu1 %vm9621_vm3, %v13423_v33  ;;  %9540 = vrcp.f32 %v5190_v13 }
0x1106   :  { %3888 = vst.msk [vmem:[#allocation2 + $0x18] sm:$0xff] %vm525_vm6, %v3856_v42  ;;  %v8050_v2 = vpop.f32.mrb[133].mxu1 }
0x110e   :  { %v9539_v52 = vpop.eup %9538 }
0x110f   :  { %v5207_v54 = vmul.f32 %v9539_v52, %v12510_v47  ;;  %v9541_v32 = vpop.eup %9540 }
0x1110   :  { %v5208_v57 = vmul.f32 %v9541_v32, %v12487_v4 }
0x1111   :  { %8331 = vmatmul.mubr.msk.f32.gmra.mrb[194].mxu1 %vm690_vm8, %v5207_v54 }
0x1112   :  { %8333 = vmatprep.mubr.msk.f32.mxu1 %vm9621_vm3, %v13423_v33 }
0x1115   :  { %8334 = vmatmul.mubr.msk.f32.gmra.mrb[196].mxu1 %vm690_vm8, %v5208_v57 }
0x1116   :  { %8379 = vmatprep.mubr.msk.f32.mxu1 %vm9621_vm3, %v13423_v33 }
0x1124   :  { %v9192_v48 = vpop.permute.xlu0 %9191 }
0x1125   :  { %v9194_v26 = vunpack.i.h.bf16 %v9192_v48  ;;  %v9193_v51 = vunpack.i.l.bf16 %v9192_v48 }
0x1127   :  { %v8787_v29 = vpack.c.bf16 %v9194_v26, %v9193_v51 }
0x1128   :  { %v9197_v19 = vpop.permute.xlu0 %9196 }
0x1129   :  { %8788 = vmatpush3.bf16.msra.mxu0 %v8787_v29  ;;  %v9199_v60 = vunpack.i.h.bf16 %v9197_v19  ;;  %v9198_v18 = vunpack.i.l.bf16 %v9197_v19 }
0x112a   :  { %8789 = vmatprep.subr.bf16.mxu0 %v13424_v58 }
0x112b   :  { %v8790_v8 = vpack.c.bf16 %v9199_v60, %v9198_v18 }
0x112d   :  { %8791 = vmatpush3.bf16.msra.mxu0 %v8790_v8 }
0x112e   :  { %8798 = vmatprep.subr.bf16.mxu0 %v13424_v58 }
0x1132   :  { %v3861_v5 = vpop.f32.mrb[134].mxu1 }
0x1133   :  { %3889 = vst.msk [vmem:[#allocation2 + $0x20] sm:$0xff] %vm525_vm6, %v3861_v5  ;;  %v8053_v3 = vpop.f32.mrb[135].mxu1 }
0x113a   :  { %v3866_v34 = vpop.f32.mrb[136].mxu1 }
0x113b   :  { %3890 = vst.msk [vmem:[#allocation2 + $0x28] sm:$0xff] %vm525_vm6, %v3866_v34  ;;  %v8056_v47 = vpop.f32.mrb[137].mxu1 }
0x113e   :  { %v3871_v15 = vpop.f32.mrb[138].mxu1 }
0x113f   :  { %3891 = vst.msk [vmem:[#allocation2 + $0x30] sm:$0xff] %vm525_vm6, %v3871_v15  ;;  %v8059_v55 = vpop.f32.mrb[139].mxu1 }
0x1142   :  { %v3876_v62 = vpop.f32.mrb[140].mxu1 }
0x1143   :  { %3892 = vst.msk [vmem:[#allocation2 + $0x38] sm:$0xff] %vm525_vm6, %v3876_v62  ;;  %v8062_v4 = vpop.f32.mrb[141].mxu1 }
0x1146   :  { %v3881_v14 = vpop.f32.mrb[142].mxu1 }
0x1147   :  { %3893 = vst.msk [vmem:[#allocation2 + $0x40] sm:$0xff] %vm525_vm6, %v3881_v14  ;;  %v8065_v7 = vpop.f32.mrb[143].mxu1 }
0x1177   :  { %v4313_v27 = vpop.f32.mrb[144].mxu1 }
0x1178   :  { %4366 = vrot.lane.b32.xlu0 %v4313_v27, %s9635_s12  ;;  %v8131_v39 = vpop.f32.mrb[145].mxu1 }
0x117b   :  { %v4318_v59 = vpop.f32.mrb[146].mxu1 }
0x117c   :  { %4368 = vrot.lane.b32.xlu1 %v4318_v59, %s9635_s12  ;;  %v8134_v45 = vpop.f32.mrb[147].mxu1 }
0x117f   :  { %v4323_v22 = vpop.f32.mrb[148].mxu1 }
0x1180   :  { %4370 = vrot.lane.b32.xlu0 %v4323_v22, %s9635_s12  ;;  %v8137_v12 = vpop.f32.mrb[149].mxu1 }
0x1183   :  { %v4328_v1 = vpop.f32.mrb[150].mxu1 }
0x1184   :  { %4372 = vrot.lane.b32.xlu1 %v4328_v1, %s9635_s12  ;;  %v8140_v25 = vpop.f32.mrb[151].mxu1 }
0x1187   :  { %v4333_v61 = vpop.f32.mrb[152].mxu1 }
0x1188   :  { %4374 = vrot.lane.b32.xlu0 %v4333_v61, %s9635_s12  ;;  %v8143_v16 = vpop.f32.mrb[153].mxu1 }
0x118b   :  { %v4338_v37 = vpop.f32.mrb[154].mxu1 }
0x118c   :  { %4376 = vrot.lane.b32.xlu1 %v4338_v37, %s9635_s12  ;;  %v8146_v21 = vpop.f32.mrb[155].mxu1 }
0x118f   :  { %v4343_v0 = vpop.f32.mrb[156].mxu1 }
0x1190   :  { %v8149_v11 = vpop.f32.mrb[157].mxu1 }
0x1193   :  { %v4348_v24 = vpop.f32.mrb[158].mxu1 }
0x1194   :  { %v8152_v38 = vpop.f32.mrb[159].mxu1 }
0x1197   :  { %v4353_v30 = vpop.f32.mrb[160].mxu1 }
0x1198   :  { %v8155_v31 = vpop.f32.mrb[161].mxu1 }
0x119b   :  { %v4821_v46 = vpop.f32.mrb[162].mxu1 }
0x119c   :  { %4874 = vrot.lane.b32.xlu0 %v4821_v46, %s9636_s1  ;;  %v8221_v56 = vpop.f32.mrb[163].mxu1 }
0x119f   :  { %v4826_v44 = vpop.f32.mrb[164].mxu1 }
0x11a0   :  { %4876 = vrot.lane.b32.xlu0 %v4826_v44, %s9636_s1  ;;  %v8224_v36 = vpop.f32.mrb[165].mxu1 }
0x11a3   :  { %v4831_v6 = vpop.f32.mrb[166].mxu1 }
0x11a4   :  { %4878 = vrot.lane.b32.xlu1 %v4831_v6, %s9636_s1  ;;  %v8227_v63 = vpop.f32.mrb[167].mxu1 }
0x11a7   :  { %v4836_v40 = vpop.f32.mrb[168].mxu1 }
0x11a8   :  { %4880 = vrot.lane.b32.xlu0 %v4836_v40, %s9636_s1  ;;  %v8230_v53 = vpop.f32.mrb[169].mxu1 }
0x11ab   :  { %v4841_v10 = vpop.f32.mrb[170].mxu1 }
0x11ac   :  { %4882 = vrot.lane.b32.xlu1 %v4841_v10, %s9636_s1  ;;  %v8233_v20 = vpop.f32.mrb[171].mxu1 }
0x11af   :  { %v4846_v17 = vpop.f32.mrb[172].mxu1 }
0x11b0   :  { %v8236_v43 = vpop.f32.mrb[173].mxu1 }
0x11b1   :  { %v13475_v43 = vld [vmem:[#allocation22_spill] sm:$0xff] }
0x11b3   :  { %v4851_v9 = vpop.f32.mrb[174].mxu1 }
0x11b4   :  { %v8239_v35 = vpop.f32.mrb[175].mxu1 }
0x11b7   :  { %v4856_v49 = vpop.f32.mrb[176].mxu1 }
0x11b8   :  { %v8242_v28 = vpop.f32.mrb[177].mxu1 }
0x11bb   :  { %v4861_v41 = vpop.f32.mrb[178].mxu1 }
0x11bc   :  { %v8245_v23 = vpop.f32.mrb[179].mxu1 }
0x11bf   :  { %v5329_v13 = vpop.f32.mrb[180].mxu1 }
0x11c0   :  { %5382 = vrot.lane.b32.xlu0 %v5329_v13, %s13474_s11  ;;  %v8311_v50 = vpop.f32.mrb[181].mxu1 }
0x11c1   :  { %v13477_v50 = vld [vmem:[#allocation17_spill] sm:$0xff] }
0x11c3   :  { %v5334_v42 = vpop.f32.mrb[182].mxu1 }
0x11c4   :  { %5384 = vrot.lane.b32.xlu0 %v5334_v42, %s13474_s11  ;;  %v8314_v2 = vpop.f32.mrb[183].mxu1 }
0x11c7   :  { %v5339_v52 = vpop.f32.mrb[184].mxu1 }
0x11c8   :  { %5386 = vrot.lane.b32.xlu0 %v5339_v52, %s13474_s11  ;;  %v8317_v54 = vpop.f32.mrb[185].mxu1 }
0x11cb   :  { %v5344_v32 = vpop.f32.mrb[186].mxu1 }
0x11cc   :  { %4884 = vrot.lane.b32.xlu0 %v4846_v17, %s9636_s1  ;;  %5388 = vrot.lane.b32.xlu1 %v5344_v32, %s13474_s11  ;;  %v8320_v57 = vpop.f32.mrb[187].mxu1  ;;  %v12787_v17 = vld [vmem:[%s13345_s4 + $0x8] sm:$0xff] }
0x11cd   :  { %v13478_v57 = vld [vmem:[#allocation6_spill] sm:$0xff] }
0x11cf   :  { %v5349_v5 = vpop.f32.mrb[188].mxu1 }
0x11d0   :  { %4886 = vrot.lane.b32.xlu1 %v4851_v9, %s9636_s1  ;;  %5390 = vrot.lane.b32.xlu0 %v5349_v5, %s13474_s11  ;;  %v8323_v3 = vpop.f32.mrb[189].mxu1  ;;  %v5592_v9 = vrot.slane %v12787_v17, %v13475_v43 }
0x11d3   :  { %v5354_v34 = vpop.f32.mrb[190].mxu1 }
0x11d4   :  { %4378 = vrot.lane.b32.xlu0 %v4343_v0, %s9635_s12  ;;  %5392 = vrot.lane.b32.xlu1 %v5354_v34, %s13474_s11  ;;  %v8326_v47 = vpop.f32.mrb[191].mxu1 }
0x11d7   :  { %v5359_v15 = vpop.f32.mrb[192].mxu1 }
0x11d8   :  { %4380 = vrot.lane.b32.xlu1 %v4348_v24, %s9635_s12  ;;  %5394 = vrot.lane.b32.xlu0 %v5359_v15, %s13474_s11  ;;  %v8329_v55 = vpop.f32.mrb[193].mxu1 }
0x11d9   :  { %v13479_v55 = vld [vmem:[#allocation7_spill] sm:$0xff] }
0x11dc   :  { %4888 = vrot.lane.b32.xlu0 %v4856_v49, %s9636_s1  ;;  %v13476_v49 = vld [vmem:[#allocation18_spill] sm:$0xff] }
0x11e0   :  { %4382 = vrot.lane.b32.xlu0 %v4353_v30, %s9635_s12 }
0x11e4   :  { %v5364_v62 = vpop.f32.mrb[194].mxu1 }
0x11e5   :  { %5396 = vrot.lane.b32.xlu1 %v5364_v62, %s13474_s11  ;;  %v8332_v4 = vpop.f32.mrb[195].mxu1 }
0x11e8   :  { %v5369_v14 = vpop.f32.mrb[196].mxu1 }
0x11e9   :  { %4890 = vrot.lane.b32.xlu1 %v4861_v41, %s9636_s1  ;;  %5398 = vrot.lane.b32.xlu0 %v5369_v14, %s13474_s11  ;;  %v8335_v7 = vpop.f32.mrb[197].mxu1 }
0x11ea   :  { %v4367_v48 = vpop.permute.xlu0 %4366 }
0x11eb   :  { %4393 = vst.msk [vmem:[#allocation2] sm:$0xff] %vm1462_vm9, %v4367_v48 }
0x11ee   :  { %v4369_v26 = vpop.permute.xlu1 %4368 }
0x11ef   :  { %4394 = vst.msk [vmem:[#allocation2 + $0x8] sm:$0xff] %vm1462_vm9, %v4369_v26  ;;  %v13480_v26 = vld [vmem:[#allocation8_spill] sm:$0xff] }
0x11f2   :  { %v4371_v51 = vpop.permute.xlu0 %4370 }
0x11f3   :  { %4395 = vst.msk [vmem:[#allocation2 + $0x10] sm:$0xff] %vm1462_vm9, %v4371_v51 }
0x11f6   :  { %v4373_v29 = vpop.permute.xlu1 %4372 }
0x11f7   :  { %4396 = vst.msk [vmem:[#allocation2 + $0x18] sm:$0xff] %vm1462_vm9, %v4373_v29 }
0x11fa   :  { %v4375_v19 = vpop.permute.xlu0 %4374 }
0x11fb   :  { %4397 = vst.msk [vmem:[#allocation2 + $0x20] sm:$0xff] %vm1462_vm9, %v4375_v19 }
0x11fe   :  { %v4377_v60 = vpop.permute.xlu1 %4376 }
0x11ff   :  { %4398 = vst.msk [vmem:[#allocation2 + $0x28] sm:$0xff] %vm1462_vm9, %v4377_v60 }
0x120e   :  { %v4875_v18 = vpop.permute.xlu0 %4874 }
0x120f   :  { %4901 = vst.msk [vmem:[#allocation2] sm:$0xff] %vm1971_vm10, %v4875_v18 }
0x1212   :  { %v4877_v8 = vpop.permute.xlu0 %4876 }
0x1213   :  { %4902 = vst.msk [vmem:[#allocation2 + $0x8] sm:$0xff] %vm1971_vm10, %v4877_v8  ;;  %v13481_v8 = vld [vmem:[#allocation9_spill] sm:$0xff] }
0x1216   :  { %v4879_v27 = vpop.permute.xlu1 %4878 }
0x1217   :  { %4903 = vst.msk [vmem:[#allocation2 + $0x10] sm:$0xff] %vm1971_vm10, %v4879_v27 }
0x121a   :  { %v4881_v39 = vpop.permute.xlu0 %4880 }
0x121b   :  { %4904 = vst.msk [vmem:[#allocation2 + $0x18] sm:$0xff] %vm1971_vm10, %v4881_v39 }
0x121e   :  { %v4883_v59 = vpop.permute.xlu1 %4882 }
0x121f   :  { %4905 = vst.msk [vmem:[#allocation2 + $0x20] sm:$0xff] %vm1971_vm10, %v4883_v59 }
0x1232   :  { %v5383_v45 = vpop.permute.xlu0 %5382 }
0x1233   :  { %5409 = vst.msk [vmem:[#allocation2] sm:$0xff] %vm2480_vm11, %v5383_v45 }
0x1236   :  { %v5385_v22 = vpop.permute.xlu0 %5384 }
0x1237   :  { %5410 = vst.msk [vmem:[#allocation2 + $0x8] sm:$0xff] %vm2480_vm11, %v5385_v22 }
0x123a   :  { %v5387_v12 = vpop.permute.xlu0 %5386  ;;  %v5418_v1 = vld [vmem:[#allocation2] sm:$0xff] }
0x123b   :  { %5411 = vst.msk [vmem:[#allocation2 + $0x10] sm:$0xff] %vm2480_vm11, %v5387_v12  ;;  %8345 = vmatmul.mubr.msk.f32.vlgmr.msra.gmra.mrb[198].mxu0 %vm212_vm5, %v5418_v1  ;;  %v13482_v12 = vld [vmem:[#allocation10_spill] sm:$0xff] }
0x123c   :  { %8347 = vmatprep.mubr.msk.f32.mxu0 %vm9621_vm3, %v13423_v33 }
0x123e   :  { %v4885_v25 = vpop.permute.xlu0 %4884  ;;  %v5389_v61 = vpop.permute.xlu1 %5388  ;;  %v5419_v16 = vld [vmem:[#allocation2 + $0x8] sm:$0xff] }
0x123f   :  { %4906 = vst.msk [vmem:[#allocation2 + $0x28] sm:$0xff] %vm1971_vm10, %v4885_v25  ;;  %8348 = vmatmul.mubr.msk.f32.gmra.mrb[200].mxu0 %vm212_vm5, %v5419_v16 }
0x1240   :  { %5412 = vst.msk [vmem:[#allocation2 + $0x18] sm:$0xff] %vm2480_vm11, %v5389_v61  ;;  %8350 = vmatprep.mubr.msk.f32.mxu0 %vm9621_vm3, %v13423_v33 }
0x1242   :  { %v4887_v37 = vpop.permute.xlu1 %4886  ;;  %v5391_v21 = vpop.permute.xlu0 %5390  ;;  %v5420_v0 = vld [vmem:[#allocation2 + $0x10] sm:$0xff] }
0x1243   :  { %5413 = vst.msk [vmem:[#allocation2 + $0x20] sm:$0xff] %vm2480_vm11, %v5391_v21  ;;  %8351 = vmatmul.mubr.msk.f32.gmra.mrb[202].mxu0 %vm212_vm5, %v5420_v0  ;;  %v13483_v0 = vld [vmem:[#allocation11_spill] sm:$0xff] }
0x1244   :  { %8353 = vmatprep.mubr.msk.f32.mxu0 %vm9621_vm3, %v13423_v33 }
0x1246   :  { %v4379_v11 = vpop.permute.xlu0 %4378  ;;  %v5393_v24 = vpop.permute.xlu1 %5392 }
0x1247   :  { %v5421_v38 = vld [vmem:[#allocation2 + $0x18] sm:$0xff]  ;;  %4399 = vst.msk [vmem:[#allocation2 + $0x30] sm:$0xff] %vm1462_vm9, %v4379_v11 }
0x1248   :  { %5414 = vst.msk [vmem:[#allocation2 + $0x28] sm:$0xff] %vm2480_vm11, %v5393_v24  ;;  %8354 = vmatmul.mubr.msk.f32.gmra.mrb[204].mxu0 %vm212_vm5, %v5421_v38 }
0x1249   :  { %4907 = vst.msk [vmem:[#allocation2 + $0x30] sm:$0xff] %vm1971_vm10, %v4887_v37  ;;  %8356 = vmatprep.mubr.msk.f32.mxu0 %vm9621_vm3, %v13423_v33 }
0x124a   :  { %v4381_v30 = vpop.permute.xlu1 %4380  ;;  %v5395_v31 = vpop.permute.xlu0 %5394  ;;  %v5422_v46 = vld [vmem:[#allocation2 + $0x20] sm:$0xff] }
0x124b   :  { %4400 = vst.msk [vmem:[#allocation2 + $0x38] sm:$0xff] %vm1462_vm9, %v4381_v30 }
0x124c   :  { %5415 = vst.msk [vmem:[#allocation2 + $0x30] sm:$0xff] %vm2480_vm11, %v5395_v31  ;;  %8357 = vmatmul.mubr.msk.f32.gmra.mrb[206].mxu0 %vm212_vm5, %v5422_v46  ;;  %v13484_v46 = vld [vmem:[#allocation12_spill] sm:$0xff] }
0x124d   :  { %8359 = vmatprep.mubr.msk.f32.mxu0 %vm9621_vm3, %v13423_v33 }
0x124e   :  { %v4889_v56 = vpop.permute.xlu0 %4888 }
0x124f   :  { %v5423_v44 = vld [vmem:[#allocation2 + $0x28] sm:$0xff]  ;;  %4908 = vst.msk [vmem:[#allocation2 + $0x38] sm:$0xff] %vm1971_vm10, %v4889_v56 }
0x1250   :  { %8360 = vmatmul.mubr.msk.f32.gmra.mrb[208].mxu0 %vm212_vm5, %v5423_v44 }
0x1251   :  { %8362 = vmatprep.mubr.msk.f32.mxu0 %vm9621_vm3, %v13423_v33 }
0x1252   :  { %v4383_v36 = vpop.permute.xlu0 %4382 }
0x1253   :  { %v5424_v6 = vld [vmem:[#allocation2 + $0x30] sm:$0xff]  ;;  %4401 = vst.msk [vmem:[#allocation2 + $0x40] sm:$0xff] %vm1462_vm9, %v4383_v36 }
0x1254   :  { %8363 = vmatmul.mubr.msk.f32.gmra.mrb[210].mxu0 %vm212_vm5, %v5424_v6 }
0x1255   :  { %8365 = vmatprep.mubr.msk.f32.mxu0 %vm9621_vm3, %v13423_v33 }
0x1257   :  { %v5397_v63 = vpop.permute.xlu1 %5396 }
0x1258   :  { %5416 = vst.msk [vmem:[#allocation2 + $0x38] sm:$0xff] %vm2480_vm11, %v5397_v63 }
0x125b   :  { %v4891_v40 = vpop.permute.xlu1 %4890  ;;  %v5399_v53 = vpop.permute.xlu0 %5398 }
0x125c   :  { %4909 = vst.msk [vmem:[#allocation2 + $0x40] sm:$0xff] %vm1971_vm10, %v4891_v40 }
0x125d   :  { %5417 = vst.msk [vmem:[#allocation2 + $0x40] sm:$0xff] %vm2480_vm11, %v5399_v53 }
0x125f   :  { %v5425_v10 = vld [vmem:[#allocation2 + $0x38] sm:$0xff] }
0x1260   :  { %8366 = vmatmul.mubr.msk.f32.gmra.mrb[212].mxu0 %vm212_vm5, %v5425_v10 }
0x1261   :  { %8368 = vmatprep.mubr.msk.f32.mxu0 %vm9621_vm3, %v13423_v33 }
0x1264   :  { %v5426_v20 = vld [vmem:[#allocation2 + $0x40] sm:$0xff] }
0x1265   :  { %8369 = vmatmul.mubr.msk.f32.gmra.mrb[214].mxu0 %vm212_vm5, %v5426_v20 }
0x1266   :  { %8422 = vmatprep.mubr.msk.f32.mxu0 %vm9621_vm3, %v13423_v33 }
0x130e   :  { %v5536_v35 = vpop.f32.mrb[198].mxu0 }
0x130f   :  { %v5580_v28 = vadd.f32 %v5536_v35, %v13476_v49  ;;  %v8346_v41 = vpop.f32.mrb[199].mxu0 }
0x1311   :  { %v12792_v23 = vadd.f32 %v5592_v9, %v5580_v28 }
0x1312   :  { %v5541_v13 = vpop.f32.mrb[200].mxu0 }
0x1313   :  { %v5581_v42 = vadd.f32 %v5541_v13, %v13477_v50  ;;  %v8349_v2 = vpop.f32.mrb[201].mxu0  ;;  %v5602_v52 = vsel %vm212_vm5, %v12792_v23, 0.0 }
0x1314   :  { %5603 = vadd.xlane.f32.xlu1 %v5602_v52 }
0x1315   :  { %v12797_v54 = vadd.f32 %v5592_v9, %v5581_v42 }
0x1316   :  { %v5546_v32 = vpop.f32.mrb[202].mxu0 }
0x1317   :  { %v5582_v5 = vadd.f32 %v5546_v32, %v13478_v57  ;;  %v8352_v3 = vpop.f32.mrb[203].mxu0  ;;  %v5605_v34 = vsel %vm212_vm5, %v12797_v54, 0.0 }
0x1318   :  { %5606 = vadd.xlane.f32.xlu0 %v5605_v34 }
0x1319   :  { %v12802_v47 = vadd.f32 %v5592_v9, %v5582_v5 }
0x131b   :  { %v5551_v15 = vpop.f32.mrb[204].mxu0  ;;  %v5608_v14 = vsel %vm212_vm5, %v12802_v47, 0.0 }
0x131c   :  { %v5583_v62 = vadd.f32 %v5551_v15, %v13479_v55  ;;  %v8355_v4 = vpop.f32.mrb[205].mxu0  ;;  %5609 = vadd.xlane.f32.xlu0 %v5608_v14 }
0x131e   :  { %v12807_v7 = vadd.f32 %v5592_v9, %v5583_v62 }
0x131f   :  { %v5556_v48 = vpop.f32.mrb[206].mxu0 }
0x1320   :  { %v5584_v51 = vadd.f32 %v5556_v48, %v13480_v26  ;;  %v8358_v29 = vpop.f32.mrb[207].mxu0  ;;  %v5611_v19 = vsel %vm212_vm5, %v12807_v7, 0.0 }
0x1321   :  { %5612 = vadd.xlane.f32.xlu1 %v5611_v19 }
0x1322   :  { %v12812_v60 = vadd.f32 %v5592_v9, %v5584_v51 }
0x1323   :  { %v5561_v18 = vpop.f32.mrb[208].mxu0 }
0x1324   :  { %v5585_v27 = vadd.f32 %v5561_v18, %v13481_v8  ;;  %v8361_v39 = vpop.f32.mrb[209].mxu0  ;;  %v5614_v59 = vsel %vm212_vm5, %v12812_v60, 0.0 }
0x1325   :  { %5615 = vadd.xlane.f32.xlu0 %v5614_v59 }
0x1326   :  { %v12817_v45 = vadd.f32 %v5592_v9, %v5585_v27 }
0x1327   :  { %v5566_v22 = vpop.f32.mrb[210].mxu0 }
0x1328   :  { %v5586_v1 = vadd.f32 %v5566_v22, %v13482_v12  ;;  %v8364_v25 = vpop.f32.mrb[211].mxu0  ;;  %v5617_v61 = vsel %vm212_vm5, %v12817_v45, 0.0  ;;  %v6788_v22 = vld [vmem:[%s13343_s2 + $0x48] sm:$0xff]  ;;  %v6790_v12 = vld [vmem:[%s13343_s2 + $0x58] sm:$0xff] }
0x1329   :  { %5618 = vadd.xlane.f32.xlu1 %v5617_v61 }
0x132a   :  { %v12822_v16 = vadd.f32 %v5592_v9, %v5586_v1  ;;  %v8793_v1 = vpack.c.bf16 %v6790_v12, %v6788_v22 }
0x132c   :  { %v5620_v37 = vsel %vm212_vm5, %v12822_v16, 0.0  ;;  %8794 = vmatpush3.bf16.msra.mxu1 %v8793_v1 }
0x132d   :  { %5621 = vadd.xlane.f32.xlu0 %v5620_v37  ;;  %8795 = vmatprep.subr.bf16.mxu1 %v13424_v58  ;;  %v6792_v37 = vld [vmem:[%s13343_s2 + $0x68] sm:$0xff] }
0x1333   :  { %v5571_v21 = vpop.f32.mrb[212].mxu0 }
0x1334   :  { %v5587_v11 = vadd.f32 %v5571_v21, %v13483_v0  ;;  %v8367_v24 = vpop.f32.mrb[213].mxu0  ;;  %v6794_v21 = vld [vmem:[%s13343_s2 + $0x78] sm:$0xff] }
0x1335   :  { %v8796_v0 = vpack.c.bf16 %v6794_v21, %v6792_v37 }
0x1336   :  { %v12827_v38 = vadd.f32 %v5592_v9, %v5587_v11 }
0x1337   :  { %8797 = vmatpush3.bf16.msra.mxu1 %v8796_v0 }
0x1338   :  { %v5576_v30 = vpop.f32.mrb[214].mxu0  ;;  %v5623_v31 = vsel %vm212_vm5, %v12827_v38, 0.0  ;;  %8810 = vmatprep.subr.bf16.mxu1 %v13424_v58 }
0x1339   :  { %v5588_v56 = vadd.f32 %v5576_v30, %v13484_v46  ;;  %5624 = vadd.xlane.f32.xlu1 %v5623_v31  ;;  %v8370_v44 = vpop.f32.mrb[215].mxu0 }
0x133b   :  { %v12832_v36 = vadd.f32 %v5592_v9, %v5588_v56 }
0x133d   :  { %v5626_v6 = vsel %vm212_vm5, %v12832_v36, 0.0 }
0x133e   :  { %5627 = vadd.xlane.f32.xlu0 %v5626_v6 }
0x13a1   :  { %v5604_v63 = vpop.xlane.xlu1 %5603 }
0x13a2   :  { %v5629_v40 = vmul.f32 0.03125, %v5604_v63  ;;  %v6796_v63 = vld [vmem:[%s13344_s3 + $0x40] sm:$0xff] }
0x13a4   :  { %v12837_v53 = vsub.f32 %v12792_v23, %v5629_v40  ;;  %v6797_v40 = vld [vmem:[%s13344_s3 + $0x48] sm:$0xff] }
0x13a5   :  { %v5607_v10 = vpop.xlane.xlu0 %5606 }
0x13a6   :  { %v5630_v20 = vmul.f32 0.03125, %v5607_v10  ;;  %v5647_v35 = vmul.f32 %v12837_v53, %v12837_v53  ;;  %v6798_v10 = vld [vmem:[%s13344_s3 + $0x50] sm:$0xff] }
0x13a8   :  { %v12842_v49 = vsub.f32 %v12797_v54, %v5630_v20  ;;  %v5656_v9 = vsel %vm212_vm5, %v5647_v35, 0.0  ;;  %v8799_v20 = vpack.c.bf16 %v6797_v40, %v6796_v63  ;;  %v6799_v35 = vld [vmem:[%s13344_s3 + $0x58] sm:$0xff] }
0x13a9   :  { %v5610_v28 = vpop.xlane.xlu0 %5609  ;;  %5657 = vadd.xlane.f32.xlu1 %v5656_v9  ;;  %v8802_v9 = vpack.c.bf16 %v6799_v35, %v6798_v10 }
0x13aa   :  { %v5631_v41 = vmul.f32 0.03125, %v5610_v28  ;;  %v5648_v13 = vmul.f32 %v12842_v49, %v12842_v49  ;;  %8800 = vmatpush3.bf16.msra.mxu0 %v8799_v20  ;;  %v6800_v28 = vld [vmem:[%s13344_s3 + $0x60] sm:$0xff] }
0x13ab   :  { %8801 = vmatprep.subr.bf16.mxu0 %v13424_v58 }
0x13ac   :  { %v12848_v50 = vsub.f32 %v12802_v47, %v5631_v41  ;;  %v5659_v42 = vsel %vm212_vm5, %v5648_v13, 0.0  ;;  %v6801_v41 = vld [vmem:[%s13344_s3 + $0x68] sm:$0xff] }
0x13ad   :  { %5660 = vadd.xlane.f32.xlu0 %v5659_v42  ;;  %v8805_v13 = vpack.c.bf16 %v6801_v41, %v6800_v28 }
0x13ae   :  { %v5613_v2 = vpop.xlane.xlu1 %5612  ;;  %v5649_v32 = vmul.f32 %v12848_v50, %v12848_v50  ;;  %8803 = vmatpush3.bf16.msra.mxu0 %v8802_v9 }
0x13af   :  { %v5632_v52 = vmul.f32 0.03125, %v5613_v2  ;;  %8804 = vmatprep.subr.bf16.mxu0 %v13424_v58 }
0x13b0   :  { %v5662_v5 = vsel %vm212_vm5, %v5649_v32, 0.0 }
0x13b1   :  { %v12854_v57 = vsub.f32 %v12807_v7, %v5632_v52  ;;  %5663 = vadd.xlane.f32.xlu1 %v5662_v5 }
0x13b2   :  { %v5616_v3 = vpop.xlane.xlu0 %5615  ;;  %8806 = vmatpush3.bf16.msra.mxu0 %v8805_v13 }
0x13b3   :  { %v5633_v34 = vmul.f32 0.03125, %v5616_v3  ;;  %v5650_v15 = vmul.f32 %v12854_v57, %v12854_v57  ;;  %8807 = vmatprep.subr.bf16.mxu0 %v13424_v58 }
0x13b5   :  { %v12860_v55 = vsub.f32 %v12812_v60, %v5633_v34  ;;  %v5665_v62 = vsel %vm212_vm5, %v5650_v15, 0.0 }
0x13b6   :  { %v5619_v4 = vpop.xlane.xlu1 %5618  ;;  %5666 = vadd.xlane.f32.xlu0 %v5665_v62 }
0x13b7   :  { %v5634_v14 = vmul.f32 0.03125, %v5619_v4  ;;  %v5651_v48 = vmul.f32 %v12860_v55, %v12860_v55 }
0x13b9   :  { %v12866_v26 = vsub.f32 %v12817_v45, %v5634_v14  ;;  %v5668_v51 = vsel %vm212_vm5, %v5651_v48, 0.0  ;;  %v13485_v48 = vld [vmem:[#allocation16_spill] sm:$0xff] }
0x13ba   :  { %v5622_v29 = vpop.xlane.xlu0 %5621  ;;  %5669 = vadd.xlane.f32.xlu1 %v5668_v51  ;;  %v12927_v51 = vrot.slane %v12787_v17, %v13485_v48 }
0x13bb   :  { %v5635_v19 = vmul.f32 0.03125, %v5622_v29  ;;  %v5652_v18 = vmul.f32 %v12866_v26, %v12866_v26 }
0x13bd   :  { %v12872_v8 = vsub.f32 %v12822_v16, %v5635_v19  ;;  %v5671_v27 = vsel %vm212_vm5, %v5652_v18, 0.0  ;;  %v13486_v18 = vld [vmem:[#allocation15_spill] sm:$0xff] }
0x13be   :  { %5672 = vadd.xlane.f32.xlu0 %v5671_v27  ;;  %v12931_v27 = vrot.slane %v12787_v17, %v13486_v18 }
0x13bf   :  { %v5653_v39 = vmul.f32 %v12872_v8, %v12872_v8 }
0x13c1   :  { %v5674_v59 = vsel %vm212_vm5, %v5653_v39, 0.0 }
0x13c2   :  { %5675 = vadd.xlane.f32.xlu1 %v5674_v59 }
0x13c6   :  { %v5625_v25 = vpop.xlane.xlu1 %5624 }
0x13c7   :  { %v5636_v61 = vmul.f32 0.03125, %v5625_v25 }
0x13c9   :  { %v12892_v11 = vsub.f32 %v12827_v38, %v5636_v61 }
0x13cb   :  { %v5628_v24 = vpop.xlane.xlu0 %5627  ;;  %v5654_v30 = vmul.f32 %v12892_v11, %v12892_v11 }
0x13cc   :  { %v5637_v31 = vmul.f32 0.03125, %v5628_v24 }
0x13cd   :  { %v5677_v46 = vsel %vm212_vm5, %v5654_v30, 0.0 }
0x13ce   :  { %v12899_v56 = vsub.f32 %v12832_v36, %v5637_v31  ;;  %5678 = vadd.xlane.f32.xlu0 %v5677_v46 }
0x13d0   :  { %v5655_v44 = vmul.f32 %v12899_v56, %v12899_v56 }
0x13d2   :  { %v5680_v6 = vsel %vm212_vm5, %v5655_v44, 0.0 }
0x13d3   :  { %5681 = vadd.xlane.f32.xlu1 %v5680_v6 }
0x1436   :  { %v5658_v42 = vpop.xlane.xlu1 %5657 }
0x1437   :  { %v5683_v2 = vmul.f32 0.03125, %v5658_v42 }
0x1439   :  { %v5692_v52 = vadd.f32 1e-05, %v5683_v2 }
0x143a   :  { %v5661_v32 = vpop.xlane.xlu0 %5660 }
0x143b   :  { %9542 = vrsqrt.f32 %v5692_v52  ;;  %v5684_v5 = vmul.f32 0.03125, %v5661_v32 }
0x143d   :  { %v5693_v3 = vadd.f32 1e-05, %v5684_v5 }
0x143e   :  { %v5664_v34 = vpop.xlane.xlu1 %5663 }
0x143f   :  { %9544 = vrsqrt.f32 %v5693_v3  ;;  %v5685_v15 = vmul.f32 0.03125, %v5664_v34 }
0x1441   :  { %v5694_v62 = vadd.f32 1e-05, %v5685_v15 }
0x1443   :  { %v5667_v4 = vpop.xlane.xlu0 %5666  ;;  %9546 = vrsqrt.f32 %v5694_v62 }
0x1444   :  { %v5686_v14 = vmul.f32 0.03125, %v5667_v4 }
0x1445   :  { %v9543_v29 = vpop.eup %9542 }
0x1446   :  { %v5695_v19 = vadd.f32 1e-05, %v5686_v14  ;;  %v5710_v39 = vmul.f32 %v9543_v29, %v12837_v53 }
0x1447   :  { %v5670_v59 = vpop.xlane.xlu1 %5669 }
0x1448   :  { %9548 = vrsqrt.f32 %v5695_v19  ;;  %v5687_v22 = vmul.f32 0.03125, %v5670_v59  ;;  %v5723_v12 = vmul.f32 %v12927_v51, %v5710_v39 }
0x1449   :  { %v9545_v1 = vpop.eup %9544 }
0x144a   :  { %v5696_v25 = vadd.f32 1e-05, %v5687_v22  ;;  %v5736_v61 = vadd.f32 %v12931_v27, %v5723_v12  ;;  %v5711_v21 = vmul.f32 %v9545_v1, %v12842_v49 }
0x144b   :  { %v5673_v37 = vpop.xlane.xlu0 %5672 }
0x144c   :  { %9550 = vrsqrt.f32 %v5696_v25  ;;  %v5688_v0 = vmul.f32 0.03125, %v5673_v37  ;;  %8380 = vmatmul.mubr.msk.f32.vlgmr.msra.gmra.mrb[198].mxu1 %vm212_vm5, %v5736_v61  ;;  %v5724_v24 = vmul.f32 %v12927_v51, %v5711_v21 }
0x144d   :  { %v9547_v30 = vpop.eup %9546  ;;  %8382 = vmatprep.mubr.msk.f32.mxu1 %vm9621_vm3, %v13423_v33 }
0x144e   :  { %v5697_v53 = vadd.f32 1e-05, %v5688_v0  ;;  %v5737_v46 = vadd.f32 %v12931_v27, %v5724_v24  ;;  %v5712_v44 = vmul.f32 %v9547_v30, %v12848_v50 }
0x144f   :  { %v5676_v31 = vpop.xlane.xlu1 %5675 }
0x1450   :  { %9552 = vrsqrt.f32 %v5697_v53  ;;  %v5689_v6 = vmul.f32 0.03125, %v5676_v31  ;;  %8383 = vmatmul.mubr.msk.f32.gmra.mrb[200].mxu1 %vm212_vm5, %v5737_v46  ;;  %v5725_v49 = vmul.f32 %v12927_v51, %v5712_v44 }
0x1451   :  { %8385 = vmatprep.mubr.msk.f32.mxu1 %vm9621_vm3, %v13423_v33 }
0x1452   :  { %v9549_v63 = vpop.eup %9548  ;;  %v5698_v40 = vadd.f32 1e-05, %v5689_v6  ;;  %v5738_v10 = vadd.f32 %v12931_v27, %v5725_v49 }
0x1453   :  { %v5713_v20 = vmul.f32 %v9549_v63, %v12854_v57 }
0x1454   :  { %9554 = vrsqrt.f32 %v5698_v40  ;;  %8386 = vmatmul.mubr.msk.f32.gmra.mrb[202].mxu1 %vm212_vm5, %v5738_v10 }
0x1455   :  { %v5726_v50 = vmul.f32 %v12927_v51, %v5713_v20  ;;  %8388 = vmatprep.mubr.msk.f32.mxu1 %vm9621_vm3, %v13423_v33 }
0x1456   :  { %v9551_v35 = vpop.eup %9550 }
0x1457   :  { %v5739_v9 = vadd.f32 %v12931_v27, %v5726_v50  ;;  %v5714_v28 = vmul.f32 %v9551_v35, %v12860_v55 }
0x1459   :  { %8389 = vmatmul.mubr.msk.f32.gmra.mrb[204].mxu1 %vm212_vm5, %v5739_v9  ;;  %v5727_v41 = vmul.f32 %v12927_v51, %v5714_v28 }
0x145a   :  { %v9553_v13 = vpop.eup %9552  ;;  %8391 = vmatprep.mubr.msk.f32.mxu1 %vm9621_vm3, %v13423_v33 }
0x145b   :  { %v5740_v57 = vadd.f32 %v12931_v27, %v5727_v41  ;;  %v5715_v42 = vmul.f32 %v9553_v13, %v12866_v26  ;;  %v5679_v2 = vpop.xlane.xlu0 %5678 }
0x145c   :  { %v5690_v52 = vmul.f32 0.03125, %v5679_v2 }
0x145d   :  { %8392 = vmatmul.mubr.msk.f32.gmra.mrb[206].mxu1 %vm212_vm5, %v5740_v57  ;;  %v5728_v32 = vmul.f32 %v12927_v51, %v5715_v42 }
0x145e   :  { %v9555_v5 = vpop.eup %9554  ;;  %8394 = vmatprep.mubr.msk.f32.mxu1 %vm9621_vm3, %v13423_v33  ;;  %v5699_v55 = vadd.f32 1e-05, %v5690_v52 }
0x145f   :  { %v5741_v3 = vadd.f32 %v12931_v27, %v5728_v32  ;;  %v5716_v34 = vmul.f32 %v9555_v5, %v12872_v8 }
0x1460   :  { %9556 = vrsqrt.f32 %v5699_v55  ;;  %v5682_v15 = vpop.xlane.xlu1 %5681 }
0x1461   :  { %8395 = vmatmul.mubr.msk.f32.gmra.mrb[208].mxu1 %vm212_vm5, %v5741_v3  ;;  %v5729_v26 = vmul.f32 %v12927_v51, %v5716_v34  ;;  %v5691_v62 = vmul.f32 0.03125, %v5682_v15 }
0x1462   :  { %8397 = vmatprep.mubr.msk.f32.mxu1 %vm9621_vm3, %v13423_v33 }
0x1463   :  { %v5742_v4 = vadd.f32 %v12931_v27, %v5729_v26  ;;  %v5700_v14 = vadd.f32 1e-05, %v5691_v62 }
0x1465   :  { %8398 = vmatmul.mubr.msk.f32.gmra.mrb[210].mxu1 %vm212_vm5, %v5742_v4  ;;  %9558 = vrsqrt.f32 %v5700_v14 }
0x1466   :  { %8400 = vmatprep.mubr.msk.f32.mxu1 %vm9621_vm3, %v13423_v33 }
0x146a   :  { %v9557_v8 = vpop.eup %9556 }
0x146b   :  { %v5717_v29 = vmul.f32 %v9557_v8, %v12892_v11  ;;  %v6802_v11 = vld [vmem:[%s13344_s3 + $0x70] sm:$0xff] }
0x146d   :  { %v5730_v19 = vmul.f32 %v12927_v51, %v5717_v29 }
0x146f   :  { %v9559_v39 = vpop.eup %9558  ;;  %v5743_v59 = vadd.f32 %v12931_v27, %v5730_v19 }
0x1470   :  { %v5718_v22 = vmul.f32 %v9559_v39, %v12899_v56  ;;  %v6803_v56 = vld [vmem:[%s13344_s3 + $0x78] sm:$0xff] }
0x1471   :  { %8401 = vmatmul.mubr.msk.f32.gmra.mrb[212].mxu1 %vm212_vm5, %v5743_v59  ;;  %v8808_v25 = vpack.c.bf16 %v6803_v56, %v6802_v11 }
0x1472   :  { %8403 = vmatprep.mubr.msk.f32.mxu1 %vm9621_vm3, %v13423_v33  ;;  %v5731_v12 = vmul.f32 %v12927_v51, %v5718_v22  ;;  %v13487_v51 = vld [vmem:[#allocation19_spill] sm:$0xff] }
0x1473   :  { %8809 = vmatpush3.bf16.msra.mxu0 %v8808_v25  ;;  %v13488_v61 = vsub.s32 6, %v13487_v51  ;;  %v13489_v29 = vsub.s32 5, %v13487_v51 }
0x1474   :  { %v5744_v1 = vadd.f32 %v12931_v27, %v5731_v12  ;;  %8826 = vmatprep.subr.bf16.mxu0 %v13424_v58 }
0x1475   :  { %v5748_v27 = vrot.slane %v12787_v17, %v13488_v61  ;;  %v6044_v19 = vrot.slane %v12787_v17, %v13489_v29 }
0x1476   :  { %8404 = vmatmul.mubr.msk.f32.gmra.mrb[214].mxu1 %vm212_vm5, %v5744_v1 }
0x1477   :  { %8467 = vmatprep.mubr.msk.f32.mxu1 %vm9621_vm3, %v13423_v33 }
0x151f   :  { %v5842_v37 = vpop.f32.mrb[198].mxu1 }
0x1520   :  { %v5843_v21 = vadd.f32 %v5842_v37, %v5748_v27  ;;  %v8381_v0 = vpop.f32.mrb[199].mxu1 }
0x1522   :  { %v5886_v24 = vmax.f32 %v5843_v21, 0.0 }
0x1523   :  { %v5847_v30 = vpop.f32.mrb[200].mxu1 }
0x1524   :  { %v5848_v53 = vadd.f32 %v5847_v30, %v5748_v27  ;;  %v8384_v31 = vpop.f32.mrb[201].mxu1  ;;  %8423 = vmatmul.mubr.msk.f32.vlgmr.msra.gmra.mrb[216].mxu0 %vm2967_vm12, %v5886_v24 }
0x1525   :  { %8425 = vmatprep.mubr.msk.f32.mxu0 %vm9621_vm3, %v13423_v33 }
0x1526   :  { %v5887_v46 = vmax.f32 %v5848_v53, 0.0 }
0x1527   :  { %v5852_v44 = vpop.f32.mrb[202].mxu1 }
0x1528   :  { %v5853_v6 = vadd.f32 %v5852_v44, %v5748_v27  ;;  %v8387_v49 = vpop.f32.mrb[203].mxu1  ;;  %8426 = vmatmul.mubr.msk.f32.gmra.mrb[218].mxu0 %vm2967_vm12, %v5887_v46 }
0x1529   :  { %8428 = vmatprep.mubr.msk.f32.mxu0 %vm9621_vm3, %v13423_v33 }
0x152a   :  { %v5888_v63 = vmax.f32 %v5853_v6, 0.0 }
0x152c   :  { %v5857_v40 = vpop.f32.mrb[204].mxu1  ;;  %8429 = vmatmul.mubr.msk.f32.gmra.mrb[220].mxu0 %vm2967_vm12, %v5888_v63 }
0x152d   :  { %v5858_v10 = vadd.f32 %v5857_v40, %v5748_v27  ;;  %v8390_v20 = vpop.f32.mrb[205].mxu1  ;;  %8431 = vmatprep.mubr.msk.f32.mxu0 %vm9621_vm3, %v13423_v33 }
0x152f   :  { %v5889_v50 = vmax.f32 %v5858_v10, 0.0 }
0x1530   :  { %v5862_v35 = vpop.f32.mrb[206].mxu1 }
0x1531   :  { %v5863_v9 = vadd.f32 %v5862_v35, %v5748_v27  ;;  %v8393_v28 = vpop.f32.mrb[207].mxu1  ;;  %8432 = vmatmul.mubr.msk.f32.gmra.mrb[222].mxu0 %vm2967_vm12, %v5889_v50 }
0x1532   :  { %8434 = vmatprep.mubr.msk.f32.mxu0 %vm9621_vm3, %v13423_v33 }
0x1533   :  { %v5890_v41 = vmax.f32 %v5863_v9, 0.0 }
0x1534   :  { %v5867_v13 = vpop.f32.mrb[208].mxu1 }
0x1535   :  { %v5868_v57 = vadd.f32 %v5867_v13, %v5748_v27  ;;  %v8396_v42 = vpop.f32.mrb[209].mxu1  ;;  %8435 = vmatmul.mubr.msk.f32.gmra.mrb[224].mxu0 %vm2967_vm12, %v5890_v41 }
0x1536   :  { %8437 = vmatprep.mubr.msk.f32.mxu0 %vm9621_vm3, %v13423_v33 }
0x1537   :  { %v5891_v2 = vmax.f32 %v5868_v57, 0.0 }
0x1538   :  { %v5872_v52 = vpop.f32.mrb[210].mxu1 }
0x1539   :  { %v5873_v32 = vadd.f32 %v5872_v52, %v5748_v27  ;;  %v8399_v5 = vpop.f32.mrb[211].mxu1  ;;  %8438 = vmatmul.mubr.msk.f32.gmra.mrb[226].mxu0 %vm2967_vm12, %v5891_v2 }
0x153a   :  { %8440 = vmatprep.mubr.msk.f32.mxu0 %vm9621_vm3, %v13423_v33 }
0x153b   :  { %v5892_v55 = vmax.f32 %v5873_v32, 0.0 }
0x153d   :  { %8441 = vmatmul.mubr.msk.f32.gmra.mrb[228].mxu0 %vm2967_vm12, %v5892_v55 }
0x153e   :  { %8443 = vmatprep.mubr.msk.f32.mxu0 %vm9621_vm3, %v13423_v33 }
0x1544   :  { %v5877_v3 = vpop.f32.mrb[212].mxu1 }
0x1545   :  { %v5878_v34 = vadd.f32 %v5877_v3, %v5748_v27  ;;  %v8402_v15 = vpop.f32.mrb[213].mxu1 }
0x1547   :  { %v5893_v26 = vmax.f32 %v5878_v34, 0.0 }
0x1549   :  { %v5882_v62 = vpop.f32.mrb[214].mxu1  ;;  %8444 = vmatmul.mubr.msk.f32.gmra.mrb[230].mxu0 %vm2967_vm12, %v5893_v26 }
0x154a   :  { %v5883_v4 = vadd.f32 %v5882_v62, %v5748_v27  ;;  %v8405_v14 = vpop.f32.mrb[215].mxu1  ;;  %8446 = vmatprep.mubr.msk.f32.mxu0 %vm9621_vm3, %v13423_v33 }
0x154c   :  { %v5894_v8 = vmax.f32 %v5883_v4, 0.0 }
0x154e   :  { %8447 = vmatmul.mubr.msk.f32.gmra.mrb[232].mxu0 %vm2967_vm12, %v5894_v8 }
0x154f   :  { %8519 = vmatprep.mubr.msk.f32.mxu0 %vm9621_vm3, %v13423_v33 }
0x15f7   :  { %v5988_v39 = vpop.f32.mrb[216].mxu0 }
0x15f8   :  { %v6032_v59 = vadd.f32 %v5988_v39, %v12792_v23  ;;  %v8424_v22 = vpop.f32.mrb[217].mxu0 }
0x15fa   :  { %v13028_v12 = vadd.f32 %v6044_v19, %v6032_v59 }
0x15fb   :  { %v5993_v1 = vpop.f32.mrb[218].mxu0 }
0x15fc   :  { %v6056_v11 = vmax.f32 %v13028_v12, 0.0  ;;  %v6033_v56 = vadd.f32 %v5993_v1, %v12797_v54  ;;  %v8427_v25 = vpop.f32.mrb[219].mxu0 }
0x15fe   :  { %v6046_v61 = vadd.f32 %v6044_v19, %v6033_v56  ;;  %v6065_v27 = vsel %vm212_vm5, %v6056_v11, 0.0 }
0x15ff   :  { %6066 = vadd.xlane.f32.xlu0 %v6065_v27  ;;  %v5998_v37 = vpop.f32.mrb[220].mxu0 }
0x1600   :  { %v6057_v51 = vmax.f32 %v6046_v61, 0.0  ;;  %v6034_v17 = vadd.f32 %v5998_v37, %v12802_v47  ;;  %v8430_v21 = vpop.f32.mrb[221].mxu0 }
0x1602   :  { %v6047_v0 = vadd.f32 %v6044_v19, %v6034_v17  ;;  %v6068_v23 = vsel %vm212_vm5, %v6057_v51, 0.0 }
0x1603   :  { %6069 = vadd.xlane.f32.xlu1 %v6068_v23 }
0x1604   :  { %v6003_v24 = vpop.f32.mrb[222].mxu0  ;;  %v6058_v30 = vmax.f32 %v6047_v0, 0.0 }
0x1605   :  { %v6035_v53 = vadd.f32 %v6003_v24, %v12807_v7  ;;  %v8433_v31 = vpop.f32.mrb[223].mxu0 }
0x1606   :  { %v6071_v46 = vsel %vm212_vm5, %v6058_v30, 0.0 }
0x1607   :  { %v6048_v54 = vadd.f32 %v6044_v19, %v6035_v53  ;;  %6072 = vadd.xlane.f32.xlu0 %v6071_v46 }
0x1608   :  { %v6008_v44 = vpop.f32.mrb[224].mxu0 }
0x1609   :  { %v6059_v6 = vmax.f32 %v6048_v54, 0.0  ;;  %v6036_v49 = vadd.f32 %v6008_v44, %v12812_v60  ;;  %v8436_v63 = vpop.f32.mrb[225].mxu0 }
0x160b   :  { %v6049_v47 = vadd.f32 %v6044_v19, %v6036_v49  ;;  %v6074_v40 = vsel %vm212_vm5, %v6059_v6, 0.0 }
0x160c   :  { %6075 = vadd.xlane.f32.xlu1 %v6074_v40  ;;  %v6013_v10 = vpop.f32.mrb[226].mxu0 }
0x160d   :  { %v6060_v20 = vmax.f32 %v6049_v47, 0.0  ;;  %v6037_v50 = vadd.f32 %v6013_v10, %v12817_v45  ;;  %v8439_v35 = vpop.f32.mrb[227].mxu0 }
0x160f   :  { %v6050_v7 = vadd.f32 %v6044_v19, %v6037_v50  ;;  %v6077_v9 = vsel %vm212_vm5, %v6060_v20, 0.0 }
0x1610   :  { %6078 = vadd.xlane.f32.xlu0 %v6077_v9  ;;  %v6018_v28 = vpop.f32.mrb[228].mxu0 }
0x1611   :  { %v6061_v41 = vmax.f32 %v6050_v7, 0.0  ;;  %v6038_v13 = vadd.f32 %v6018_v28, %v12822_v16  ;;  %v8442_v57 = vpop.f32.mrb[229].mxu0 }
0x1613   :  { %v6051_v60 = vadd.f32 %v6044_v19, %v6038_v13  ;;  %v6080_v42 = vsel %vm212_vm5, %v6061_v41, 0.0 }
0x1614   :  { %6081 = vadd.xlane.f32.xlu1 %v6080_v42 }
0x1615   :  { %v6062_v2 = vmax.f32 %v6051_v60, 0.0 }
0x1617   :  { %v6083_v52 = vsel %vm212_vm5, %v6062_v2, 0.0 }
0x1618   :  { %6084 = vadd.xlane.f32.xlu0 %v6083_v52 }
0x161c   :  { %v6023_v32 = vpop.f32.mrb[230].mxu0 }
0x161d   :  { %v6039_v45 = vadd.f32 %v6023_v32, %v12827_v38  ;;  %v8445_v5 = vpop.f32.mrb[231].mxu0 }
0x161f   :  { %v6052_v55 = vadd.f32 %v6044_v19, %v6039_v45 }
0x1621   :  { %v6063_v3 = vmax.f32 %v6052_v55, 0.0  ;;  %v6028_v34 = vpop.f32.mrb[232].mxu0 }
0x1622   :  { %v6040_v15 = vadd.f32 %v6028_v34, %v12832_v36  ;;  %v8448_v26 = vpop.f32.mrb[233].mxu0 }
0x1623   :  { %v6086_v16 = vsel %vm212_vm5, %v6063_v3, 0.0  ;;  %v13096_v26 = vld [vmem:[%s13346_s5 + $0x8] sm:$0xff] }
0x1624   :  { %v6053_v62 = vadd.f32 %v6044_v19, %v6040_v15  ;;  %6087 = vadd.xlane.f32.xlu1 %v6086_v16 }
0x1626   :  { %v6064_v4 = vmax.f32 %v6053_v62, 0.0 }
0x1628   :  { %v6089_v14 = vsel %vm212_vm5, %v6064_v4, 0.0 }
0x1629   :  { %6090 = vadd.xlane.f32.xlu0 %v6089_v14 }
0x168c   :  { %v6067_v8 = vpop.xlane.xlu0 %6066 }
0x168d   :  { %v6092_v29 = vmul.f32 0.03125, %v6067_v8 }
0x168f   :  { %v13048_v39 = vsub.f32 %v6056_v11, %v6092_v29 }
0x1690   :  { %v6070_v38 = vpop.xlane.xlu1 %6069 }
0x1691   :  { %v6093_v59 = vmul.f32 0.03125, %v6070_v38  ;;  %v6110_v22 = vmul.f32 %v13048_v39, %v13048_v39 }
0x1693   :  { %v13052_v12 = vsub.f32 %v6057_v51, %v6093_v59  ;;  %v6119_v36 = vsel %vm212_vm5, %v6110_v22, 0.0  ;;  %v13105_v22 = vrot.slane %v13096_v26, %v13485_v48 }
0x1694   :  { %v6073_v1 = vpop.xlane.xlu0 %6072  ;;  %6120 = vadd.xlane.f32.xlu1 %v6119_v36 }
0x1695   :  { %v6094_v19 = vmul.f32 0.03125, %v6073_v1  ;;  %v6111_v56 = vmul.f32 %v13052_v12, %v13052_v12 }
0x1697   :  { %v13057_v25 = vsub.f32 %v6058_v30, %v6094_v19  ;;  %v6122_v11 = vsel %vm212_vm5, %v6111_v56, 0.0  ;;  %v13110_v19 = vrot.slane %v13096_v26, %v13486_v18 }
0x1698   :  { %6123 = vadd.xlane.f32.xlu0 %v6122_v11 }
0x1699   :  { %v6076_v61 = vpop.xlane.xlu1 %6075  ;;  %v6112_v37 = vmul.f32 %v13057_v25, %v13057_v25 }
0x169a   :  { %v6095_v27 = vmul.f32 0.03125, %v6076_v61 }
0x169b   :  { %v6125_v17 = vsel %vm212_vm5, %v6112_v37, 0.0 }
0x169c   :  { %v13062_v51 = vsub.f32 %v6059_v6, %v6095_v27  ;;  %6126 = vadd.xlane.f32.xlu1 %v6125_v17 }
0x169d   :  { %v6079_v21 = vpop.xlane.xlu0 %6078 }
0x169e   :  { %v6096_v0 = vmul.f32 0.03125, %v6079_v21  ;;  %v6113_v23 = vmul.f32 %v13062_v51, %v13062_v51 }
0x16a0   :  { %v13067_v24 = vsub.f32 %v6060_v20, %v6096_v0  ;;  %v6128_v30 = vsel %vm212_vm5, %v6113_v23, 0.0 }
0x16a1   :  { %v6082_v53 = vpop.xlane.xlu1 %6081  ;;  %6129 = vadd.xlane.f32.xlu0 %v6128_v30 }
0x16a2   :  { %v6097_v31 = vmul.f32 0.03125, %v6082_v53  ;;  %v6114_v54 = vmul.f32 %v13067_v24, %v13067_v24 }
0x16a4   :  { %v13072_v46 = vsub.f32 %v6061_v41, %v6097_v31  ;;  %v6131_v44 = vsel %vm212_vm5, %v6114_v54, 0.0 }
0x16a5   :  { %v6085_v6 = vpop.xlane.xlu0 %6084  ;;  %6132 = vadd.xlane.f32.xlu1 %v6131_v44 }
0x16a6   :  { %v6098_v49 = vmul.f32 0.03125, %v6085_v6  ;;  %v6115_v63 = vmul.f32 %v13072_v46, %v13072_v46 }
0x16a8   :  { %v13077_v47 = vsub.f32 %v6062_v2, %v6098_v49  ;;  %v6134_v40 = vsel %vm212_vm5, %v6115_v63, 0.0 }
0x16a9   :  { %6135 = vadd.xlane.f32.xlu0 %v6134_v40 }
0x16aa   :  { %v6116_v10 = vmul.f32 %v13077_v47, %v13077_v47 }
0x16ac   :  { %v6137_v20 = vsel %vm212_vm5, %v6116_v10, 0.0 }
0x16ad   :  { %6138 = vadd.xlane.f32.xlu1 %v6137_v20 }
0x16b1   :  { %v6088_v50 = vpop.xlane.xlu1 %6087 }
0x16b2   :  { %v6099_v35 = vmul.f32 0.03125, %v6088_v50 }
0x16b4   :  { %v13083_v7 = vsub.f32 %v6063_v3, %v6099_v35 }
0x16b6   :  { %v6091_v9 = vpop.xlane.xlu0 %6090  ;;  %v6117_v28 = vmul.f32 %v13083_v7, %v13083_v7 }
0x16b7   :  { %v6100_v41 = vmul.f32 0.03125, %v6091_v9 }
0x16b8   :  { %v6140_v13 = vsel %vm212_vm5, %v6117_v28, 0.0 }
0x16b9   :  { %v13088_v57 = vsub.f32 %v6064_v4, %v6100_v41  ;;  %6141 = vadd.xlane.f32.xlu0 %v6140_v13  ;;  %v13490_v4 = vld [vmem:[#allocation20_spill] sm:$0xff] }
0x16ba   :  { %v13100_v14 = vrot.slane %v13096_v26, %v13490_v4 }
0x16bb   :  { %v6118_v60 = vmul.f32 %v13088_v57, %v13088_v57 }
0x16bd   :  { %v6143_v42 = vsel %vm212_vm5, %v6118_v60, 0.0 }
0x16be   :  { %6144 = vadd.xlane.f32.xlu1 %v6143_v42 }
0x1721   :  { %v6121_v2 = vpop.xlane.xlu1 %6120 }
0x1722   :  { %v6146_v52 = vmul.f32 0.03125, %v6121_v2 }
0x1724   :  { %v6155_v32 = vadd.f32 1e-05, %v6146_v52 }
0x1725   :  { %v6124_v45 = vpop.xlane.xlu0 %6123 }
0x1726   :  { %9560 = vrsqrt.f32 %v6155_v32  ;;  %v6147_v5 = vmul.f32 0.03125, %v6124_v45 }
0x1728   :  { %v6156_v55 = vadd.f32 1e-05, %v6147_v5 }
0x1729   :  { %v6127_v3 = vpop.xlane.xlu1 %6126 }
0x172a   :  { %9562 = vrsqrt.f32 %v6156_v55  ;;  %v6148_v34 = vmul.f32 0.03125, %v6127_v3 }
0x172c   :  { %v6157_v15 = vadd.f32 1e-05, %v6148_v34 }
0x172e   :  { %v6130_v16 = vpop.xlane.xlu0 %6129  ;;  %9564 = vrsqrt.f32 %v6157_v15 }
0x172f   :  { %v6149_v62 = vmul.f32 0.03125, %v6130_v16 }
0x1730   :  { %v9561_v8 = vpop.eup %9560 }
0x1731   :  { %v6158_v29 = vadd.f32 1e-05, %v6149_v62  ;;  %v6173_v59 = vmul.f32 %v9561_v8, %v13048_v39 }
0x1732   :  { %v6133_v38 = vpop.xlane.xlu1 %6132 }
0x1733   :  { %9566 = vrsqrt.f32 %v6158_v29  ;;  %v6150_v36 = vmul.f32 0.03125, %v6133_v38  ;;  %v6186_v1 = vmul.f32 %v13100_v14, %v6173_v59 }
0x1734   :  { %v9563_v56 = vpop.eup %9562 }
0x1735   :  { %v6159_v11 = vadd.f32 1e-05, %v6150_v36  ;;  %v13113_v27 = vadd.f32 %v13105_v22, %v6186_v1  ;;  %v6174_v39 = vmul.f32 %v9563_v56, %v13052_v12 }
0x1736   :  { %v6136_v61 = vpop.xlane.xlu0 %6135 }
0x1737   :  { %9568 = vrsqrt.f32 %v6159_v11  ;;  %v6151_v37 = vmul.f32 0.03125, %v6136_v61  ;;  %v6222_v48 = vmul.f32 %v13110_v19, %v13113_v27  ;;  %v6187_v17 = vmul.f32 %v13100_v14, %v6174_v39 }
0x1738   :  { %v9565_v21 = vpop.eup %9564 }
0x1739   :  { %v6160_v0 = vadd.f32 1e-05, %v6151_v37  ;;  %v6231_v18 = vsel %vm212_vm5, %v6222_v48, 0.0  ;;  %v13121_v30 = vadd.f32 %v13105_v22, %v6187_v17  ;;  %v6175_v53 = vmul.f32 %v9565_v21, %v13057_v25 }
0x173a   :  { %v6139_v23 = vpop.xlane.xlu1 %6138  ;;  %6232 = vadd.xlane.f32.xlu0 %v6231_v18 }
0x173b   :  { %9570 = vrsqrt.f32 %v6160_v0  ;;  %v6152_v31 = vmul.f32 0.03125, %v6139_v23  ;;  %v6223_v12 = vmul.f32 %v13110_v19, %v13121_v30  ;;  %v6188_v54 = vmul.f32 %v13100_v14, %v6175_v53 }
0x173c   :  { %v6268_v0 = vrot.slane %v13096_v26, 4 }
0x173d   :  { %v9567_v44 = vpop.eup %9566  ;;  %v6161_v6 = vadd.f32 1e-05, %v6152_v31  ;;  %v6234_v49 = vsel %vm212_vm5, %v6223_v12, 0.0  ;;  %v13129_v63 = vadd.f32 %v13105_v22, %v6188_v54  ;;  %v13198_v31 = vld [vmem:[%s13348_s7 + $0x10] sm:$0xff]  ;;  %v13203_v54 = vld [vmem:[%s13348_s7 + $0x18] sm:$0xff] }
0x173e   :  { %v6176_v40 = vmul.f32 %v9567_v44, %v13062_v51  ;;  %6235 = vadd.xlane.f32.xlu1 %v6234_v49  ;;  %8838 = vpush %v6268_v0 }
0x173f   :  { %9572 = vrsqrt.f32 %v6161_v6  ;;  %v6224_v25 = vmul.f32 %v13110_v19, %v13129_v63 }
0x1740   :  { %v6189_v10 = vmul.f32 %v13100_v14, %v6176_v40 }
0x1741   :  { %v9569_v20 = vpop.eup %9568  ;;  %v6237_v50 = vsel %vm212_vm5, %v6224_v25, 0.0  ;;  %v13211_v25 = vld [vmem:[%s13348_s7 + $0x20] sm:$0xff] }
0x1742   :  { %v13137_v35 = vadd.f32 %v13105_v22, %v6189_v10  ;;  %v6177_v9 = vmul.f32 %v9569_v20, %v13067_v24  ;;  %6238 = vadd.xlane.f32.xlu0 %v6237_v50  ;;  %v13216_v20 = vld [vmem:[%s13348_s7 + $0x28] sm:$0xff] }
0x1744   :  { %v6225_v28 = vmul.f32 %v13110_v19, %v13137_v35  ;;  %v6190_v51 = vmul.f32 %v13100_v14, %v6177_v9 }
0x1745   :  { %v9571_v41 = vpop.eup %9570 }
0x1746   :  { %v6240_v13 = vsel %vm212_vm5, %v6225_v28, 0.0  ;;  %v13145_v60 = vadd.f32 %v13105_v22, %v6190_v51  ;;  %v6178_v42 = vmul.f32 %v9571_v41, %v13072_v46  ;;  %v6142_v2 = vpop.xlane.xlu0 %6141  ;;  %v13225_v41 = vld [vmem:[%s13348_s7 + $0x30] sm:$0xff] }
0x1747   :  { %6241 = vadd.xlane.f32.xlu1 %v6240_v13  ;;  %v6153_v52 = vmul.f32 0.03125, %v6142_v2 }
0x1748   :  { %v6226_v24 = vmul.f32 %v13110_v19, %v13145_v60  ;;  %v6191_v32 = vmul.f32 %v13100_v14, %v6178_v42  ;;  %v13230_v42 = vld [vmem:[%s13348_s7 + $0x38] sm:$0xff] }
0x1749   :  { %v9573_v45 = vpop.eup %9572  ;;  %v6162_v5 = vadd.f32 1e-05, %v6153_v52 }
0x174a   :  { %v6243_v55 = vsel %vm212_vm5, %v6226_v24, 0.0  ;;  %v13153_v3 = vadd.f32 %v13105_v22, %v6191_v32  ;;  %v6179_v34 = vmul.f32 %v9573_v45, %v13077_v47  ;;  %v13237_v45 = vld [vmem:[%s13348_s7 + $0x40] sm:$0xff] }
0x174b   :  { %6244 = vadd.xlane.f32.xlu0 %v6243_v55  ;;  %9574 = vrsqrt.f32 %v6162_v5  ;;  %v6145_v46 = vpop.xlane.xlu1 %6144  ;;  %v6054_v5 = vld [vmem:[%s13346_s5] sm:$0xff] }
0x174c   :  { %v6227_v15 = vmul.f32 %v13110_v19, %v13153_v3  ;;  %v6192_v16 = vmul.f32 %v13100_v14, %v6179_v34  ;;  %v6154_v62 = vmul.f32 0.03125, %v6145_v46  ;;  %v13247_v46 = vld [vmem:[%s13349_s8] sm:$0xff] }
0x174e   :  { %v6246_v4 = vsel %vm212_vm5, %v6227_v15, 0.0  ;;  %v13161_v8 = vadd.f32 %v13105_v22, %v6192_v16  ;;  %v6163_v29 = vadd.f32 1e-05, %v6154_v62  ;;  %v8823_v15 = vpack.c.bf16 %v13096_v26, %v6054_v5 }
0x174f   :  { %6247 = vadd.xlane.f32.xlu1 %v6246_v4 }
0x1750   :  { %v6228_v38 = vmul.f32 %v13110_v19, %v13161_v8  ;;  %9576 = vrsqrt.f32 %v6163_v29 }
0x1752   :  { %v6249_v47 = vsel %vm212_vm5, %v6228_v38, 0.0 }
0x1753   :  { %6250 = vadd.xlane.f32.xlu0 %v6249_v47 }
0x1755   :  { %v9575_v59 = vpop.eup %9574 }
0x1756   :  { %v6180_v36 = vmul.f32 %v9575_v59, %v13083_v7 }
0x1758   :  { %v6193_v1 = vmul.f32 %v13100_v14, %v6180_v36 }
0x175a   :  { %v9577_v56 = vpop.eup %9576  ;;  %v13169_v11 = vadd.f32 %v13105_v22, %v6193_v1 }
0x175b   :  { %v6181_v61 = vmul.f32 %v9577_v56, %v13088_v57  ;;  %v13186_v57 = vld [vmem:[%s13348_s7] sm:$0xff] }
0x175c   :  { %v6229_v39 = vmul.f32 %v13110_v19, %v13169_v11 }
0x175d   :  { %v6194_v37 = vmul.f32 %v13100_v14, %v6181_v61 }
0x175e   :  { %v6252_v48 = vsel %vm212_vm5, %v6229_v39, 0.0 }
0x175f   :  { %6253 = vadd.xlane.f32.xlu1 %v6252_v48  ;;  %v13177_v17 = vadd.f32 %v13105_v22, %v6194_v37  ;;  %v13191_v22 = vld [vmem:[%s13348_s7 + $0x8] sm:$0xff]  ;;  %s9638_s7 = smov [#allocation3]  }
0x1760   :  { %s6625_s8 = sshll.u32 %s9638_s7, 4  ;;  %s6626_s8 = int_to_ptr.vmem [resolvable:$true] %s6625_s8 }
0x1761   :  { %v6230_v7 = vmul.f32 %v13110_v19, %v13177_v17  ;;  %s9595_s11 = scalar_lea.vmem %s6626_s8, 128  ;;  %p9600_p1 = scmp.lt.s32.totalorder %s6626_s8, %s6626_s8 }
0x1762   :  { %p9596_p0 = scmp.ne.s32.totalorder %s6626_s8, %s9595_s11  ;;  %p9601_p2 = scmp.lt.s32.totalorder %s9595_s11, %s9595_s11 }
0x1763   :  { %v6255_v21 = vsel %vm212_vm5, %v6230_v7, 0.0 }
0x1764   :  { %6256 = vadd.xlane.f32.xlu0 %v6255_v21  ;;  %p9602_p3 = por %p9601_p2, %p9600_p1 }
0x1766   :  { %p9603_p4 = pnand %p9602_p3, %p9596_p0 }
0x176f   :  { %s8839_s5 = spop %8838 }
0x1770   :  { %v6270_v16 = vstv %s8839_s5 }
0x17c7   :  { %v6233_v14 = vpop.xlane.xlu0 %6232 }
0x17c8   :  { %v6258_v19 = vmul.f32 %v6233_v14, %v13186_v57 }
0x17cb   :  { %v6236_v23 = vpop.xlane.xlu1 %6235 }
0x17cc   :  { %v6259_v18 = vmul.f32 %v6236_v23, %v13191_v22 }
0x17ce   :  { %v8811_v53 = vpack.c.bf16 %v6259_v18, %v6258_v19 }
0x17cf   :  { %v6239_v12 = vpop.xlane.xlu0 %6238 }
0x17d0   :  { %8812 = vmatpush3.bf16.msra.mxu1 %v8811_v53  ;;  %v6260_v6 = vmul.f32 %v6239_v12, %v13198_v31 }
0x17d1   :  { %8813 = vmatprep.subr.bf16.mxu1 %v13424_v58 }
0x17d4   :  { %v6242_v44 = vpop.xlane.xlu1 %6241 }
0x17d5   :  { %v6261_v49 = vmul.f32 %v6242_v44, %v13203_v54 }
0x17d7   :  { %v8814_v40 = vpack.c.bf16 %v6261_v49, %v6260_v6 }
0x17d8   :  { %v6245_v10 = vpop.xlane.xlu0 %6244 }
0x17d9   :  { %8815 = vmatpush3.bf16.msra.mxu1 %v8814_v40  ;;  %v6262_v9 = vmul.f32 %v6245_v10, %v13211_v25 }
0x17da   :  { %8816 = vmatprep.subr.bf16.mxu1 %v13424_v58 }
0x17dc   :  { %v6248_v50 = vpop.xlane.xlu1 %6247 }
0x17dd   :  { %v6263_v28 = vmul.f32 %v6248_v50, %v13216_v20 }
0x17df   :  { %v8817_v51 = vpack.c.bf16 %v6263_v28, %v6262_v9 }
0x17e0   :  { %v6251_v13 = vpop.xlane.xlu0 %6250 }
0x17e1   :  { %8818 = vmatpush3.bf16.msra.mxu1 %v8817_v51  ;;  %v6264_v52 = vmul.f32 %v6251_v13, %v13225_v41 }
0x17e2   :  { %8819 = vmatprep.subr.bf16.mxu1 %v13424_v58 }
0x17ec   :  { %v6254_v2 = vpop.xlane.xlu1 %6253 }
0x17ed   :  { %v6265_v24 = vmul.f32 %v6254_v2, %v13230_v42 }
0x17ef   :  { %v8820_v32 = vpack.c.bf16 %v6265_v24, %v6264_v52 }
0x17f1   :  { %8821 = vmatpush3.bf16.msra.mxu1 %v8820_v32  ;;  %v6257_v55 = vpop.xlane.xlu0 %6256 }
0x17f2   :  { %v6266_v34 = vmul.f32 %v6257_v55, %v13237_v45  ;;  %8465 = vmatprep.subr.mxu1 %v13423_v33 }
0x17f5   :  { %8466 = vmatpush3.msra.mxu1 %v6266_v34 }
0x17f6   :  { %8468 = vmatmul.mubr.msk.f32.vlgmr.msra.gmra.mrb[216].mxu1 %vm690_vm8, %v13247_v46  ;;  %8822 = vmatprep.subr.bf16.mxu1 %v13424_v58 }
0x17f7   :  { %8825 = vmatpush3.bf16.msk.msra.mxu1 %vm8824_vm14, %v8823_v15  ;;  %8474 = vmatprep.mubr.msk.f32.mxu1 %vm9621_vm3, %v13423_v33 }
0x17fa   :  { %8475 = vmatmul.mubr.msk.f32.vlgmr.msra.gmra.mrb[218].mxu1 %vm6345_vm15, %v13186_v57 }
0x17fb   :  { %8477 = vmatprep.mubr.msk.f32.mxu1 %vm9621_vm3, %v13423_v33 }
0x17fe   :  { %8478 = vmatmul.mubr.msk.f32.gmra.mrb[220].mxu1 %vm6345_vm15, %v13191_v22 }
0x17ff   :  { %8480 = vmatprep.mubr.msk.f32.mxu1 %vm9621_vm3, %v13423_v33 }
0x1802   :  { %8481 = vmatmul.mubr.msk.f32.gmra.mrb[222].mxu1 %vm6345_vm15, %v13198_v31 }
0x1803   :  { %8483 = vmatprep.mubr.msk.f32.mxu1 %vm9621_vm3, %v13423_v33 }
0x1806   :  { %8484 = vmatmul.mubr.msk.f32.gmra.mrb[224].mxu1 %vm6345_vm15, %v13203_v54 }
0x1807   :  { %8486 = vmatprep.mubr.msk.f32.mxu1 %vm9621_vm3, %v13423_v33 }
0x180a   :  { %8487 = vmatmul.mubr.msk.f32.gmra.mrb[226].mxu1 %vm6345_vm15, %v13211_v25 }
0x180b   :  { %8489 = vmatprep.mubr.msk.f32.mxu1 %vm9621_vm3, %v13423_v33 }
0x180e   :  { %8490 = vmatmul.mubr.msk.f32.gmra.mrb[228].mxu1 %vm6345_vm15, %v13216_v20 }
0x180f   :  { %8492 = vmatprep.mubr.msk.f32.mxu1 %vm9621_vm3, %v13423_v33 }
0x1812   :  { %8493 = vmatmul.mubr.msk.f32.gmra.mrb[230].mxu1 %vm6345_vm15, %v13225_v41 }
0x1813   :  { %8495 = vmatprep.mubr.msk.f32.mxu1 %vm9621_vm3, %v13423_v33 }
0x1816   :  { %8496 = vmatmul.mubr.msk.f32.gmra.mrb[232].mxu1 %vm6345_vm15, %v13230_v42 }
0x1817   :  { %8498 = vmatprep.mubr.msk.f32.mxu1 %vm9621_vm3, %v13423_v33 }
0x181a   :  { %8499 = vmatmul.mubr.msk.f32.gmra.mrb[234].mxu1 %vm6345_vm15, %v13237_v45 }
0x18c9   :  { %v6341_v62 = vpop.f32.mrb[216].mxu1 }
0x18ca   :  { %v6342_v4 = vadd.f32 %v6341_v62, %v6270_v16  ;;  %v8469_v29 = vpop.f32.mrb[217].mxu1 }
0x18cc   :  { %6612 = vst.msk [vmem:[#allocation3] sm:$0xff] %vm6345_vm15, %v6342_v4 }
0x18cd   :  { %v6442_v38 = vpop.f32.mrb[218].mxu1 }
0x18ce   :  { %v6486_v47 = vmul.f32 %v6442_v38, %v13113_v27  ;;  %v8476_v59 = vpop.f32.mrb[219].mxu1 }
0x18d0   :  { %v6495_v36 = vsel %vm212_vm5, %v6486_v47, 0.0 }
0x18d1   :  { %6496 = vadd.xlane.f32.xlu1 %v6495_v36  ;;  %v6447_v1 = vpop.f32.mrb[220].mxu1 }
0x18d2   :  { %v6487_v56 = vmul.f32 %v6447_v1, %v13121_v30  ;;  %v8479_v61 = vpop.f32.mrb[221].mxu1 }
0x18d4   :  { %v6498_v39 = vsel %vm212_vm5, %v6487_v56, 0.0 }
0x18d5   :  { %6499 = vadd.xlane.f32.xlu0 %v6498_v39  ;;  %v6452_v37 = vpop.f32.mrb[222].mxu1 }
0x18d6   :  { %v6488_v48 = vmul.f32 %v6452_v37, %v13129_v63  ;;  %v8482_v7 = vpop.f32.mrb[223].mxu1 }
0x18d8   :  { %v6501_v21 = vsel %vm212_vm5, %v6488_v48, 0.0 }
0x18d9   :  { %6502 = vadd.xlane.f32.xlu1 %v6501_v21  ;;  %v6457_v0 = vpop.f32.mrb[224].mxu1 }
0x18da   :  { %v6489_v27 = vmul.f32 %v6457_v0, %v13137_v35  ;;  %v8485_v14 = vpop.f32.mrb[225].mxu1 }
0x18dc   :  { %v6504_v23 = vsel %vm212_vm5, %v6489_v27, 0.0 }
0x18dd   :  { %6505 = vadd.xlane.f32.xlu0 %v6504_v23  ;;  %v6462_v19 = vpop.f32.mrb[226].mxu1 }
0x18de   :  { %v6490_v30 = vmul.f32 %v6462_v19, %v13145_v60  ;;  %v8488_v18 = vpop.f32.mrb[227].mxu1 }
0x18e0   :  { %v6507_v53 = vsel %vm212_vm5, %v6490_v30, 0.0 }
0x18e1   :  { %6508 = vadd.xlane.f32.xlu1 %v6507_v53  ;;  %v6467_v12 = vpop.f32.mrb[228].mxu1 }
0x18e2   :  { %v6491_v63 = vmul.f32 %v6467_v12, %v13153_v3  ;;  %v8491_v44 = vpop.f32.mrb[229].mxu1 }
0x18e4   :  { %v6510_v6 = vsel %vm212_vm5, %v6491_v63, 0.0 }
0x18e5   :  { %6511 = vadd.xlane.f32.xlu0 %v6510_v6  ;;  %v6472_v49 = vpop.f32.mrb[230].mxu1 }
0x18e6   :  { %v6492_v35 = vmul.f32 %v6472_v49, %v13161_v8  ;;  %v8494_v40 = vpop.f32.mrb[231].mxu1 }
0x18e8   :  { %v6513_v10 = vsel %vm212_vm5, %v6492_v35, 0.0 }
0x18e9   :  { %6514 = vadd.xlane.f32.xlu1 %v6513_v10  ;;  %v6477_v50 = vpop.f32.mrb[232].mxu1 }
0x18ea   :  { %v6493_v60 = vmul.f32 %v6477_v50, %v13169_v11  ;;  %v8497_v9 = vpop.f32.mrb[233].mxu1 }
0x18ec   :  { %v6516_v28 = vsel %vm212_vm5, %v6493_v60, 0.0 }
0x18ed   :  { %6517 = vadd.xlane.f32.xlu0 %v6516_v28  ;;  %v6482_v51 = vpop.f32.mrb[234].mxu1 }
0x18ee   :  { %v6494_v3 = vmul.f32 %v6482_v51, %v13177_v17  ;;  %v8500_v13 = vpop.f32.mrb[235].mxu1 }
0x18f0   :  { %v6519_v2 = vsel %vm212_vm5, %v6494_v3, 0.0 }
0x18f1   :  { %6520 = vadd.xlane.f32.xlu1 %v6519_v2 }
0x195e   :  { %v6497_v52 = vpop.xlane.xlu1 %6496 }
0x195f   :  { %v6522_v24 = vmul.f32 %v6497_v52, %v13186_v57 }
0x1962   :  { %v6500_v8 = vpop.xlane.xlu0 %6499 }
0x1963   :  { %v6523_v32 = vmul.f32 %v6500_v8, %v13191_v22 }
0x1965   :  { %v8827_v5 = vpack.c.bf16 %v6523_v32, %v6522_v24 }
0x1966   :  { %v6503_v11 = vpop.xlane.xlu1 %6502 }
0x1967   :  { %8828 = vmatpush3.bf16.msra.mxu0 %v8827_v5  ;;  %v6524_v34 = vmul.f32 %v6503_v11, %v13198_v31 }
0x1968   :  { %8829 = vmatprep.subr.bf16.mxu0 %v13424_v58 }
0x196a   :  { %v6506_v55 = vpop.xlane.xlu0 %6505 }
0x196b   :  { %v6525_v17 = vmul.f32 %v6506_v55, %v13203_v54 }
0x196d   :  { %v8830_v15 = vpack.c.bf16 %v6525_v17, %v6524_v34 }
0x196e   :  { %v6509_v16 = vpop.xlane.xlu1 %6508 }
0x196f   :  { %8831 = vmatpush3.bf16.msra.mxu0 %v8830_v15  ;;  %v6526_v57 = vmul.f32 %v6509_v16, %v13211_v25 }
0x1970   :  { %8832 = vmatprep.subr.bf16.mxu0 %v13424_v58 }
0x1972   :  { %v6512_v62 = vpop.xlane.xlu0 %6511 }
0x1973   :  { %v6527_v22 = vmul.f32 %v6512_v62, %v13216_v20 }
0x1975   :  { %v8833_v4 = vpack.c.bf16 %v6527_v22, %v6526_v57 }
0x1976   :  { %v6515_v29 = vpop.xlane.xlu1 %6514 }
0x1977   :  { %8834 = vmatpush3.bf16.msra.mxu0 %v8833_v4  ;;  %v6528_v31 = vmul.f32 %v6515_v29, %v13225_v41  ;;  %v6607_v41 = vrot.slane %v13096_v26, %v13475_v43 }
0x1978   :  { %8835 = vmatprep.subr.bf16.mxu0 %v13424_v58 }
0x197a   :  { %v6518_v38 = vpop.xlane.xlu0 %6517 }
0x197b   :  { %v6529_v54 = vmul.f32 %v6518_v38, %v13230_v42 }
0x197d   :  { %v8836_v47 = vpack.c.bf16 %v6529_v54, %v6528_v31 }
0x197e   :  { %v6521_v59 = vpop.xlane.xlu1 %6520 }
0x197f   :  { %8837 = vmatpush3.bf16.msra.mxu0 %v8836_v47  ;;  %v6530_v36 = vmul.f32 %v6521_v59, %v13237_v45 }
0x1980   :  { %8517 = vmatprep.subr.mxu0 %v13423_v33 }
0x1983   :  { %8518 = vmatpush3.msra.mxu0 %v6530_v36 }
0x1984   :  { %8520 = vmatmul.mubr.msk.f32.vlgmr.msra.gmra.mrb[234].mxu0 %vm690_vm8, %v13247_v46 }
0x1a57   :  { %v6597_v25 = vpop.f32.mrb[234].mxu0 }
0x1a58   :  { %v6601_v20 = vsel %vm6345_vm15, %v6597_v25, 0.0  ;;  %v8521_v58 = vpop.f32.mrb[235].mxu0 }
0x1a59   :  { %6602 = vadd.xlane.f32.xlu0 %v6601_v20 }
0x1ae6   :  { %v6603_v42 = vpop.xlane.xlu0 %6602 }
0x1ae7   :  { %v6608_v1 = vadd.f32 %v6607_v41, %v6603_v42 }
0x1ae9   :  { %9578 = vtanh.f32 %v6608_v1 }
0x1af3   :  { %v9579_v56 = vpop.eup %9578 }
0x1af4   :  { %6614 = vrot.lane.b32.xlu1 %v9579_v56, %s9635_s12 }
0x1b66   :  { %v6615_v33 = vpop.permute.xlu1 %6614 }
0x1b67   :  { %6618 = vst.msk [vmem:[#allocation3] sm:$0xff] %vm6617_vm1, %v6615_v33 }
0x1b68   :  { %9606 = shalt.err (!%p9603_p4)
}
0x1b69   :  { %s9607_s22 = scalar_lea.hbm %s13350_s9, 128 }
0x1b6a   :  { %p9608_p5 = scmp.ne.s32.totalorder %s13350_s9, %s9607_s22  ;;  %p9611_p6 = scmp.lt.u32.totalorder %s9607_s22, %s13350_s9 }
0x1b6c   :  { %p9613_p7 = pnand %p9611_p6, %p9608_p5 }
0x1b6e   :  { %9616 = shalt.err (!%p9613_p7)
}
0x1b6f   :  { %6628 = dma.vmem_to_hbm [thread:$0]  %s6626_s8, 128, %s13350_s9, [#allocation4]  }
0x1b70   :  { %9617 = dma.done.wait [#allocation4], 128  }
0x1b71   :  { %9618 = vsyncadd [#allocation4], 4294967168 }
0x1b72   :  { %6632 = vsyncpa [#allocation4], 1 }

</bundles_post_ra>
